<compile_context>
chip_gen: v5e
topology: v5e:2x2
jax: 0.10.0
libtpu: 0.0.40
codegen_flags: <defaults>
</compile_context>

<pallas_src>
import functools

import jax
import jax.numpy as jnp
from jax import lax
from jax.experimental import pallas as pl
from jax.experimental.pallas import tpu as pltpu

EPS = 1e-5


def _vmem_limit_bytes():
    """~3/4 of this generation's physical VMEM (v7x ~48 MiB, v5e/v6e ~96 MiB)."""
    cap = 128 * 1024 * 1024
    try:
        cap = int(getattr(pltpu.get_tpu_info(), "vmem_capacity_bytes", cap))
    except Exception:
        pass
    return int(cap * 3 // 4)


# ---------------------------------------------------------------------------
# In-kernel helpers (lane-dense (C, NSp) slabs; NSp is a multiple of 128 by
# construction, so every load/store is a full-lane op)
# ---------------------------------------------------------------------------
def _shift(a, s):
    """out[:, q] = a[:, q + s] (circular).  Wrap-around only ever lands on
    halo positions, which are masked / discarded downstream."""
    if s == 0:
        return a
    return pltpu.roll(a, shift=(-s) % a.shape[-1], axis=1)


def _conv3x3x3(x, w_ref, Wp, Lpad):
    """3x3x3 SAME conv on a halo-padded flat slab.

    x     : (C, NSp) f32, zero halo (d/h/w borders and per-plane lane pad).
    w_ref : (3, C, 9*C) bf16 ref, indexed [kd, c_out, (kh, kw, c_in)].
    Returns (C, NSp) f32; only interior positions are valid (halo is garbage).
    """
    C = x.shape[0]
    # (dh, dw) tap stack: 9 lane-unaligned rolls (shared across kd), cast to
    # bf16 tap-by-tap so the concat / store traffic runs at half width.
    taps = []
    for dh in (-1, 0, 1):
        for dw in (-1, 0, 1):
            taps.append(_shift(x, dh * Wp + dw).astype(jnp.bfloat16))
    cols = jnp.concatenate(taps, axis=0)                        # (9C, NSp) bf16
    # 3 partial matmuls over kd (K = 9C each); the kd = 0/2 partials are
    # realigned with lane-ALIGNED plane shifts (Lpad is a multiple of 128).
    y = None
    for kd in range(3):
        p = jnp.dot(w_ref[kd], cols, preferred_element_type=jnp.float32)
        p = _shift(p, (kd - 1) * Lpad)
        y = p if y is None else y + p
    return y                                                     # (C, NSp) f32


def _bn_relu(y, m, gamma, beta, inv_count):
    """Training-mode BatchNorm (single-pass batch stats over the interior
    positions selected by mask m) followed by ReLU.
    y: (C, NSp) f32, m: (1, NSp) f32, gamma/beta: (C, 1) f32."""
    ym = y * m                                       # zero the halo for the stats
    s1 = jnp.sum(ym, axis=1, keepdims=True)          # (C, 1)
    s2 = jnp.sum(ym * ym, axis=1, keepdims=True)     # (C, 1)
    mean = s1 * inv_count
    var = s2 * inv_count - mean * mean               # biased, as in BN
    scale = gamma * lax.rsqrt(var + EPS)             # (C, 1)  (rsqrt -> EUP)
    shift = beta - mean * scale
    return jnp.maximum(ym * scale + shift, 0.0)      # halo garbage; caller masks if needed


# ---------------------------------------------------------------------------
# Fused DeBlock kernel: conv1 -> bn1+relu -> conv2 -> bn2+relu -> +x
# ---------------------------------------------------------------------------
def _deblock_kernel(x_ref, m_ref, w1_ref, w2_ref, g1_ref, b1_ref, g2_ref, b2_ref,
                    o_ref, *, Wp, Lpad, inv_count):
    m = m_ref[...]                                               # (1, NSp)

    # conv1 -> bn1 -> relu   (re-zero the halo so it is a valid conv2 input)
    y1 = _conv3x3x3(x_ref[...], w1_ref, Wp, Lpad)
    z1 = _bn_relu(y1, m, g1_ref[...], b1_ref[...], inv_count) * m

    # conv2 -> bn2 -> relu
    y2 = _conv3x3x3(z1, w2_ref, Wp, Lpad)
    z2 = _bn_relu(y2, m, g2_ref[...], b2_ref[...], inv_count)

    # Residual add fused into the store (x re-read from its VMEM ref; halo
    # positions hold garbage and are sliced away by the wrapper).
    o_ref[...] = (z2 + x_ref[...]).astype(o_ref.dtype)


# ---------------------------------------------------------------------------
# Wrapper: pad/transpose once in XLA, single pallas_call, un-pad.
# ---------------------------------------------------------------------------
@jax.jit
def deblock_forward(x_ncdhw, params):
    """x: (N, C, D, H, W) float32 (PyTorch NCDHW). Returns same shape/dtype."""
    N, C, D, H, W = x_ncdhw.shape
    Dp, Hp, Wp = D + 2, H + 2, W + 2
    Lp = Hp * Wp
    Lpad = ((Lp + 127) // 128) * 128        # lane-aligned per-plane stride
    NSp = N * Dp * Lpad
    inv_count = 1.0 / float(N * D * H * W)  # BN stats over interior positions only

    # Halo-padded, channel-major, lane-dense slab: (C, NSp), zero halo.
    xp = jnp.pad(x_ncdhw, ((0, 0), (0, 0), (1, 1), (1, 1), (1, 1)))
    xp = jnp.transpose(xp, (1, 0, 2, 3, 4)).reshape(C, N * Dp, Lp)
    xp = jnp.pad(xp, ((0, 0), (0, 0), (0, Lpad - Lp))).reshape(C, NSp)

    # Interior mask, built once as a single (1, NSp) row (broadcast over C).
    hp = jnp.arange(Hp)[:, None]
    wp = jnp.arange(Wp)[None, :]
    plane = ((hp >= 1) & (hp <= H) & (wp >= 1) & (wp <= W)).astype(jnp.float32)
    plane = jnp.concatenate([plane.reshape(Lp), jnp.zeros((Lpad - Lp,), jnp.float32)])
    dpat = ((jnp.arange(Dp) >= 1) & (jnp.arange(Dp) <= D)).astype(jnp.float32)
    mask = (jnp.tile(dpat, N)[:, None] * plane[None, :]).reshape(1, NSp)

    # Conv weights (kd,kh,kw,Cin,Cout) -> (kd, Cout, (kh,kw,Cin)), bf16 MXU operand.
    def prep_w(w):
        return jnp.transpose(w, (0, 4, 1, 2, 3)).reshape(3, C, 9 * C).astype(jnp.bfloat16)

    w1 = prep_w(params["w1"])
    w2 = prep_w(params["w2"])
    g1 = params["g1"].reshape(C, 1).astype(jnp.float32)
    be1 = params["be1"].reshape(C, 1).astype(jnp.float32)
    g2 = params["g2"].reshape(C, 1).astype(jnp.float32)
    be2 = params["be2"].reshape(C, 1).astype(jnp.float32)
    # NOTE: conv biases intentionally NOT passed -- training-mode BN cancels them.

    kernel = functools.partial(_deblock_kernel, Wp=Wp, Lpad=Lpad, inv_count=inv_count)
    full = lambda shape: pl.BlockSpec(shape, lambda i: (0,) * len(shape))

    out = pl.pallas_call(
        kernel,
        out_shape=jax.ShapeDtypeStruct((C, NSp), x_ncdhw.dtype),
        grid=(1,),
        in_specs=[
            full((C, NSp)),                              # x slab
            full((1, NSp)),                              # interior mask
            full((3, C, 9 * C)), full((3, C, 9 * C)),    # conv1 / conv2 weights (bf16)
            full((C, 1)), full((C, 1)),                  # bn1 gamma / beta
            full((C, 1)), full((C, 1)),                  # bn2 gamma / beta
        ],
        out_specs=full((C, NSp)),
        compiler_params=pltpu.CompilerParams(
            dimension_semantics=("arbitrary",),
            vmem_limit_bytes=_vmem_limit_bytes(),
        ),
    )(xp, mask, w1, w2, g1, be1, g2, be2)

    # Strip halo / lane padding and return to NCDHW.
    out = out.reshape(C, N, Dp, Lpad)[:, :, :, :Lp]
    out = out.reshape(C, N, Dp, Hp, Wp)[:, :, 1:1 + D, 1:1 + H, 1:1 + W]
    return jnp.transpose(out, (1, 0, 2, 3, 4))


# ---------------------------------------------------------------------------
# Pure-JAX reference (faithful PyTorch math incl. conv bias, HIGHEST precision)
# ---------------------------------------------------------------------------
def deblock_reference(x_ncdhw, params):
    x = jnp.transpose(x_ncdhw, (0, 2, 3, 4, 1))   # NCDHW -> NDHWC

    def conv(h, w, b):
        return lax.conv_general_dilated(
            h, w, window_strides=(1, 1, 1), padding="SAME",
            dimension_numbers=("NDHWC", "DHWIO", "NDHWC"),
            precision=lax.Precision.HIGHEST) + b

    def bn_relu(h, g, be):
        mean = jnp.mean(h, axis=(0, 1, 2, 3), keepdims=True)
        var = jnp.mean((h - mean) ** 2, axis=(0, 1, 2, 3), keepdims=True)
        return jnp.maximum((h - mean) * lax.rsqrt(var + EPS) * g + be, 0.0)

    h = bn_relu(conv(x, params["w1"], params["b1"]), params["g1"], params["be1"])
    h = bn_relu(conv(h, params["w2"], params["b2"]), params["g2"], params["be2"])
    h = h + x
    return jnp.transpose(h, (0, 4, 1, 2, 3))


if __name__ == "__main__":
    N, C, D, H, W = 2, 8, 8, 8, 8
    key = jax.random.PRNGKey(0)
    kx, kw1, kb1, kw2, kb2 = jax.random.split(key, 5)

    x = jax.random.normal(kx, (N, C, D, H, W), jnp.float32)   # NCDHW, like PyTorch

    # Deterministic parameters (shapes per DeBlock.__init__, C in == C out).
    params = {
        "w1": 0.1 * jax.random.normal(kw1, (3, 3, 3, C, C), jnp.float32),  # DHWIO
        "b1": 0.1 * jax.random.normal(kb1, (C,), jnp.float32),
        "w2": 0.1 * jax.random.normal(kw2, (3, 3, 3, C, C), jnp.float32),
        "b2": 0.1 * jax.random.normal(kb2, (C,), jnp.float32),
        # BatchNorm3d default init: weight = 1, bias = 0
        "g1": jnp.ones((C,), jnp.float32),
        "be1": jnp.zeros((C,), jnp.float32),
        "g2": jnp.ones((C,), jnp.float32),
        "be2": jnp.zeros((C,), jnp.float32),
    }

    out = jax.block_until_ready(deblock_forward(x, params))
    ref = jax.block_until_ready(deblock_reference(x, params))

    assert out.shape == x.shape and out.dtype == x.dtype
    # Tolerance: the kernel multiplies on the MXU with explicit bf16 operands
    # (f32 accumulation), while the reference uses f32 HIGHEST, so ~1e-2-level
    # deviations through two convs + two BNs are expected and acceptable.
    if not jnp.allclose(out, ref, rtol=3e-2, atol=3e-2):
        max_err = float(jnp.max(jnp.abs(out - ref)))
        raise AssertionError(f"mismatch vs reference, max abs err = {max_err}")

    print("KERNEL_OK")
</pallas_src>

<mosaic_0001>
module attributes {stable_mosaic.version = 11 : i64} {
  func.func @_deblock_kernel(%arg0: i32, %arg1: memref<8x2560xf32, #tpu.memory_space<vmem>>, %arg2: memref<1x2560xf32, #tpu.memory_space<vmem>>, %arg3: memref<3x8x72xbf16, #tpu.memory_space<vmem>>, %arg4: memref<3x8x72xbf16, #tpu.memory_space<vmem>>, %arg5: memref<8x1xf32, #tpu.memory_space<vmem>>, %arg6: memref<8x1xf32, #tpu.memory_space<vmem>>, %arg7: memref<8x1xf32, #tpu.memory_space<vmem>>, %arg8: memref<8x1xf32, #tpu.memory_space<vmem>>, %arg9: memref<8x2560xf32, #tpu.memory_space<vmem>>) attributes {dimension_semantics = [#tpu.dimension_semantics<arbitrary>], iteration_bounds = array<i64: 1>, scalar_prefetch = 0 : i64, scratch_operands = 0 : i64, tpu.core_type = #tpu.core_type<tc>, window_params = [{pipeline_mode = #tpu.pipeline_mode<synchronous>, transform_indices = @transform_0, window_bounds = array<i64: 8, 2560>}, {pipeline_mode = #tpu.pipeline_mode<synchronous>, transform_indices = @transform_1, window_bounds = array<i64: 1, 2560>}, {pipeline_mode = #tpu.pipeline_mode<synchronous>, transform_indices = @transform_2, window_bounds = array<i64: 3, 8, 72>}, {pipeline_mode = #tpu.pipeline_mode<synchronous>, transform_indices = @transform_3, window_bounds = array<i64: 3, 8, 72>}, {pipeline_mode = #tpu.pipeline_mode<synchronous>, transform_indices = @transform_4, window_bounds = array<i64: 8, 1>}, {pipeline_mode = #tpu.pipeline_mode<synchronous>, transform_indices = @transform_5, window_bounds = array<i64: 8, 1>}, {pipeline_mode = #tpu.pipeline_mode<synchronous>, transform_indices = @transform_6, window_bounds = array<i64: 8, 1>}, {pipeline_mode = #tpu.pipeline_mode<synchronous>, transform_indices = @transform_7, window_bounds = array<i64: 8, 1>}, {pipeline_mode = #tpu.pipeline_mode<synchronous>, transform_indices = @transform_8, window_bounds = array<i64: 8, 2560>}]} {
    %c0 = arith.constant 0 : index
    %c0_0 = arith.constant 0 : index
    %0 = vector.load %arg2[%c0, %c0_0] : memref<1x2560xf32, #tpu.memory_space<vmem>>, vector<1x2560xf32>
    %c0_1 = arith.constant 0 : index
    %c0_2 = arith.constant 0 : index
    %1 = vector.load %arg1[%c0_1, %c0_2] : memref<8x2560xf32, #tpu.memory_space<vmem>>, vector<8x2560xf32>
    %c11_i32 = arith.constant 11 : i32
    %2 = tpu.dynamic_rotate %1 by %c11_i32 dim 1 : vector<8x2560xf32>, i32 -> vector<8x2560xf32>
    %3 = arith.truncf %2 : vector<8x2560xf32> to vector<8x2560xbf16>
    %c10_i32 = arith.constant 10 : i32
    %4 = tpu.dynamic_rotate %1 by %c10_i32 dim 1 : vector<8x2560xf32>, i32 -> vector<8x2560xf32>
    %5 = arith.truncf %4 : vector<8x2560xf32> to vector<8x2560xbf16>
    %c9_i32 = arith.constant 9 : i32
    %6 = tpu.dynamic_rotate %1 by %c9_i32 dim 1 : vector<8x2560xf32>, i32 -> vector<8x2560xf32>
    %7 = arith.truncf %6 : vector<8x2560xf32> to vector<8x2560xbf16>
    %c1_i32 = arith.constant 1 : i32
    %8 = tpu.dynamic_rotate %1 by %c1_i32 dim 1 : vector<8x2560xf32>, i32 -> vector<8x2560xf32>
    %9 = arith.truncf %8 : vector<8x2560xf32> to vector<8x2560xbf16>
    %10 = arith.truncf %1 : vector<8x2560xf32> to vector<8x2560xbf16>
    %c2559_i32 = arith.constant 2559 : i32
    %11 = tpu.dynamic_rotate %1 by %c2559_i32 dim 1 : vector<8x2560xf32>, i32 -> vector<8x2560xf32>
    %12 = arith.truncf %11 : vector<8x2560xf32> to vector<8x2560xbf16>
    %c2551_i32 = arith.constant 2551 : i32
    %13 = tpu.dynamic_rotate %1 by %c2551_i32 dim 1 : vector<8x2560xf32>, i32 -> vector<8x2560xf32>
    %14 = arith.truncf %13 : vector<8x2560xf32> to vector<8x2560xbf16>
    %c2550_i32 = arith.constant 2550 : i32
    %15 = tpu.dynamic_rotate %1 by %c2550_i32 dim 1 : vector<8x2560xf32>, i32 -> vector<8x2560xf32>
    %16 = arith.truncf %15 : vector<8x2560xf32> to vector<8x2560xbf16>
    %c2549_i32 = arith.constant 2549 : i32
    %17 = tpu.dynamic_rotate %1 by %c2549_i32 dim 1 : vector<8x2560xf32>, i32 -> vector<8x2560xf32>
    %18 = arith.truncf %17 : vector<8x2560xf32> to vector<8x2560xbf16>
    %19 = tpu.concatenate %3, %5, %7, %9, %10, %12, %14, %16, %18 in 0 : vector<8x2560xbf16>, vector<8x2560xbf16>, vector<8x2560xbf16>, vector<8x2560xbf16>, vector<8x2560xbf16>, vector<8x2560xbf16>, vector<8x2560xbf16>, vector<8x2560xbf16>, vector<8x2560xbf16> -> vector<72x2560xbf16>
    %c0_3 = arith.constant 0 : index
    %c0_4 = arith.constant 0 : index
    %c0_5 = arith.constant 0 : index
    %20 = vector.load %arg3[%c0_3, %c0_4, %c0_5] : memref<3x8x72xbf16, #tpu.memory_space<vmem>>, vector<1x8x72xbf16>
    %21 = vector.shape_cast %20 : vector<1x8x72xbf16> to vector<8x72xbf16>
    %cst = arith.constant dense<0.000000e+00> : vector<8x2560xf32>
    %22 = tpu.matmul %21, %19, %cst {dimension_numbers = #tpu.dot_dimension_numbers<[1], [0], [0], [1], [0, 0, 1, 1], [], []>} : vector<8x72xbf16>, vector<72x2560xbf16>, vector<8x2560xf32> -> vector<8x2560xf32>
    %c128_i32 = arith.constant 128 : i32
    %23 = tpu.dynamic_rotate %22 by %c128_i32 dim 1 : vector<8x2560xf32>, i32 -> vector<8x2560xf32>
    %c1 = arith.constant 1 : index
    %c0_6 = arith.constant 0 : index
    %c0_7 = arith.constant 0 : index
    %24 = vector.load %arg3[%c1, %c0_6, %c0_7] : memref<3x8x72xbf16, #tpu.memory_space<vmem>>, vector<1x8x72xbf16>
    %25 = vector.shape_cast %24 : vector<1x8x72xbf16> to vector<8x72xbf16>
    %cst_8 = arith.constant dense<0.000000e+00> : vector<8x2560xf32>
    %26 = tpu.matmul %25, %19, %cst_8 {dimension_numbers = #tpu.dot_dimension_numbers<[1], [0], [0], [1], [0, 0, 1, 1], [], []>} : vector<8x72xbf16>, vector<72x2560xbf16>, vector<8x2560xf32> -> vector<8x2560xf32>
    %27 = arith.addf %23, %26 : vector<8x2560xf32>
    %c2 = arith.constant 2 : index
    %c0_9 = arith.constant 0 : index
    %c0_10 = arith.constant 0 : index
    %28 = vector.load %arg3[%c2, %c0_9, %c0_10] : memref<3x8x72xbf16, #tpu.memory_space<vmem>>, vector<1x8x72xbf16>
    %29 = vector.shape_cast %28 : vector<1x8x72xbf16> to vector<8x72xbf16>
    %cst_11 = arith.constant dense<0.000000e+00> : vector<8x2560xf32>
    %30 = tpu.matmul %29, %19, %cst_11 {dimension_numbers = #tpu.dot_dimension_numbers<[1], [0], [0], [1], [0, 0, 1, 1], [], []>} : vector<8x72xbf16>, vector<72x2560xbf16>, vector<8x2560xf32> -> vector<8x2560xf32>
    %c2432_i32 = arith.constant 2432 : i32
    %31 = tpu.dynamic_rotate %30 by %c2432_i32 dim 1 : vector<8x2560xf32>, i32 -> vector<8x2560xf32>
    %32 = arith.addf %27, %31 : vector<8x2560xf32>
    %c0_12 = arith.constant 0 : index
    %c0_13 = arith.constant 0 : index
    %33 = vector.load %arg5[%c0_12, %c0_13] : memref<8x1xf32, #tpu.memory_space<vmem>>, vector<8x1xf32>
    %c0_14 = arith.constant 0 : index
    %c0_15 = arith.constant 0 : index
    %34 = vector.load %arg6[%c0_14, %c0_15] : memref<8x1xf32, #tpu.memory_space<vmem>>, vector<8x1xf32>
    %35 = vector.broadcast %0 : vector<1x2560xf32> to vector<8x2560xf32>
    %36 = arith.mulf %32, %35 : vector<8x2560xf32>
    %cst_16 = arith.constant dense<0.000000e+00> : vector<8xf32>
    %37 = vector.multi_reduction <add>, %36, %cst_16 [1] : vector<8x2560xf32> to vector<8xf32>
    %38 = vector.shape_cast %37 : vector<8xf32> to vector<8x1xf32>
    %39 = arith.mulf %36, %36 : vector<8x2560xf32>
    %cst_17 = arith.constant dense<0.000000e+00> : vector<8xf32>
    %40 = vector.multi_reduction <add>, %39, %cst_17 [1] : vector<8x2560xf32> to vector<8xf32>
    %41 = vector.shape_cast %40 : vector<8xf32> to vector<8x1xf32>
    %cst_18 = arith.constant 9.765625E-4 : f32
    %42 = vector.broadcast %cst_18 : f32 to vector<8x1xf32>
    %43 = arith.mulf %38, %42 : vector<8x1xf32>
    %cst_19 = arith.constant 9.765625E-4 : f32
    %44 = vector.broadcast %cst_19 : f32 to vector<8x1xf32>
    %45 = arith.mulf %41, %44 : vector<8x1xf32>
    %46 = arith.mulf %43, %43 : vector<8x1xf32>
    %47 = arith.subf %45, %46 : vector<8x1xf32>
    %cst_20 = arith.constant 9.99999974E-6 : f32
    %48 = vector.broadcast %cst_20 : f32 to vector<8x1xf32>
    %49 = arith.addf %47, %48 : vector<8x1xf32>
    %50 = math.rsqrt %49 : vector<8x1xf32>
    %51 = arith.mulf %33, %50 : vector<8x1xf32>
    %52 = arith.mulf %43, %51 : vector<8x1xf32>
    %53 = arith.subf %34, %52 : vector<8x1xf32>
    %54 = vector.broadcast %51 : vector<8x1xf32> to vector<8x2560xf32>
    %55 = arith.mulf %36, %54 : vector<8x2560xf32>
    %56 = vector.broadcast %53 : vector<8x1xf32> to vector<8x2560xf32>
    %57 = arith.addf %55, %56 : vector<8x2560xf32>
    %cst_21 = arith.constant 0.000000e+00 : f32
    %58 = vector.broadcast %cst_21 : f32 to vector<8x2560xf32>
    %59 = arith.maximumf %57, %58 : vector<8x2560xf32>
    %60 = vector.broadcast %0 : vector<1x2560xf32> to vector<8x2560xf32>
    %61 = arith.mulf %59, %60 : vector<8x2560xf32>
    %c11_i32_22 = arith.constant 11 : i32
    %62 = tpu.dynamic_rotate %61 by %c11_i32_22 dim 1 : vector<8x2560xf32>, i32 -> vector<8x2560xf32>
    %63 = arith.truncf %62 : vector<8x2560xf32> to vector<8x2560xbf16>
    %c10_i32_23 = arith.constant 10 : i32
    %64 = tpu.dynamic_rotate %61 by %c10_i32_23 dim 1 : vector<8x2560xf32>, i32 -> vector<8x2560xf32>
    %65 = arith.truncf %64 : vector<8x2560xf32> to vector<8x2560xbf16>
    %c9_i32_24 = arith.constant 9 : i32
    %66 = tpu.dynamic_rotate %61 by %c9_i32_24 dim 1 : vector<8x2560xf32>, i32 -> vector<8x2560xf32>
    %67 = arith.truncf %66 : vector<8x2560xf32> to vector<8x2560xbf16>
    %c1_i32_25 = arith.constant 1 : i32
    %68 = tpu.dynamic_rotate %61 by %c1_i32_25 dim 1 : vector<8x2560xf32>, i32 -> vector<8x2560xf32>
    %69 = arith.truncf %68 : vector<8x2560xf32> to vector<8x2560xbf16>
    %70 = arith.truncf %61 : vector<8x2560xf32> to vector<8x2560xbf16>
    %c2559_i32_26 = arith.constant 2559 : i32
    %71 = tpu.dynamic_rotate %61 by %c2559_i32_26 dim 1 : vector<8x2560xf32>, i32 -> vector<8x2560xf32>
    %72 = arith.truncf %71 : vector<8x2560xf32> to vector<8x2560xbf16>
    %c2551_i32_27 = arith.constant 2551 : i32
    %73 = tpu.dynamic_rotate %61 by %c2551_i32_27 dim 1 : vector<8x2560xf32>, i32 -> vector<8x2560xf32>
    %74 = arith.truncf %73 : vector<8x2560xf32> to vector<8x2560xbf16>
    %c2550_i32_28 = arith.constant 2550 : i32
    %75 = tpu.dynamic_rotate %61 by %c2550_i32_28 dim 1 : vector<8x2560xf32>, i32 -> vector<8x2560xf32>
    %76 = arith.truncf %75 : vector<8x2560xf32> to vector<8x2560xbf16>
    %c2549_i32_29 = arith.constant 2549 : i32
    %77 = tpu.dynamic_rotate %61 by %c2549_i32_29 dim 1 : vector<8x2560xf32>, i32 -> vector<8x2560xf32>
    %78 = arith.truncf %77 : vector<8x2560xf32> to vector<8x2560xbf16>
    %79 = tpu.concatenate %63, %65, %67, %69, %70, %72, %74, %76, %78 in 0 : vector<8x2560xbf16>, vector<8x2560xbf16>, vector<8x2560xbf16>, vector<8x2560xbf16>, vector<8x2560xbf16>, vector<8x2560xbf16>, vector<8x2560xbf16>, vector<8x2560xbf16>, vector<8x2560xbf16> -> vector<72x2560xbf16>
    %c0_30 = arith.constant 0 : index
    %c0_31 = arith.constant 0 : index
    %c0_32 = arith.constant 0 : index
    %80 = vector.load %arg4[%c0_30, %c0_31, %c0_32] : memref<3x8x72xbf16, #tpu.memory_space<vmem>>, vector<1x8x72xbf16>
    %81 = vector.shape_cast %80 : vector<1x8x72xbf16> to vector<8x72xbf16>
    %cst_33 = arith.constant dense<0.000000e+00> : vector<8x2560xf32>
    %82 = tpu.matmul %81, %79, %cst_33 {dimension_numbers = #tpu.dot_dimension_numbers<[1], [0], [0], [1], [0, 0, 1, 1], [], []>} : vector<8x72xbf16>, vector<72x2560xbf16>, vector<8x2560xf32> -> vector<8x2560xf32>
    %c128_i32_34 = arith.constant 128 : i32
    %83 = tpu.dynamic_rotate %82 by %c128_i32_34 dim 1 : vector<8x2560xf32>, i32 -> vector<8x2560xf32>
    %c1_35 = arith.constant 1 : index
    %c0_36 = arith.constant 0 : index
    %c0_37 = arith.constant 0 : index
    %84 = vector.load %arg4[%c1_35, %c0_36, %c0_37] : memref<3x8x72xbf16, #tpu.memory_space<vmem>>, vector<1x8x72xbf16>
    %85 = vector.shape_cast %84 : vector<1x8x72xbf16> to vector<8x72xbf16>
    %cst_38 = arith.constant dense<0.000000e+00> : vector<8x2560xf32>
    %86 = tpu.matmul %85, %79, %cst_38 {dimension_numbers = #tpu.dot_dimension_numbers<[1], [0], [0], [1], [0, 0, 1, 1], [], []>} : vector<8x72xbf16>, vector<72x2560xbf16>, vector<8x2560xf32> -> vector<8x2560xf32>
    %87 = arith.addf %83, %86 : vector<8x2560xf32>
    %c2_39 = arith.constant 2 : index
    %c0_40 = arith.constant 0 : index
    %c0_41 = arith.constant 0 : index
    %88 = vector.load %arg4[%c2_39, %c0_40, %c0_41] : memref<3x8x72xbf16, #tpu.memory_space<vmem>>, vector<1x8x72xbf16>
    %89 = vector.shape_cast %88 : vector<1x8x72xbf16> to vector<8x72xbf16>
    %cst_42 = arith.constant dense<0.000000e+00> : vector<8x2560xf32>
    %90 = tpu.matmul %89, %79, %cst_42 {dimension_numbers = #tpu.dot_dimension_numbers<[1], [0], [0], [1], [0, 0, 1, 1], [], []>} : vector<8x72xbf16>, vector<72x2560xbf16>, vector<8x2560xf32> -> vector<8x2560xf32>
    %c2432_i32_43 = arith.constant 2432 : i32
    %91 = tpu.dynamic_rotate %90 by %c2432_i32_43 dim 1 : vector<8x2560xf32>, i32 -> vector<8x2560xf32>
    %92 = arith.addf %87, %91 : vector<8x2560xf32>
    %c0_44 = arith.constant 0 : index
    %c0_45 = arith.constant 0 : index
    %93 = vector.load %arg7[%c0_44, %c0_45] : memref<8x1xf32, #tpu.memory_space<vmem>>, vector<8x1xf32>
    %c0_46 = arith.constant 0 : index
    %c0_47 = arith.constant 0 : index
    %94 = vector.load %arg8[%c0_46, %c0_47] : memref<8x1xf32, #tpu.memory_space<vmem>>, vector<8x1xf32>
    %95 = vector.broadcast %0 : vector<1x2560xf32> to vector<8x2560xf32>
    %96 = arith.mulf %92, %95 : vector<8x2560xf32>
    %cst_48 = arith.constant dense<0.000000e+00> : vector<8xf32>
    %97 = vector.multi_reduction <add>, %96, %cst_48 [1] : vector<8x2560xf32> to vector<8xf32>
    %98 = vector.shape_cast %97 : vector<8xf32> to vector<8x1xf32>
    %99 = arith.mulf %96, %96 : vector<8x2560xf32>
    %cst_49 = arith.constant dense<0.000000e+00> : vector<8xf32>
    %100 = vector.multi_reduction <add>, %99, %cst_49 [1] : vector<8x2560xf32> to vector<8xf32>
    %101 = vector.shape_cast %100 : vector<8xf32> to vector<8x1xf32>
    %cst_50 = arith.constant 9.765625E-4 : f32
    %102 = vector.broadcast %cst_50 : f32 to vector<8x1xf32>
    %103 = arith.mulf %98, %102 : vector<8x1xf32>
    %cst_51 = arith.constant 9.765625E-4 : f32
    %104 = vector.broadcast %cst_51 : f32 to vector<8x1xf32>
    %105 = arith.mulf %101, %104 : vector<8x1xf32>
    %106 = arith.mulf %103, %103 : vector<8x1xf32>
    %107 = arith.subf %105, %106 : vector<8x1xf32>
    %cst_52 = arith.constant 9.99999974E-6 : f32
    %108 = vector.broadcast %cst_52 : f32 to vector<8x1xf32>
    %109 = arith.addf %107, %108 : vector<8x1xf32>
    %110 = math.rsqrt %109 : vector<8x1xf32>
    %111 = arith.mulf %93, %110 : vector<8x1xf32>
    %112 = arith.mulf %103, %111 : vector<8x1xf32>
    %113 = arith.subf %94, %112 : vector<8x1xf32>
    %114 = vector.broadcast %111 : vector<8x1xf32> to vector<8x2560xf32>
    %115 = arith.mulf %96, %114 : vector<8x2560xf32>
    %116 = vector.broadcast %113 : vector<8x1xf32> to vector<8x2560xf32>
    %117 = arith.addf %115, %116 : vector<8x2560xf32>
    %cst_53 = arith.constant 0.000000e+00 : f32
    %118 = vector.broadcast %cst_53 : f32 to vector<8x2560xf32>
    %119 = arith.maximumf %117, %118 : vector<8x2560xf32>
    %c0_54 = arith.constant 0 : index
    %c0_55 = arith.constant 0 : index
    %120 = vector.load %arg1[%c0_54, %c0_55] : memref<8x2560xf32, #tpu.memory_space<vmem>>, vector<8x2560xf32>
    %121 = arith.addf %119, %120 : vector<8x2560xf32>
    %c0_56 = arith.constant 0 : index
    %c0_57 = arith.constant 0 : index
    %122 = vector.load %arg9[%c0_56, %c0_57] : memref<8x2560xf32, #tpu.memory_space<vmem>>, vector<8x2560xf32>
    tpu.vector_store %arg9[%c0_56, %c0_57], %121 {strides = array<i32>} : memref<8x2560xf32, #tpu.memory_space<vmem>>, vector<8x2560xf32>,
    return
  }
  func.func @transform_0(%arg0: i32) -> (i32, i32) {
    %c0_i32 = arith.constant 0 : i32
    %c0_i32_0 = arith.constant 0 : i32
    %c0_i32_1 = arith.constant 0 : i32
    return %c0_i32, %c0_i32_0 : i32, i32
  }
  func.func @transform_1(%arg0: i32) -> (i32, i32) {
    %c0_i32 = arith.constant 0 : i32
    %c0_i32_0 = arith.constant 0 : i32
    %c0_i32_1 = arith.constant 0 : i32
    return %c0_i32, %c0_i32_0 : i32, i32
  }
  func.func @transform_2(%arg0: i32) -> (i32, i32, i32) {
    %c0_i32 = arith.constant 0 : i32
    %c0_i32_0 = arith.constant 0 : i32
    %c0_i32_1 = arith.constant 0 : i32
    %c0_i32_2 = arith.constant 0 : i32
    return %c0_i32, %c0_i32_0, %c0_i32_1 : i32, i32, i32
  }
  func.func @transform_3(%arg0: i32) -> (i32, i32, i32) {
    %c0_i32 = arith.constant 0 : i32
    %c0_i32_0 = arith.constant 0 : i32
    %c0_i32_1 = arith.constant 0 : i32
    %c0_i32_2 = arith.constant 0 : i32
    return %c0_i32, %c0_i32_0, %c0_i32_1 : i32, i32, i32
  }
  func.func @transform_4(%arg0: i32) -> (i32, i32) {
    %c0_i32 = arith.constant 0 : i32
    %c0_i32_0 = arith.constant 0 : i32
    %c0_i32_1 = arith.constant 0 : i32
    return %c0_i32, %c0_i32_0 : i32, i32
  }
  func.func @transform_5(%arg0: i32) -> (i32, i32) {
    %c0_i32 = arith.constant 0 : i32
    %c0_i32_0 = arith.constant 0 : i32
    %c0_i32_1 = arith.constant 0 : i32
    return %c0_i32, %c0_i32_0 : i32, i32
  }
  func.func @transform_6(%arg0: i32) -> (i32, i32) {
    %c0_i32 = arith.constant 0 : i32
    %c0_i32_0 = arith.constant 0 : i32
    %c0_i32_1 = arith.constant 0 : i32
    return %c0_i32, %c0_i32_0 : i32, i32
  }
  func.func @transform_7(%arg0: i32) -> (i32, i32) {
    %c0_i32 = arith.constant 0 : i32
    %c0_i32_0 = arith.constant 0 : i32
    %c0_i32_1 = arith.constant 0 : i32
    return %c0_i32, %c0_i32_0 : i32, i32
  }
  func.func @transform_8(%arg0: i32) -> (i32, i32) {
    %c0_i32 = arith.constant 0 : i32
    %c0_i32_0 = arith.constant 0 : i32
    %c0_i32_1 = arith.constant 0 : i32
    return %c0_i32, %c0_i32_0 : i32, i32
  }
}

</mosaic_0001>

<bundles_post_ra>
// kernel: tile.8
= control target key start
LH: loop header
LB: loop body
LE: loop exit
PB: predicated region body
PF: predicated region fallthrough
CT: control target
= control target key end

     0   :  { %s22_s0 = inlined_call_operand.vmem [shape: f32[10], index: 0, kind: input, shape index: {}]   ;;  %s23_s1 = inlined_call_operand.vmem [shape: f32[2,10], index: 1, kind: output, shape index: {}]  }
   0x1   :  { %v4_v0 = vld [vmem:[%s22_s0] ss:$0 sm:$0xff] }
   0x2   :  { %5 = vst [vmem:[%s23_s1] sm:$0x3] %v4_v0 }

// kernel: mul.8
= control target key start
LH: loop header
LB: loop body
LE: loop exit
PB: predicated region body
PF: predicated region fallthrough
CT: control target
= control target key end

     0   :  { %vm7_vm0 = vcmask 80896   ;;  %vm13_vm1 = vcmask 162896   ;;  %s39_s0 = inlined_call_operand.vmem [shape: f32[2,10], index: 0, kind: input, shape index: {}]   ;;  %s40_s1 = inlined_call_operand.vmem [shape: f32[20], index: 1, kind: output, shape index: {}]  }
   0x1   :  { %v4_v0 = vld [vmem:[%s39_s0] sm:$0x3]  ;;  %s22_s0 = smov 10  }
   0x2   :  { %5 = vst [vmem:[#allocation1] sm:$0x3] %v4_v0 }
   0x9   :  { %v10_v1 = vld [vmem:[#allocation1 + $0x1] sm:$0x1]   ;;  %v6_v2 = vld [vmem:[#allocation1] sm:$0x1]  }
   0xa   :  { %11 = vrot.lane.b32.xlu0 %v10_v1, %s22_s0  ;;  %8 = vst.msk [vmem:[#allocation0] sm:$0x1] %vm7_vm0, %v6_v2  }
  0x7c   :  { %v12_v3 = vpop.permute.xlu0 %11  }
  0x7d   :  { %14 = vst.msk [vmem:[#allocation0] sm:$0x1] %vm13_vm1, %v12_v3  }
  0x84   :  { %v17_v4 = vld [vmem:[#allocation0] sm:$0x1] }
  0x85   :  { %20 = vst [vmem:[%s40_s1] sm:$0x1] %v17_v4 }

// kernel: deblock_forward.1
= control target key start
LH: loop header
LB: loop body
LE: loop exit
PB: predicated region body
PF: predicated region fallthrough
CT: control target
= control target key end

     0   :  { %s5947_s17 = smov 117   ;;  %s5948_s18 = smov 119   ;;  %v93_v30 = vlaneseq  ;;  %vm1083_vm3 = vcmask 1043456   ;;  %vm1405_vm9 = vcmask 588800   ;;  %s10960_s0 = inlined_call_operand.vmem [shape: f32[8,2560], index: 0, kind: input, shape index: {}]   ;;  %s10961_s2 = inlined_call_operand.vmem [shape: bf16[3,8,72], index: 2, kind: input, shape index: {}]   ;;  %s10962_s1 = inlined_call_operand.vmem [shape: f32[1,2560], index: 1, kind: input, shape index: {}]   ;;  %s10963_s4 = inlined_call_operand.vmem [shape: f32[8,1], index: 4, kind: input, shape index: {}]   ;;  %s10964_s5 = inlined_call_operand.vmem [shape: f32[8,1], index: 5, kind: input, shape index: {}]   ;;  %s10965_s3 = inlined_call_operand.vmem [shape: bf16[3,8,72], index: 3, kind: input, shape index: {}]   ;;  %s10966_s6 = inlined_call_operand.vmem [shape: f32[8,1], index: 6, kind: input, shape index: {}]   ;;  %s10967_s7 = inlined_call_operand.vmem [shape: f32[8,1], index: 7, kind: input, shape index: {}]   ;;  %s10968_s8 = inlined_call_operand.vmem [shape: f32[8,2560], index: 8, kind: output, shape index: {}]  }
   0x1   :  { %v6004_v0 = vld [vmem:[%s10960_s0 + $0x10] sm:$0xff]  ;;  %v6009_v1 = vld [vmem:[%s10960_s0 + $0x18] sm:$0xff]  ;;  %v6014_v2 = vld [vmem:[%s10960_s0 + $0x8] sm:$0xff]  ;;  %s5949_s19 = smov 118   ;;  %s5950_s20 = smov 127  }
   0x2   :  { %v5117_v3 = vpack.i.bf16 %v6009_v1, %v6004_v0  ;;  %v6021_v4 = vld [vmem:[%s10960_s0 + $0x30] sm:$0xff]  ;;  %v6026_v5 = vld [vmem:[%s10960_s0] sm:$0xff]  ;;  %v5177_v9 = vpack.i.bf16 %v6004_v0, %v6014_v2  ;;  %s5951_s21 = smov 9   ;;  %s5952_s22 = smov 1   ;;  %v6059_v11 = vld [vmem:[%s10960_s0 + $0x28] sm:$0xff]  ;;  %v6138_v32 = vand.u32 127, %v93_v30 }
   0x3   :  { %v6031_v6 = vld [vmem:[%s10960_s0 + $0x20] sm:$0xff]  ;;  %v5127_v7 = vpack.i.bf16 %v6021_v4, %v6014_v2  ;;  %v5182_v10 = vpack.i.bf16 %v6026_v5, %v6009_v1  ;;  %v6064_v12 = vld [vmem:[%s10960_s0 + $0x98] sm:$0xff]  ;;  %s5953_s27 = smov 11   ;;  %s5954_s28 = smov 10   ;;  %v43_v17 = vld [vmem:[%s10960_s0 + $0x50] sm:$0xff]  ;;  %v339_v61 = vpack.c.bf16 %v6014_v2, %v6026_v5 }
   0x4   :  { %v5137_v8 = vpack.i.bf16 %v6026_v5, %v6031_v6  ;;  %5118 = vrot.lane.b32.xlu0 %v5117_v3, %s5947_s17  ;;  %v5197_v13 = vpack.i.bf16 %v6059_v11, %v6064_v12  ;;  %v6077_v14 = vld [vmem:[%s10960_s0 + $0x38] sm:$0xff]  ;;  %v41_v15 = vld [vmem:[%s10960_s0 + $0x40] sm:$0xff]  ;;  %v5242_v18 = vpack.i.bf16 %v43_v17, %v6059_v11  ;;  %v42_v20 = vld [vmem:[%s10960_s0 + $0x48] sm:$0xff]  ;;  %11312 = vst [vmem:[#allocation2_spill] sm:$0xff] %v6138_v32  ;;  %vm531_vm0 = vcmp.lt.s32.totalorder %v6138_v32, 118 }
   0x5   :  { %5128 = vrot.lane.b32.xlu1 %v5127_v7, %s5947_s17  ;;  %v5227_v16 = vpack.i.bf16 %v41_v15, %v6077_v14  ;;  %v5277_v19 = vpack.i.bf16 %v6077_v14, %v6021_v4  ;;  %v5287_v21 = vpack.i.bf16 %v42_v20, %v6031_v6  ;;  %v44_v22 = vld [vmem:[%s10960_s0 + $0x58] sm:$0xff]  ;;  %v6114_v23 = vld [vmem:[%s10960_s0 + $0x60] sm:$0xff]  ;;  %v6125_v26 = vld [vmem:[%s10960_s0 + $0x70] sm:$0xff]  ;;  %vm602_vm1 = vcmp.lt.s32.totalorder %v6138_v32, 117 }
   0x6   :  { %5138 = vrot.lane.b32.xlu2 %v5137_v8, %s5948_s18  ;;  %v5307_v25 = vpack.i.bf16 %v6114_v23, %v44_v22  ;;  %v5322_v28 = vpack.i.bf16 %v6125_v26, %v42_v20  ;;  %v6149_v37 = vld [vmem:[%s10960_s0 + $0x68] sm:$0xff]  ;;  %vm460_vm2 = vcmp.lt.s32.totalorder %v6138_v32, 119  ;;  %v6161_v43 = vpack.i.bf16 %v44_v22, %v43_v17 }
   0x7   :  { %v6164_v44 = vpack.i.bf16 %v6149_v37, %v41_v15  ;;  %vm389_vm4 = vcmp.lt.s32.totalorder %v6138_v32, 127  ;;  %v843_v20 = vunpack.c.l.b16 %v339_v61  ;;  %vm308_vm5 = vcmp.lt.s32.totalorder %v6138_v32, 1 }
   0x8   :  { %vm237_vm6 = vcmp.lt.s32.totalorder %v6138_v32, 9  ;;  %vm166_vm7 = vcmp.lt.s32.totalorder %v6138_v32, 10  ;;  %vm95_vm8 = vcmp.lt.s32.totalorder %v6138_v32, 11 }
   0xc   :  { %5123 = vrot.lane.b32.xlu0 %v5137_v8, %s5947_s17 }
   0xd   :  { %5133 = vrot.lane.b32.xlu1 %v5117_v3, %s5948_s18 }
   0xe   :  { %5143 = vrot.lane.b32.xlu2 %v5117_v3, %s5949_s19 }
  0x14   :  { %5148 = vrot.lane.b32.xlu0 %v5137_v8, %s5949_s19 }
  0x15   :  { %5153 = vrot.lane.b32.xlu1 %v5127_v7, %s5948_s18 }
  0x16   :  { %5158 = vrot.lane.b32.xlu2 %v5127_v7, %s5949_s19 }
  0x1c   :  { %5163 = vrot.lane.b32.xlu0 %v5117_v3, %s5950_s20 }
  0x1d   :  { %5168 = vrot.lane.b32.xlu1 %v5137_v8, %s5950_s20  ;;  %v6205_v8 = vld [vmem:[%s10960_s0 + $0x80] sm:$0xff] }
  0x1e   :  { %5173 = vrot.lane.b32.xlu2 %v5127_v7, %s5950_s20  ;;  %v6200_v7 = vld [vmem:[%s10960_s0 + $0x78] sm:$0xff] }
  0x24   :  { %5178 = vrot.lane.b32.xlu0 %v5177_v9, %s5951_s21 }
  0x25   :  { %5183 = vrot.lane.b32.xlu1 %v5182_v10, %s5951_s21 }
  0x26   :  { %5188 = vrot.lane.b32.xlu2 %v5177_v9, %s5952_s22 }
  0x2c   :  { %5193 = vrot.lane.b32.xlu0 %v5182_v10, %s5952_s22 }
  0x2d   :  { %5198 = vrot.lane.b32.xlu1 %v5197_v13, %s5951_s21 }
  0x2e   :  { %5203 = vrot.lane.b32.xlu2 %v5197_v13, %s5952_s22 }
  0x34   :  { %5208 = vrot.lane.b32.xlu0 %v5177_v9, %s5953_s27 }
  0x35   :  { %5213 = vrot.lane.b32.xlu1 %v5182_v10, %s5953_s27 }
  0x36   :  { %5218 = vrot.lane.b32.xlu2 %v5177_v9, %s5954_s28 }
  0x3c   :  { %5223 = vrot.lane.b32.xlu0 %v5182_v10, %s5954_s28  ;;  %v6212_v10 = vpack.c.bf16 %v6009_v1, %v6004_v0 }
  0x3d   :  { %5228 = vrot.lane.b32.xlu1 %v5227_v16, %s5947_s17 }
  0x3e   :  { %5233 = vrot.lane.b32.xlu2 %v5197_v13, %s5953_s27 }
  0x44   :  { %5238 = vrot.lane.b32.xlu0 %v5197_v13, %s5954_s28 }
  0x45   :  { %5243 = vrot.lane.b32.xlu1 %v5242_v18, %s5947_s17 }
  0x46   :  { %5248 = vrot.lane.b32.xlu2 %v5227_v16, %s5948_s18 }
  0x4c   :  { %5253 = vrot.lane.b32.xlu0 %v5227_v16, %s5949_s19 }
  0x4d   :  { %5258 = vrot.lane.b32.xlu1 %v5242_v18, %s5948_s18 }
  0x4e   :  { %5263 = vrot.lane.b32.xlu2 %v5242_v18, %s5949_s19 }
  0x54   :  { %5268 = vrot.lane.b32.xlu0 %v5227_v16, %s5950_s20 }
  0x55   :  { %5273 = vrot.lane.b32.xlu1 %v5242_v18, %s5950_s20 }
  0x56   :  { %5278 = vrot.lane.b32.xlu2 %v5277_v19, %s5951_s21 }
  0x5c   :  { %5283 = vrot.lane.b32.xlu0 %v5277_v19, %s5952_s22 }
  0x5d   :  { %5288 = vrot.lane.b32.xlu1 %v5287_v21, %s5951_s21 }
  0x5e   :  { %5293 = vrot.lane.b32.xlu2 %v5287_v21, %s5952_s22 }
  0x60   :  { %v6116_v24 = vpop.permute.xlu2 %5138 }
  0x61   :  { %v10969_v41 = vunpack.i.h.bf16 %v6116_v24  ;;  %v10975_v42 = vunpack.i.l.bf16 %v6116_v24 }
  0x64   :  { %5298 = vrot.lane.b32.xlu0 %v5277_v19, %s5953_s27 }
  0x65   :  { %5303 = vrot.lane.b32.xlu1 %v5277_v19, %s5954_s28  ;;  %v6229_v19 = vpack.i.bf16 %v6205_v8, %v6200_v7 }
  0x66   :  { %5308 = vrot.lane.b32.xlu2 %v5307_v25, %s5947_s17 }
  0x68   :  { %v6127_v27 = vpop.permute.xlu2 %5143 }
  0x69   :  { %v5146_v35 = vunpack.i.h.bf16 %v6127_v27  ;;  %v5145_v36 = vunpack.i.l.bf16 %v6127_v27 }
  0x6b   :  { %v6170_v45 = vsel %vm531_vm0, %v5145_v36, %v5146_v35 }
  0x6c   :  { %5313 = vrot.lane.b32.xlu0 %v5287_v21, %s5953_s27 }
  0x6d   :  { %5318 = vrot.lane.b32.xlu1 %v5287_v21, %s5954_s28 }
  0x6e   :  { %5323 = vrot.lane.b32.xlu2 %v5322_v28, %s5947_s17 }
  0x70   :  { %v6133_v29 = vpop.permute.xlu2 %5158 }
  0x71   :  { %v5160_v38 = vunpack.i.l.bf16 %v6133_v29 }
  0x73   :  { %v549_v53 = vsel %vm531_vm0, %v5160_v38, %v5145_v36 }
  0x74   :  { %5328 = vrot.lane.b32.xlu0 %v5307_v25, %s5948_s18 }
  0x75   :  { %5333 = vrot.lane.b32.xlu1 %v5307_v25, %s5949_s19 }
  0x76   :  { %5338 = vrot.lane.b32.xlu2 %v5322_v28, %s5948_s18  ;;  %v5119_v31 = vpop.permute.xlu0 %5118 }
  0x77   :  { %v6140_v33 = vpop.permute.xlu1 %5128  ;;  %v5120_v39 = vunpack.i.l.bf16 %v5119_v31  ;;  %v5121_v46 = vunpack.i.h.bf16 %v5119_v31 }
  0x78   :  { %v6142_v34 = vpop.permute.xlu2 %5173  ;;  %v5130_v40 = vunpack.i.l.bf16 %v6140_v33 }
  0x79   :  { %v619_v60 = vsel %vm602_vm1, %v5120_v39, %v5121_v46  ;;  %v5175_v9 = vunpack.i.l.bf16 %v6142_v34 }
  0x7a   :  { %v620_v54 = vsel %vm602_vm1, %v5130_v40, %v5120_v39 }
  0x7c   :  { %5343 = vrot.lane.b32.xlu0 %v5322_v28, %s5949_s19 }
  0x7d   :  { %5348 = vrot.lane.b32.xlu1 %v5307_v25, %s5950_s20 }
  0x7e   :  { %5353 = vrot.lane.b32.xlu2 %v5322_v28, %s5950_s20  ;;  %v6172_v47 = vpop.permute.xlu0 %5123 }
  0x7f   :  { %v5134_v48 = vpop.permute.xlu1 %5133  ;;  %v10971_v50 = vunpack.i.h.bf16 %v6172_v47  ;;  %v10976_v51 = vunpack.i.l.bf16 %v6172_v47 }
  0x80   :  { %v6174_v49 = vpop.permute.xlu2 %5188  ;;  %v5136_v55 = vunpack.i.h.bf16 %v5134_v48  ;;  %v5135_v56 = vunpack.i.l.bf16 %v5134_v48 }
  0x81   :  { %v621_v57 = vsel %vm602_vm1, %v10971_v50, %v5130_v40  ;;  %v618_v58 = vsel %vm602_vm1, %v5121_v46, %v10976_v51  ;;  %v844_v40 = vunpack.c.h.b16 %v339_v61  ;;  %v845_v46 = vunpack.c.l.b16 %v6212_v10 }
  0x82   :  { %v623_v59 = vpack.c.bf16 %v620_v54, %v621_v57  ;;  %v624_v3 = vpack.c.bf16 %v618_v58, %v619_v60  ;;  %v476_v13 = vsel %vm460_vm2, %v5136_v55, %v10975_v42  ;;  %v477_v15 = vsel %vm460_vm2, %v5135_v56, %v5136_v55 }
  0x83   :  { %v482_v39 = vpack.c.bf16 %v476_v13, %v477_v15  ;;  %v846_v61 = vunpack.c.h.b16 %v6212_v10  ;;  %v5191_v13 = vunpack.i.h.bf16 %v6174_v49 }
  0x84   :  { %5358 = vrot.lane.b32.xlu0 %v6161_v43, %s5951_s21  ;;  %v1043_v2 = vunpack.c.l.b16 %v623_v59  ;;  %v1044_v5 = vunpack.c.h.b16 %v623_v59  ;;  %v1045_v16 = vunpack.c.l.b16 %v624_v3  ;;  %v1046_v17 = vunpack.c.h.b16 %v624_v3 }
  0x85   :  { %5363 = vrot.lane.b32.xlu1 %v6161_v43, %s5952_s22  ;;  %v945_v3 = vunpack.c.l.b16 %v482_v39 }
  0x86   :  { %5368 = vrot.lane.b32.xlu2 %v6164_v44, %s5951_s21  ;;  %v6224_v18 = vpop.permute.xlu0 %5148  ;;  %v1063_v0 = vpack.c.b16 %v1043_v2, %v1043_v2  ;;  %v1064_v1 = vpack.c.b16 %v1044_v5, %v1044_v5  ;;  %v1065_v30 = vpack.c.b16 %v1045_v16, %v1045_v16  ;;  %v1066_v31 = vpack.c.b16 %v1046_v17, %v1046_v17 }
  0x87   :  { %v6231_v21 = vpop.permute.xlu1 %5153  ;;  %v10972_v25 = vunpack.i.h.bf16 %v6224_v18  ;;  %v10981_v28 = vunpack.i.l.bf16 %v6224_v18  ;;  %v6276_v2 = vpack.c.b16 %v843_v20, %v843_v20  ;;  %v6278_v5 = vpack.c.b16 %v844_v40, %v844_v40 }
  0x88   :  { %v6233_v22 = vpop.permute.xlu2 %5203  ;;  %v5155_v36 = vunpack.i.l.bf16 %v6231_v21  ;;  %v6250_v55 = vsel %vm1083_vm3, %v1063_v0, 0  ;;  %v6253_v57 = vsel %vm1083_vm3, %v1064_v1, 0  ;;  %v6264_v27 = vsel %vm1083_vm3, %v1065_v30, 0 }
  0x89   :  { %v550_v48 = vsel %vm531_vm0, %v10972_v25, %v5160_v38  ;;  %v547_v54 = vsel %vm531_vm0, %v5146_v35, %v10981_v28  ;;  %11313 = vst [vmem:[#allocation3_spill] sm:$0xff] %v6253_v57  ;;  %1472 = vmatpush.bf16.msra.mxu0 %v6250_v55  ;;  %1485 = vmatpush.bf16.msra.mxu1 %v6253_v57  ;;  %v6267_v35 = vsel %vm1083_vm3, %v1066_v31, 0  ;;  %v946_v0 = vunpack.c.h.b16 %v482_v39 }
  0x8a   :  { %v478_v58 = vsel %vm460_vm2, %v5155_v36, %v5135_v56  ;;  %v479_v38 = vsel %vm460_vm2, %v10969_v41, %v5155_v36  ;;  %11314 = vst [vmem:[#allocation4_spill] sm:$0xff] %v6264_v27  ;;  %1498 = vmatpush.bf16.msra.mxu2 %v6264_v27  ;;  %1511 = vmatpush.bf16.msra.mxu3 %v6267_v35  ;;  %v6317_v41 = vld [vmem:[%s10960_s0 + $0x90] sm:$0xff]  ;;  %v11341_v27 = vunpack.i.l.bf16 %v6172_v47  ;;  %v11342_v57 = vunpack.i.h.bf16 %v6233_v22 }
  0x8b   :  { %11315 = vst [vmem:[#allocation5_spill] sm:$0xff] %v6267_v35  ;;  %v481_v56 = vpack.c.bf16 %v478_v58, %v479_v38  ;;  %v552_v59 = vpack.c.bf16 %v549_v53, %v550_v48  ;;  %v553_v60 = vpack.c.bf16 %v547_v54, %v6170_v45  ;;  %v965_v38 = vpack.c.b16 %v945_v3, %v945_v3 }
  0x8c   :  { %5373 = vrot.lane.b32.xlu0 %v6164_v44, %s5952_s22 }
  0x8d   :  { %5378 = vrot.lane.b32.xlu1 %v6161_v43, %s5953_s27  ;;  %v943_v53 = vunpack.c.l.b16 %v481_v56  ;;  %v993_v45 = vunpack.c.l.b16 %v552_v59  ;;  %v944_v15 = vunpack.c.h.b16 %v481_v56  ;;  %v994_v16 = vunpack.c.h.b16 %v552_v59 }
  0x8e   :  { %5383 = vrot.lane.b32.xlu2 %v6161_v43, %s5954_s28  ;;  %v5164_v10 = vpop.permute.xlu0 %5163  ;;  %v995_v17 = vunpack.c.l.b16 %v553_v60  ;;  %v996_v1 = vunpack.c.h.b16 %v553_v60  ;;  %v5190_v43 = vunpack.i.l.bf16 %v6174_v49 }
  0x8f   :  { %v6286_v20 = vpop.permute.xlu1 %5168  ;;  %v5166_v31 = vunpack.i.h.bf16 %v5164_v10  ;;  %v5165_v36 = vunpack.i.l.bf16 %v5164_v10  ;;  %v963_v40 = vpack.c.b16 %v943_v53, %v943_v53  ;;  %v1013_v48 = vpack.c.b16 %v993_v45, %v993_v45 }
  0x90   :  { %v6288_v30 = vpop.permute.xlu2 %5218  ;;  %v10970_v54 = vunpack.i.h.bf16 %v6286_v20  ;;  %v10974_v58 = vunpack.i.l.bf16 %v6286_v20  ;;  %v964_v60 = vpack.c.b16 %v944_v15, %v944_v15  ;;  %v1014_v45 = vpack.c.b16 %v994_v16, %v994_v16 }
  0x91   :  { %v406_v39 = vsel %vm389_vm4, %v5165_v36, %v5166_v31  ;;  %v407_v56 = vsel %vm389_vm4, %v5175_v9, %v5165_v36  ;;  %v6300_v59 = vsel %vm1083_vm3, %v963_v40, %v1013_v48  ;;  %v966_v10 = vpack.c.b16 %v946_v0, %v946_v0 }
  0x92   :  { %11316 = vst [vmem:[#allocation6_spill] sm:$0xff] %v6300_v59  ;;  %v408_v53 = vsel %vm389_vm4, %v10970_v54, %v5175_v9  ;;  %v405_v3 = vsel %vm389_vm4, %v5166_v31, %v10974_v58  ;;  %1473 = vmatpush.bf16.msra.mxu0 %v6300_v59  ;;  %v1015_v36 = vpack.c.b16 %v995_v17, %v995_v17 }
  0x93   :  { %v1016_v15 = vpack.c.b16 %v996_v1, %v996_v1  ;;  %v410_v40 = vpack.c.bf16 %v407_v56, %v408_v53  ;;  %v411_v48 = vpack.c.bf16 %v405_v3, %v406_v39  ;;  %v6320_v9 = vsel %vm1083_vm3, %v964_v60, %v1014_v45 }
  0x94   :  { %11317 = vst [vmem:[#allocation7_spill] sm:$0xff] %v6320_v9  ;;  %5388 = vrot.lane.b32.xlu0 %v6229_v19, %s5947_s17  ;;  %v865_v31 = vpack.c.b16 %v845_v46, %v845_v46  ;;  %v866_v54 = vpack.c.b16 %v846_v61, %v846_v61  ;;  %1486 = vmatpush.bf16.msra.mxu1 %v6320_v9 }
  0x95   :  { %v6326_v16 = vsel %vm1083_vm3, %v965_v38, %v1015_v36  ;;  %v6329_v17 = vsel %vm1083_vm3, %v966_v10, %v1016_v15  ;;  %5393 = vrot.lane.b32.xlu1 %v6164_v44, %s5953_s27  ;;  %v893_v0 = vunpack.c.l.b16 %v410_v40  ;;  %v894_v1 = vunpack.c.h.b16 %v410_v40 }
  0x96   :  { %11318 = vst [vmem:[#allocation8_spill] sm:$0xff] %v6326_v16  ;;  %v6339_v46 = vsel %vm308_vm5, %v5190_v43, %v5191_v13  ;;  %1499 = vmatpush.bf16.msra.mxu2 %v6326_v16  ;;  %1512 = vmatpush.bf16.msra.mxu3 %v6329_v17  ;;  %v5179_v61 = vpop.permute.xlu0 %5178  ;;  %v895_v38 = vunpack.c.l.b16 %v411_v48  ;;  %v896_v39 = vunpack.c.h.b16 %v411_v48  ;;  %v6345_v56 = vpack.i.bf16 %v6317_v41, %v6149_v37 }
  0x97   :  { %11319 = vst [vmem:[#allocation9_spill] sm:$0xff] %v6329_v17  ;;  %5398 = vrot.lane.b32.xlu2 %v6164_v44, %s5954_s28  ;;  %v6349_v60 = vpop.permute.xlu1 %5183  ;;  %v5181_v3 = vunpack.i.h.bf16 %v5179_v61  ;;  %v5180_v45 = vunpack.i.l.bf16 %v5179_v61  ;;  %v913_v10 = vpack.c.b16 %v893_v0, %v893_v0  ;;  %v914_v36 = vpack.c.b16 %v894_v1, %v894_v1 }
  0x98   :  { %v6351_v53 = vpop.permute.xlu2 %5233  ;;  %v10977_v15 = vunpack.i.h.bf16 %v6288_v30  ;;  %v10978_v40 = vunpack.i.l.bf16 %v6288_v30  ;;  %v10973_v48 = vunpack.i.l.bf16 %v6349_v60  ;;  %v915_v61 = vpack.c.b16 %v895_v38, %v895_v38 }
  0x99   :  { %v255_v37 = vsel %vm237_vm6, %v5180_v45, %v5181_v3  ;;  %v6360_v44 = vsel %vm1083_vm3, %v6276_v2, %v913_v10  ;;  %v6364_v50 = vsel %vm1083_vm3, %v6278_v5, %v914_v36  ;;  %v5186_v0 = vunpack.i.h.bf16 %v6349_v60  ;;  %v6376_v2 = vld [vmem:[%s10960_s0 + $0x88] sm:$0xff] }
  0x9a   :  { %11320 = vst [vmem:[#allocation10_spill] sm:$0xff] %v6360_v44  ;;  %v254_v1 = vsel %vm237_vm6, %v5181_v3, %v10973_v48  ;;  %1474 = vmatpush.bf16.msra.mxu0 %v6360_v44  ;;  %1487 = vmatpush.bf16.msra.mxu1 %v6364_v50  ;;  %v916_v25 = vpack.c.b16 %v896_v39, %v896_v39  ;;  %v10986_v5 = vunpack.i.h.bf16 %v6231_v21  ;;  %v10979_v48 = vunpack.i.l.bf16 %v6233_v22 }
  0x9b   :  { %11321 = vst [vmem:[#allocation11_spill] sm:$0xff] %v6364_v50  ;;  %v6380_v38 = vsel %vm1083_vm3, %v865_v31, %v915_v61  ;;  %v259_v10 = vpack.c.bf16 %v254_v1, %v255_v37  ;;  %v6391_v39 = vpack.i.bf16 %v6200_v7, %v6125_v26  ;;  %v6400_v31 = vsel %vm166_vm7, %v10978_v40, %v10977_v15 }
  0x9c   :  { %11322 = vst [vmem:[#allocation12_spill] sm:$0xff] %v6380_v38  ;;  %1500 = vmatpush.bf16.msra.mxu2 %v6380_v38  ;;  %v6385_v3 = vsel %vm1083_vm3, %v866_v54, %v916_v25  ;;  %5403 = vrot.lane.b32.xlu0 %v6345_v56, %s5947_s17  ;;  %v6407_v25 = vpack.i.bf16 %v6376_v2, %v6114_v23  ;;  %v11333_v50 = vunpack.i.h.bf16 %v6288_v30 }
  0x9d   :  { %11323 = vst [vmem:[#allocation13_spill] sm:$0xff] %v6385_v3  ;;  %1513 = vmatpush.bf16.msra.mxu3 %v6385_v3  ;;  %5408 = vrot.lane.b32.xlu1 %v6229_v19, %s5948_s18  ;;  %v256_v54 = vsel %vm237_vm6, %v5186_v0, %v5180_v45  ;;  %v745_v63 = vunpack.c.l.b16 %v259_v10  ;;  %v746_v51 = vunpack.c.h.b16 %v259_v10  ;;  %v6443_v10 = vpack.i.bf16 %v6376_v2, %v6064_v12 }
  0x9e   :  { %v6413_v37 = vpop.permute.xlu0 %5193 }
  0x9f   :  { %5413 = vrot.lane.b32.xlu2 %v6229_v19, %s5949_s19  ;;  %v6418_v61 = vpop.permute.xlu1 %5198  ;;  %v5196_v58 = vunpack.i.h.bf16 %v6413_v37  ;;  %v10980_v26 = vunpack.i.l.bf16 %v6413_v37  ;;  %v766_v52 = vpack.c.b16 %v746_v51, %v746_v51 }
  0xa0   :  { %v6420_v1 = vpop.permute.xlu2 %5248  ;;  %v10982_v42 = vunpack.i.l.bf16 %v6418_v61 }
  0xa1   :  { %v10983_v45 = vunpack.i.h.bf16 %v6420_v1  ;;  %v5250_v36 = vunpack.i.l.bf16 %v6420_v1  ;;  %v327_v62 = vsel %vm308_vm5, %v5196_v58, %v5190_v43  ;;  %v328_v15 = vsel %vm308_vm5, %v10979_v48, %v5196_v58 }
  0xa2   :  { %v325_v40 = vsel %vm308_vm5, %v5191_v13, %v10980_v26  ;;  %v257_v43 = vsel %vm237_vm6, %v10982_v42, %v5186_v0  ;;  %v329_v13 = vpack.c.bf16 %v327_v62, %v328_v15  ;;  %v765_v42 = vpack.c.b16 %v745_v63, %v745_v63 }
  0xa3   :  { %v472_v58 = vsel %vm460_vm2, %v5250_v36, %v10983_v45  ;;  %v473_v49 = vsel %vm460_vm2, %v10986_v5, %v5250_v36  ;;  %v258_v48 = vpack.c.bf16 %v256_v54, %v257_v43  ;;  %v330_v12 = vpack.c.bf16 %v325_v40, %v6339_v46 }
  0xa4   :  { %v484_v26 = vpack.c.bf16 %v472_v58, %v473_v49  ;;  %5418 = vrot.lane.b32.xlu0 %v6345_v56, %s5948_s18  ;;  %v793_v28 = vunpack.c.l.b16 %v329_v13  ;;  %v794_v0 = vunpack.c.h.b16 %v329_v13 }
  0xa5   :  { %5423 = vrot.lane.b32.xlu1 %v6345_v56, %s5949_s19  ;;  %v743_v45 = vunpack.c.l.b16 %v258_v48  ;;  %v744_v3 = vunpack.c.h.b16 %v258_v48  ;;  %v795_v36 = vunpack.c.l.b16 %v330_v12  ;;  %v796_v46 = vunpack.c.h.b16 %v330_v12 }
  0xa6   :  { %v5209_v62 = vpop.permute.xlu0 %5208  ;;  %v813_v15 = vpack.c.b16 %v793_v28, %v793_v28  ;;  %v814_v54 = vpack.c.b16 %v794_v0, %v794_v0  ;;  %v949_v40 = vunpack.c.l.b16 %v484_v26  ;;  %v950_v0 = vunpack.c.h.b16 %v484_v26 }
  0xa7   :  { %5428 = vrot.lane.b32.xlu2 %v6229_v19, %s5950_s20  ;;  %v6465_v43 = vpop.permute.xlu1 %5213  ;;  %v5211_v51 = vunpack.i.h.bf16 %v5209_v62  ;;  %v5210_v58 = vunpack.i.l.bf16 %v5209_v62  ;;  %v763_v49 = vpack.c.b16 %v743_v45, %v743_v45  ;;  %v764_v13 = vpack.c.b16 %v744_v3, %v744_v3 }
  0xa8   :  { %v6467_v63 = vpop.permute.xlu2 %5263  ;;  %v5216_v5 = vunpack.i.h.bf16 %v6465_v43  ;;  %v815_v38 = vpack.c.b16 %v795_v36, %v795_v36  ;;  %v11326_v45 = vunpack.i.l.bf16 %v6351_v53  ;;  %v11327_v62 = vunpack.i.h.bf16 %v6133_v29 }
  0xa9   :  { %v5265_v28 = vunpack.i.l.bf16 %v6467_v63  ;;  %v113_v12 = vsel %vm95_vm8, %v5210_v58, %v5211_v51  ;;  %v6475_v19 = vsel %vm1083_vm3, %v763_v49, %v813_v15  ;;  %v6478_v7 = vsel %vm1083_vm3, %v764_v13, %v814_v54 }
  0xaa   :  { %11324 = vst [vmem:[#allocation14_spill] sm:$0xff] %v6475_v19  ;;  %v115_v3 = vsel %vm95_vm8, %v11326_v45, %v5216_v5  ;;  %v11328_v48 = vunpack.i.l.bf16 %v6224_v18  ;;  %v11329_v49 = vunpack.i.l.bf16 %v6465_v43  ;;  %1475 = vmatpush.bf16.msra.mxu0 %v6475_v19  ;;  %v114_v54 = vsel %vm95_vm8, %v5216_v5, %v5210_v58  ;;  %1488 = vmatpush.bf16.msra.mxu1 %v6478_v7 }
  0xab   :  { %11325 = vst [vmem:[#allocation15_spill] sm:$0xff] %v6478_v7  ;;  %v545_v26 = vsel %vm531_vm0, %v5265_v28, %v11327_v62  ;;  %v6501_v13 = vsel %vm1083_vm3, %v765_v42, %v815_v38  ;;  %v816_v45 = vpack.c.b16 %v796_v46, %v796_v46 }
  0xac   :  { %v546_v15 = vsel %vm531_vm0, %v11328_v48, %v5265_v28  ;;  %v112_v36 = vsel %vm95_vm8, %v5211_v51, %v11329_v49  ;;  %11330 = vst [vmem:[#allocation16_spill] sm:$0xff] %v6501_v13  ;;  %1501 = vmatpush.bf16.msra.mxu2 %v6501_v13  ;;  %5433 = vrot.lane.b32.xlu0 %v6345_v56, %s5950_s20  ;;  %v11335_v13 = vunpack.i.h.bf16 %v6140_v33 }
  0xad   :  { %v117_v62 = vpack.c.bf16 %v112_v36, %v113_v12  ;;  %v116_v51 = vpack.c.bf16 %v114_v54, %v115_v3  ;;  %v6508_v48 = vsel %vm1083_vm3, %v766_v52, %v816_v45  ;;  %5438 = vrot.lane.b32.xlu1 %v6391_v39, %s5951_s21  ;;  %v554_v28 = vpack.c.bf16 %v545_v26, %v546_v15 }
  0xae   :  { %11331 = vst [vmem:[#allocation17_spill] sm:$0xff] %v6508_v48  ;;  %1514 = vmatpush.bf16.msra.mxu3 %v6508_v48  ;;  %v6513_v42 = vpop.permute.xlu0 %5223  ;;  %v6515_v12 = vpack.c.b16 %v949_v40, %v949_v40  ;;  %v6525_v54 = vpack.c.b16 %v950_v0, %v950_v0 }
  0xaf   :  { %v645_v5 = vunpack.c.l.b16 %v117_v62  ;;  %v646_v58 = vunpack.c.h.b16 %v117_v62  ;;  %v643_v38 = vunpack.c.l.b16 %v116_v51  ;;  %v644_v46 = vunpack.c.h.b16 %v116_v51  ;;  %5443 = vrot.lane.b32.xlu2 %v6391_v39, %s5952_s22  ;;  %v6519_v56 = vpop.permute.xlu1 %5228 }
  0xb0   :  { %v6521_v52 = vpop.permute.xlu2 %5278  ;;  %v5226_v3 = vunpack.i.h.bf16 %v6513_v42  ;;  %v10997_v49 = vunpack.i.l.bf16 %v6513_v42  ;;  %v5230_v26 = vunpack.i.l.bf16 %v6519_v56  ;;  %v11332_v62 = vunpack.i.l.bf16 %v6288_v30 }
  0xb1   :  { %v665_v36 = vpack.c.b16 %v645_v5, %v645_v5  ;;  %v5280_v15 = vunpack.i.l.bf16 %v6521_v52  ;;  %v666_v5 = vpack.c.b16 %v646_v58, %v646_v58  ;;  %v6541_v45 = vpack.c.b16 %v643_v38, %v643_v38 }
  0xb2   :  { %v185_v51 = vsel %vm166_vm7, %v5226_v3, %v11332_v62  ;;  %v183_v0 = vsel %vm166_vm7, %v11333_v50, %v10997_v49  ;;  %v11334_v48 = vunpack.i.h.bf16 %v6519_v56  ;;  %v615_v62 = vsel %vm602_vm1, %v11335_v13, %v5230_v26 }
  0xb3   :  { %v11336_v7 = vunpack.i.h.bf16 %v6521_v52  ;;  %v6557_v50 = vpack.c.b16 %v644_v46, %v644_v46  ;;  %v188_v58 = vpack.c.bf16 %v183_v0, %v6400_v31  ;;  %v997_v49 = vunpack.c.l.b16 %v554_v28 }
  0xb4   :  { %v614_v40 = vsel %vm602_vm1, %v5230_v26, %v11334_v48  ;;  %v998_v19 = vunpack.c.h.b16 %v554_v28  ;;  %v11337_v48 = vunpack.i.h.bf16 %v6418_v61  ;;  %5448 = vrot.lane.b32.xlu0 %v6407_v25, %s5951_s21  ;;  %v341_v13 = vpack.c.bf16 %v6059_v11, %v6031_v6 }
  0xb5   :  { %v6555_v30 = vsel %vm237_vm6, %v5280_v15, %v11336_v7  ;;  %v626_v38 = vpack.c.bf16 %v614_v40, %v615_v62  ;;  %v6570_v7 = vpack.i.bf16 %v6205_v8, %v6317_v41  ;;  %5453 = vrot.lane.b32.xlu1 %v6407_v25, %s5952_s22  ;;  %v695_v31 = vunpack.c.l.b16 %v188_v58 }
  0xb6   :  { %v6564_v44 = vsel %vm237_vm6, %v11337_v48, %v5280_v15  ;;  %v696_v46 = vunpack.c.h.b16 %v188_v58  ;;  %v6576_v26 = vpop.permute.xlu0 %5238  ;;  %v6578_v15 = vpack.c.b16 %v997_v49, %v997_v49  ;;  %v6580_v0 = vpack.c.b16 %v998_v19, %v998_v19 }
  0xb7   :  { %v1049_v28 = vunpack.c.l.b16 %v626_v38  ;;  %v1050_v40 = vunpack.c.h.b16 %v626_v38  ;;  %v847_v62 = vunpack.c.l.b16 %v341_v13  ;;  %5458 = vrot.lane.b32.xlu2 %v6391_v39, %s5953_s27  ;;  %v6584_v48 = vpop.permute.xlu1 %5243  ;;  %v11016_v11 = vunpack.i.l.bf16 %v6576_v26 }
  0xb8   :  { %v6586_v6 = vpop.permute.xlu2 %5293  ;;  %v715_v17 = vpack.c.b16 %v695_v31, %v695_v31  ;;  %v716_v58 = vpack.c.b16 %v696_v46, %v696_v46  ;;  %v848_v16 = vunpack.c.h.b16 %v341_v13  ;;  %v5245_v49 = vunpack.i.l.bf16 %v6584_v48 }
  0xb9   :  { %v5295_v19 = vunpack.i.l.bf16 %v6586_v6  ;;  %v186_v59 = vsel %vm166_vm7, %v11016_v11, %v5226_v3  ;;  %v1069_v13 = vpack.c.b16 %v1049_v28, %v1049_v28  ;;  %v11340_v46 = vunpack.i.h.bf16 %v6140_v33 }
  0xba   :  { %v6598_v35 = vsel %vm1083_vm3, %v665_v36, %v715_v17  ;;  %v6601_v31 = vsel %vm1083_vm3, %v666_v5, %v716_v58  ;;  %v617_v38 = vsel %vm602_vm1, %v11341_v27, %v5245_v49  ;;  %v11343_v3 = vunpack.i.l.bf16 %v6413_v37 }
  0xbb   :  { %11338 = vst [vmem:[#allocation18_spill] sm:$0xff] %v6598_v35  ;;  %v616_v9 = vsel %vm602_vm1, %v5245_v49, %v11340_v46  ;;  %v323_v17 = vsel %vm308_vm5, %v5295_v19, %v11342_v57  ;;  %1502 = vmatpush.bf16.msra.mxu2 %v6598_v35  ;;  %v187_v5 = vpack.c.bf16 %v185_v51, %v186_v59  ;;  %v6624_v28 = vsel %vm1083_vm3, %v1069_v13, 0 }
  0xbc   :  { %11339 = vst [vmem:[#allocation19_spill] sm:$0xff] %v6601_v31  ;;  %v324_v36 = vsel %vm308_vm5, %v11343_v3, %v5295_v19  ;;  %1515 = vmatpush.bf16.msra.mxu3 %v6601_v31  ;;  %v1070_v27 = vpack.c.b16 %v1050_v40, %v1050_v40  ;;  %5463 = vrot.lane.b32.xlu0 %v6391_v39, %s5954_s28  ;;  %v11347_v58 = vunpack.i.h.bf16 %v6231_v21 }
  0xbd   :  { %v6620_v33 = vpack.c.bf16 %v323_v17, %v324_v36  ;;  %11344 = vst [vmem:[#allocation20_spill] sm:$0xff] %v6624_v28  ;;  %v625_v57 = vpack.c.bf16 %v616_v9, %v617_v38  ;;  %v6630_v37 = vpack.c.b16 %v847_v62, %v847_v62  ;;  %v6632_v49 = vpack.c.b16 %v848_v16, %v848_v16 }
  0xbe   :  { %v6635_v59 = vsel %vm1083_vm3, %v1070_v27, 0  ;;  %5468 = vrot.lane.b32.xlu1 %v6443_v10, %s5947_s17  ;;  %v693_v51 = vunpack.c.l.b16 %v187_v5  ;;  %v694_v40 = vunpack.c.h.b16 %v187_v5  ;;  %v342_v19 = vpack.c.bf16 %v6077_v14, %v6021_v4  ;;  %v6642_v13 = vpop.permute.xlu0 %5253 }
  0xbf   :  { %1550 = vmatpush.bf16.msrb.mxu2 %v6624_v28  ;;  %11345 = vst [vmem:[#allocation21_spill] sm:$0xff] %v6635_v59  ;;  %v1047_v9 = vunpack.c.l.b16 %v625_v57  ;;  %v1048_v39 = vunpack.c.h.b16 %v625_v57  ;;  %5473 = vrot.lane.b32.xlu2 %v6407_v25, %s5953_s27  ;;  %v6648_v62 = vpop.permute.xlu1 %5258  ;;  %v11017_v46 = vunpack.i.h.bf16 %v6642_v13  ;;  %v5255_v4 = vunpack.i.l.bf16 %v6642_v13 }
  0xc0   :  { %1563 = vmatpush.bf16.msrb.mxu3 %v6635_v59  ;;  %v6650_v38 = vpop.permute.xlu2 %5308  ;;  %v713_v14 = vpack.c.b16 %v693_v51, %v693_v51  ;;  %v714_v17 = vpack.c.b16 %v694_v40, %v694_v40  ;;  %v5260_v36 = vunpack.i.l.bf16 %v6648_v62  ;;  %v11346_v57 = vunpack.i.h.bf16 %v6133_v29 }
  0xc1   :  { %v11018_v5 = vunpack.i.h.bf16 %v6650_v38  ;;  %v5310_v27 = vunpack.i.l.bf16 %v6650_v38  ;;  %v543_v25 = vsel %vm531_vm0, %v5255_v4, %v11017_v46  ;;  %v11348_v46 = vunpack.i.l.bf16 %v6116_v24 }
  0xc2   :  { %v544_v11 = vsel %vm531_vm0, %v11346_v57, %v5255_v4  ;;  %v6668_v51 = vsel %vm1083_vm3, %v6541_v45, %v713_v14  ;;  %v6672_v40 = vsel %vm1083_vm3, %v6557_v50, %v714_v17  ;;  %v474_v16 = vsel %vm460_vm2, %v5260_v36, %v11347_v58 }
  0xc3   :  { %v475_v29 = vsel %vm460_vm2, %v11348_v46, %v5260_v36  ;;  %v610_v45 = vsel %vm602_vm1, %v5310_v27, %v11018_v5  ;;  %v11349_v4 = vunpack.i.h.bf16 %v6584_v48  ;;  %1476 = vmatpush.bf16.msra.mxu0 %v6668_v51  ;;  %v555_v58 = vpack.c.bf16 %v543_v25, %v544_v11  ;;  %1489 = vmatpush.bf16.msra.mxu1 %v6672_v40 }
  0xc4   :  { %v483_v21 = vpack.c.bf16 %v474_v16, %v475_v29  ;;  %v1067_v17 = vpack.c.b16 %v1047_v9, %v1047_v9  ;;  %v1068_v46 = vpack.c.b16 %v1048_v39, %v1048_v39  ;;  %150 = vrot.lane.b32.xlu0 %v6114_v23, %s5954_s28  ;;  %v849_v36 = vunpack.c.l.b16 %v342_v19 }
  0xc5   :  { %v611_v50 = vsel %vm602_vm1, %v11349_v4, %v5310_v27  ;;  %v850_v57 = vunpack.c.h.b16 %v342_v19  ;;  %v797_v5 = vunpack.c.l.b16 %v6620_v33  ;;  %v999_v11 = vunpack.c.l.b16 %v555_v58 }
  0xc6   :  { %v6691_v14 = vpack.c.bf16 %v610_v45, %v611_v50  ;;  %v6698_v3 = vsel %vm1083_vm3, %v1067_v17, 0  ;;  %5478 = vrot.lane.b32.xlu1 %v6443_v10, %s5948_s18  ;;  %v947_v16 = vunpack.c.l.b16 %v483_v21  ;;  %v948_v27 = vunpack.c.h.b16 %v483_v21  ;;  %v6706_v39 = vpop.permute.xlu0 %5268 }
  0xc7   :  { %11350 = vst [vmem:[#allocation22_spill] sm:$0xff] %v6698_v3  ;;  %1524 = vmatpush.bf16.msrb.mxu0 %v6698_v3  ;;  %v6704_v9 = vsel %vm1083_vm3, %v1068_v46, 0  ;;  %v1000_v23 = vunpack.c.h.b16 %v555_v58  ;;  %v6708_v19 = vpack.c.b16 %v849_v36, %v849_v36  ;;  %v6710_v25 = vpack.c.b16 %v850_v57, %v850_v57  ;;  %5483 = vrot.lane.b32.xlu2 %v6443_v10, %s5949_s19  ;;  %v6715_v29 = vpop.permute.xlu1 %5273 }
  0xc8   :  { %11351 = vst [vmem:[#allocation23_spill] sm:$0xff] %v6704_v9  ;;  %1537 = vmatpush.bf16.msrb.mxu1 %v6704_v9  ;;  %v6717_v45 = vpop.permute.xlu2 %5323  ;;  %v11025_v4 = vunpack.i.h.bf16 %v6706_v39  ;;  %v5270_v50 = vunpack.i.l.bf16 %v6706_v39  ;;  %v967_v21 = vpack.c.b16 %v947_v16, %v947_v16  ;;  %v968_v17 = vpack.c.b16 %v948_v27, %v948_v27 }
  0xc9   :  { %v5275_v46 = vunpack.i.l.bf16 %v6715_v29  ;;  %v5325_v57 = vunpack.i.l.bf16 %v6717_v45  ;;  %v11352_v28 = vunpack.i.h.bf16 %v6142_v34 }
  0xca   :  { %v401_v59 = vsel %vm389_vm4, %v5270_v50, %v11025_v4  ;;  %v6735_v16 = vsel %vm1083_vm3, %v967_v21, %v6578_v15  ;;  %v6739_v27 = vsel %vm1083_vm3, %v968_v17, %v6580_v0  ;;  %v11356_v4 = vunpack.i.l.bf16 %v6286_v20 }
  0xcb   :  { %v402_v9 = vsel %vm389_vm4, %v11352_v28, %v5270_v50  ;;  %11353 = vst [vmem:[#allocation24_spill] sm:$0xff] %v6735_v16  ;;  %v11355_v36 = vmov %v11352_v28  ;;  %v11357_v28 = vunpack.i.h.bf16 %v6584_v48  ;;  %v11358_v50 = vunpack.i.h.bf16 %v6519_v56  ;;  %1525 = vmatpush.bf16.msrb.mxu0 %v6735_v16 }
  0xcc   :  { %11354 = vst [vmem:[#allocation25_spill] sm:$0xff] %v6739_v27  ;;  %v403_v58 = vsel %vm389_vm4, %v5275_v46, %v11355_v36  ;;  %v404_v3 = vsel %vm389_vm4, %v11356_v4, %v5275_v46  ;;  %v413_v17 = vpack.c.bf16 %v401_v59, %v402_v9  ;;  %1538 = vmatpush.bf16.msrb.mxu1 %v6739_v27  ;;  %v798_v56 = vunpack.c.h.b16 %v6620_v33 }
  0xcd   :  { %v612_v15 = vsel %vm602_vm1, %v5325_v57, %v11357_v28  ;;  %v613_v0 = vsel %vm602_vm1, %v11358_v50, %v5325_v57  ;;  %v412_v34 = vpack.c.bf16 %v403_v58, %v404_v3  ;;  %v1019_v36 = vpack.c.b16 %v999_v11, %v999_v11  ;;  %5488 = vrot.lane.b32.xlu0 %v6443_v10, %s5950_s20 }
  0xce   :  { %v6758_v21 = vpack.c.bf16 %v612_v15, %v613_v0  ;;  %v1020_v4 = vpack.c.b16 %v1000_v23, %v1000_v23  ;;  %v6763_v48 = vpack.c.b16 %v797_v5, %v797_v5  ;;  %v261_v46 = vpack.c.bf16 %v6555_v30, %v6564_v44  ;;  %5493 = vrot.lane.b32.xlu1 %v6570_v7, %s5951_s21  ;;  %v6779_v33 = vpop.permute.xlu0 %5283 }
  0xcf   :  { %v6770_v3 = vsel %vm1083_vm3, %v6515_v12, %v1019_v36  ;;  %v897_v59 = vunpack.c.l.b16 %v412_v34  ;;  %v898_v11 = vunpack.c.h.b16 %v412_v34  ;;  %v899_v9 = vunpack.c.l.b16 %v413_v17  ;;  %5498 = vrot.lane.b32.xlu2 %v6570_v7, %s5952_s22  ;;  %v6786_v12 = vpop.permute.xlu1 %5288 }
  0xd0   :  { %11359 = vst [vmem:[#allocation26_spill] sm:$0xff] %v6770_v3  ;;  %1551 = vmatpush.bf16.msrb.mxu2 %v6770_v3  ;;  %v6777_v10 = vsel %vm1083_vm3, %v6525_v54, %v1020_v4  ;;  %v900_v5 = vunpack.c.h.b16 %v413_v17  ;;  %v6781_v44 = vpack.c.b16 %v798_v56, %v798_v56  ;;  %v749_v30 = vunpack.c.l.b16 %v261_v46  ;;  %v6788_v23 = vpop.permute.xlu2 %5338 }
  0xd1   :  { %11360 = vst [vmem:[#allocation27_spill] sm:$0xff] %v6777_v10  ;;  %1564 = vmatpush.bf16.msrb.mxu3 %v6777_v10  ;;  %v11028_v58 = vunpack.i.h.bf16 %v6779_v33  ;;  %v5285_v54 = vunpack.i.l.bf16 %v6779_v33  ;;  %v917_v57 = vpack.c.b16 %v897_v59, %v897_v59  ;;  %v918_v28 = vpack.c.b16 %v898_v11, %v898_v11 }
  0xd2   :  { %v5290_v50 = vunpack.i.l.bf16 %v6786_v12  ;;  %v5340_v34 = vunpack.i.l.bf16 %v6788_v23  ;;  %v11361_v36 = vunpack.i.h.bf16 %v6233_v22  ;;  %v11364_v11 = vunpack.i.h.bf16 %v6418_v61 }
  0xd3   :  { %v321_v17 = vsel %vm308_vm5, %v5285_v54, %v11028_v58  ;;  %v6806_v56 = vsel %vm1083_vm3, %v6630_v37, %v917_v57  ;;  %v6810_v59 = vsel %vm1083_vm3, %v6632_v49, %v918_v28  ;;  %v11365_v58 = vunpack.i.l.bf16 %v6349_v60  ;;  %v6832_v28 = vld [vmem:[%s10961_s2] sm:$0xf] }
  0xd4   :  { %v322_v4 = vsel %vm308_vm5, %v11361_v36, %v5285_v54  ;;  %11362 = vst [vmem:[#allocation28_spill] sm:$0xff] %v6806_v56  ;;  %v252_v0 = vsel %vm237_vm6, %v5290_v50, %v11364_v11  ;;  %v11366_v54 = vunpack.i.h.bf16 %v6648_v62  ;;  %v11367_v57 = vunpack.i.h.bf16 %v6420_v1  ;;  %1526 = vmatpush.bf16.msrb.mxu0 %v6806_v56  ;;  %1539 = vmatpush.bf16.msrb.mxu1 %v6810_v59 }
  0xd5   :  { %11363 = vst [vmem:[#allocation29_spill] sm:$0xff] %v6810_v59  ;;  %v253_v15 = vsel %vm237_vm6, %v11365_v58, %v5290_v50  ;;  %v332_v58 = vpack.c.bf16 %v321_v17, %v322_v4  ;;  %v919_v50 = vpack.c.b16 %v899_v9, %v899_v9  ;;  %v920_v11 = vpack.c.b16 %v900_v5, %v900_v5 }
  0xd6   :  { %v470_v37 = vsel %vm460_vm2, %v5340_v34, %v11366_v54  ;;  %v471_v49 = vsel %vm460_vm2, %v11367_v57, %v5340_v34  ;;  %v260_v60 = vpack.c.bf16 %v252_v0, %v253_v15  ;;  %5503 = vrot.lane.b32.xlu0 %v6570_v7, %s5953_s27  ;;  %v769_v1 = vpack.c.b16 %v749_v30, %v749_v30 }
  0xd7   :  { %v6834_v36 = vpack.c.bf16 %v470_v37, %v471_v49  ;;  %v750_v34 = vunpack.c.h.b16 %v261_v46  ;;  %v6841_v54 = vsel %vm1083_vm3, %v6708_v19, %v919_v50  ;;  %v11369_v15 = vpack.i.bf16 %v6317_v41, %v6376_v2  ;;  %4986 = vmatmul.msk.bf16.vlgmr.msra.gmra.mxu2 %vm1405_vm9, %v6832_v28  ;;  %v6854_v46 = vpop.permute.xlu0 %5298  ;;  %4987 = vmatmul.msk.bf16.vlgmr.msra.gmra.mxu3 %vm1405_vm9, %v6832_v28  ;;  %v6860_v2 = vpop.permute.xlu1 %5303 }
  0xd8   :  { %11368 = vst [vmem:[#allocation30_spill] sm:$0xff] %v6841_v54  ;;  %v747_v0 = vunpack.c.l.b16 %v260_v60  ;;  %v748_v17 = vunpack.c.h.b16 %v260_v60  ;;  %v799_v4 = vunpack.c.l.b16 %v332_v58  ;;  %1552 = vmatpush.bf16.msrb.mxu2 %v6841_v54  ;;  %v6852_v7 = vsel %vm1083_vm3, %v6710_v25, %v920_v11  ;;  %158 = vrot.lane.b32.xlu2 %v6205_v8, %s5954_s28  ;;  %v6864_v5 = vpop.permute.xlu2 %5353 }
  0xd9   :  { %5508 = vrot.lane.b32.xlu1 %v11369_v15, %s5954_s28  ;;  %11370 = vst [vmem:[#allocation31_spill] sm:$0xff] %v6852_v7  ;;  %v770_v19 = vpack.c.b16 %v750_v34, %v750_v34  ;;  %v800_v9 = vunpack.c.h.b16 %v332_v58  ;;  %v1053_v41 = vunpack.c.l.b16 %v6691_v14  ;;  %1565 = vmatpush.bf16.msrb.mxu3 %v6852_v7  ;;  %v11029_v25 = vunpack.i.h.bf16 %v6854_v46 }
  0xda   :  { %v5300_v30 = vunpack.i.l.bf16 %v6854_v46  ;;  %v767_v37 = vpack.c.b16 %v747_v0, %v747_v0  ;;  %v768_v57 = vpack.c.b16 %v748_v17, %v748_v17  ;;  %v11030_v49 = vunpack.i.h.bf16 %v6860_v2  ;;  %4984 = vmatmul.msk.bf16.vlgmr.msra.gmra.mxu0 %vm1405_vm9, %v6832_v28  ;;  %4985 = vmatmul.msk.bf16.vlgmr.msra.gmra.mxu1 %vm1405_vm9, %v6832_v28 }
  0xdb   :  { %v5305_v60 = vunpack.i.l.bf16 %v6860_v2  ;;  %v5355_v50 = vunpack.i.l.bf16 %v6864_v5  ;;  %v11371_v11 = vunpack.i.h.bf16 %v6351_v53  ;;  %v819_v7 = vpack.c.b16 %v799_v4, %v799_v4  ;;  %v11502_v32 = vld [vmem:[#allocation28_spill] sm:$0xff] }
  0xdc   :  { %v108_v8 = vsel %vm95_vm8, %v5300_v30, %v11029_v25  ;;  %v6886_v15 = vsel %vm1083_vm3, %v767_v37, %v6763_v48  ;;  %v6890_v0 = vsel %vm1083_vm3, %v768_v57, %v6781_v44  ;;  %v11374_v25 = vunpack.i.h.bf16 %v6576_v26 }
  0xdd   :  { %v109_v34 = vsel %vm95_vm8, %v11371_v11, %v5300_v30  ;;  %11372 = vst [vmem:[#allocation32_spill] sm:$0xff] %v6886_v15  ;;  %v179_v17 = vsel %vm166_vm7, %v5305_v60, %v11030_v49  ;;  %v11375_v30 = vunpack.i.h.bf16 %v6715_v29  ;;  %v11376_v37 = vunpack.i.h.bf16 %v6706_v39  ;;  %1527 = vmatpush.bf16.msrb.mxu0 %v6886_v15  ;;  %1540 = vmatpush.bf16.msrb.mxu1 %v6890_v0 }
  0xde   :  { %11373 = vst [vmem:[#allocation33_spill] sm:$0xff] %v6890_v0  ;;  %v180_v58 = vsel %vm166_vm7, %v11374_v25, %v5305_v60  ;;  %v119_v49 = vpack.c.bf16 %v108_v8, %v109_v34  ;;  %v820_v25 = vpack.c.b16 %v800_v9, %v800_v9  ;;  %v1073_v60 = vpack.c.b16 %v1053_v41, %v1053_v41 }
  0xdf   :  { %v399_v48 = vsel %vm389_vm4, %v5355_v50, %v11375_v30  ;;  %v400_v44 = vsel %vm389_vm4, %v11376_v37, %v5355_v50  ;;  %v190_v57 = vpack.c.bf16 %v179_v17, %v180_v58  ;;  %v1054_v54 = vunpack.c.h.b16 %v6691_v14  ;;  %v6921_v8 = vpop.permute.xlu0 %5313  ;;  %v6927_v41 = vpop.permute.xlu1 %5318 }
  0xe0   :  { %v6909_v11 = vpack.c.bf16 %v399_v48, %v400_v44  ;;  %v1051_v30 = vunpack.c.l.b16 %v6758_v21  ;;  %v6915_v39 = vsel %vm1083_vm3, %v769_v1, %v819_v7  ;;  %v649_v59 = vunpack.c.l.b16 %v119_v49  ;;  %v6929_v1 = vpop.permute.xlu2 %5368 }
  0xe1   :  { %11377 = vst [vmem:[#allocation34_spill] sm:$0xff] %v6915_v39  ;;  %v699_v50 = vunpack.c.l.b16 %v190_v57  ;;  %v650_v37 = vunpack.c.h.b16 %v119_v49  ;;  %1553 = vmatpush.bf16.msrb.mxu2 %v6915_v39  ;;  %v6919_v58 = vsel %vm1083_vm3, %v770_v19, %v820_v25  ;;  %v700_v4 = vunpack.c.h.b16 %v190_v57 }
  0xe2   :  { %11378 = vst [vmem:[#allocation35_spill] sm:$0xff] %v6919_v58  ;;  %v6924_v9 = vsel %vm1083_vm3, %v1073_v60, 0  ;;  %v1074_v14 = vpack.c.b16 %v1054_v54, %v1054_v54  ;;  %1566 = vmatpush.bf16.msrb.mxu3 %v6919_v58  ;;  %v5315_v49 = vunpack.i.l.bf16 %v6921_v8  ;;  %v669_v34 = vpack.c.b16 %v649_v59, %v649_v59 }
  0xe3   :  { %11379 = vst [vmem:[#allocation36_spill] sm:$0xff] %v6924_v9  ;;  %v719_v19 = vpack.c.b16 %v699_v50, %v699_v50  ;;  %v5320_v48 = vunpack.i.l.bf16 %v6927_v41  ;;  %v5370_v54 = vunpack.i.l.bf16 %v6929_v1  ;;  %v11380_v57 = vunpack.i.h.bf16 %v6351_v53 }
  0xe4   :  { %v11381_v60 = vunpack.i.l.bf16 %v6465_v43  ;;  %v670_v50 = vpack.c.b16 %v650_v37, %v650_v37  ;;  %v11383_v17 = vunpack.i.h.bf16 %v6576_v26  ;;  %v11384_v58 = vunpack.i.l.bf16 %v6513_v42 }
  0xe5   :  { %v110_v25 = vsel %vm95_vm8, %v5315_v49, %v11380_v57  ;;  %v6946_v59 = vsel %vm1083_vm3, %v669_v34, %v719_v19  ;;  %v11385_v57 = vunpack.i.h.bf16 %v6786_v12  ;;  %v720_v42 = vpack.c.b16 %v700_v4, %v700_v4 }
  0xe6   :  { %v111_v7 = vsel %vm95_vm8, %v11381_v60, %v5315_v49  ;;  %11382 = vst [vmem:[#allocation37_spill] sm:$0xff] %v6946_v59  ;;  %v181_v44 = vsel %vm166_vm7, %v5320_v48, %v11383_v17  ;;  %v182_v39 = vsel %vm166_vm7, %v11384_v58, %v5320_v48  ;;  %v11386_v49 = vunpack.i.h.bf16 %v6521_v52  ;;  %1554 = vmatpush.bf16.msrb.mxu2 %v6946_v59 }
  0xe7   :  { %v248_v43 = vsel %vm237_vm6, %v5370_v54, %v11385_v57  ;;  %v189_v34 = vpack.c.bf16 %v181_v44, %v182_v39  ;;  %v118_v17 = vpack.c.bf16 %v110_v25, %v111_v7  ;;  %v6969_v58 = vsel %vm1083_vm3, %v1074_v14, 0  ;;  %v6979_v4 = vpop.permute.xlu0 %5328  ;;  %v6987_v44 = vpop.permute.xlu1 %5333 }
  0xe8   :  { %v249_v37 = vsel %vm237_vm6, %v11386_v49, %v5370_v54  ;;  %11387 = vst [vmem:[#allocation38_spill] sm:$0xff] %v6969_v58  ;;  %v1071_v48 = vpack.c.b16 %v1051_v30, %v1051_v30  ;;  %v1052_v60 = vunpack.c.h.b16 %v6758_v21  ;;  %v951_v52 = vunpack.c.l.b16 %v6834_v36  ;;  %v6989_v25 = vpop.permute.xlu2 %5383 }
  0xe9   :  { %v6965_v19 = vpack.c.bf16 %v248_v43, %v249_v37  ;;  %v6974_v57 = vsel %vm1083_vm3, %v670_v50, %v720_v42  ;;  %v647_v54 = vunpack.c.l.b16 %v118_v17  ;;  %v697_v49 = vunpack.c.l.b16 %v189_v34  ;;  %4990 = vmatmul.msk.bf16.vlgmr.msrb.gmra.mxu2 %vm1405_vm9, %v6832_v28 }
  0xea   :  { %1602 = vmatpush.bf16.msra.mxu2 %v6924_v9  ;;  %11388 = vst [vmem:[#allocation39_spill] sm:$0xff] %v6974_v57  ;;  %v648_v39 = vunpack.c.h.b16 %v118_v17  ;;  %1567 = vmatpush.bf16.msrb.mxu3 %v6974_v57  ;;  %v698_v14 = vunpack.c.h.b16 %v189_v34  ;;  %v6982_v30 = vsel %vm1083_vm3, %v1071_v48, 0  ;;  %v1072_v21 = vpack.c.b16 %v1052_v60, %v1052_v60 }
  0xeb   :  { %11389 = vst [vmem:[#allocation40_spill] sm:$0xff] %v6982_v30  ;;  %v6984_v7 = vpack.c.b16 %v951_v52, %v951_v52  ;;  %v11047_v50 = vunpack.i.h.bf16 %v6979_v4  ;;  %v5330_v43 = vunpack.i.l.bf16 %v6979_v4  ;;  %v667_v37 = vpack.c.b16 %v647_v54, %v647_v54 }
  0xec   :  { %v717_v17 = vpack.c.b16 %v697_v49, %v697_v49  ;;  %v11048_v34 = vunpack.i.h.bf16 %v6987_v44  ;;  %v5335_v42 = vunpack.i.l.bf16 %v6987_v44  ;;  %v5385_v60 = vunpack.i.l.bf16 %v6989_v25 }
  0xed   :  { %v468_v52 = vsel %vm460_vm2, %v5330_v43, %v11047_v50  ;;  %v668_v49 = vpack.c.b16 %v648_v39, %v648_v39  ;;  %4991 = vmatmul.msk.bf16.vlgmr.msrb.gmra.mxu3 %vm1405_vm9, %v6832_v28  ;;  %v11392_v57 = vunpack.i.h.bf16 %v6467_v63  ;;  %v11393_v50 = vunpack.i.h.bf16 %v6989_v25 }
  0xee   :  { %1615 = vmatpush.bf16.msra.mxu3 %v6969_v58  ;;  %v11390_v58 = vunpack.i.h.bf16 %v6648_v62  ;;  %v7006_v54 = vsel %vm1083_vm3, %v667_v37, %v717_v17  ;;  %v539_v48 = vsel %vm531_vm0, %v5335_v42, %v11048_v34  ;;  %v11394_v39 = vunpack.i.h.bf16 %v6927_v41 }
  0xef   :  { %11391 = vst [vmem:[#allocation41_spill] sm:$0xff] %v7006_v54  ;;  %v540_v62 = vsel %vm531_vm0, %v11392_v57, %v5335_v42  ;;  %1528 = vmatpush.bf16.msrb.mxu0 %v7006_v54  ;;  %v718_v59 = vpack.c.b16 %v698_v14, %v698_v14  ;;  %v7031_v57 = vsel %vm1083_vm3, %v1072_v21, 0  ;;  %v952_v42 = vunpack.c.h.b16 %v6834_v36  ;;  %v5916_v14 = vld [vmem:[%s10960_s0 + $0x48] sm:$0xff] }
  0xf0   :  { %v469_v9 = vsel %vm460_vm2, %v11390_v58, %v5330_v43  ;;  %v175_v58 = vsel %vm166_vm7, %v5385_v60, %v11393_v50  ;;  %v176_v43 = vsel %vm166_vm7, %v11394_v39, %v5385_v60  ;;  %v557_v37 = vpack.c.bf16 %v539_v48, %v540_v62  ;;  %11395 = vst [vmem:[#allocation42_spill] sm:$0xff] %v7031_v57  ;;  %v5913_v50 = vld [vmem:[%s10960_s0 + $0x50] sm:$0xff]  ;;  %v5914_v60 = vld [vmem:[%s10960_s0 + $0x58] sm:$0xff]  ;;  %v7054_v39 = vpop.permute.xlu0 %5343 }
  0xf1   :  { %v7027_v17 = vpack.c.bf16 %v175_v58, %v176_v43  ;;  %v486_v34 = vpack.c.bf16 %v468_v52, %v469_v9  ;;  %v344_v48 = vpack.c.bf16 %v5914_v60, %v5913_v50  ;;  %v5915_v9 = vld [vmem:[%s10960_s0 + $0x40] sm:$0xff]  ;;  %v7049_v36 = vsel %vm1083_vm3, %v668_v49, %v718_v59 }
  0xf2   :  { %v7046_v21 = vpack.c.bf16 %v5916_v14, %v5915_v9  ;;  %11396 = vst [vmem:[#allocation43_spill] sm:$0xff] %v7049_v36  ;;  %v1003_v62 = vunpack.c.l.b16 %v557_v37  ;;  %4988 = vmatmul.msk.bf16.vlgmr.msrb.gmra.mxu0 %vm1405_vm9, %v6832_v28  ;;  %1541 = vmatpush.bf16.msrb.mxu1 %v7049_v36  ;;  %v1004_v43 = vunpack.c.h.b16 %v557_v37  ;;  %v972_v50 = vpack.c.b16 %v952_v42, %v952_v42  ;;  %v7057_v9 = vpop.permute.xlu1 %5348  ;;  %v7063_v37 = vpop.permute.xlu2 %5398 }
  0xf3   :  { %1576 = vmatpush.bf16.msra.mxu0 %v6982_v30  ;;  %v953_v52 = vunpack.c.l.b16 %v486_v34  ;;  %v954_v58 = vunpack.c.h.b16 %v486_v34  ;;  %v853_v60 = vunpack.c.l.b16 %v344_v48  ;;  %v854_v30 = vunpack.c.h.b16 %v344_v48 }
  0xf4   :  { %v5345_v49 = vunpack.i.l.bf16 %v7054_v39  ;;  %v1023_v14 = vpack.c.b16 %v1003_v62, %v1003_v62  ;;  %v11063_v54 = vunpack.i.h.bf16 %v7057_v9  ;;  %v5350_v36 = vunpack.i.l.bf16 %v7057_v9 }
  0xf5   :  { %v973_v34 = vpack.c.b16 %v953_v52, %v953_v52  ;;  %v974_v0 = vpack.c.b16 %v954_v58, %v954_v58  ;;  %v1024_v15 = vpack.c.b16 %v1004_v43, %v1004_v43  ;;  %v11397_v42 = vunpack.i.h.bf16 %v6467_v63  ;;  %4989 = vmatmul.msk.bf16.vlgmr.msrb.gmra.mxu1 %vm1405_vm9, %v6832_v28 }
  0xf6   :  { %1589 = vmatpush.bf16.msra.mxu1 %v7031_v57  ;;  %v11398_v57 = vunpack.i.h.bf16 %v6642_v13  ;;  %v873_v62 = vpack.c.b16 %v853_v60, %v853_v60  ;;  %v397_v63 = vsel %vm389_vm4, %v5350_v36, %v11063_v54  ;;  %v11400_v58 = vunpack.i.h.bf16 %v6715_v29 }
  0xf7   :  { %v541_v48 = vsel %vm531_vm0, %v5345_v49, %v11397_v42  ;;  %v7074_v52 = vsel %vm1083_vm3, %v973_v34, %v1023_v14  ;;  %v7090_v34 = vsel %vm1083_vm3, %v974_v0, %v1024_v15  ;;  %v874_v14 = vpack.c.b16 %v854_v30, %v854_v30 }
  0xf8   :  { %v542_v59 = vsel %vm531_vm0, %v11398_v57, %v5345_v49  ;;  %11399 = vst [vmem:[#allocation44_spill] sm:$0xff] %v7074_v52  ;;  %v398_v13 = vsel %vm389_vm4, %v11400_v58, %v5350_v36  ;;  %v5400_v57 = vunpack.i.l.bf16 %v7063_v37  ;;  %1603 = vmatpush.bf16.msra.mxu2 %v7074_v52  ;;  %v11402_v42 = vunpack.i.h.bf16 %v6927_v41  ;;  %1616 = vmatpush.bf16.msra.mxu3 %v7090_v34  ;;  %v7105_v41 = vpop.permute.xlu0 %5358 }
  0xf9   :  { %v415_v60 = vpack.c.bf16 %v397_v63, %v398_v13  ;;  %v556_v49 = vpack.c.bf16 %v541_v48, %v542_v59  ;;  %11401 = vst [vmem:[#allocation45_spill] sm:$0xff] %v7090_v34  ;;  %v11403_v54 = vunpack.i.h.bf16 %v6860_v2  ;;  %v851_v58 = vunpack.c.l.b16 %v7046_v21 }
  0xfa   :  { %v177_v29 = vsel %vm166_vm7, %v5400_v57, %v11402_v42  ;;  %v901_v59 = vunpack.c.l.b16 %v6909_v11  ;;  %v852_v2 = vunpack.c.h.b16 %v7046_v21  ;;  %v7108_v43 = vpop.permute.xlu1 %5363  ;;  %v7114_v10 = vpop.permute.xlu2 %5413 }
  0xfb   :  { %v178_v36 = vsel %vm166_vm7, %v11403_v54, %v5400_v57  ;;  %v1001_v15 = vunpack.c.l.b16 %v556_v49  ;;  %v1002_v0 = vunpack.c.h.b16 %v556_v49  ;;  %v903_v30 = vunpack.c.l.b16 %v415_v60 }
  0xfc   :  { %v7103_v48 = vpack.c.bf16 %v177_v29, %v178_v36  ;;  %v904_v63 = vunpack.c.h.b16 %v415_v60  ;;  %v871_v13 = vpack.c.b16 %v851_v58, %v851_v58  ;;  %v921_v42 = vpack.c.b16 %v901_v59, %v901_v59 }
  0xfd   :  { %v11073_v54 = vunpack.i.h.bf16 %v7105_v41  ;;  %v5360_v57 = vunpack.i.l.bf16 %v7105_v41  ;;  %v1021_v34 = vpack.c.b16 %v1001_v15, %v1001_v15  ;;  %v1022_v52 = vpack.c.b16 %v1002_v0, %v1002_v0 }
  0xfe   :  { %v11072_v29 = vunpack.i.h.bf16 %v7108_v43  ;;  %v5365_v49 = vunpack.i.l.bf16 %v7108_v43  ;;  %v923_v36 = vpack.c.b16 %v903_v30, %v903_v30  ;;  %v924_v56 = vpack.c.b16 %v904_v63, %v904_v63 }
  0xff   :  { %v246_v21 = vsel %vm237_vm6, %v5360_v57, %v11073_v54  ;;  %v11404_v60 = vunpack.i.h.bf16 %v6786_v12  ;;  %v7126_v59 = vsel %vm1083_vm3, %v6984_v7, %v1021_v34  ;;  %v7129_v15 = vsel %vm1083_vm3, %v972_v50, %v1022_v52 }
 0x100   :  { %11405 = vst [vmem:[#allocation46_spill] sm:$0xff] %v7129_v15  ;;  %v317_v0 = vsel %vm308_vm5, %v5365_v49, %v11072_v29  ;;  %v11406_v30 = vunpack.i.h.bf16 %v6586_v6  ;;  %v11074_v63 = vunpack.i.h.bf16 %v7114_v10  ;;  %1577 = vmatpush.bf16.msra.mxu0 %v7126_v59  ;;  %1590 = vmatpush.bf16.msra.mxu1 %v7129_v15  ;;  %v7144_v52 = vsel %vm1083_vm3, %v873_v62, %v923_v36 }
 0x101   :  { %v247_v58 = vsel %vm237_vm6, %v11404_v60, %v5360_v57  ;;  %v5415_v57 = vunpack.i.l.bf16 %v7114_v10  ;;  %11407 = vst [vmem:[#allocation47_spill] sm:$0xff] %v7144_v52  ;;  %v7147_v34 = vsel %vm1083_vm3, %v874_v14, %v924_v56  ;;  %v11409_v60 = vunpack.i.h.bf16 %v7054_v39  ;;  %1604 = vmatpush.bf16.msra.mxu2 %v7144_v52 }
 0x102   :  { %v318_v12 = vsel %vm308_vm5, %v11406_v30, %v5365_v49  ;;  %v263_v50 = vpack.c.bf16 %v246_v21, %v247_v58  ;;  %11408 = vst [vmem:[#allocation48_spill] sm:$0xff] %v7147_v34  ;;  %1617 = vmatpush.bf16.msra.mxu3 %v7147_v34  ;;  %v7160_v62 = vsel %vm1083_vm3, %v871_v13, %v921_v42  ;;  %v902_v56 = vunpack.c.h.b16 %v6909_v11  ;;  %v7169_v54 = vpop.permute.xlu1 %5378 }
 0x103   :  { %v334_v7 = vpack.c.bf16 %v317_v0, %v318_v12  ;;  %v535_v49 = vsel %vm531_vm0, %v5415_v57, %v11074_v63  ;;  %v536_v30 = vsel %vm531_vm0, %v11409_v60, %v5415_v57  ;;  %11410 = vst [vmem:[#allocation49_spill] sm:$0xff] %v7160_v62  ;;  %v872_v36 = vpack.c.b16 %v852_v2, %v852_v2  ;;  %v7166_v12 = vpop.permute.xlu0 %5373 }
 0x104   :  { %v7163_v14 = vpack.c.bf16 %v535_v49, %v536_v30  ;;  %v753_v21 = vunpack.c.l.b16 %v263_v50  ;;  %1578 = vmatpush.bf16.msra.mxu0 %v7160_v62  ;;  %v922_v0 = vpack.c.b16 %v902_v56, %v902_v56  ;;  %v754_v57 = vunpack.c.h.b16 %v263_v50 }
 0x105   :  { %v803_v58 = vunpack.c.l.b16 %v334_v7  ;;  %v804_v60 = vunpack.c.h.b16 %v334_v7  ;;  %v751_v29 = vunpack.c.l.b16 %v6965_v19  ;;  %v5375_v11 = vunpack.i.l.bf16 %v7166_v12  ;;  %v7179_v7 = vpop.permute.xlu2 %5428 }
 0x106   :  { %v773_v42 = vpack.c.b16 %v753_v21, %v753_v21  ;;  %v7174_v2 = vsel %vm1083_vm3, %v872_v36, %v922_v0  ;;  %v11077_v30 = vunpack.i.h.bf16 %v7169_v54  ;;  %v5380_v56 = vunpack.i.l.bf16 %v7169_v54 }
 0x107   :  { %v823_v49 = vpack.c.b16 %v803_v58, %v803_v58  ;;  %11411 = vst [vmem:[#allocation50_spill] sm:$0xff] %v7174_v2  ;;  %v774_v63 = vpack.c.b16 %v754_v57, %v754_v57  ;;  %1591 = vmatpush.bf16.msra.mxu1 %v7174_v2  ;;  %v11412_v50 = vunpack.i.h.bf16 %v6586_v6  ;;  %v11413_v21 = vunpack.i.h.bf16 %v6779_v33 }
 0x108   :  { %v824_v0 = vpack.c.b16 %v804_v60, %v804_v60  ;;  %v104_v57 = vsel %vm95_vm8, %v5380_v56, %v11077_v30  ;;  %v11415_v34 = vunpack.i.h.bf16 %v6921_v8  ;;  %v5430_v33 = vunpack.i.l.bf16 %v7179_v7 }
 0x109   :  { %v319_v13 = vsel %vm308_vm5, %v5375_v11, %v11412_v50  ;;  %v320_v36 = vsel %vm308_vm5, %v11413_v21, %v5375_v11  ;;  %v7190_v58 = vsel %vm1083_vm3, %v773_v42, %v823_v49  ;;  %v11078_v50 = vunpack.i.h.bf16 %v7179_v7 }
 0x10a   :  { %11414 = vst [vmem:[#allocation51_spill] sm:$0xff] %v7190_v58  ;;  %v105_v6 = vsel %vm95_vm8, %v11415_v34, %v5380_v56  ;;  %1605 = vmatpush.bf16.msra.mxu2 %v7190_v58  ;;  %v333_v42 = vpack.c.bf16 %v319_v13, %v320_v36  ;;  %v7204_v60 = vsel %vm1083_vm3, %v774_v63, %v824_v0  ;;  %v11417_v30 = vunpack.i.h.bf16 %v6864_v5  ;;  %v7222_v2 = vpop.permute.xlu1 %5393 }
 0x10b   :  { %v121_v11 = vpack.c.bf16 %v104_v57, %v105_v6  ;;  %11416 = vst [vmem:[#allocation52_spill] sm:$0xff] %v7204_v60  ;;  %v771_v49 = vpack.c.b16 %v751_v29, %v751_v29  ;;  %v393_v21 = vsel %vm389_vm4, %v5430_v33, %v11078_v50  ;;  %1618 = vmatpush.bf16.msra.mxu3 %v7204_v60  ;;  %v752_v56 = vunpack.c.h.b16 %v6965_v19  ;;  %v7219_v57 = vpop.permute.xlu0 %5388 }
 0x10c   :  { %v394_v34 = vsel %vm389_vm4, %v11417_v30, %v5430_v33  ;;  %v703_v13 = vunpack.c.l.b16 %v7027_v17  ;;  %v801_v63 = vunpack.c.l.b16 %v333_v42  ;;  %v802_v29 = vunpack.c.h.b16 %v333_v42 }
 0x10d   :  { %v7217_v36 = vpack.c.bf16 %v393_v21, %v394_v34  ;;  %v653_v0 = vunpack.c.l.b16 %v121_v11  ;;  %v772_v6 = vpack.c.b16 %v752_v56, %v752_v56  ;;  %v654_v58 = vunpack.c.h.b16 %v121_v11  ;;  %v7228_v15 = vpop.permute.xlu2 %5443 }
 0x10e   :  { %v723_v50 = vpack.c.b16 %v703_v13, %v703_v13  ;;  %v704_v52 = vunpack.c.h.b16 %v7027_v17  ;;  %v11091_v30 = vunpack.i.h.bf16 %v7219_v57  ;;  %v5390_v19 = vunpack.i.l.bf16 %v7219_v57 }
 0x10f   :  { %v821_v33 = vpack.c.b16 %v801_v63, %v801_v63  ;;  %v822_v60 = vpack.c.b16 %v802_v29, %v802_v29  ;;  %v5395_v42 = vunpack.i.l.bf16 %v7222_v2  ;;  %v673_v34 = vpack.c.b16 %v653_v0, %v653_v0 }
 0x110   :  { %v674_v62 = vpack.c.b16 %v654_v58, %v654_v58  ;;  %v606_v17 = vsel %vm602_vm1, %v5390_v19, %v11091_v30  ;;  %v11418_v11 = vunpack.i.h.bf16 %v6717_v45  ;;  %v11420_v58 = vunpack.i.h.bf16 %v6921_v8 }
 0x111   :  { %v7239_v13 = vsel %vm1083_vm3, %v771_v49, %v821_v33  ;;  %v7242_v63 = vsel %vm1083_vm3, %v772_v6, %v822_v60  ;;  %v11421_v0 = vunpack.i.h.bf16 %v6854_v46  ;;  %v11092_v21 = vunpack.i.h.bf16 %v7228_v15 }
 0x112   :  { %v607_v56 = vsel %vm602_vm1, %v11418_v11, %v5390_v19  ;;  %11419 = vst [vmem:[#allocation53_spill] sm:$0xff] %v7242_v63  ;;  %v106_v29 = vsel %vm95_vm8, %v5395_v42, %v11420_v58  ;;  %v5445_v19 = vunpack.i.l.bf16 %v7228_v15  ;;  %1579 = vmatpush.bf16.msra.mxu0 %v7239_v13  ;;  %1592 = vmatpush.bf16.msra.mxu1 %v7242_v63  ;;  %v11423_v33 = vunpack.i.h.bf16 %v7166_v12 }
 0x113   :  { %v107_v30 = vsel %vm95_vm8, %v11421_v0, %v5395_v42  ;;  %v630_v49 = vpack.c.bf16 %v606_v17, %v607_v56  ;;  %v7257_v8 = vsel %vm1083_vm3, %v673_v34, %v723_v50  ;;  %v724_v6 = vpack.c.b16 %v704_v52, %v704_v52  ;;  %v7276_v56 = vpop.permute.xlu0 %5403 }
 0x114   :  { %v120_v60 = vpack.c.bf16 %v106_v29, %v107_v30  ;;  %11422 = vst [vmem:[#allocation54_spill] sm:$0xff] %v7257_v8  ;;  %v313_v46 = vsel %vm308_vm5, %v5445_v19, %v11092_v21  ;;  %v314_v42 = vsel %vm308_vm5, %v11423_v33, %v5445_v19  ;;  %1606 = vmatpush.bf16.msra.mxu2 %v7257_v8  ;;  %v701_v11 = vunpack.c.l.b16 %v7103_v48  ;;  %v7278_v33 = vpop.permute.xlu1 %5408 }
 0x115   :  { %v702_v30 = vunpack.c.h.b16 %v7103_v48  ;;  %v7270_v17 = vpack.c.bf16 %v313_v46, %v314_v42  ;;  %v7273_v52 = vsel %vm1083_vm3, %v674_v62, %v724_v6  ;;  %v1057_v0 = vunpack.c.l.b16 %v630_v49 }
 0x116   :  { %11424 = vst [vmem:[#allocation55_spill] sm:$0xff] %v7273_v52  ;;  %v651_v50 = vunpack.c.l.b16 %v120_v60  ;;  %v652_v34 = vunpack.c.h.b16 %v120_v60  ;;  %1619 = vmatpush.bf16.msra.mxu3 %v7273_v52  ;;  %v721_v58 = vpack.c.b16 %v701_v11, %v701_v11  ;;  %v1058_v19 = vunpack.c.h.b16 %v630_v49 }
 0x117   :  { %v722_v29 = vpack.c.b16 %v702_v30, %v702_v30  ;;  %v5405_v48 = vunpack.i.l.bf16 %v7276_v56  ;;  %4994 = vmatmul.msk.bf16.vlgmr.msra.gmra.mxu2 %vm1405_vm9, %v6832_v28  ;;  %v5410_v60 = vunpack.i.l.bf16 %v7278_v33  ;;  %v1077_v6 = vpack.c.b16 %v1057_v0, %v1057_v0  ;;  %v7286_v30 = vpop.permute.xlu2 %5458 }
 0x118   :  { %v671_v46 = vpack.c.b16 %v651_v50, %v651_v50  ;;  %v672_v42 = vpack.c.b16 %v652_v34, %v652_v34  ;;  %v1078_v11 = vpack.c.b16 %v1058_v19, %v1058_v19  ;;  %v11425_v49 = vunpack.i.h.bf16 %v6717_v45 }
 0x119   :  { %v11426_v52 = vunpack.i.h.bf16 %v6650_v38  ;;  %4995 = vmatmul.msk.bf16.vlgmr.msra.gmra.mxu3 %vm1405_vm9, %v6832_v28  ;;  %v11429_v0 = vunpack.i.h.bf16 %v7278_v33  ;;  %v11430_v19 = vunpack.i.h.bf16 %v6788_v23  ;;  %v11434_v63 = vunpack.i.h.bf16 %v6788_v23 }
 0x11a   :  { %v608_v21 = vsel %vm602_vm1, %v5405_v48, %v11425_v49  ;;  %v7297_v34 = vsel %vm1083_vm3, %v671_v46, %v721_v58  ;;  %v7300_v62 = vsel %vm1083_vm3, %v672_v42, %v722_v29  ;;  %v5460_v58 = vunpack.i.l.bf16 %v7286_v30 }
 0x11b   :  { %v609_v50 = vsel %vm602_vm1, %v11426_v52, %v5405_v48  ;;  %11427 = vst [vmem:[#allocation56_spill] sm:$0xff] %v7297_v34  ;;  %v464_v45 = vsel %vm460_vm2, %v5410_v60, %v11429_v0  ;;  %v465_v38 = vsel %vm460_vm2, %v11430_v19, %v5410_v60  ;;  %v11095_v52 = vunpack.i.h.bf16 %v7286_v30  ;;  %1580 = vmatpush.bf16.msra.mxu0 %v7297_v34 }
 0x11c   :  { %11428 = vst [vmem:[#allocation57_spill] sm:$0xff] %v7300_v62  ;;  %1593 = vmatpush.bf16.msra.mxu1 %v7300_v62  ;;  %v488_v29 = vpack.c.bf16 %v464_v45, %v465_v38  ;;  %v629_v48 = vpack.c.bf16 %v608_v21, %v609_v50  ;;  %v7317_v46 = vsel %vm1083_vm3, %v1077_v6, 0  ;;  %v7320_v42 = vsel %vm1083_vm3, %v1078_v11, 0  ;;  %v7340_v38 = vpop.permute.xlu0 %5418 }
 0x11d   :  { %11431 = vst [vmem:[#allocation58_spill] sm:$0xff] %v7317_v46  ;;  %v100_v60 = vsel %vm95_vm8, %v5460_v58, %v11095_v52  ;;  %v11433_v49 = vunpack.i.h.bf16 %v7222_v2  ;;  %1654 = vmatpush.bf16.msrb.mxu2 %v7317_v46  ;;  %1667 = vmatpush.bf16.msrb.mxu3 %v7320_v42  ;;  %v1007_v21 = vunpack.c.l.b16 %v7163_v14  ;;  %v1008_v6 = vunpack.c.h.b16 %v7163_v14  ;;  %v5917_v14 = vld [vmem:[%s10960_s0 + $0x70] sm:$0xff] }
 0x11e   :  { %11432 = vst [vmem:[#allocation59_spill] sm:$0xff] %v7320_v42  ;;  %v1055_v50 = vunpack.c.l.b16 %v629_v48  ;;  %v1056_v45 = vunpack.c.h.b16 %v629_v48  ;;  %v957_v19 = vunpack.c.l.b16 %v488_v29  ;;  %4992 = vmatmul.msk.bf16.vlgmr.msra.gmra.mxu0 %vm1405_vm9, %v6832_v28  ;;  %v5918_v48 = vld [vmem:[%s10960_s0 + $0x78] sm:$0xff]  ;;  %v11439_v23 = vunpack.i.h.bf16 %v6987_v44 }
 0x11f   :  { %v101_v0 = vsel %vm95_vm8, %v11433_v49, %v5460_v58  ;;  %4993 = vmatmul.msk.bf16.vlgmr.msra.gmra.mxu1 %vm1405_vm9, %v6832_v28  ;;  %v1027_v58 = vpack.c.b16 %v1007_v21, %v1007_v21  ;;  %v958_v49 = vunpack.c.h.b16 %v488_v29  ;;  %v1028_v52 = vpack.c.b16 %v1008_v6, %v1008_v6  ;;  %v7354_v34 = vpop.permute.xlu2 %5473 }
 0x120   :  { %v7334_v11 = vpack.c.bf16 %v100_v60, %v101_v0  ;;  %v346_v60 = vpack.c.bf16 %v5918_v48, %v5917_v14  ;;  %v7348_v0 = vpop.permute.xlu1 %5423  ;;  %v5420_v28 = vunpack.i.l.bf16 %v7340_v38  ;;  %v1075_v46 = vpack.c.b16 %v1055_v50, %v1055_v50 }
 0x121   :  { %v1076_v8 = vpack.c.b16 %v1056_v45, %v1056_v45  ;;  %v5426_v29 = vunpack.i.h.bf16 %v7348_v0  ;;  %v5425_v21 = vunpack.i.l.bf16 %v7348_v0  ;;  %v977_v6 = vpack.c.b16 %v957_v19, %v957_v19 }
 0x122   :  { %v978_v62 = vpack.c.b16 %v958_v49, %v958_v49  ;;  %v466_v14 = vsel %vm460_vm2, %v5420_v28, %v11434_v63  ;;  %v11435_v48 = vunpack.i.h.bf16 %v6979_v4  ;;  %v7365_v50 = vsel %vm1083_vm3, %v1075_v46, 0 }
 0x123   :  { %11436 = vst [vmem:[#allocation60_spill] sm:$0xff] %v7365_v50  ;;  %v7368_v45 = vsel %vm1083_vm3, %v1076_v8, 0  ;;  %v11438_v19 = vunpack.i.h.bf16 %v7054_v39  ;;  %v538_v63 = vsel %vm531_vm0, %v11439_v23, %v5425_v21  ;;  %v5475_v0 = vunpack.i.l.bf16 %v7354_v34  ;;  %1628 = vmatpush.bf16.msrb.mxu0 %v7365_v50 }
 0x124   :  { %v467_v42 = vsel %vm460_vm2, %v11435_v48, %v5420_v28  ;;  %11437 = vst [vmem:[#allocation61_spill] sm:$0xff] %v7368_v45  ;;  %1641 = vmatpush.bf16.msrb.mxu1 %v7368_v45  ;;  %v7383_v39 = vsel %vm1083_vm3, %v977_v6, %v1027_v58  ;;  %v7386_v28 = vsel %vm1083_vm3, %v978_v62, %v1028_v52  ;;  %v11442_v44 = vunpack.i.h.bf16 %v7222_v2  ;;  %v7402_v23 = vpop.permute.xlu0 %5433 }
 0x125   :  { %v537_v49 = vsel %vm531_vm0, %v5425_v21, %v11438_v19  ;;  %v487_v46 = vpack.c.bf16 %v466_v14, %v467_v42  ;;  %11440 = vst [vmem:[#allocation62_spill] sm:$0xff] %v7383_v39  ;;  %v11443_v48 = vunpack.i.h.bf16 %v7169_v54  ;;  %1655 = vmatpush.bf16.msrb.mxu2 %v7383_v39  ;;  %1668 = vmatpush.bf16.msrb.mxu3 %v7386_v28  ;;  %v857_v42 = vunpack.c.l.b16 %v346_v60 }
 0x126   :  { %v558_v8 = vpack.c.bf16 %v537_v49, %v538_v63  ;;  %11441 = vst [vmem:[#allocation63_spill] sm:$0xff] %v7386_v28  ;;  %v102_v21 = vsel %vm95_vm8, %v5475_v0, %v11442_v44  ;;  %v907_v58 = vunpack.c.l.b16 %v7217_v36  ;;  %v858_v62 = vunpack.c.h.b16 %v346_v60 }
 0x127   :  { %v103_v19 = vsel %vm95_vm8, %v11443_v48, %v5475_v0  ;;  %v908_v2 = vunpack.c.h.b16 %v7217_v36  ;;  %v955_v52 = vunpack.c.l.b16 %v487_v46  ;;  %v877_v14 = vpack.c.b16 %v857_v42, %v857_v42  ;;  %v5484_v42 = vpop.permute.xlu2 %5483 }
 0x128   :  { %v7399_v6 = vpack.c.bf16 %v102_v21, %v103_v19  ;;  %v927_v49 = vpack.c.b16 %v907_v58, %v907_v58  ;;  %v1005_v54 = vunpack.c.l.b16 %v558_v8  ;;  %v956_v63 = vunpack.c.h.b16 %v487_v46  ;;  %v7404_v48 = vpop.permute.xlu1 %5438 }
 0x129   :  { %v878_v0 = vpack.c.b16 %v858_v62, %v858_v62  ;;  %v928_v44 = vpack.c.b16 %v908_v2, %v908_v2  ;;  %v5435_v28 = vunpack.i.l.bf16 %v7402_v23  ;;  %v11110_v36 = vunpack.i.h.bf16 %v7404_v48 }
 0x12a   :  { %v7409_v21 = vsel %vm1083_vm3, %v877_v14, %v927_v49  ;;  %v5440_v60 = vunpack.i.l.bf16 %v7404_v48  ;;  %v975_v19 = vpack.c.b16 %v955_v52, %v955_v52  ;;  %v11446_v58 = vunpack.i.h.bf16 %v6864_v5 }
 0x12b   :  { %11444 = vst [vmem:[#allocation64_spill] sm:$0xff] %v7409_v21  ;;  %1656 = vmatpush.bf16.msrb.mxu2 %v7409_v21  ;;  %v7415_v46 = vsel %vm1083_vm3, %v878_v0, %v928_v44  ;;  %v11447_v2 = vunpack.i.h.bf16 %v7057_v9  ;;  %v1025_v49 = vpack.c.b16 %v1005_v54, %v1005_v54  ;;  %v11448_v0 = vunpack.i.h.bf16 %v6929_v1 }
 0x12c   :  { %11445 = vst [vmem:[#allocation65_spill] sm:$0xff] %v7415_v46  ;;  %v395_v62 = vsel %vm389_vm4, %v5435_v28, %v11446_v58  ;;  %1669 = vmatpush.bf16.msrb.mxu3 %v7415_v46  ;;  %v242_v52 = vsel %vm237_vm6, %v5440_v60, %v11110_v36  ;;  %v5486_v44 = vunpack.i.h.bf16 %v5484_v42  ;;  %v5485_v58 = vunpack.i.l.bf16 %v5484_v42 }
 0x12d   :  { %v396_v14 = vsel %vm389_vm4, %v11447_v2, %v5435_v28  ;;  %v243_v5 = vsel %vm237_vm6, %v11448_v0, %v5440_v60  ;;  %v7437_v28 = vsel %vm1083_vm3, %v975_v19, %v1025_v49  ;;  %v976_v54 = vpack.c.b16 %v956_v63, %v956_v63 }
 0x12e   :  { %v7434_v4 = vpack.c.bf16 %v242_v52, %v243_v5  ;;  %v416_v9 = vpack.c.bf16 %v395_v62, %v396_v14  ;;  %11449 = vst [vmem:[#allocation66_spill] sm:$0xff] %v7437_v28  ;;  %v533_v2 = vsel %vm531_vm0, %v5486_v44, %v5426_v29  ;;  %v532_v36 = vsel %vm531_vm0, %v5426_v29, %v5485_v58  ;;  %v5919_v29 = vld [vmem:[%s10960_s0 + $0x60] sm:$0xff] }
 0x12f   :  { %v11450_v46 = vunpack.i.h.bf16 %v7114_v10  ;;  %v11451_v42 = vunpack.i.h.bf16 %v6224_v18  ;;  %1629 = vmatpush.bf16.msrb.mxu0 %v7437_v28  ;;  %v1006_v14 = vunpack.c.h.b16 %v558_v8  ;;  %v5920_v10 = vld [vmem:[%s10960_s0 + $0x68] sm:$0xff]  ;;  %v7462_v18 = vpop.permute.xlu0 %5448  ;;  %v807_v5 = vunpack.c.l.b16 %v7270_v17 }
 0x130   :  { %v905_v49 = vunpack.c.l.b16 %v416_v9  ;;  %v906_v52 = vunpack.c.h.b16 %v416_v9  ;;  %v757_v0 = vunpack.c.l.b16 %v7434_v4  ;;  %v11452_v9 = vunpack.i.h.bf16 %v6929_v1 }
 0x131   :  { %v534_v60 = vsel %vm531_vm0, %v11450_v46, %v5486_v44  ;;  %v551_v62 = vsel %vm531_vm0, %v5485_v58, %v11451_v42  ;;  %v345_v46 = vpack.c.bf16 %v5920_v10, %v5919_v29  ;;  %v5454_v44 = vpop.permute.xlu1 %5453  ;;  %v5450_v58 = vunpack.i.l.bf16 %v7462_v18  ;;  %v5499_v10 = vpop.permute.xlu2 %5498 }
 0x132   :  { %v7452_v19 = vpack.c.bf16 %v533_v2, %v534_v60  ;;  %v7454_v63 = vpack.c.bf16 %v551_v62, %v532_v36  ;;  %v1026_v36 = vpack.c.b16 %v1006_v14, %v1006_v14  ;;  %v5456_v60 = vunpack.i.h.bf16 %v5454_v44 }
 0x133   :  { %v855_v2 = vunpack.c.l.b16 %v345_v46  ;;  %v5455_v42 = vunpack.i.l.bf16 %v5454_v44  ;;  %v925_v62 = vpack.c.b16 %v905_v49, %v905_v49  ;;  %v856_v21 = vunpack.c.h.b16 %v345_v46 }
 0x134   :  { %v7469_v29 = vsel %vm1083_vm3, %v976_v54, %v1026_v36  ;;  %v244_v39 = vsel %vm237_vm6, %v5450_v58, %v11452_v9  ;;  %v11453_v14 = vunpack.i.h.bf16 %v7105_v41  ;;  %v11454_v49 = vunpack.i.h.bf16 %v7166_v12 }
 0x135   :  { %v875_v28 = vpack.c.b16 %v855_v2, %v855_v2  ;;  %1642 = vmatpush.bf16.msrb.mxu1 %v7469_v29  ;;  %v11455_v46 = vunpack.i.h.bf16 %v7108_v43  ;;  %v5501_v36 = vunpack.i.h.bf16 %v5499_v10  ;;  %v5500_v44 = vunpack.i.l.bf16 %v5499_v10 }
 0x136   :  { %v245_v8 = vsel %vm237_vm6, %v11453_v14, %v5450_v58  ;;  %v315_v54 = vsel %vm308_vm5, %v5455_v42, %v11454_v49  ;;  %v876_v58 = vpack.c.b16 %v856_v21, %v856_v21  ;;  %v11456_v12 = vunpack.i.l.bf16 %v6233_v22 }
 0x137   :  { %v316_v1 = vsel %vm308_vm5, %v11455_v46, %v5455_v42  ;;  %v264_v41 = vpack.c.bf16 %v244_v39, %v245_v8  ;;  %v7489_v45 = vsel %vm1083_vm3, %v875_v28, %v925_v62  ;;  %v311_v2 = vsel %vm308_vm5, %v5501_v36, %v5456_v60 }
 0x138   :  { %v335_v9 = vpack.c.bf16 %v315_v54, %v316_v1  ;;  %v309_v14 = vsel %vm308_vm5, %v5500_v44, %v11456_v12  ;;  %v310_v43 = vsel %vm308_vm5, %v5456_v60, %v5500_v44  ;;  %v11457_v42 = vunpack.i.h.bf16 %v7228_v15  ;;  %1630 = vmatpush.bf16.msrb.mxu0 %v7489_v45  ;;  %v5464_v54 = vpop.permute.xlu0 %5463 }
 0x139   :  { %v7506_v21 = vpack.c.bf16 %v309_v14, %v310_v43  ;;  %v926_v8 = vpack.c.b16 %v906_v52, %v906_v52  ;;  %v777_v62 = vpack.c.b16 %v757_v0, %v757_v0  ;;  %v827_v22 = vpack.c.b16 %v807_v5, %v807_v5  ;;  %v5469_v46 = vpop.permute.xlu1 %5468  ;;  %v7524_v14 = vpop.permute.xlu2 %158 }
 0x13a   :  { %v312_v39 = vsel %vm308_vm5, %v11457_v42, %v5501_v36  ;;  %v758_v10 = vunpack.c.h.b16 %v7434_v4  ;;  %v808_v49 = vunpack.c.h.b16 %v7270_v17  ;;  %v755_v60 = vunpack.c.l.b16 %v264_v41 }
 0x13b   :  { %v7504_v28 = vpack.c.bf16 %v311_v2, %v312_v39  ;;  %v7511_v15 = vsel %vm1083_vm3, %v876_v58, %v926_v8  ;;  %v5466_v1 = vunpack.i.h.bf16 %v5464_v54  ;;  %v5465_v36 = vunpack.i.l.bf16 %v5464_v54 }
 0x13c   :  { %v805_v44 = vunpack.c.l.b16 %v335_v9  ;;  %1643 = vmatpush.bf16.msrb.mxu1 %v7511_v15  ;;  %v7515_v2 = vsel %vm1083_vm3, %v777_v62, %v827_v22  ;;  %v778_v52 = vpack.c.b16 %v758_v10, %v758_v10  ;;  %v828_v0 = vpack.c.b16 %v808_v49, %v808_v49 }
 0x13d   :  { %v5471_v5 = vunpack.i.h.bf16 %v5469_v46  ;;  %1657 = vmatpush.bf16.msrb.mxu2 %v7515_v2  ;;  %v5470_v17 = vunpack.i.l.bf16 %v5469_v46  ;;  %v171_v4 = vsel %vm166_vm7, %v5465_v36, %v5466_v1  ;;  %v11458_v58 = vunpack.i.h.bf16 %v7063_v37 }
 0x13e   :  { %v775_v43 = vpack.c.b16 %v755_v60, %v755_v60  ;;  %v7527_v42 = vsel %vm1083_vm3, %v778_v52, %v828_v0  ;;  %v11459_v39 = vunpack.i.h.bf16 %v7276_v56  ;;  %v11460_v62 = vunpack.i.h.bf16 %v7219_v57 }
 0x13f   :  { %v172_v12 = vsel %vm166_vm7, %v11458_v58, %v5465_v36  ;;  %1670 = vmatpush.bf16.msrb.mxu3 %v7527_v42  ;;  %v11462_v60 = vunpack.i.h.bf16 %v6172_v47  ;;  %v7551_v57 = vsel %vm166_vm7, %v5466_v1, %v7524_v14  ;;  %v825_v0 = vpack.c.b16 %v805_v44, %v805_v44 }
 0x140   :  { %v604_v8 = vsel %vm602_vm1, %v5471_v5, %v11459_v39  ;;  %v605_v22 = vsel %vm602_vm1, %v11460_v62, %v5471_v5  ;;  %v194_v10 = vpack.c.bf16 %v171_v4, %v172_v12  ;;  %v11461_v49 = vmov %v11459_v39  ;;  %v151_v62 = vpop.permute.xlu0 %150 }
 0x141   :  { %v603_v54 = vsel %vm602_vm1, %v11461_v49, %v5470_v17  ;;  %v622_v46 = vsel %vm602_vm1, %v5470_v17, %v11462_v60  ;;  %v7546_v36 = vpack.c.bf16 %v604_v8, %v605_v22  ;;  %v756_v5 = vunpack.c.h.b16 %v264_v41  ;;  %v5479_v1 = vpop.permute.xlu1 %5478 }
 0x142   :  { %v632_v52 = vpack.c.bf16 %v622_v46, %v603_v54  ;;  %v806_v4 = vunpack.c.h.b16 %v335_v9  ;;  %v657_v56 = vunpack.c.l.b16 %v7334_v11  ;;  %v707_v58 = vunpack.c.l.b16 %v194_v10 }
 0x143   :  { %v658_v12 = vunpack.c.h.b16 %v7334_v11  ;;  %v708_v47 = vunpack.c.h.b16 %v194_v10  ;;  %v7556_v39 = vsel %vm1083_vm3, %v775_v43, %v825_v0  ;;  %v776_v17 = vpack.c.b16 %v756_v5, %v756_v5 }
 0x144   :  { %v826_v8 = vpack.c.b16 %v806_v4, %v806_v4  ;;  %v1061_v22 = vunpack.c.l.b16 %v632_v52  ;;  %1631 = vmatpush.bf16.msrb.mxu0 %v7556_v39  ;;  %v11463_v44 = vunpack.i.h.bf16 %v7063_v37  ;;  %v11464_v41 = vunpack.i.h.bf16 %v6989_v25 }
 0x145   :  { %v677_v10 = vpack.c.b16 %v657_v56, %v657_v56  ;;  %v727_v43 = vpack.c.b16 %v707_v58, %v707_v58  ;;  %v5481_v54 = vunpack.i.h.bf16 %v5479_v1  ;;  %v5480_v60 = vunpack.i.l.bf16 %v5479_v1 }
 0x146   :  { %v173_v9 = vsel %vm166_vm7, %v151_v62, %v11463_v44  ;;  %v174_v11 = vsel %vm166_vm7, %v11464_v41, %v151_v62  ;;  %v7568_v49 = vsel %vm1083_vm3, %v776_v17, %v826_v8  ;;  %v678_v0 = vpack.c.b16 %v658_v12, %v658_v12 }
 0x147   :  { %v193_v46 = vpack.c.bf16 %v173_v9, %v174_v11  ;;  %1644 = vmatpush.bf16.msrb.mxu1 %v7568_v49  ;;  %v7572_v37 = vsel %vm1083_vm3, %v677_v10, %v727_v43  ;;  %v728_v5 = vpack.c.b16 %v708_v47, %v708_v47  ;;  %v1081_v4 = vpack.c.b16 %v1061_v22, %v1061_v22 }
 0x148   :  { %v11465_v25 = vunpack.i.h.bf16 %v7340_v38  ;;  %v11467_v8 = vunpack.i.h.bf16 %v7278_v33  ;;  %v11468_v1 = vunpack.i.h.bf16 %v6116_v24  ;;  %1658 = vmatpush.bf16.msrb.mxu2 %v7572_v37  ;;  %v1062_v41 = vunpack.c.h.b16 %v632_v52  ;;  %v7611_v52 = vld [vmem:[%s10961_s2] sm:$0xf] }
 0x149   :  { %v705_v38 = vunpack.c.l.b16 %v193_v46  ;;  %v706_v44 = vunpack.c.h.b16 %v193_v46  ;;  %v7596_v9 = vsel %vm1083_vm3, %v678_v0, %v728_v5  ;;  %v7599_v33 = vsel %vm1083_vm3, %v1081_v4, 0  ;;  %v5489_v46 = vpop.permute.xlu0 %5488 }
 0x14a   :  { %v461_v56 = vsel %vm460_vm2, %v11465_v25, %v5480_v60  ;;  %v11466_v58 = vmov %v11465_v25  ;;  %v463_v62 = vsel %vm460_vm2, %v11467_v8, %v5481_v54  ;;  %v480_v12 = vsel %vm460_vm2, %v5480_v60, %v11468_v1  ;;  %1671 = vmatpush.bf16.msrb.mxu3 %v7596_v9  ;;  %v5494_v25 = vpop.permute.xlu1 %5493 }
 0x14b   :  { %v462_v17 = vsel %vm460_vm2, %v5481_v54, %v11466_v58  ;;  %v7593_v22 = vpack.c.bf16 %v480_v12, %v461_v56  ;;  %v655_v24 = vunpack.c.l.b16 %v7399_v6  ;;  %v725_v11 = vpack.c.b16 %v705_v38, %v705_v38  ;;  %4998 = vmatmul.msk.bf16.vlgmr.msrb.gmra.mxu2 %vm1405_vm9, %v7611_v52 }
 0x14c   :  { %v7591_v47 = vpack.c.bf16 %v462_v17, %v463_v62  ;;  %v726_v10 = vpack.c.b16 %v706_v44, %v706_v44  ;;  %1706 = vmatpush.bf16.msra.mxu2 %v7599_v33  ;;  %v656_v43 = vunpack.c.h.b16 %v7399_v6  ;;  %v1059_v54 = vunpack.c.l.b16 %v7546_v36 }
 0x14d   :  { %v1082_v60 = vpack.c.b16 %v1062_v41, %v1062_v41  ;;  %v675_v0 = vpack.c.b16 %v655_v24, %v655_v24  ;;  %v1060_v5 = vunpack.c.h.b16 %v7546_v36  ;;  %v961_v4 = vunpack.c.l.b16 %v7593_v22  ;;  %4999 = vmatmul.msk.bf16.vlgmr.msrb.gmra.mxu3 %vm1405_vm9, %v7611_v52 }
 0x14e   :  { %v5491_v56 = vunpack.i.h.bf16 %v5489_v46  ;;  %v5490_v6 = vunpack.i.l.bf16 %v5489_v46  ;;  %v676_v58 = vpack.c.b16 %v656_v43, %v656_v43  ;;  %v1079_v17 = vpack.c.b16 %v1059_v54, %v1059_v54 }
 0x14f   :  { %v7616_v8 = vsel %vm1083_vm3, %v1082_v60, 0  ;;  %v5496_v62 = vunpack.i.h.bf16 %v5494_v25  ;;  %v5495_v36 = vunpack.i.l.bf16 %v5494_v25  ;;  %v7619_v1 = vsel %vm1083_vm3, %v675_v0, %v725_v11 }
 0x150   :  { %1719 = vmatpush.bf16.msra.mxu3 %v7616_v8  ;;  %v11469_v12 = vunpack.i.h.bf16 %v7179_v7  ;;  %v11470_v44 = vunpack.i.h.bf16 %v7402_v23  ;;  %v11472_v43 = vunpack.i.h.bf16 %v6286_v20  ;;  %v11473_v7 = vunpack.i.l.bf16 %v6418_v61  ;;  %1632 = vmatpush.bf16.msrb.mxu0 %v7619_v1 }
 0x151   :  { %v11474_v46 = vunpack.i.h.bf16 %v7462_v18  ;;  %v11476_v20 = vunpack.i.h.bf16 %v7404_v48  ;;  %v7666_v18 = vsel %vm1083_vm3, %v676_v58, %v726_v10  ;;  %v1080_v48 = vpack.c.b16 %v1060_v5, %v1060_v5 }
 0x152   :  { %v392_v38 = vsel %vm389_vm4, %v11469_v12, %v5491_v56  ;;  %v390_v41 = vsel %vm389_vm4, %v11470_v44, %v5490_v6  ;;  %v11471_v24 = vmov %v11470_v44  ;;  %v409_v54 = vsel %vm389_vm4, %v5490_v6, %v11472_v43  ;;  %1645 = vmatpush.bf16.msrb.mxu1 %v7666_v18 }
 0x153   :  { %v391_v11 = vsel %vm389_vm4, %v5491_v56, %v11471_v24  ;;  %v238_v60 = vsel %vm237_vm6, %v5495_v36, %v11473_v7  ;;  %v239_v0 = vsel %vm237_vm6, %v11474_v46, %v5495_v36  ;;  %v11475_v23 = vmov %v11474_v46  ;;  %4996 = vmatmul.msk.bf16.vlgmr.msrb.gmra.mxu0 %vm1405_vm9, %v7611_v52  ;;  %v5509_v7 = vpop.permute.xlu1 %5508 }
 0x154   :  { %v240_v25 = vsel %vm237_vm6, %v5496_v62, %v11475_v23  ;;  %v241_v56 = vsel %vm237_vm6, %v11476_v20, %v5496_v62  ;;  %v7659_v6 = vpack.c.bf16 %v238_v60, %v239_v0  ;;  %v7661_v12 = vpack.c.bf16 %v391_v11, %v392_v38 }
 0x155   :  { %v7657_v61 = vpack.c.bf16 %v240_v25, %v241_v56  ;;  %v7663_v44 = vpack.c.bf16 %v409_v54, %v390_v41  ;;  %v7669_v36 = vsel %vm1083_vm3, %v1079_v17, 0  ;;  %v981_v24 = vpack.c.b16 %v961_v4, %v961_v4  ;;  %v5504_v17 = vpop.permute.xlu0 %5503  ;;  %4997 = vmatmul.msk.bf16.vlgmr.msrb.gmra.mxu1 %vm1405_vm9, %v7611_v52 }
 0x156   :  { %1680 = vmatpush.bf16.msra.mxu0 %v7669_v36  ;;  %v1011_v62 = vunpack.c.l.b16 %v7454_v63  ;;  %v962_v43 = vunpack.c.h.b16 %v7593_v22  ;;  %v1012_v38 = vunpack.c.h.b16 %v7454_v63  ;;  %v959_v41 = vunpack.c.l.b16 %v7591_v47 }
 0x157   :  { %v7678_v10 = vsel %vm1083_vm3, %v1080_v48, 0  ;;  %v1009_v58 = vunpack.c.l.b16 %v7452_v19  ;;  %v960_v5 = vunpack.c.h.b16 %v7591_v47  ;;  %v1010_v4 = vunpack.c.h.b16 %v7452_v19 }
 0x158   :  { %1693 = vmatpush.bf16.msra.mxu1 %v7678_v10  ;;  %v1031_v22 = vpack.c.b16 %v1011_v62, %v1011_v62  ;;  %v982_v11 = vpack.c.b16 %v962_v43, %v962_v43  ;;  %v1032_v63 = vpack.c.b16 %v1012_v38, %v1012_v38  ;;  %v979_v54 = vpack.c.b16 %v959_v41, %v959_v41 }
 0x159   :  { %v1029_v60 = vpack.c.b16 %v1009_v58, %v1009_v58  ;;  %v980_v46 = vpack.c.b16 %v960_v5, %v960_v5  ;;  %v1030_v0 = vpack.c.b16 %v1010_v4, %v1010_v4  ;;  %v5511_v47 = vunpack.i.h.bf16 %v5509_v7 }
 0x15a   :  { %v7689_v19 = vsel %vm1083_vm3, %v981_v24, %v1031_v22  ;;  %v7692_v23 = vsel %vm1083_vm3, %v982_v11, %v1032_v63  ;;  %v5510_v25 = vunpack.i.l.bf16 %v5509_v7  ;;  %v5506_v20 = vunpack.i.h.bf16 %v5504_v17 }
 0x15b   :  { %1707 = vmatpush.bf16.msra.mxu2 %v7689_v19  ;;  %1720 = vmatpush.bf16.msra.mxu3 %v7692_v23  ;;  %v7697_v56 = vsel %vm1083_vm3, %v979_v54, %v1029_v60  ;;  %v7700_v48 = vsel %vm1083_vm3, %v980_v46, %v1030_v0  ;;  %v11477_v62 = vunpack.i.l.bf16 %v6576_v26  ;;  %v5505_v43 = vunpack.i.l.bf16 %v5504_v17 }
 0x15c   :  { %1681 = vmatpush.bf16.msra.mxu0 %v7697_v56  ;;  %1694 = vmatpush.bf16.msra.mxu1 %v7700_v48  ;;  %v168_v38 = vsel %vm166_vm7, %v5510_v25, %v5511_v47  ;;  %v169_v41 = vsel %vm166_vm7, %v7524_v14, %v5510_v25  ;;  %v11478_v58 = vunpack.i.h.bf16 %v7354_v34  ;;  %v909_v5 = vunpack.c.l.b16 %v7661_v12  ;;  %v5924_v34 = vld [vmem:[%s10960_s0 + $0x98] sm:$0xff]  ;;  %v5925_v25 = vld [vmem:[%s10960_s0 + $0x90] sm:$0xff] }
 0x15d   :  { %v167_v24 = vsel %vm166_vm7, %v5511_v47, %v11477_v62  ;;  %v7719_v4 = vpack.c.bf16 %v169_v41, %v7551_v57  ;;  %v11479_v22 = vunpack.i.h.bf16 %v7286_v30  ;;  %v11480_v63 = vunpack.i.l.bf16 %v6351_v53  ;;  %v5922_v57 = vld [vmem:[%s10960_s0 + $0x80] sm:$0xff]  ;;  %v5923_v30 = vld [vmem:[%s10960_s0 + $0x88] sm:$0xff] }
 0x15e   :  { %v98_v26 = vsel %vm95_vm8, %v5506_v20, %v11478_v58  ;;  %v7721_v17 = vpack.c.bf16 %v167_v24, %v168_v38  ;;  %v11481_v7 = vmov %v11478_v58  ;;  %v347_v46 = vpack.c.bf16 %v5923_v30, %v5922_v57 }
 0x15f   :  { %v99_v11 = vsel %vm95_vm8, %v11479_v22, %v5506_v20  ;;  %v96_v14 = vsel %vm95_vm8, %v5505_v43, %v11480_v63  ;;  %v97_v60 = vsel %vm95_vm8, %v11481_v7, %v5505_v43  ;;  %v929_v0 = vpack.c.b16 %v909_v5, %v909_v5 }
 0x160   :  { %v124_v54 = vpack.c.bf16 %v98_v26, %v99_v11  ;;  %v7741_v53 = vpack.c.bf16 %v96_v14, %v97_v60  ;;  %v910_v47 = vunpack.c.h.b16 %v7661_v12  ;;  %v348_v20 = vpack.c.bf16 %v5924_v34, %v5925_v25 }
 0x161   :  { %v911_v62 = vunpack.c.l.b16 %v7663_v44  ;;  %v859_v24 = vunpack.c.l.b16 %v347_v46  ;;  %v860_v43 = vunpack.c.h.b16 %v347_v46  ;;  %v912_v38 = vunpack.c.h.b16 %v7663_v44 }
 0x162   :  { %v759_v41 = vunpack.c.l.b16 %v7657_v61  ;;  %v930_v58 = vpack.c.b16 %v910_v47, %v910_v47  ;;  %v861_v26 = vunpack.c.l.b16 %v348_v20  ;;  %v862_v5 = vunpack.c.h.b16 %v348_v20 }
 0x163   :  { %v931_v12 = vpack.c.b16 %v911_v62, %v911_v62  ;;  %v879_v22 = vpack.c.b16 %v859_v24, %v859_v24  ;;  %v880_v11 = vpack.c.b16 %v860_v43, %v860_v43  ;;  %v932_v63 = vpack.c.b16 %v912_v38, %v912_v38 }
 0x164   :  { %v779_v14 = vpack.c.b16 %v759_v41, %v759_v41  ;;  %v881_v7 = vpack.c.b16 %v861_v26, %v861_v26  ;;  %v882_v60 = vpack.c.b16 %v862_v5, %v862_v5  ;;  %v809_v57 = vunpack.c.l.b16 %v7504_v28 }
 0x165   :  { %v760_v30 = vunpack.c.h.b16 %v7657_v61  ;;  %v7756_v46 = vsel %vm1083_vm3, %v879_v22, %v929_v0  ;;  %v7759_v44 = vsel %vm1083_vm3, %v880_v11, %v930_v58  ;;  %v810_v47 = vunpack.c.h.b16 %v7504_v28 }
 0x166   :  { %v761_v34 = vunpack.c.l.b16 %v7659_v6  ;;  %1682 = vmatpush.bf16.msra.mxu0 %v7756_v46  ;;  %1695 = vmatpush.bf16.msra.mxu1 %v7759_v44  ;;  %v7766_v25 = vsel %vm1083_vm3, %v881_v7, %v931_v12  ;;  %v7769_v20 = vsel %vm1083_vm3, %v882_v60, %v932_v63  ;;  %v829_v61 = vpack.c.b16 %v809_v57, %v809_v57 }
 0x167   :  { %v811_v0 = vunpack.c.l.b16 %v7506_v21  ;;  %1708 = vmatpush.bf16.msra.mxu2 %v7766_v25  ;;  %1721 = vmatpush.bf16.msra.mxu3 %v7769_v20  ;;  %v780_v28 = vpack.c.b16 %v760_v30, %v760_v30  ;;  %v830_v62 = vpack.c.b16 %v810_v47, %v810_v47  ;;  %v762_v43 = vunpack.c.h.b16 %v7659_v6 }
 0x168   :  { %v781_v24 = vpack.c.b16 %v761_v34, %v761_v34  ;;  %v7776_v38 = vsel %vm1083_vm3, %v779_v14, %v829_v61  ;;  %v812_v58 = vunpack.c.h.b16 %v7506_v21  ;;  %v659_v26 = vunpack.c.l.b16 %v124_v54 }
 0x169   :  { %v831_v41 = vpack.c.b16 %v811_v0, %v811_v0  ;;  %v7780_v12 = vsel %vm1083_vm3, %v780_v28, %v830_v62  ;;  %v782_v5 = vpack.c.b16 %v762_v43, %v762_v43  ;;  %v709_v22 = vunpack.c.l.b16 %v7719_v4 }
 0x16a   :  { %v660_v11 = vunpack.c.h.b16 %v124_v54  ;;  %1683 = vmatpush.bf16.msra.mxu0 %v7776_v38  ;;  %1696 = vmatpush.bf16.msra.mxu1 %v7780_v12  ;;  %v832_v63 = vpack.c.b16 %v812_v58, %v812_v58  ;;  %v679_v14 = vpack.c.b16 %v659_v26, %v659_v26  ;;  %v710_v7 = vunpack.c.h.b16 %v7719_v4  ;;  %v11483_v58 = vld [vmem:[#allocation4_spill] sm:$0xff]  ;;  %v11484_v26 = vld [vmem:[#allocation5_spill] sm:$0xff] }
 0x16b   :  { %v7786_v6 = vsel %vm1083_vm3, %v781_v24, %v831_v41  ;;  %v729_v21 = vpack.c.b16 %v709_v22, %v709_v22  ;;  %v661_v57 = vunpack.c.l.b16 %v7741_v53  ;;  %v711_v30 = vunpack.c.l.b16 %v7721_v17  ;;  %v11482_v41 = vld [vmem:[#allocation3_spill] sm:$0xff] }
 0x16c   :  { %1709 = vmatpush.bf16.msra.mxu2 %v7786_v6  ;;  %v680_v60 = vpack.c.b16 %v660_v11, %v660_v11  ;;  %v7793_v54 = vsel %vm1083_vm3, %v782_v5, %v832_v63  ;;  %v730_v47 = vpack.c.b16 %v710_v7, %v710_v7  ;;  %v662_v34 = vunpack.c.h.b16 %v7741_v53  ;;  %v11485_v5 = vld [vmem:[#allocation6_spill] sm:$0xff]  ;;  %v11486_v22 = vld [vmem:[#allocation7_spill] sm:$0xff]  ;;  %v11487_v11 = vld [vmem:[#allocation8_spill] sm:$0xff] }
 0x16d   :  { %v712_v61 = vunpack.c.h.b16 %v7721_v17  ;;  %1722 = vmatpush.bf16.msra.mxu3 %v7793_v54  ;;  %v7799_v4 = vsel %vm1083_vm3, %v679_v14, %v729_v21  ;;  %v681_v0 = vpack.c.b16 %v661_v57, %v661_v57  ;;  %v731_v28 = vpack.c.b16 %v711_v30, %v711_v30  ;;  %v11488_v63 = vld [vmem:[#allocation9_spill] sm:$0xff]  ;;  %v11489_v14 = vld [vmem:[#allocation10_spill] sm:$0xff]  ;;  %v11490_v7 = vld [vmem:[#allocation11_spill] sm:$0xff] }
 0x16e   :  { %1684 = vmatpush.bf16.msra.mxu0 %v7799_v4  ;;  %v7803_v62 = vsel %vm1083_vm3, %v680_v60, %v730_v47  ;;  %v682_v24 = vpack.c.b16 %v662_v34, %v662_v34  ;;  %v11491_v21 = vld [vmem:[#allocation12_spill] sm:$0xff]  ;;  %v11492_v60 = vld [vmem:[#allocation13_spill] sm:$0xff]  ;;  %v11493_v57 = vld [vmem:[#allocation14_spill] sm:$0xff] }
 0x16f   :  { %v732_v43 = vpack.c.b16 %v712_v61, %v712_v61  ;;  %1697 = vmatpush.bf16.msra.mxu1 %v7803_v62  ;;  %v7807_v53 = vsel %vm1083_vm3, %v681_v0, %v731_v28  ;;  %v11494_v30 = vld [vmem:[#allocation15_spill] sm:$0xff]  ;;  %v11496_v47 = vld [vmem:[#allocation17_spill] sm:$0xff]  ;;  %v7844_v34 = vld [vmem:[%s10961_s2 + $0x4] sm:$0xf] }
 0x170   :  { %1710 = vmatpush.bf16.msra.mxu2 %v7807_v53  ;;  %v11497_v61 = vld [vmem:[#allocation22_spill] sm:$0xff]  ;;  %v11498_v0 = vld [vmem:[#allocation23_spill] sm:$0xff]  ;;  %v11499_v28 = vld [vmem:[#allocation20_spill] sm:$0xff] }
 0x171   :  { %v7812_v17 = vsel %vm1083_vm3, %v682_v24, %v732_v43  ;;  %5000 = vmatmul.msk.bf16.vlgmr.msra.gmra.mxu0 %vm1405_vm9, %v7611_v52  ;;  %v11500_v24 = vld [vmem:[#allocation21_spill] sm:$0xff]  ;;  %v11501_v43 = vld [vmem:[#allocation27_spill] sm:$0xff] }
 0x172   :  { %1737 = vmatpush.bf16.msrb.mxu0 %v6250_v55  ;;  %1723 = vmatpush.bf16.msra.mxu3 %v7812_v17 }
 0x173   :  { %1750 = vmatpush.bf16.msrb.mxu1 %v11482_v41  ;;  %5002 = vmatmul.msk.bf16.vlgmr.msra.gmra.mxu2 %vm1405_vm9, %v7611_v52 }
 0x174   :  { %1763 = vmatpush.bf16.msrb.mxu2 %v11483_v58  ;;  %5001 = vmatmul.msk.bf16.vlgmr.msra.gmra.mxu1 %vm1405_vm9, %v7611_v52 }
 0x175   :  { %5003 = vmatmul.msk.bf16.vlgmr.msra.gmra.mxu3 %vm1405_vm9, %v7611_v52  ;;  %v11495_v52 = vld [vmem:[#allocation16_spill] sm:$0xff] }
 0x176   :  { %1776 = vmatpush.bf16.msrb.mxu3 %v11484_v26  ;;  %1738 = vmatpush.bf16.msrb.mxu0 %v11485_v5 }
 0x177   :  { %1751 = vmatpush.bf16.msrb.mxu1 %v11486_v22 }
 0x178   :  { %1764 = vmatpush.bf16.msrb.mxu2 %v11487_v11 }
 0x17a   :  { %1777 = vmatpush.bf16.msrb.mxu3 %v11488_v63  ;;  %1739 = vmatpush.bf16.msrb.mxu0 %v11489_v14 }
 0x17b   :  { %1752 = vmatpush.bf16.msrb.mxu1 %v11490_v7 }
 0x17c   :  { %1765 = vmatpush.bf16.msrb.mxu2 %v11491_v21 }
 0x17e   :  { %1778 = vmatpush.bf16.msrb.mxu3 %v11492_v60  ;;  %1740 = vmatpush.bf16.msrb.mxu0 %v11493_v57 }
 0x17f   :  { %1753 = vmatpush.bf16.msrb.mxu1 %v11494_v30 }
 0x180   :  { %1766 = vmatpush.bf16.msrb.mxu2 %v11495_v52 }
 0x182   :  { %1779 = vmatpush.bf16.msrb.mxu3 %v11496_v47  ;;  %1741 = vmatpush.bf16.msrb.mxu0 %v6668_v51 }
 0x183   :  { %1754 = vmatpush.bf16.msrb.mxu1 %v6672_v40 }
 0x184   :  { %1767 = vmatpush.bf16.msrb.mxu2 %v6598_v35  ;;  %v11508_v35 = vld [vmem:[#allocation34_spill] sm:$0xff] }
 0x185   :  { %5005 = vmatmul.msk.bf16.vlgmr.msrb.gmra.mxu0 %vm1405_vm9, %v7844_v34 }
 0x186   :  { %1780 = vmatpush.bf16.msrb.mxu3 %v6601_v31  ;;  %1789 = vmatpush.bf16.msra.mxu0 %v11497_v61  ;;  %v11506_v61 = vld [vmem:[#allocation32_spill] sm:$0xff]  ;;  %v11507_v31 = vld [vmem:[#allocation33_spill] sm:$0xff] }
 0x187   :  { %1802 = vmatpush.bf16.msra.mxu1 %v11498_v0  ;;  %5007 = vmatmul.msk.bf16.vlgmr.msrb.gmra.mxu2 %vm1405_vm9, %v7844_v34  ;;  %v11505_v0 = vld [vmem:[#allocation31_spill] sm:$0xff] }
 0x188   :  { %1815 = vmatpush.bf16.msra.mxu2 %v11499_v28  ;;  %5006 = vmatmul.msk.bf16.vlgmr.msrb.gmra.mxu1 %vm1405_vm9, %v7844_v34  ;;  %v11504_v28 = vld [vmem:[#allocation30_spill] sm:$0xff] }
 0x189   :  { %5008 = vmatmul.msk.bf16.vlgmr.msrb.gmra.mxu3 %vm1405_vm9, %v7844_v34 }
 0x18a   :  { %1828 = vmatpush.bf16.msra.mxu3 %v11500_v24  ;;  %1790 = vmatpush.bf16.msra.mxu0 %v6735_v16  ;;  %v11503_v24 = vld [vmem:[#allocation29_spill] sm:$0xff]  ;;  %v11509_v16 = vld [vmem:[#allocation35_spill] sm:$0xff] }
 0x18b   :  { %1803 = vmatpush.bf16.msra.mxu1 %v6739_v27  ;;  %v11510_v27 = vld [vmem:[#allocation41_spill] sm:$0xff] }
 0x18c   :  { %1816 = vmatpush.bf16.msra.mxu2 %v6770_v3  ;;  %v11511_v3 = vld [vmem:[#allocation43_spill] sm:$0xff] }
 0x18e   :  { %1829 = vmatpush.bf16.msra.mxu3 %v11501_v43  ;;  %1791 = vmatpush.bf16.msra.mxu0 %v11502_v32  ;;  %v11512_v43 = vld [vmem:[#allocation37_spill] sm:$0xff]  ;;  %v11513_v32 = vld [vmem:[#allocation39_spill] sm:$0xff] }
 0x18f   :  { %1804 = vmatpush.bf16.msra.mxu1 %v11503_v24  ;;  %v7875_v24 = vpop.f32.mrf.mxu1 }
 0x190   :  { %1817 = vmatpush.bf16.msra.mxu2 %v11504_v28  ;;  %11514 = vst [vmem:[#allocation3_spill] sm:$0xff] %v7875_v24  ;;  %v7877_v28 = vpop.f32.mrf.mxu0  ;;  %v11520_v24 = vld [vmem:[#allocation46_spill] sm:$0xff] }
 0x191   :  { %11515 = vst [vmem:[#allocation4_spill] sm:$0xff] %v7877_v28  ;;  %v11521_v28 = vld [vmem:[#allocation44_spill] sm:$0xff] }
 0x192   :  { %1830 = vmatpush.bf16.msra.mxu3 %v11505_v0  ;;  %1792 = vmatpush.bf16.msra.mxu0 %v11506_v61  ;;  %v11516_v0 = vld [vmem:[#allocation40_spill] sm:$0xff]  ;;  %v11517_v61 = vld [vmem:[#allocation42_spill] sm:$0xff] }
 0x193   :  { %1805 = vmatpush.bf16.msra.mxu1 %v11507_v31  ;;  %v11518_v31 = vld [vmem:[#allocation36_spill] sm:$0xff] }
 0x194   :  { %1818 = vmatpush.bf16.msra.mxu2 %v11508_v35  ;;  %v11519_v35 = vld [vmem:[#allocation38_spill] sm:$0xff] }
 0x196   :  { %1831 = vmatpush.bf16.msra.mxu3 %v11509_v16  ;;  %1793 = vmatpush.bf16.msra.mxu0 %v11510_v27  ;;  %v11527_v27 = vld [vmem:[#allocation47_spill] sm:$0xff]  ;;  %v11528_v16 = vld [vmem:[#allocation48_spill] sm:$0xff] }
 0x197   :  { %1806 = vmatpush.bf16.msra.mxu1 %v11511_v3  ;;  %v11526_v3 = vld [vmem:[#allocation50_spill] sm:$0xff] }
 0x198   :  { %1819 = vmatpush.bf16.msra.mxu2 %v11512_v43  ;;  %v11525_v43 = vld [vmem:[#allocation49_spill] sm:$0xff] }
 0x199   :  { %5009 = vmatmul.msk.bf16.vlgmr.msra.gmra.mxu0 %vm1405_vm9, %v7844_v34 }
 0x19a   :  { %1832 = vmatpush.bf16.msra.mxu3 %v11513_v32  ;;  %1841 = vmatpush.bf16.msrb.mxu0 %v11516_v0  ;;  %v1493_v0 = vpop.f32.mrf.mxu1  ;;  %v1480_v32 = vpop.f32.mrf.mxu0 }
 0x19b   :  { %1854 = vmatpush.bf16.msrb.mxu1 %v11517_v61  ;;  %5011 = vmatmul.msk.bf16.vlgmr.msra.gmra.mxu2 %vm1405_vm9, %v7844_v34  ;;  %v7897_v61 = vpop.f32.mrf.mxu3  ;;  %v11533_v32 = vld [vmem:[#allocation56_spill] sm:$0xff] }
 0x19c   :  { %1867 = vmatpush.bf16.msrb.mxu2 %v11518_v31  ;;  %5010 = vmatmul.msk.bf16.vlgmr.msra.gmra.mxu1 %vm1405_vm9, %v7844_v34  ;;  %v11522_v31 = vld [vmem:[#allocation45_spill] sm:$0xff]  ;;  %11524 = vst [vmem:[#allocation6_spill] sm:$0xff] %v7897_v61 }
 0x19d   :  { %5012 = vmatmul.msk.bf16.vlgmr.msra.gmra.mxu3 %vm1405_vm9, %v7844_v34 }
 0x19e   :  { %1880 = vmatpush.bf16.msrb.mxu3 %v11519_v35  ;;  %1842 = vmatpush.bf16.msrb.mxu0 %v7126_v59  ;;  %v7895_v35 = vpop.f32.mrf.mxu2 }
 0x19f   :  { %1855 = vmatpush.bf16.msrb.mxu1 %v11520_v24  ;;  %11523 = vst [vmem:[#allocation5_spill] sm:$0xff] %v7895_v35  ;;  %v11529_v24 = vld [vmem:[#allocation53_spill] sm:$0xff] }
 0x1a0   :  { %1868 = vmatpush.bf16.msrb.mxu2 %v11521_v28  ;;  %v11530_v28 = vld [vmem:[#allocation51_spill] sm:$0xff] }
 0x1a2   :  { %1881 = vmatpush.bf16.msrb.mxu3 %v11522_v31  ;;  %1843 = vmatpush.bf16.msrb.mxu0 %v11525_v43  ;;  %v11531_v31 = vld [vmem:[#allocation52_spill] sm:$0xff]  ;;  %v7907_v0 = vpop.f32.mrf.mxu1  ;;  %v11534_v43 = vld [vmem:[#allocation57_spill] sm:$0xff] }
 0x1a3   :  { %1856 = vmatpush.bf16.msrb.mxu1 %v11526_v3  ;;  %v1519_v61 = vpop.f32.mrf.mxu3  ;;  %11532 = vst [vmem:[#allocation7_spill] sm:$0xff] %v7907_v0  ;;  %v11535_v3 = vld [vmem:[#allocation54_spill] sm:$0xff] }
 0x1a4   :  { %1869 = vmatpush.bf16.msrb.mxu2 %v11527_v27  ;;  %v11536_v27 = vld [vmem:[#allocation55_spill] sm:$0xff]  ;;  %v11541_v61 = vld [vmem:[#allocation66_spill] sm:$0xff] }
 0x1a5   :  { %v11542_v0 = vld [vmem:[#allocation62_spill] sm:$0xff] }
 0x1a6   :  { %1882 = vmatpush.bf16.msrb.mxu3 %v11528_v16  ;;  %1844 = vmatpush.bf16.msrb.mxu0 %v7239_v13  ;;  %v1506_v35 = vpop.f32.mrf.mxu2  ;;  %v7913_v16 = vpop.f32.mrf.mxu0 }
 0x1a7   :  { %1857 = vmatpush.bf16.msrb.mxu1 %v11529_v24  ;;  %11537 = vst [vmem:[#allocation8_spill] sm:$0xff] %v7913_v16  ;;  %v11538_v24 = vld [vmem:[#allocation61_spill] sm:$0xff]  ;;  %v11540_v35 = vld [vmem:[#allocation59_spill] sm:$0xff] }
 0x1a8   :  { %1870 = vmatpush.bf16.msrb.mxu2 %v11530_v28  ;;  %v11539_v28 = vld [vmem:[#allocation58_spill] sm:$0xff]  ;;  %v11543_v16 = vld [vmem:[#allocation63_spill] sm:$0xff] }
 0x1aa   :  { %1883 = vmatpush.bf16.msrb.mxu3 %v11531_v31  ;;  %1845 = vmatpush.bf16.msrb.mxu0 %v11533_v32 }
 0x1ab   :  { %1858 = vmatpush.bf16.msrb.mxu1 %v11534_v43 }
 0x1ac   :  { %1871 = vmatpush.bf16.msrb.mxu2 %v11535_v3  ;;  %v11547_v3 = vld [vmem:[#allocation65_spill] sm:$0xff] }
 0x1ad   :  { %5013 = vmatmul.msk.bf16.vlgmr.msrb.gmra.mxu0 %vm1405_vm9, %v7844_v34 }
 0x1ae   :  { %1884 = vmatpush.bf16.msrb.mxu3 %v11536_v27  ;;  %1893 = vmatpush.bf16.msra.mxu0 %v7365_v50  ;;  %v1532_v50 = vpop.f32.mrf.mxu0  ;;  %v11546_v27 = vld [vmem:[#allocation64_spill] sm:$0xff] }
 0x1af   :  { %1906 = vmatpush.bf16.msra.mxu1 %v11538_v24  ;;  %5015 = vmatmul.msk.bf16.vlgmr.msrb.gmra.mxu2 %vm1405_vm9, %v7844_v34  ;;  %v1545_v24 = vpop.f32.mrf.mxu1 }
 0x1b0   :  { %1919 = vmatpush.bf16.msra.mxu2 %v11539_v28  ;;  %5014 = vmatmul.msk.bf16.vlgmr.msrb.gmra.mxu1 %vm1405_vm9, %v7844_v34  ;;  %v7933_v28 = vpop.f32.mrf.mxu3 }
 0x1b1   :  { %5016 = vmatmul.msk.bf16.vlgmr.msrb.gmra.mxu3 %vm1405_vm9, %v7844_v34  ;;  %11545 = vst [vmem:[#allocation10_spill] sm:$0xff] %v7933_v28 }
 0x1b2   :  { %1932 = vmatpush.bf16.msra.mxu3 %v11540_v35  ;;  %1894 = vmatpush.bf16.msra.mxu0 %v11541_v61  ;;  %v7931_v35 = vpop.f32.mrf.mxu2 }
 0x1b3   :  { %1907 = vmatpush.bf16.msra.mxu1 %v7469_v29  ;;  %11544 = vst [vmem:[#allocation9_spill] sm:$0xff] %v7931_v35 }
 0x1b4   :  { %1920 = vmatpush.bf16.msra.mxu2 %v11542_v0 }
 0x1b6   :  { %1933 = vmatpush.bf16.msra.mxu3 %v11543_v16  ;;  %1895 = vmatpush.bf16.msra.mxu0 %v7489_v45  ;;  %v7945_v50 = vpop.f32.mrf.mxu0 }
 0x1b7   :  { %1908 = vmatpush.bf16.msra.mxu1 %v7511_v15  ;;  %v7943_v24 = vpop.f32.mrf.mxu1  ;;  %11549 = vst [vmem:[#allocation12_spill] sm:$0xff] %v7945_v50 }
 0x1b8   :  { %1921 = vmatpush.bf16.msra.mxu2 %v11546_v27  ;;  %v1571_v28 = vpop.f32.mrf.mxu3  ;;  %11548 = vst [vmem:[#allocation11_spill] sm:$0xff] %v7943_v24 }
 0x1ba   :  { %1934 = vmatpush.bf16.msra.mxu3 %v11547_v3  ;;  %1896 = vmatpush.bf16.msra.mxu0 %v7556_v39  ;;  %v1558_v35 = vpop.f32.mrf.mxu2 }
 0x1bb   :  { %1909 = vmatpush.bf16.msra.mxu1 %v7568_v49 }
 0x1bc   :  { %1922 = vmatpush.bf16.msra.mxu2 %v7515_v2 }
 0x1be   :  { %1935 = vmatpush.bf16.msra.mxu3 %v7527_v42  ;;  %1897 = vmatpush.bf16.msra.mxu0 %v7619_v1  ;;  %v1584_v50 = vpop.f32.mrf.mxu0 }
 0x1bf   :  { %1910 = vmatpush.bf16.msra.mxu1 %v7666_v18  ;;  %v1597_v24 = vpop.f32.mrf.mxu1  ;;  %v11563_v50 = vld [vmem:[#allocation29_spill] sm:$0xff] }
 0x1c0   :  { %1923 = vmatpush.bf16.msra.mxu2 %v7572_v37  ;;  %v7965_v35 = vpop.f32.mrf.mxu3  ;;  %v11562_v24 = vld [vmem:[#allocation28_spill] sm:$0xff] }
 0x1c1   :  { %5017 = vmatmul.msk.bf16.vlgmr.msra.gmra.mxu0 %vm1405_vm9, %v7844_v34  ;;  %11551 = vst [vmem:[#allocation14_spill] sm:$0xff] %v7965_v35 }
 0x1c2   :  { %1936 = vmatpush.bf16.msra.mxu3 %v7596_v9  ;;  %1945 = vmatpush.bf16.msrb.mxu0 %v7669_v36  ;;  %v7963_v28 = vpop.f32.mrf.mxu2 }
 0x1c3   :  { %1958 = vmatpush.bf16.msrb.mxu1 %v7678_v10  ;;  %5019 = vmatmul.msk.bf16.vlgmr.msra.gmra.mxu2 %vm1405_vm9, %v7844_v34  ;;  %11550 = vst [vmem:[#allocation13_spill] sm:$0xff] %v7963_v28 }
 0x1c4   :  { %1971 = vmatpush.bf16.msrb.mxu2 %v7599_v33  ;;  %5018 = vmatmul.msk.bf16.vlgmr.msra.gmra.mxu1 %vm1405_vm9, %v7844_v34 }
 0x1c5   :  { %5020 = vmatmul.msk.bf16.vlgmr.msra.gmra.mxu3 %vm1405_vm9, %v7844_v34 }
 0x1c6   :  { %1984 = vmatpush.bf16.msrb.mxu3 %v7616_v8  ;;  %1946 = vmatpush.bf16.msrb.mxu0 %v7697_v56 }
 0x1c7   :  { %1959 = vmatpush.bf16.msrb.mxu1 %v7700_v48 }
 0x1c8   :  { %1972 = vmatpush.bf16.msrb.mxu2 %v7689_v19  ;;  %v1623_v35 = vpop.f32.mrf.mxu3 }
 0x1c9   :  { %v11565_v35 = vld [vmem:[#allocation31_spill] sm:$0xff] }
 0x1ca   :  { %1985 = vmatpush.bf16.msrb.mxu3 %v7692_v23  ;;  %1947 = vmatpush.bf16.msrb.mxu0 %v7756_v46  ;;  %v1610_v28 = vpop.f32.mrf.mxu2 }
 0x1cb   :  { %1960 = vmatpush.bf16.msrb.mxu1 %v7759_v44  ;;  %v11564_v28 = vld [vmem:[#allocation30_spill] sm:$0xff] }
 0x1cc   :  { %1973 = vmatpush.bf16.msrb.mxu2 %v7766_v25 }
 0x1ce   :  { %1986 = vmatpush.bf16.msrb.mxu3 %v7769_v20  ;;  %1948 = vmatpush.bf16.msrb.mxu0 %v7776_v38 }
 0x1cf   :  { %1961 = vmatpush.bf16.msrb.mxu1 %v7780_v12 }
 0x1d0   :  { %1974 = vmatpush.bf16.msrb.mxu2 %v7786_v6 }
 0x1d2   :  { %1987 = vmatpush.bf16.msrb.mxu3 %v7793_v54  ;;  %1949 = vmatpush.bf16.msrb.mxu0 %v7799_v4 }
 0x1d3   :  { %1962 = vmatpush.bf16.msrb.mxu1 %v7803_v62 }
 0x1d4   :  { %1975 = vmatpush.bf16.msrb.mxu2 %v7807_v53 }
 0x1d5   :  { %5021 = vmatmul.msk.bf16.vlgmr.msrb.gmra.mxu0 %vm1405_vm9, %v7844_v34 }
 0x1d6   :  { %1988 = vmatpush.bf16.msrb.mxu3 %v7812_v17  ;;  %2022 = vmatpush.bf16.msra.mxu0 %v6250_v55  ;;  %v8001_v55 = vpop.f32.mrf.mxu2 }
 0x1d7   :  { %2035 = vmatpush.bf16.msra.mxu1 %v11482_v41  ;;  %5023 = vmatmul.msk.bf16.vlgmr.msrb.gmra.mxu2 %vm1405_vm9, %v7844_v34  ;;  %v8005_v41 = vpop.f32.mrf.mxu0 }
 0x1d8   :  { %2048 = vmatpush.bf16.msra.mxu2 %v11483_v58  ;;  %5022 = vmatmul.msk.bf16.vlgmr.msrb.gmra.mxu1 %vm1405_vm9, %v7844_v34  ;;  %v8007_v58 = vpop.f32.mrf.mxu3 }
 0x1d9   :  { %5024 = vmatmul.msk.bf16.vlgmr.msrb.gmra.mxu3 %vm1405_vm9, %v7844_v34  ;;  %v11561_v34 = vld [vmem:[#allocation27_spill] sm:$0xff] }
 0x1da   :  { %2061 = vmatpush.bf16.msra.mxu3 %v11484_v26  ;;  %2023 = vmatpush.bf16.msra.mxu0 %v11485_v5  ;;  %v8011_v26 = vpop.f32.mrf.mxu1 }
 0x1db   :  { %2036 = vmatpush.bf16.msra.mxu1 %v11486_v22  ;;  %v11552_v22 = vld [vmem:[#allocation18_spill] sm:$0xff] }
 0x1dc   :  { %2049 = vmatpush.bf16.msra.mxu2 %v11487_v11  ;;  %v11553_v11 = vld [vmem:[#allocation19_spill] sm:$0xff] }
 0x1de   :  { %2062 = vmatpush.bf16.msra.mxu3 %v11488_v63  ;;  %2024 = vmatpush.bf16.msra.mxu0 %v11489_v14  ;;  %v1662_v5 = vpop.f32.mrf.mxu2  ;;  %v8022_v63 = vld [vmem:[%s10961_s2 + $0x8] sm:$0xf]  ;;  %v11554_v14 = vld [vmem:[#allocation22_spill] sm:$0xff] }
 0x1df   :  { %2037 = vmatpush.bf16.msra.mxu1 %v11490_v7  ;;  %v11555_v7 = vld [vmem:[#allocation23_spill] sm:$0xff]  ;;  %v11566_v5 = vld [vmem:[#allocation32_spill] sm:$0xff] }
 0x1e0   :  { %2050 = vmatpush.bf16.msra.mxu2 %v11491_v21  ;;  %v1636_v21 = vpop.f32.mrf.mxu0 }
 0x1e1   :  { %v11571_v21 = vld [vmem:[#allocation43_spill] sm:$0xff] }
 0x1e2   :  { %2063 = vmatpush.bf16.msra.mxu3 %v11492_v60  ;;  %2025 = vmatpush.bf16.msra.mxu0 %v11493_v57  ;;  %v1675_v60 = vpop.f32.mrf.mxu3  ;;  %v11556_v57 = vld [vmem:[#allocation20_spill] sm:$0xff] }
 0x1e3   :  { %2038 = vmatpush.bf16.msra.mxu1 %v11494_v30  ;;  %v11558_v30 = vld [vmem:[#allocation24_spill] sm:$0xff]  ;;  %v11572_v60 = vld [vmem:[#allocation37_spill] sm:$0xff] }
 0x1e4   :  { %2051 = vmatpush.bf16.msra.mxu2 %v11495_v52  ;;  %v11559_v52 = vld [vmem:[#allocation25_spill] sm:$0xff] }
 0x1e6   :  { %2064 = vmatpush.bf16.msra.mxu3 %v11496_v47  ;;  %2026 = vmatpush.bf16.msra.mxu0 %v6668_v51  ;;  %v11557_v51 = vld [vmem:[#allocation21_spill] sm:$0xff]  ;;  %v11560_v47 = vld [vmem:[#allocation26_spill] sm:$0xff] }
 0x1e7   :  { %2039 = vmatpush.bf16.msra.mxu1 %v6672_v40  ;;  %v1649_v40 = vpop.f32.mrf.mxu1 }
 0x1e8   :  { %2052 = vmatpush.bf16.msra.mxu2 %v11552_v22  ;;  %v11567_v22 = vld [vmem:[#allocation33_spill] sm:$0xff]  ;;  %v11575_v40 = vld [vmem:[#allocation42_spill] sm:$0xff] }
 0x1e9   :  { %5026 = vmatmul.msk.bf16.vlgmr.msra.gmra.mxu0 %vm1405_vm9, %v8022_v63 }
 0x1ea   :  { %2065 = vmatpush.bf16.msra.mxu3 %v11553_v11  ;;  %2074 = vmatpush.bf16.msrb.mxu0 %v11554_v14  ;;  %v11568_v11 = vld [vmem:[#allocation34_spill] sm:$0xff]  ;;  %v11569_v14 = vld [vmem:[#allocation35_spill] sm:$0xff] }
 0x1eb   :  { %2087 = vmatpush.bf16.msrb.mxu1 %v11555_v7  ;;  %5028 = vmatmul.msk.bf16.vlgmr.msra.gmra.mxu2 %vm1405_vm9, %v8022_v63  ;;  %v11570_v7 = vld [vmem:[#allocation41_spill] sm:$0xff] }
 0x1ec   :  { %2100 = vmatpush.bf16.msrb.mxu2 %v11556_v57  ;;  %5027 = vmatmul.msk.bf16.vlgmr.msra.gmra.mxu1 %vm1405_vm9, %v8022_v63  ;;  %v11573_v57 = vld [vmem:[#allocation39_spill] sm:$0xff] }
 0x1ed   :  { %5029 = vmatmul.msk.bf16.vlgmr.msra.gmra.mxu3 %vm1405_vm9, %v8022_v63 }
 0x1ee   :  { %2113 = vmatpush.bf16.msrb.mxu3 %v11557_v51  ;;  %2075 = vmatpush.bf16.msrb.mxu0 %v11558_v30  ;;  %v11574_v51 = vld [vmem:[#allocation40_spill] sm:$0xff] }
 0x1ef   :  { %2088 = vmatpush.bf16.msrb.mxu1 %v11559_v52  ;;  %v11576_v52 = vld [vmem:[#allocation36_spill] sm:$0xff] }
 0x1f0   :  { %2101 = vmatpush.bf16.msrb.mxu2 %v11560_v47  ;;  %v11577_v47 = vld [vmem:[#allocation38_spill] sm:$0xff] }
 0x1f1   :  { %v8054_v30 = vpop.f32.mrf.mxu1 }
 0x1f2   :  { %2114 = vmatpush.bf16.msrb.mxu3 %v11561_v34  ;;  %2076 = vmatpush.bf16.msrb.mxu0 %v11562_v24  ;;  %v8058_v34 = vpop.f32.mrf.mxu0  ;;  %v11578_v24 = vld [vmem:[#allocation46_spill] sm:$0xff] }
 0x1f3   :  { %2089 = vmatpush.bf16.msrb.mxu1 %v11563_v50  ;;  %v11579_v50 = vld [vmem:[#allocation44_spill] sm:$0xff] }
 0x1f4   :  { %2102 = vmatpush.bf16.msrb.mxu2 %v11564_v28  ;;  %v11580_v28 = vld [vmem:[#allocation45_spill] sm:$0xff] }
 0x1f6   :  { %2115 = vmatpush.bf16.msrb.mxu3 %v11565_v35  ;;  %2077 = vmatpush.bf16.msrb.mxu0 %v11566_v5  ;;  %v8072_v35 = vpop.f32.mrf.mxu2  ;;  %v11581_v5 = vld [vmem:[#allocation49_spill] sm:$0xff] }
 0x1f7   :  { %2090 = vmatpush.bf16.msrb.mxu1 %v11567_v22  ;;  %v11582_v22 = vld [vmem:[#allocation50_spill] sm:$0xff] }
 0x1f8   :  { %2103 = vmatpush.bf16.msrb.mxu2 %v11568_v11  ;;  %v1725_v11 = vpop.f32.mrf.mxu3 }
 0x1fa   :  { %2116 = vmatpush.bf16.msrb.mxu3 %v11569_v14  ;;  %2078 = vmatpush.bf16.msrb.mxu0 %v11570_v7  ;;  %v1701_v14 = vpop.f32.mrf.mxu1  ;;  %v11583_v7 = vld [vmem:[#allocation47_spill] sm:$0xff] }
 0x1fb   :  { %2091 = vmatpush.bf16.msrb.mxu1 %v11571_v21  ;;  %v11584_v21 = vld [vmem:[#allocation48_spill] sm:$0xff] }
 0x1fc   :  { %2104 = vmatpush.bf16.msrb.mxu2 %v11572_v60  ;;  %v1688_v60 = vpop.f32.mrf.mxu0 }
 0x1fd   :  { %5030 = vmatmul.msk.bf16.vlgmr.msrb.gmra.mxu0 %vm1405_vm9, %v8022_v63 }
 0x1fe   :  { %2117 = vmatpush.bf16.msrb.mxu3 %v11573_v57  ;;  %2126 = vmatpush.bf16.msra.mxu0 %v11574_v51  ;;  %v11586_v57 = vld [vmem:[#allocation51_spill] sm:$0xff]  ;;  %v1714_v51 = vpop.f32.mrf.mxu2 }
 0x1ff   :  { %2139 = vmatpush.bf16.msra.mxu1 %v11575_v40  ;;  %5032 = vmatmul.msk.bf16.vlgmr.msrb.gmra.mxu2 %vm1405_vm9, %v8022_v63 }
 0x200   :  { %2152 = vmatpush.bf16.msra.mxu2 %v11576_v52  ;;  %5031 = vmatmul.msk.bf16.vlgmr.msrb.gmra.mxu1 %vm1405_vm9, %v8022_v63  ;;  %v1727_v40 = vpop.f32.mrf.mxu3  ;;  %v11587_v52 = vld [vmem:[#allocation54_spill] sm:$0xff] }
 0x201   :  { %5033 = vmatmul.msk.bf16.vlgmr.msrb.gmra.mxu3 %vm1405_vm9, %v8022_v63 }
 0x202   :  { %2165 = vmatpush.bf16.msra.mxu3 %v11577_v47  ;;  %2127 = vmatpush.bf16.msra.mxu0 %v7126_v59  ;;  %v11585_v59 = vld [vmem:[#allocation53_spill] sm:$0xff]  ;;  %v11588_v47 = vld [vmem:[#allocation55_spill] sm:$0xff] }
 0x203   :  { %2140 = vmatpush.bf16.msra.mxu1 %v11578_v24  ;;  %v11589_v24 = vld [vmem:[#allocation60_spill] sm:$0xff] }
 0x204   :  { %2153 = vmatpush.bf16.msra.mxu2 %v11579_v50  ;;  %v11590_v50 = vld [vmem:[#allocation61_spill] sm:$0xff] }
 0x206   :  { %2166 = vmatpush.bf16.msra.mxu3 %v11580_v28  ;;  %2128 = vmatpush.bf16.msra.mxu0 %v11581_v5  ;;  %v11591_v28 = vld [vmem:[#allocation58_spill] sm:$0xff]  ;;  %v11592_v5 = vld [vmem:[#allocation59_spill] sm:$0xff] }
 0x207   :  { %2141 = vmatpush.bf16.msra.mxu1 %v11582_v22 }
 0x208   :  { %2154 = vmatpush.bf16.msra.mxu2 %v11583_v7 }
 0x20a   :  { %2167 = vmatpush.bf16.msra.mxu3 %v11584_v21  ;;  %2129 = vmatpush.bf16.msra.mxu0 %v7239_v13  ;;  %v8088_v13 = vpop.f32.mrf.mxu1 }
 0x20b   :  { %2142 = vmatpush.bf16.msra.mxu1 %v11585_v59 }
 0x20c   :  { %2155 = vmatpush.bf16.msra.mxu2 %v11586_v57  ;;  %v8108_v22 = vpop.f32.mrf.mxu3 }
 0x20e   :  { %2168 = vmatpush.bf16.msra.mxu3 %v11531_v31  ;;  %2130 = vmatpush.bf16.msra.mxu0 %v11533_v32  ;;  %v1743_v31 = vpop.f32.mrf.mxu0  ;;  %v8106_v32 = vpop.f32.mrf.mxu2 }
 0x20f   :  { %2143 = vmatpush.bf16.msra.mxu1 %v11534_v43  ;;  %v8100_v43 = vadd.f32 %v1743_v31, %v1725_v11 }
 0x210   :  { %2156 = vmatpush.bf16.msra.mxu2 %v11587_v52 }
 0x211   :  { %5034 = vmatmul.msk.bf16.vlgmr.msra.gmra.mxu0 %vm1405_vm9, %v8022_v63 }
 0x212   :  { %2169 = vmatpush.bf16.msra.mxu3 %v11588_v47  ;;  %2178 = vmatpush.bf16.msrb.mxu0 %v11589_v24  ;;  %v1758_v14 = vpop.f32.mrf.mxu1  ;;  %v11593_v24 = vld [vmem:[#allocation4_spill] sm:$0xff] }
 0x213   :  { %2191 = vmatpush.bf16.msrb.mxu1 %v11590_v50  ;;  %5036 = vmatmul.msk.bf16.vlgmr.msra.gmra.mxu2 %vm1405_vm9, %v8022_v63  ;;  %v1995_v50 = vadd.f32 %v8088_v13, %v11593_v24 }
 0x214   :  { %2204 = vmatpush.bf16.msrb.mxu2 %v11591_v28  ;;  %5035 = vmatmul.msk.bf16.vlgmr.msra.gmra.mxu1 %vm1405_vm9, %v8022_v63  ;;  %v30_v28 = vld [vmem:[%s10962_s1] sm:$0xff] }
 0x215   :  { %5037 = vmatmul.msk.bf16.vlgmr.msra.gmra.mxu3 %vm1405_vm9, %v8022_v63 }
 0x216   :  { %2217 = vmatpush.bf16.msrb.mxu3 %v11592_v5  ;;  %2179 = vmatpush.bf16.msrb.mxu0 %v11541_v61  ;;  %v1745_v61 = vpop.f32.mrf.mxu0  ;;  %v8196_v5 = vperm.slane %v30_v28, 1 }
 0x217   :  { %2192 = vmatpush.bf16.msrb.mxu1 %v7469_v29  ;;  %v1784_v29 = vpop.f32.mrf.mxu3 }
 0x218   :  { %2205 = vmatpush.bf16.msrb.mxu2 %v11542_v0  ;;  %11594 = vst [vmem:[#allocation15_spill] sm:$0xff] %v8196_v5 }
 0x21a   :  { %2218 = vmatpush.bf16.msrb.mxu3 %v11543_v16  ;;  %2180 = vmatpush.bf16.msrb.mxu0 %v7489_v45  ;;  %v1771_v16 = vpop.f32.mrf.mxu2 }
 0x21b   :  { %2193 = vmatpush.bf16.msrb.mxu1 %v7511_v15 }
 0x21c   :  { %2206 = vmatpush.bf16.msrb.mxu2 %v11546_v27 }
 0x21e   :  { %2219 = vmatpush.bf16.msrb.mxu3 %v11547_v3  ;;  %2181 = vmatpush.bf16.msrb.mxu0 %v7556_v39  ;;  %v8126_v27 = vpop.f32.mrf.mxu0  ;;  %v8128_v3 = vpop.f32.mrf.mxu1 }
 0x21f   :  { %2194 = vmatpush.bf16.msrb.mxu1 %v7568_v49 }
 0x220   :  { %2207 = vmatpush.bf16.msrb.mxu2 %v7515_v2  ;;  %v8146_v15 = vpop.f32.mrf.mxu3 }
 0x222   :  { %2220 = vmatpush.bf16.msrb.mxu3 %v7527_v42  ;;  %2182 = vmatpush.bf16.msrb.mxu0 %v7619_v1  ;;  %v8144_v45 = vpop.f32.mrf.mxu2 }
 0x223   :  { %2195 = vmatpush.bf16.msrb.mxu1 %v7666_v18 }
 0x224   :  { %2208 = vmatpush.bf16.msrb.mxu2 %v7572_v37 }
 0x225   :  { %5038 = vmatmul.msk.bf16.vlgmr.msrb.gmra.mxu0 %vm1405_vm9, %v8022_v63 }
 0x226   :  { %2221 = vmatpush.bf16.msrb.mxu3 %v7596_v9  ;;  %2230 = vmatpush.bf16.msra.mxu0 %v7669_v36  ;;  %v1797_v2 = vpop.f32.mrf.mxu0  ;;  %v1810_v42 = vpop.f32.mrf.mxu1 }
 0x227   :  { %2243 = vmatpush.bf16.msra.mxu1 %v7678_v10  ;;  %5040 = vmatmul.msk.bf16.vlgmr.msrb.gmra.mxu2 %vm1405_vm9, %v8022_v63  ;;  %v8199_v2 = vperm.slane %v30_v28, 0  ;;  %v11596_v42 = vld [vmem:[#allocation3_spill] sm:$0xff] }
 0x228   :  { %2256 = vmatpush.bf16.msra.mxu2 %v7599_v33  ;;  %5039 = vmatmul.msk.bf16.vlgmr.msrb.gmra.mxu1 %vm1405_vm9, %v8022_v63  ;;  %v1836_v49 = vpop.f32.mrf.mxu3 }
 0x229   :  { %5041 = vmatmul.msk.bf16.vlgmr.msrb.gmra.mxu3 %vm1405_vm9, %v8022_v63  ;;  %11595 = vst [vmem:[#allocation16_spill] sm:$0xff] %v8199_v2  ;;  %v11597_v49 = vld [vmem:[#allocation5_spill] sm:$0xff] }
 0x22a   :  { %2269 = vmatpush.bf16.msra.mxu3 %v7616_v8  ;;  %2231 = vmatpush.bf16.msra.mxu0 %v7697_v56  ;;  %v1823_v39 = vpop.f32.mrf.mxu2  ;;  %v1997_v13 = vadd.f32 %v8108_v22, %v11597_v49 }
 0x22b   :  { %2244 = vmatpush.bf16.msra.mxu1 %v7700_v48  ;;  %v1996_v39 = vadd.f32 %v8106_v32, %v11596_v42 }
 0x22c   :  { %2257 = vmatpush.bf16.msra.mxu2 %v7689_v19 }
 0x22e   :  { %2270 = vmatpush.bf16.msra.mxu3 %v7692_v23  ;;  %2232 = vmatpush.bf16.msra.mxu0 %v7756_v46  ;;  %v8162_v37 = vpop.f32.mrf.mxu0  ;;  %v8164_v9 = vpop.f32.mrf.mxu1 }
 0x22f   :  { %2245 = vmatpush.bf16.msra.mxu1 %v7759_v44 }
 0x230   :  { %2258 = vmatpush.bf16.msra.mxu2 %v7766_v25 }
 0x232   :  { %2271 = vmatpush.bf16.msra.mxu3 %v7769_v20  ;;  %2233 = vmatpush.bf16.msra.mxu0 %v7776_v38  ;;  %v8170_v33 = vpop.f32.mrf.mxu2 }
 0x233   :  { %2246 = vmatpush.bf16.msra.mxu1 %v7780_v12 }
 0x234   :  { %2259 = vmatpush.bf16.msra.mxu2 %v7786_v6  ;;  %v8172_v8 = vpop.f32.mrf.mxu3 }
 0x236   :  { %2272 = vmatpush.bf16.msra.mxu3 %v7793_v54  ;;  %2234 = vmatpush.bf16.msra.mxu0 %v7799_v4  ;;  %v1849_v1 = vpop.f32.mrf.mxu0  ;;  %v1862_v18 = vpop.f32.mrf.mxu1 }
 0x237   :  { %2247 = vmatpush.bf16.msra.mxu1 %v7803_v62  ;;  %v8208_v18 = vperm.slane %v30_v28, 2 }
 0x238   :  { %2260 = vmatpush.bf16.msra.mxu2 %v7807_v53 }
 0x239   :  { %5042 = vmatmul.msk.bf16.vlgmr.msra.gmra.mxu0 %vm1405_vm9, %v8022_v63  ;;  %11598 = vst [vmem:[#allocation17_spill] sm:$0xff] %v8208_v18 }
 0x23a   :  { %2273 = vmatpush.bf16.msra.mxu3 %v7812_v17  ;;  %5043 = vmatmul.msk.bf16.vlgmr.msra.gmra.mxu1 %vm1405_vm9, %v8022_v63  ;;  %v1875_v36 = vpop.f32.mrf.mxu2 }
 0x23b   :  { %5044 = vmatmul.msk.bf16.vlgmr.msra.gmra.mxu2 %vm1405_vm9, %v8022_v63 }
 0x23c   :  { %v1888_v10 = vpop.f32.mrf.mxu3 }
 0x23d   :  { %5045 = vmatmul.msk.bf16.vlgmr.msra.gmra.mxu3 %vm1405_vm9, %v8022_v63 }
 0x23e   :  { %v8174_v19 = vpop.f32.mrf.mxu0 }
 0x241   :  { %v8176_v23 = vpop.f32.mrf.mxu1 }
 0x246   :  { %v8178_v56 = vpop.f32.mrf.mxu2  ;;  %v1901_v46 = vpop.f32.mrf.mxu0 }
 0x248   :  { %v8180_v48 = vpop.f32.mrf.mxu3 }
 0x249   :  { %v1914_v44 = vpop.f32.mrf.mxu1 }
 0x24a   :  { %v8213_v44 = vperm.slane %v30_v28, 3 }
 0x24c   :  { %11599 = vst [vmem:[#allocation52_spill] sm:$0xff] %v8213_v44 }
 0x24e   :  { %v1927_v25 = vpop.f32.mrf.mxu2 }
 0x250   :  { %v1940_v20 = vpop.f32.mrf.mxu3 }
 0x251   :  { %v11600_v20 = vld [vmem:[#allocation6_spill] sm:$0xff] }
 0x252   :  { %v8182_v38 = vpop.f32.mrf.mxu0  ;;  %v1998_v22 = vadd.f32 %v8126_v27, %v11600_v20  ;;  %v11608_v20 = vld [vmem:[#allocation10_spill] sm:$0xff] }
 0x255   :  { %v8184_v12 = vpop.f32.mrf.mxu1 }
 0x25a   :  { %v8186_v6 = vpop.f32.mrf.mxu2  ;;  %v1953_v4 = vpop.f32.mrf.mxu0 }
 0x25c   :  { %v1990_v54 = vpop.f32.mrf.mxu3 }
 0x25d   :  { %v1966_v62 = vpop.f32.mrf.mxu1  ;;  %v2013_v0 = vadd.f32 %v1990_v54, %v8072_v35  ;;  %v11601_v54 = vld [vmem:[#allocation8_spill] sm:$0xff] }
 0x25e   :  { %v1999_v4 = vadd.f32 %v8128_v3, %v11601_v54  ;;  %v8233_v3 = vperm.slane %v30_v28, 5 }
 0x260   :  { %11603 = vst [vmem:[#allocation57_spill] sm:$0xff] %v8233_v3 }
 0x262   :  { %v1979_v53 = vpop.f32.mrf.mxu2 }
 0x264   :  { %v1992_v17 = vpop.f32.mrf.mxu3 }
 0x266   :  { %v2028_v63 = vpop.f32.mrf.mxu0 }
 0x267   :  { %v8189_v7 = vadd.f32 %v2028_v63, %v2013_v0  ;;  %v8231_v63 = vperm.slane %v30_v28, 4 }
 0x269   :  { %v2041_v11 = vpop.f32.mrf.mxu1  ;;  %11602 = vst [vmem:[#allocation56_spill] sm:$0xff] %v8231_v63 }
 0x26a   :  { %v2279_v29 = vadd.f32 %v2041_v11, %v8100_v43 }
 0x26c   :  { %v8211_v36 = vmul.f32 %v8199_v2, %v2279_v29  ;;  %v8251_v29 = vperm.slane %v30_v28, 6 }
 0x26e   :  { %v2054_v21 = vpop.f32.mrf.mxu2  ;;  %v2030_v59 = vpop.f32.mrf.mxu0  ;;  %v2385_v62 = vmul.f32 %v8211_v36, %v8211_v36  ;;  %11606 = vst [vmem:[#allocation66_spill] sm:$0xff] %v8251_v29 }
 0x26f   :  { %v2280_v35 = vadd.f32 %v2054_v21, %v1995_v50  ;;  %v11605_v50 = vld [vmem:[#allocation9_spill] sm:$0xff] }
 0x270   :  { %v2067_v60 = vpop.f32.mrf.mxu3 }
 0x271   :  { %v2043_v57 = vpop.f32.mrf.mxu1  ;;  %v8206_v1 = vmul.f32 %v8196_v5, %v2280_v35  ;;  %v2281_v10 = vadd.f32 %v2067_v60, %v1996_v39  ;;  %v2001_v35 = vadd.f32 %v8146_v15, %v11605_v50  ;;  %v11612_v50 = vld [vmem:[#allocation11_spill] sm:$0xff] }
 0x273   :  { %v2386_v43 = vmul.f32 %v8206_v1, %v8206_v1  ;;  %v2364_v53 = vadd.f32 %v8206_v1, %v8211_v36  ;;  %v8226_v17 = vmul.f32 %v8208_v18, %v2281_v10 }
 0x275   :  { %v2405_v27 = vadd.f32 %v2386_v43, %v2385_v62  ;;  %v2365_v57 = vadd.f32 %v2364_v53, %v8226_v17  ;;  %v8258_v43 = vld [vmem:[%s10962_s1 + $0x8] sm:$0xff] }
 0x276   :  { %v2056_v51 = vpop.f32.mrf.mxu2 }
 0x277   :  { %v2387_v51 = vmul.f32 %v8226_v17, %v8226_v17 }
 0x278   :  { %v2069_v40 = vpop.f32.mrf.mxu3 }
 0x27a   :  { %v2080_v52 = vpop.f32.mrf.mxu0 }
 0x27b   :  { %v2282_v46 = vadd.f32 %v2080_v52, %v1997_v13  ;;  %v11604_v52 = vld [vmem:[#allocation7_spill] sm:$0xff]  ;;  %v8253_v13 = vperm.slane %v30_v28, 7  ;;  %v2002_v28 = vadd.f32 %v8162_v37, %v11608_v20  ;;  %v8280_v37 = vperm.slane %v8258_v43, 1 }
 0x27c   :  { %v2000_v24 = vadd.f32 %v8144_v45, %v11604_v52 }
 0x27d   :  { %v2093_v47 = vpop.f32.mrf.mxu1  ;;  %v8229_v0 = vmul.f32 %v8213_v44, %v2282_v46  ;;  %11607 = vst [vmem:[#allocation62_spill] sm:$0xff] %v8253_v13 }
 0x27e   :  { %v2283_v60 = vadd.f32 %v2093_v47, %v1998_v22  ;;  %v11609_v22 = vld [vmem:[#allocation12_spill] sm:$0xff]  ;;  %11611 = vst [vmem:[#allocation64_spill] sm:$0xff] %v8280_v37 }
 0x27f   :  { %v2388_v40 = vmul.f32 %v8229_v0, %v8229_v0  ;;  %v2366_v47 = vadd.f32 %v2365_v57, %v8229_v0  ;;  %v2003_v54 = vadd.f32 %v8164_v9, %v11609_v22  ;;  %v11616_v22 = vld [vmem:[#allocation14_spill] sm:$0xff] }
 0x282   :  { %v2106_v31 = vpop.f32.mrf.mxu2  ;;  %v2082_v61 = vpop.f32.mrf.mxu0 }
 0x283   :  { %v2284_v59 = vadd.f32 %v2106_v31, %v1999_v4  ;;  %v2406_v61 = vadd.f32 %v2405_v27, %v2387_v51  ;;  %v8246_v31 = vmul.f32 %v8231_v63, %v2283_v60  ;;  %v8277_v27 = vperm.slane %v8258_v43, 0 }
 0x284   :  { %v2119_v14 = vpop.f32.mrf.mxu3 }
 0x285   :  { %v2095_v16 = vpop.f32.mrf.mxu1  ;;  %v2407_v42 = vadd.f32 %v2406_v61, %v2388_v40  ;;  %v2285_v39 = vadd.f32 %v2119_v14, %v2000_v24  ;;  %11610 = vst [vmem:[#allocation63_spill] sm:$0xff] %v8277_v27  ;;  %v11613_v61 = vld [vmem:[#allocation13_spill] sm:$0xff] }
 0x286   :  { %v8249_v16 = vmul.f32 %v8233_v3, %v2284_v59 }
 0x287   :  { %v8271_v53 = vmul.f32 %v8251_v29, %v2285_v39 }
 0x288   :  { %v2390_v14 = vmul.f32 %v8249_v16, %v8249_v16 }
 0x289   :  { %v2391_v51 = vmul.f32 %v8271_v53, %v8271_v53 }
 0x28a   :  { %v2108_v25 = vpop.f32.mrf.mxu2 }
 0x28b   :  { %v2367_v25 = vadd.f32 %v2366_v47, %v8246_v31 }
 0x28c   :  { %v2121_v32 = vpop.f32.mrf.mxu3 }
 0x28d   :  { %v2389_v32 = vmul.f32 %v8246_v31, %v8246_v31  ;;  %v2368_v62 = vadd.f32 %v2367_v25, %v8249_v16 }
 0x28e   :  { %v2132_v11 = vpop.f32.mrf.mxu0 }
 0x28f   :  { %v2286_v49 = vadd.f32 %v2132_v11, %v2001_v35  ;;  %v2408_v4 = vadd.f32 %v2407_v42, %v2389_v32  ;;  %v2369_v9 = vadd.f32 %v2368_v62, %v8271_v53  ;;  %v2004_v35 = vadd.f32 %v8170_v33, %v11612_v50 }
 0x291   :  { %v2145_v21 = vpop.f32.mrf.mxu1  ;;  %v8274_v11 = vmul.f32 %v8253_v13, %v2286_v49  ;;  %v2409_v60 = vadd.f32 %v2408_v4, %v2390_v14  ;;  %v8302_v14 = vperm.slane %v8258_v43, 3 }
 0x292   :  { %v2287_v59 = vadd.f32 %v2145_v21, %v2002_v28  ;;  %v2005_v21 = vadd.f32 %v8172_v8, %v11613_v61 }
 0x293   :  { %v2392_v40 = vmul.f32 %v8274_v11, %v8274_v11  ;;  %v2410_v47 = vadd.f32 %v2409_v60, %v2391_v51  ;;  %v2370_v42 = vadd.f32 %v2369_v9, %v8274_v11  ;;  %11615 = vst [vmem:[#allocation18_spill] sm:$0xff] %v8302_v14  ;;  %v8321_v51 = vperm.slane %v8258_v43, 4 }
 0x294   :  { %v8293_v39 = vmul.f32 %v8277_v27, %v2287_v59  ;;  %v2007_v59 = vadd.f32 %v8176_v23, %v8005_v41  ;;  %v2008_v23 = vadd.f32 %v8178_v56, %v8011_v26 }
 0x295   :  { %v2411_v25 = vadd.f32 %v2410_v47, %v2392_v40  ;;  %11617 = vst [vmem:[#allocation19_spill] sm:$0xff] %v8321_v51 }
 0x296   :  { %v2158_v45 = vpop.f32.mrf.mxu2  ;;  %v2134_v46 = vpop.f32.mrf.mxu0  ;;  %v2371_v8 = vadd.f32 %v2370_v42, %v8293_v39  ;;  %v2393_v20 = vmul.f32 %v8293_v39, %v8293_v39 }
 0x297   :  { %v2288_v57 = vadd.f32 %v2158_v45, %v2003_v54  ;;  %v8299_v45 = vperm.slane %v8258_v43, 2  ;;  %v2006_v54 = vadd.f32 %v8174_v19, %v11616_v22  ;;  %v8324_v19 = vperm.slane %v8258_v43, 5 }
 0x298   :  { %v2171_v10 = vpop.f32.mrf.mxu3  ;;  %v2412_v4 = vadd.f32 %v2411_v25, %v2393_v20  ;;  %v2009_v22 = vadd.f32 %v8180_v48, %v8001_v55 }
 0x299   :  { %v2147_v15 = vpop.f32.mrf.mxu1  ;;  %v8296_v49 = vmul.f32 %v8280_v37, %v2288_v57  ;;  %11614 = vst [vmem:[#allocation65_spill] sm:$0xff] %v8299_v45  ;;  %v2289_v32 = vadd.f32 %v2171_v10, %v2004_v35 }
 0x29a   :  { %11618 = vst [vmem:[#allocation22_spill] sm:$0xff] %v8324_v19 }
 0x29b   :  { %v2394_v28 = vmul.f32 %v8296_v49, %v8296_v49  ;;  %v2372_v62 = vadd.f32 %v2371_v8, %v8296_v49  ;;  %v8313_v10 = vmul.f32 %v8299_v45, %v2289_v32 }
 0x29d   :  { %v2413_v57 = vadd.f32 %v2412_v4, %v2394_v28  ;;  %v2373_v61 = vadd.f32 %v2372_v62, %v8313_v10  ;;  %v2010_v4 = vadd.f32 %v8182_v38, %v8007_v58 }
 0x29e   :  { %v2160_v52 = vpop.f32.mrf.mxu2 }
 0x2a0   :  { %v2173_v24 = vpop.f32.mrf.mxu3 }
 0x2a2   :  { %v2184_v46 = vpop.f32.mrf.mxu0 }
 0x2a3   :  { %v2290_v33 = vadd.f32 %v2184_v46, %v2005_v21  ;;  %v2395_v21 = vmul.f32 %v8313_v10, %v8313_v10 }
 0x2a5   :  { %v2197_v15 = vpop.f32.mrf.mxu1  ;;  %v8316_v60 = vmul.f32 %v8302_v14, %v2290_v33  ;;  %v2414_v47 = vadd.f32 %v2413_v57, %v2395_v21  ;;  %v8341_v33 = vperm.slane %v8258_v43, 6 }
 0x2a6   :  { %v2291_v9 = vadd.f32 %v2197_v15, %v2006_v54  ;;  %v8351_v54 = vperm.slane %v8258_v43, 7 }
 0x2a7   :  { %v2396_v41 = vmul.f32 %v8316_v60, %v8316_v60  ;;  %v2374_v42 = vadd.f32 %v2373_v61, %v8316_v60  ;;  %11619 = vst [vmem:[#allocation23_spill] sm:$0xff] %v8341_v33  ;;  %v2012_v61 = vadd.f32 %v8186_v6, %v8054_v30 }
 0x2a8   :  { %v8335_v46 = vmul.f32 %v8321_v51, %v2291_v9  ;;  %11620 = vst [vmem:[#allocation20_spill] sm:$0xff] %v8351_v54 }
 0x2a9   :  { %v2415_v25 = vadd.f32 %v2414_v47, %v2396_v41 }
 0x2aa   :  { %v2210_v40 = vpop.f32.mrf.mxu2  ;;  %v2186_v50 = vpop.f32.mrf.mxu0  ;;  %v2375_v8 = vadd.f32 %v2374_v42, %v8335_v46  ;;  %v2397_v20 = vmul.f32 %v8335_v46, %v8335_v46 }
 0x2ab   :  { %v2292_v24 = vadd.f32 %v2210_v40, %v2007_v59 }
 0x2ac   :  { %v2223_v52 = vpop.f32.mrf.mxu3  ;;  %v2416_v62 = vadd.f32 %v2415_v25, %v2397_v20 }
 0x2ad   :  { %v2199_v35 = vpop.f32.mrf.mxu1  ;;  %v8338_v15 = vmul.f32 %v8324_v19, %v2292_v24  ;;  %v2293_v32 = vadd.f32 %v2223_v52, %v2008_v23  ;;  %v32_v52 = vld [vmem:[%s10962_s1 + $0x10] sm:$0xf] }
 0x2ae   :  { %v8362_v43 = vperm.slane %v32_v52, 0  ;;  %v2011_v35 = vadd.f32 %v8184_v12, %v8058_v34  ;;  %v8376_v41 = vperm.slane %v32_v52, 1  ;;  %v8382_v25 = vperm.slane %v32_v52, 2 }
 0x2af   :  { %v2398_v26 = vmul.f32 %v8338_v15, %v8338_v15  ;;  %v2376_v59 = vadd.f32 %v2375_v8, %v8338_v15  ;;  %v8357_v57 = vmul.f32 %v8341_v33, %v2293_v32  ;;  %v8384_v20 = vperm.slane %v32_v52, 3 }
 0x2b0   :  { %11621 = vst [vmem:[#allocation21_spill] sm:$0xff] %v8362_v43 }
 0x2b1   :  { %v2417_v55 = vadd.f32 %v2416_v62, %v2398_v26  ;;  %v2377_v58 = vadd.f32 %v2376_v59, %v8357_v57  ;;  %v2399_v38 = vmul.f32 %v8357_v57, %v8357_v57  ;;  %11622 = vst [vmem:[#allocation24_spill] sm:$0xff] %v8376_v41  ;;  %v2363_v62 = vmul.f32 %v8384_v20, %v8189_v7 }
 0x2b2   :  { %v2212_v56 = vpop.f32.mrf.mxu2  ;;  %11623 = vst [vmem:[#allocation25_spill] sm:$0xff] %v8382_v25  ;;  %v5955_v7 = vmov 0  }
 0x2b3   :  { %v2418_v23 = vadd.f32 %v2417_v55, %v2399_v38  ;;  %11624 = vst [vmem:[#allocation26_spill] sm:$0xff] %v8384_v20  ;;  %5512 = vset.pattern.permute.xlu2 %v5955_v7  ;;  %5908 = vset.pattern.permute.xlu0 %v5955_v7 }
 0x2b4   :  { %v2225_v28 = vpop.f32.mrf.mxu3 }
 0x2b6   :  { %v2236_v9 = vpop.f32.mrf.mxu0 }
 0x2b7   :  { %v2249_v40 = vpop.f32.mrf.mxu1  ;;  %v2294_v24 = vadd.f32 %v2236_v9, %v2009_v22 }
 0x2b8   :  { %v2295_v48 = vadd.f32 %v2249_v40, %v2010_v4 }
 0x2b9   :  { %v8365_v50 = vmul.f32 %v8351_v54, %v2294_v24 }
 0x2ba   :  { %v8380_v42 = vmul.f32 %v8362_v43, %v2295_v48 }
 0x2bb   :  { %v2400_v21 = vmul.f32 %v8365_v50, %v8365_v50  ;;  %v2378_v47 = vadd.f32 %v2377_v58, %v8365_v50 }
 0x2bc   :  { %v2401_v28 = vmul.f32 %v8380_v42, %v8380_v42 }
 0x2bd   :  { %v2419_v34 = vadd.f32 %v2418_v23, %v2400_v21  ;;  %v2379_v56 = vadd.f32 %v2378_v47, %v8380_v42 }
 0x2be   :  { %v2262_v32 = vpop.f32.mrf.mxu2  ;;  %v2238_v6 = vpop.f32.mrf.mxu0 }
 0x2bf   :  { %v2296_v12 = vadd.f32 %v2262_v32, %v2011_v35  ;;  %v2251_v26 = vpop.f32.mrf.mxu1  ;;  %v2420_v40 = vadd.f32 %v2419_v34, %v2401_v28  ;;  %v2404_v35 = vmul.f32 %v2363_v62, %v2363_v62 }
 0x2c0   :  { %v2275_v8 = vpop.f32.mrf.mxu3 }
 0x2c1   :  { %v2297_v30 = vadd.f32 %v2275_v8, %v2012_v61  ;;  %v8390_v22 = vmul.f32 %v8376_v41, %v2296_v12 }
 0x2c3   :  { %v8393_v4 = vmul.f32 %v8382_v25, %v2297_v30  ;;  %v2402_v59 = vmul.f32 %v8390_v22, %v8390_v22  ;;  %v2380_v9 = vadd.f32 %v2379_v56, %v8390_v22 }
 0x2c5   :  { %v2381_v52 = vadd.f32 %v2380_v9, %v8393_v4  ;;  %v2403_v24 = vmul.f32 %v8393_v4, %v8393_v4  ;;  %v2421_v55 = vadd.f32 %v2420_v40, %v2402_v59  ;;  %v2299_v9 = vld [vmem:[%s10963_s4] sm:$0xff] }
 0x2c6   :  { %v2264_v48 = vpop.f32.mrf.mxu2 }
 0x2c7   :  { %v2382_v38 = vadd.f32 %v2381_v52, %v2363_v62  ;;  %v2422_v61 = vadd.f32 %v2421_v55, %v2403_v24  ;;  %v2300_v48 = vld [vmem:[%s10964_s5] sm:$0xff] }
 0x2c8   :  { %v2277_v58 = vpop.f32.mrf.mxu3 }
 0x2c9   :  { %2383 = vadd.xlane.f32.xlu0 %v2382_v38  ;;  %v2423_v21 = vadd.f32 %v2422_v61, %v2404_v35 }
 0x2cb   :  { %2424 = vadd.xlane.f32.xlu1 %v2423_v21 }
 0x33c   :  { %v2384_v23 = vpop.xlane.xlu0 %2383 }
 0x33d   :  { %v2426_v47 = vmul.f32 0.0009765625, %v2384_v23 }
 0x33e   :  { %v2425_v32 = vpop.xlane.xlu1 %2424 }
 0x33f   :  { %v2428_v8 = vmul.f32 %v2426_v47, %v2426_v47  ;;  %v2427_v34 = vmul.f32 0.0009765625, %v2425_v32 }
 0x341   :  { %v2429_v12 = vsub.f32 %v2427_v34, %v2428_v8 }
 0x343   :  { %v2430_v30 = vadd.f32 1e-05, %v2429_v12 }
 0x345   :  { %5909 = vrsqrt.f32 %v2430_v30  ;;  %vm2437_vm11 = vweird.f32 %v2430_v30 }
 0x34b   :  { %v5910_v6 = vpop.eup %5909 }
 0x34c   :  { %v2432_v26 = vmul.f32 %v5910_v6, %v2430_v30  ;;  %vm2438_vm10 = vweird.f32 %v5910_v6 }
 0x34d   :  { %vm2439_vm12 = vmor %vm2437_vm11, %vm2438_vm10 }
 0x34e   :  { %v2433_v56 = vmul.f32 %v5910_v6, %v2432_v26 }
 0x350   :  { %v2434_v28 = vmul.f32 0.5, %v2433_v56 }
 0x352   :  { %v2435_v59 = vsub.f32 1.5, %v2434_v28 }
 0x354   :  { %v2436_v40 = vmul.f32 %v5910_v6, %v2435_v59 }
 0x356   :  { %v2440_v52 = vsel %vm2439_vm12, %v5910_v6, %v2436_v40 }
 0x357   :  { %v2441_v24 = vmul.f32 %v2440_v52, %v2299_v9 }
 0x359   :  { %2446 = vperm.xlu2 %5512, %v2441_v24   ;;  %v2442_v55 = vmul.f32 %v2441_v24, %v2426_v47 }
 0x35b   :  { %v2443_v58 = vsub.f32 %v2300_v48, %v2442_v55 }
 0x361   :  { %2471 = vperm.xlu2 %5512, %v2443_v58  }
 0x3b3   :  { %v8409_v38 = vpop.permute.xlu2 %2446 }
 0x3b4   :  { %v2451_v35 = vmul.f32 %v8409_v38, %v8226_v17  ;;  %v2452_v61 = vmul.f32 %v8409_v38, %v8229_v0  ;;  %v2449_v21 = vmul.f32 %v8409_v38, %v8211_v36  ;;  %v2453_v7 = vmul.f32 %v8409_v38, %v8246_v31 }
 0x3b5   :  { %v2450_v47 = vmul.f32 %v8409_v38, %v8206_v1  ;;  %v2455_v0 = vmul.f32 %v8409_v38, %v8271_v53  ;;  %v2454_v31 = vmul.f32 %v8409_v38, %v8249_v16  ;;  %v2468_v12 = vmul.f32 %v8409_v38, %v2363_v62 }
 0x3bb   :  { %v8419_v23 = vpop.permute.xlu2 %2471 }
 0x3bc   :  { %v2476_v32 = vadd.f32 %v8419_v23, %v2451_v35  ;;  %v2477_v8 = vadd.f32 %v8419_v23, %v2452_v61  ;;  %v2474_v17 = vadd.f32 %v8419_v23, %v2449_v21  ;;  %v2478_v34 = vadd.f32 %v8419_v23, %v2453_v7 }
 0x3bd   :  { %v2475_v36 = vadd.f32 %v8419_v23, %v2450_v47  ;;  %v2480_v56 = vadd.f32 %v8419_v23, %v2455_v0  ;;  %v2479_v28 = vadd.f32 %v8419_v23, %v2454_v31  ;;  %v2493_v59 = vadd.f32 %v8419_v23, %v2468_v12 }
 0x3be   :  { %v2496_v30 = vmax.f32 %v2476_v32, 0.0  ;;  %v2497_v1 = vmax.f32 %v2477_v8, 0.0  ;;  %v2494_v6 = vmax.f32 %v2474_v17, 0.0  ;;  %v2498_v26 = vmax.f32 %v2478_v34, 0.0 }
 0x3bf   :  { %v2495_v40 = vmax.f32 %v2475_v36, 0.0  ;;  %v2500_v55 = vmax.f32 %v2480_v56, 0.0  ;;  %v2499_v48 = vmax.f32 %v2479_v28, 0.0  ;;  %v2513_v58 = vmax.f32 %v2493_v59, 0.0 }
 0x3c0   :  { %v8437_v9 = vmul.f32 %v2496_v30, %v8208_v18  ;;  %v8440_v53 = vmul.f32 %v2497_v1, %v8213_v44  ;;  %v8443_v16 = vmul.f32 %v2494_v6, %v8199_v2  ;;  %v8446_v62 = vmul.f32 %v2498_v26, %v8231_v63 }
 0x3c1   :  { %v2456_v35 = vmul.f32 %v8409_v38, %v8274_v11  ;;  %v2457_v61 = vmul.f32 %v8409_v38, %v8293_v39  ;;  %v2515_v21 = vmul.f32 %v2495_v40, %v8196_v5  ;;  %v2459_v7 = vmul.f32 %v8409_v38, %v8313_v10 }
 0x3c2   :  { %v8450_v52 = vpack.i.bf16 %v8440_v53, %v8437_v9  ;;  %v8454_v24 = vpack.i.bf16 %v8443_v16, %v8446_v62  ;;  %v2458_v8 = vmul.f32 %v8409_v38, %v8296_v49  ;;  %v2460_v11 = vmul.f32 %v8409_v38, %v8316_v60 }
 0x3c3   :  { %v2481_v47 = vadd.f32 %v8419_v23, %v2456_v35  ;;  %v2482_v32 = vadd.f32 %v8419_v23, %v2457_v61  ;;  %v2520_v39 = vmul.f32 %v2500_v55, %v8251_v29  ;;  %v8477_v17 = vmul.f32 %v2499_v48, %v8233_v3 }
 0x3c4   :  { %5539 = vrot.lane.b32.xlu1 %v8450_v52, %s5949_s19  ;;  %5514 = vrot.lane.b32.xlu2 %v8450_v52, %s5947_s17  ;;  %v8480_v34 = vmul.f32 %v2513_v58, %v8384_v20  ;;  %v2484_v10 = vadd.f32 %v8419_v23, %v2459_v7  ;;  %v8485_v31 = vpack.i.bf16 %v8443_v16, %v8440_v53 }
 0x3c5   :  { %5534 = vrot.lane.b32.xlu0 %v8454_v24, %s5948_s18  ;;  %v2501_v0 = vmax.f32 %v2481_v47, 0.0  ;;  %v2502_v36 = vmax.f32 %v2482_v32, 0.0  ;;  %v2483_v49 = vadd.f32 %v8419_v23, %v2458_v8  ;;  %v8489_v60 = vpack.i.bf16 %v8437_v9, %v2515_v21 }
 0x3c6   :  { %v2485_v12 = vadd.f32 %v8419_v23, %v2460_v11  ;;  %v2463_v30 = vmul.f32 %v8409_v38, %v8357_v57  ;;  %v2504_v1 = vmax.f32 %v2484_v10, 0.0  ;;  %v5553_v26 = vpack.i.bf16 %v2520_v39, %v2515_v21 }
 0x3c7   :  { %v2503_v6 = vmax.f32 %v2483_v49, 0.0  ;;  %v8496_v28 = vpack.i.bf16 %v8477_v17, %v8480_v34  ;;  %v2521_v40 = vmul.f32 %v2501_v0, %v8253_v13  ;;  %v2522_v57 = vmul.f32 %v2502_v36, %v8277_v27 }
 0x3c8   :  { %v2505_v56 = vmax.f32 %v2485_v12, 0.0  ;;  %v2488_v59 = vadd.f32 %v8419_v23, %v2463_v30  ;;  %v2524_v48 = vmul.f32 %v2504_v1, %v8299_v45  ;;  %v2462_v35 = vmul.f32 %v8409_v38, %v8338_v15 }
 0x3c9   :  { %v2523_v55 = vmul.f32 %v2503_v6, %v8280_v37  ;;  %v8516_v47 = vpack.i.bf16 %v2522_v57, %v2521_v40  ;;  %v8518_v32 = vpack.i.bf16 %v2521_v40, %v2520_v39  ;;  %v2464_v10 = vmul.f32 %v8409_v38, %v8365_v50 }
 0x3ca   :  { %v8514_v61 = vmul.f32 %v2505_v56, %v8302_v14  ;;  %v2508_v7 = vmax.f32 %v2488_v59, 0.0  ;;  %v2487_v8 = vadd.f32 %v8419_v23, %v2462_v35  ;;  %v2467_v15 = vmul.f32 %v8409_v38, %v8393_v4 }
 0x3cb   :  { %v8509_v58 = vpack.i.bf16 %v2523_v55, %v8446_v62  ;;  %v2489_v12 = vadd.f32 %v8419_v23, %v2464_v10  ;;  %v2466_v1 = vmul.f32 %v8409_v38, %v8390_v22  ;;  %v8546_v59 = vpack.c.bf16 %v2515_v21, %v8443_v16 }
 0x3cc   :  { %5564 = vrot.lane.b32.xlu1 %v8454_v24, %s5950_s20  ;;  %5519 = vrot.lane.b32.xlu2 %v8454_v24, %s5947_s17  ;;  %v2528_v11 = vmul.f32 %v2508_v7, %v8341_v33  ;;  %v8525_v0 = vpack.i.bf16 %v8514_v61, %v2524_v48  ;;  %v2507_v36 = vmax.f32 %v2487_v8, 0.0  ;;  %v2492_v50 = vadd.f32 %v8419_v23, %v2467_v15 }
 0x3cd   :  { %5554 = vrot.lane.b32.xlu0 %v5553_v26, %s5949_s19  ;;  %v2509_v6 = vmax.f32 %v2489_v12, 0.0  ;;  %v8550_v35 = vpack.c.bf16 %v8440_v53, %v8437_v9  ;;  %v2491_v7 = vadd.f32 %v8419_v23, %v2466_v1  ;;  %v8583_v15 = vpack.c.bf16 %v2521_v40, %v2520_v39 }
 0x3ce   :  { %v8533_v49 = vmul.f32 %v2507_v36, %v8324_v19  ;;  %v8538_v30 = vpack.i.bf16 %v2528_v11, %v2523_v55  ;;  %v2512_v56 = vmax.f32 %v2492_v50, 0.0  ;;  %v8581_v36 = vpack.c.bf16 %v8477_v17, %v8446_v62 }
 0x3cf   :  { %v8554_v8 = vmul.f32 %v2509_v6, %v8351_v54  ;;  %v2511_v22 = vmax.f32 %v2491_v7, 0.0  ;;  %v8586_v12 = vpack.c.bf16 %v8514_v61, %v2524_v48  ;;  %v8588_v50 = vpack.c.bf16 %v2523_v55, %v2522_v57 }
 0x3d0   :  { %v8543_v4 = vpack.i.bf16 %v8533_v49, %v2522_v57  ;;  %v8557_v10 = vmul.f32 %v2512_v56, %v8382_v25  ;;  %v3314_v33 = vunpack.c.l.b16 %v8546_v59  ;;  %v3319_v63 = vunpack.c.h.b16 %v8581_v36 }
 0x3d1   :  { %v8566_v9 = vmul.f32 %v2511_v22, %v8376_v41  ;;  %v8569_v53 = vpack.i.bf16 %v8554_v8, %v2528_v11  ;;  %v8597_v1 = vpack.c.bf16 %v8554_v8, %v2528_v11 }
 0x3d2   :  { %v8573_v16 = vpack.i.bf16 %v8557_v10, %v8533_v49  ;;  %v8601_v62 = vpack.c.bf16 %v8480_v34, %v8557_v10 }
 0x3d3   :  { %v8577_v21 = vpack.i.bf16 %v8566_v9, %v8480_v34 }
 0x3d4   :  { %5579 = vrot.lane.b32.xlu1 %v8485_v31, %s5951_s21  ;;  %5524 = vrot.lane.b32.xlu2 %v5553_v26, %s5947_s17 }
 0x3d5   :  { %5569 = vrot.lane.b32.xlu0 %v5553_v26, %s5950_s20 }
 0x3dc   :  { %5594 = vrot.lane.b32.xlu1 %v8496_v28, %s5951_s21  ;;  %5529 = vrot.lane.b32.xlu2 %v8450_v52, %s5948_s18 }
 0x3dd   :  { %5584 = vrot.lane.b32.xlu0 %v8489_v60, %s5952_s22 }
 0x3e4   :  { %5609 = vrot.lane.b32.xlu1 %v8485_v31, %s5953_s27  ;;  %5544 = vrot.lane.b32.xlu2 %v8454_v24, %s5949_s19  ;;  %v5638_v24 = vpack.i.bf16 %v2524_v48, %v8477_v17 }
 0x3e5   :  { %5599 = vrot.lane.b32.xlu0 %v8496_v28, %s5952_s22 }
 0x3ec   :  { %5624 = vrot.lane.b32.xlu1 %v8516_v47, %s5947_s17  ;;  %5549 = vrot.lane.b32.xlu2 %v5553_v26, %s5948_s18 }
 0x3ed   :  { %5614 = vrot.lane.b32.xlu0 %v8489_v60, %s5954_s28 }
 0x3f4   :  { %5639 = vrot.lane.b32.xlu1 %v5638_v24, %s5947_s17  ;;  %5559 = vrot.lane.b32.xlu2 %v8450_v52, %s5950_s20  ;;  %v2461_v52 = vmul.f32 %v8409_v38, %v8335_v46 }
 0x3f5   :  { %5629 = vrot.lane.b32.xlu0 %v8496_v28, %s5953_s27 }
 0x3f6   :  { %v2486_v39 = vadd.f32 %v8419_v23, %v2461_v52 }
 0x3f8   :  { %v2506_v17 = vmax.f32 %v2486_v39, 0.0 }
 0x3fa   :  { %v8639_v34 = vmul.f32 %v2506_v17, %v8321_v51 }
 0x3fc   :  { %5654 = vrot.lane.b32.xlu1 %v5638_v24, %s5948_s18  ;;  %5574 = vrot.lane.b32.xlu2 %v8489_v60, %s5951_s21 }
 0x3fd   :  { %5644 = vrot.lane.b32.xlu0 %v8516_v47, %s5948_s18 }
 0x404   :  { %5669 = vrot.lane.b32.xlu1 %v5638_v24, %s5950_s20  ;;  %5589 = vrot.lane.b32.xlu2 %v8485_v31, %s5952_s22 }
 0x405   :  { %5659 = vrot.lane.b32.xlu0 %v5638_v24, %s5949_s19 }
 0x40c   :  { %5684 = vrot.lane.b32.xlu1 %v8509_v58, %s5951_s21  ;;  %5604 = vrot.lane.b32.xlu2 %v8489_v60, %s5953_s27  ;;  %v8643_v60 = vpack.i.bf16 %v8639_v34, %v8514_v61 }
 0x40d   :  { %5674 = vrot.lane.b32.xlu0 %v8518_v32, %s5951_s21 }
 0x414   :  { %5699 = vrot.lane.b32.xlu1 %v8518_v32, %s5954_s28  ;;  %5619 = vrot.lane.b32.xlu2 %v8485_v31, %s5954_s28 }
 0x415   :  { %5689 = vrot.lane.b32.xlu0 %v8509_v58, %s5952_s22 }
 0x41c   :  { %5714 = vrot.lane.b32.xlu1 %v8509_v58, %s5954_s28  ;;  %5634 = vrot.lane.b32.xlu2 %v8496_v28, %s5954_s28 }
 0x41d   :  { %5704 = vrot.lane.b32.xlu0 %v8643_v60, %s5947_s17 }
 0x41e   :  { %v5515_v46 = vpop.permute.xlu2 %5514 }
 0x41f   :  { %v5517_v31 = vunpack.i.h.bf16 %v5515_v46  ;;  %v5516_v26 = vunpack.i.l.bf16 %v5515_v46 }
 0x421   :  { %v3090_v55 = vsel %vm602_vm1, %v5516_v26, %v5517_v31 }
 0x424   :  { %5729 = vrot.lane.b32.xlu1 %v8643_v60, %s5949_s19  ;;  %5649 = vrot.lane.b32.xlu2 %v8516_v47, %s5949_s19 }
 0x425   :  { %5719 = vrot.lane.b32.xlu0 %v8538_v30, %s5947_s17 }
 0x426   :  { %v8657_v40 = vpop.permute.xlu2 %5519 }
 0x427   :  { %11625 = vst [vmem:[#allocation27_spill] sm:$0xff] %v8657_v40  ;;  %v11131_v57 = vunpack.i.l.bf16 %v8657_v40  ;;  %v11129_v24 = vunpack.i.h.bf16 %v8657_v40 }
 0x429   :  { %v3089_v48 = vsel %vm602_vm1, %v5517_v31, %v11131_v57 }
 0x42a   :  { %v3095_v61 = vpack.c.bf16 %v3089_v48, %v3090_v55 }
 0x42c   :  { %5744 = vrot.lane.b32.xlu1 %v8643_v60, %s5950_s20  ;;  %5664 = vrot.lane.b32.xlu2 %v8516_v47, %s5950_s20  ;;  %v3516_v11 = vunpack.c.l.b16 %v3095_v61  ;;  %v3517_v6 = vunpack.c.h.b16 %v3095_v61 }
 0x42d   :  { %5734 = vrot.lane.b32.xlu0 %v8538_v30, %s5948_s18 }
 0x42e   :  { %v8672_v56 = vpop.permute.xlu2 %5524  ;;  %v3536_v7 = vpack.c.b16 %v3516_v11, %v3516_v11  ;;  %v3537_v22 = vpack.c.b16 %v3517_v6, %v3517_v6 }
 0x42f   :  { %v5526_v52 = vunpack.i.l.bf16 %v8672_v56 }
 0x430   :  { %v8677_v39 = vsel %vm1083_vm3, %v3536_v7, 0  ;;  %v8680_v17 = vsel %vm1083_vm3, %v3537_v22, 0 }
 0x431   :  { %11627 = vst [vmem:[#allocation28_spill] sm:$0xff] %v8677_v39  ;;  %v3091_v47 = vsel %vm602_vm1, %v5526_v52, %v5516_v26  ;;  %v3092_v46 = vsel %vm602_vm1, %v11129_v24, %v5526_v52  ;;  %3967 = vmatpush.bf16.msrb.mxu2 %v8677_v39  ;;  %3980 = vmatpush.bf16.msrb.mxu3 %v8680_v17 }
 0x432   :  { %11628 = vst [vmem:[#allocation29_spill] sm:$0xff] %v8680_v17  ;;  %v3094_v31 = vpack.c.bf16 %v3091_v47, %v3092_v46  ;;  %v2465_v47 = vmul.f32 %v8409_v38, %v8380_v42 }
 0x434   :  { %5759 = vrot.lane.b32.xlu1 %v8525_v0, %s5952_s22  ;;  %5679 = vrot.lane.b32.xlu2 %v8518_v32, %s5952_s22  ;;  %v3514_v55 = vunpack.c.l.b16 %v3094_v31  ;;  %v3515_v48 = vunpack.c.h.b16 %v3094_v31 }
 0x435   :  { %5749 = vrot.lane.b32.xlu0 %v8538_v30, %s5950_s20 }
 0x436   :  { %v5540_v26 = vpop.permute.xlu1 %5539  ;;  %v5530_v61 = vpop.permute.xlu2 %5529  ;;  %v3534_v11 = vpack.c.b16 %v3514_v55, %v3514_v55  ;;  %v3535_v6 = vpack.c.b16 %v3515_v48, %v3515_v48  ;;  %v2490_v55 = vadd.f32 %v8419_v23, %v2465_v47 }
 0x437   :  { %v8696_v7 = vpop.permute.xlu0 %5534  ;;  %v5532_v22 = vunpack.i.h.bf16 %v5530_v61  ;;  %v5531_v52 = vunpack.i.l.bf16 %v5530_v61  ;;  %v5542_v38 = vunpack.i.h.bf16 %v5540_v26  ;;  %v5541_v61 = vunpack.i.l.bf16 %v5540_v26 }
 0x438   :  { %11629 = vst [vmem:[#allocation30_spill] sm:$0xff] %v8696_v7  ;;  %v11130_v46 = vunpack.i.l.bf16 %v8696_v7  ;;  %v8702_v24 = vsel %vm1083_vm3, %v3534_v11, 0  ;;  %v8705_v31 = vsel %vm1083_vm3, %v3535_v6, 0  ;;  %v2510_v23 = vmax.f32 %v2490_v55, 0.0 }
 0x439   :  { %11630 = vst [vmem:[#allocation31_spill] sm:$0xff] %v8702_v24  ;;  %3941 = vmatpush.bf16.msrb.mxu0 %v8702_v24  ;;  %3954 = vmatpush.bf16.msrb.mxu1 %v8705_v31  ;;  %v2950_v42 = vsel %vm460_vm2, %v5531_v52, %v5532_v22  ;;  %v11142_v19 = vunpack.i.h.bf16 %v8696_v7 }
 0x43a   :  { %11631 = vst [vmem:[#allocation32_spill] sm:$0xff] %v8705_v31  ;;  %v2949_v48 = vsel %vm460_vm2, %v5532_v22, %v11130_v46 }
 0x43b   :  { %v2955_v11 = vpack.c.bf16 %v2949_v48, %v2950_v42  ;;  %v8738_v48 = vmul.f32 %v2510_v23, %v8362_v43 }
 0x43c   :  { %5774 = vrot.lane.b32.xlu1 %v8525_v0, %s5953_s27  ;;  %5694 = vrot.lane.b32.xlu2 %v8518_v32, %s5953_s27  ;;  %v3020_v32 = vsel %vm531_vm0, %v5541_v61, %v5542_v38 }
 0x43d   :  { %5764 = vrot.lane.b32.xlu0 %v8543_v4, %s5951_s21  ;;  %v3416_v55 = vunpack.c.l.b16 %v2955_v11  ;;  %v3417_v25 = vunpack.c.h.b16 %v2955_v11  ;;  %v3315_v11 = vunpack.c.h.b16 %v8546_v59 }
 0x43e   :  { %v8722_v6 = vpop.permute.xlu1 %5564  ;;  %v8724_v47 = vpop.permute.xlu2 %5544 }
 0x43f   :  { %11632 = vst [vmem:[#allocation33_spill] sm:$0xff] %v8722_v6  ;;  %v8726_v46 = vpop.permute.xlu0 %5554  ;;  %v11137_v57 = vunpack.i.l.bf16 %v8724_v47  ;;  %v11634_v41 = vunpack.i.h.bf16 %v8724_v47  ;;  %v3437_v43 = vpack.c.b16 %v3417_v25, %v3417_v25  ;;  %v11150_v45 = vunpack.i.h.bf16 %v8722_v6 }
 0x440   :  { %11633 = vst [vmem:[#allocation34_spill] sm:$0xff] %v8724_v47  ;;  %v5556_v20 = vunpack.i.l.bf16 %v8726_v46  ;;  %v11151_v37 = vunpack.i.l.bf16 %v8722_v6 }
 0x441   :  { %v3019_v26 = vsel %vm531_vm0, %v5542_v38, %v11137_v57 }
 0x442   :  { %v3025_v42 = vpack.c.bf16 %v3019_v26, %v3020_v32  ;;  %v3021_v22 = vsel %vm531_vm0, %v5556_v20, %v5541_v61  ;;  %v3022_v54 = vsel %vm531_vm0, %v11634_v41, %v5556_v20  ;;  %v3316_v32 = vunpack.c.l.b16 %v8550_v35 }
 0x443   :  { %v3436_v61 = vpack.c.b16 %v3416_v55, %v3416_v55  ;;  %v8757_v41 = vpack.i.bf16 %v8738_v48, %v8554_v8  ;;  %v3317_v20 = vunpack.c.h.b16 %v8550_v35  ;;  %v3024_v26 = vpack.c.bf16 %v3021_v22, %v3022_v54 }
 0x444   :  { %5789 = vrot.lane.b32.xlu1 %v8543_v4, %s5953_s27  ;;  %5709 = vrot.lane.b32.xlu2 %v8509_v58, %s5953_s27  ;;  %v3466_v38 = vunpack.c.l.b16 %v3025_v42  ;;  %v3467_v23 = vunpack.c.h.b16 %v3025_v42  ;;  %v8774_v54 = vpack.c.b16 %v3314_v33, %v3314_v33  ;;  %v8776_v35 = vpack.c.b16 %v3315_v11, %v3315_v11 }
 0x445   :  { %5779 = vrot.lane.b32.xlu0 %v8525_v0, %s5954_s28  ;;  %v3465_v33 = vunpack.c.h.b16 %v3024_v26  ;;  %v8792_v11 = vpack.i.bf16 %v8738_v48, %v8557_v10 }
 0x446   :  { %v8760_v57 = vpop.permute.xlu1 %5579  ;;  %v8762_v58 = vpop.permute.xlu2 %5549  ;;  %v3486_v42 = vpack.c.b16 %v3466_v38, %v3466_v38  ;;  %v3487_v59 = vpack.c.b16 %v3467_v23, %v3467_v23  ;;  %v8786_v38 = vpack.c.b16 %v3316_v32, %v3316_v32  ;;  %v3464_v23 = vunpack.c.l.b16 %v3024_v26 }
 0x447   :  { %v8765_v51 = vpop.permute.xlu0 %5569  ;;  %v5551_v55 = vunpack.i.l.bf16 %v8762_v58  ;;  %v8800_v32 = vpack.i.bf16 %v8566_v9, %v8639_v34 }
 0x448   :  { %v8769_v14 = vsel %vm1083_vm3, %v3436_v61, %v3486_v42  ;;  %v8772_v8 = vsel %vm1083_vm3, %v3437_v43, %v3487_v59  ;;  %v8788_v61 = vpack.c.b16 %v3317_v20, %v3317_v20  ;;  %v5571_v26 = vunpack.i.l.bf16 %v8765_v51 }
 0x449   :  { %11635 = vst [vmem:[#allocation35_spill] sm:$0xff] %v8769_v14  ;;  %v2951_v25 = vsel %vm460_vm2, %v5551_v55, %v5531_v52  ;;  %v2952_v22 = vsel %vm460_vm2, %v11142_v19, %v5551_v55  ;;  %3968 = vmatpush.bf16.msrb.mxu2 %v8769_v14  ;;  %3981 = vmatpush.bf16.msrb.mxu3 %v8772_v8  ;;  %v3318_v59 = vunpack.c.l.b16 %v8581_v36 }
 0x44a   :  { %11636 = vst [vmem:[#allocation41_spill] sm:$0xff] %v8772_v8  ;;  %v2954_v43 = vpack.c.bf16 %v2951_v25, %v2952_v22  ;;  %v3484_v22 = vpack.c.b16 %v3464_v23, %v3464_v23  ;;  %v3485_v19 = vpack.c.b16 %v3465_v33, %v3465_v33  ;;  %v3320_v23 = vunpack.c.l.b16 %v8583_v15 }
 0x44b   :  { %v2882_v33 = vsel %vm389_vm4, %v11150_v45, %v5571_v26  ;;  %v3322_v45 = vunpack.c.l.b16 %v8588_v50 }
 0x44c   :  { %5804 = vrot.lane.b32.xlu1 %v8757_v41, %s5948_s18  ;;  %5724 = vrot.lane.b32.xlu2 %v8643_v60, %s5948_s18  ;;  %v3414_v52 = vunpack.c.l.b16 %v2954_v43  ;;  %v3415_v42 = vunpack.c.h.b16 %v2954_v43 }
 0x44d   :  { %5794 = vrot.lane.b32.xlu0 %v8543_v4, %s5954_s28 }
 0x44e   :  { %v8808_v55 = vpop.permute.xlu1 %5594  ;;  %v5560_v25 = vpop.permute.xlu2 %5559  ;;  %v3434_v60 = vpack.c.b16 %v3414_v52, %v3414_v52  ;;  %v3435_v43 = vpack.c.b16 %v3415_v42, %v3415_v42 }
 0x44f   :  { %v8812_v27 = vpop.permute.xlu0 %5584  ;;  %v5562_v13 = vunpack.i.h.bf16 %v5560_v25  ;;  %v5561_v29 = vunpack.i.l.bf16 %v5560_v25 }
 0x450   :  { %v8815_v3 = vsel %vm1083_vm3, %v3434_v60, %v3484_v22  ;;  %v8818_v20 = vsel %vm1083_vm3, %v3435_v43, %v3485_v19  ;;  %v3321_v60 = vunpack.c.h.b16 %v8583_v15  ;;  %v3324_v22 = vunpack.c.l.b16 %v8586_v12 }
 0x451   :  { %11637 = vst [vmem:[#allocation43_spill] sm:$0xff] %v8815_v3  ;;  %v2879_v52 = vsel %vm389_vm4, %v5562_v13, %v11151_v37  ;;  %v2880_v42 = vsel %vm389_vm4, %v5561_v29, %v5562_v13  ;;  %v2881_v19 = vsel %vm389_vm4, %v5571_v26, %v5561_v29  ;;  %3942 = vmatpush.bf16.msrb.mxu0 %v8815_v3  ;;  %v3325_v43 = vunpack.c.h.b16 %v8586_v12 }
 0x452   :  { %11638 = vst [vmem:[#allocation37_spill] sm:$0xff] %v8818_v20  ;;  %v2884_v36 = vpack.c.bf16 %v2881_v19, %v2882_v33  ;;  %v2885_v25 = vpack.c.bf16 %v2879_v52, %v2880_v42  ;;  %3955 = vmatpush.bf16.msrb.mxu1 %v8818_v20  ;;  %v8846_v15 = vpack.c.b16 %v3318_v59, %v3318_v59  ;;  %v3323_v42 = vunpack.c.h.b16 %v8588_v50 }
 0x453   :  { %v8848_v52 = vpack.c.b16 %v3319_v63, %v3319_v63  ;;  %v8850_v12 = vpack.c.b16 %v3320_v23, %v3320_v23  ;;  %v8857_v5 = vpack.c.b16 %v3321_v60, %v3321_v60  ;;  %v2820_v63 = vpack.c.bf16 %v8533_v49, %v8639_v34 }
 0x454   :  { %5819 = vrot.lane.b32.xlu1 %v8573_v16, %s5949_s19  ;;  %5739 = vrot.lane.b32.xlu2 %v8538_v30, %s5949_s19  ;;  %v3364_v29 = vunpack.c.l.b16 %v2884_v36  ;;  %v3365_v13 = vunpack.c.h.b16 %v2884_v36  ;;  %v3366_v26 = vunpack.c.l.b16 %v2885_v25  ;;  %v3367_v33 = vunpack.c.h.b16 %v2885_v25 }
 0x455   :  { %5809 = vrot.lane.b32.xlu0 %v8757_v41, %s5949_s19  ;;  %v8863_v59 = vpack.c.bf16 %v8566_v9, %v8738_v48  ;;  %v5582_v50 = vunpack.i.h.bf16 %v8760_v57  ;;  %v8877_v49 = vpack.c.b16 %v3324_v22, %v3324_v22  ;;  %v3329_v22 = vunpack.c.h.b16 %v8597_v1 }
 0x456   :  { %v8853_v19 = vpop.permute.xlu1 %5609  ;;  %v5575_v37 = vpop.permute.xlu2 %5574  ;;  %v3384_v44 = vpack.c.b16 %v3364_v29, %v3364_v29  ;;  %v3385_v30 = vpack.c.b16 %v3365_v13, %v3365_v13  ;;  %v3386_v18 = vpack.c.b16 %v3366_v26, %v3366_v26  ;;  %v3387_v36 = vpack.c.b16 %v3367_v33, %v3367_v33 }
 0x457   :  { %v8855_v2 = vpop.permute.xlu0 %5599  ;;  %v5576_v25 = vunpack.i.l.bf16 %v5575_v37  ;;  %v5577_v60 = vunpack.i.h.bf16 %v5575_v37  ;;  %v8879_v26 = vpack.c.b16 %v3325_v43, %v3325_v43  ;;  %v8881_v33 = vpack.c.b16 %v3322_v45, %v3322_v45 }
 0x458   :  { %v8869_v29 = vsel %vm1083_vm3, %v8774_v54, %v3384_v44  ;;  %v8873_v13 = vsel %vm1083_vm3, %v8776_v35, %v3385_v30  ;;  %v8887_v44 = vsel %vm1083_vm3, %v8786_v38, %v3386_v18  ;;  %v8891_v37 = vsel %vm1083_vm3, %v8788_v61, %v3387_v36 }
 0x459   :  { %11639 = vst [vmem:[#allocation39_spill] sm:$0xff] %v8869_v29  ;;  %3943 = vmatpush.bf16.msrb.mxu0 %v8869_v29  ;;  %3956 = vmatpush.bf16.msrb.mxu1 %v8873_v13  ;;  %v2732_v23 = vsel %vm237_vm6, %v5582_v50, %v5576_v25  ;;  %v8893_v54 = vpack.c.b16 %v3323_v42, %v3323_v42  ;;  %v11160_v35 = vunpack.i.l.bf16 %v8760_v57  ;;  %v3328_v45 = vunpack.c.l.b16 %v8597_v1 }
 0x45a   :  { %11640 = vst [vmem:[#allocation40_spill] sm:$0xff] %v8873_v13  ;;  %3969 = vmatpush.bf16.msrb.mxu2 %v8887_v44  ;;  %3982 = vmatpush.bf16.msrb.mxu3 %v8891_v37  ;;  %v3326_v43 = vunpack.c.l.b16 %v2820_v63  ;;  %v11643_v18 = vunpack.i.l.bf16 %v8808_v55  ;;  %v3327_v61 = vunpack.c.h.b16 %v2820_v63  ;;  %v3330_v42 = vunpack.c.l.b16 %v8863_v59 }
 0x45b   :  { %11641 = vst [vmem:[#allocation42_spill] sm:$0xff] %v8887_v44  ;;  %v3331_v30 = vunpack.c.h.b16 %v8863_v59  ;;  %v2730_v1 = vsel %vm237_vm6, %v5577_v60, %v11160_v35  ;;  %v2731_v36 = vsel %vm237_vm6, %v5576_v25, %v5577_v60  ;;  %v5586_v63 = vunpack.i.l.bf16 %v8812_v27 }
 0x45c   :  { %11642 = vst [vmem:[#allocation36_spill] sm:$0xff] %v8891_v37  ;;  %v2733_v38 = vsel %vm237_vm6, %v11643_v18, %v5582_v50  ;;  %5834 = vrot.lane.b32.xlu1 %v8569_v53, %s5951_s21  ;;  %5754 = vrot.lane.b32.xlu2 %v8525_v0, %s5951_s21  ;;  %v3332_v18 = vunpack.c.l.b16 %v8601_v62  ;;  %v5587_v0 = vunpack.i.h.bf16 %v8812_v27  ;;  %v5527_v27 = vunpack.i.h.bf16 %v8672_v56 }
 0x45d   :  { %v2734_v50 = vpack.c.bf16 %v2732_v23, %v2733_v38  ;;  %5824 = vrot.lane.b32.xlu0 %v8757_v41, %s5950_s20  ;;  %v2735_v29 = vpack.c.bf16 %v2730_v1, %v2731_v36  ;;  %v8934_v59 = vpack.c.b16 %v3328_v45, %v3328_v45  ;;  %v8936_v8 = vpack.c.b16 %v3329_v22, %v3329_v22 }
 0x45e   :  { %v8922_v37 = vpop.permute.xlu1 %5624  ;;  %v8924_v44 = vpop.permute.xlu2 %5589  ;;  %v11644_v25 = vunpack.i.l.bf16 %v8855_v2  ;;  %v2801_v13 = vsel %vm308_vm5, %v5586_v63, %v5587_v0  ;;  %v8950_v22 = vpack.c.b16 %v3326_v43, %v3326_v43  ;;  %v8964_v43 = vpack.c.b16 %v3330_v42, %v3330_v42 }
 0x45f   :  { %v5626_v23 = vunpack.i.l.bf16 %v8922_v37  ;;  %v8929_v60 = vpop.permute.xlu0 %5614  ;;  %v5592_v38 = vunpack.i.h.bf16 %v8924_v44  ;;  %v3214_v20 = vunpack.c.l.b16 %v2734_v50  ;;  %v3215_v3 = vunpack.c.h.b16 %v2734_v50 }
 0x460   :  { %v11645_v56 = vunpack.i.l.bf16 %v8924_v44  ;;  %11646 = vst [vmem:[#allocation38_spill] sm:$0xff] %v8950_v22  ;;  %v11647_v1 = vunpack.i.h.bf16 %v8922_v37 }
 0x461   :  { %v2802_v35 = vsel %vm308_vm5, %v5592_v38, %v5586_v63  ;;  %v2803_v14 = vsel %vm308_vm5, %v11644_v25, %v5592_v38  ;;  %v3086_v25 = vsel %vm602_vm1, %v5527_v27, %v5626_v23  ;;  %v8958_v38 = vpack.c.b16 %v3327_v61, %v3327_v61  ;;  %11649 = vst [vmem:[#allocation44_spill] sm:$0xff] %v8964_v43 }
 0x462   :  { %v2804_v17 = vpack.c.bf16 %v2802_v35, %v2803_v14  ;;  %v2800_v45 = vsel %vm308_vm5, %v5587_v0, %v11645_v56  ;;  %v3085_v36 = vsel %vm602_vm1, %v5626_v23, %v11647_v1  ;;  %v8966_v0 = vpack.c.b16 %v3331_v30, %v3331_v30 }
 0x463   :  { %v2805_v50 = vpack.c.bf16 %v2800_v45, %v2801_v13  ;;  %11648 = vst [vmem:[#allocation46_spill] sm:$0xff] %v8958_v38  ;;  %v3234_v63 = vpack.c.b16 %v3214_v20, %v3214_v20  ;;  %v3235_v23 = vpack.c.b16 %v3215_v3, %v3215_v3  ;;  %v3216_v13 = vunpack.c.l.b16 %v2735_v29 }
 0x464   :  { %5849 = vrot.lane.b32.xlu1 %v8800_v32, %s5952_s22  ;;  %5769 = vrot.lane.b32.xlu2 %v8543_v4, %s5952_s22  ;;  %v3264_v14 = vunpack.c.l.b16 %v2804_v17  ;;  %v3265_v35 = vunpack.c.h.b16 %v2804_v17  ;;  %11650 = vst [vmem:[#allocation45_spill] sm:$0xff] %v8966_v0  ;;  %v3217_v61 = vunpack.c.h.b16 %v2735_v29  ;;  %v3097_v56 = vpack.c.bf16 %v3085_v36, %v3086_v25 }
 0x465   :  { %5839 = vrot.lane.b32.xlu0 %v8569_v53, %s5952_s22  ;;  %v3266_v4 = vunpack.c.l.b16 %v2805_v50  ;;  %v3267_v0 = vunpack.c.h.b16 %v2805_v50  ;;  %v11182_v43 = vunpack.i.l.bf16 %v8853_v19  ;;  %v8982_v29 = vpack.c.b16 %v3332_v18, %v3332_v18 }
 0x466   :  { %v8970_v45 = vpop.permute.xlu1 %5639  ;;  %v5605_v1 = vpop.permute.xlu2 %5604  ;;  %v3284_v39 = vpack.c.b16 %v3264_v14, %v3264_v14  ;;  %v3285_v31 = vpack.c.b16 %v3265_v35, %v3265_v35  ;;  %v11654_v25 = vunpack.i.l.bf16 %v8657_v40  ;;  %v3236_v50 = vpack.c.b16 %v3216_v13, %v3216_v13 }
 0x467   :  { %v5641_v17 = vunpack.i.l.bf16 %v8970_v45  ;;  %v8973_v42 = vpop.permute.xlu0 %5629  ;;  %v5607_v30 = vunpack.i.h.bf16 %v5605_v1  ;;  %v5606_v24 = vunpack.i.l.bf16 %v5605_v1  ;;  %11653 = vst [vmem:[#allocation47_spill] sm:$0xff] %v8982_v29  ;;  %v3237_v35 = vpack.c.b16 %v3217_v61, %v3217_v61 }
 0x468   :  { %v8977_v3 = vsel %vm1083_vm3, %v3234_v63, %v3284_v39  ;;  %v8980_v20 = vsel %vm1083_vm3, %v3235_v23, %v3285_v31  ;;  %v11181_v39 = vunpack.i.l.bf16 %v8973_v42  ;;  %v3287_v63 = vpack.c.b16 %v3267_v0, %v3267_v0 }
 0x469   :  { %11651 = vst [vmem:[#allocation49_spill] sm:$0xff] %v8977_v3  ;;  %v3087_v36 = vsel %vm602_vm1, %v5641_v17, %v5527_v27  ;;  %v3088_v14 = vsel %vm602_vm1, %v11654_v25, %v5641_v17  ;;  %3944 = vmatpush.bf16.msrb.mxu0 %v8977_v3  ;;  %v2590_v31 = vsel %vm95_vm8, %v5607_v30, %v11182_v43  ;;  %v3520_v23 = vunpack.c.l.b16 %v3097_v56 }
 0x46a   :  { %11652 = vst [vmem:[#allocation50_spill] sm:$0xff] %v8980_v20  ;;  %v8991_v1 = vpack.c.bf16 %v3087_v36, %v3088_v14  ;;  %v2591_v18 = vsel %vm95_vm8, %v5606_v24, %v5607_v30  ;;  %3957 = vmatpush.bf16.msrb.mxu1 %v8980_v20  ;;  %v3286_v27 = vpack.c.b16 %v3266_v4, %v3266_v4  ;;  %v3521_v17 = vunpack.c.h.b16 %v3097_v56 }
 0x46b   :  { %v5612_v13 = vunpack.i.h.bf16 %v8853_v19  ;;  %v5617_v61 = vunpack.i.h.bf16 %v8929_v60  ;;  %v5616_v36 = vunpack.i.l.bf16 %v8929_v60  ;;  %v11655_v30 = vunpack.c.h.b16 %v8601_v62 }
 0x46c   :  { %5864 = vrot.lane.b32.xlu1 %v8577_v21, %s5947_s17  ;;  %5784 = vrot.lane.b32.xlu2 %v8757_v41, %s5947_s17  ;;  %v2595_v56 = vpack.c.bf16 %v2590_v31, %v2591_v18  ;;  %v9015_v4 = vsel %vm1083_vm3, %v3236_v50, %v3286_v27  ;;  %v9018_v14 = vsel %vm1083_vm3, %v3237_v35, %v3287_v63  ;;  %v5552_v41 = vunpack.i.h.bf16 %v8762_v58 }
 0x46d   :  { %v9011_v25 = vpack.c.b16 %v11655_v30, %v11655_v30  ;;  %11657 = vst [vmem:[#allocation53_spill] sm:$0xff] %v9015_v4  ;;  %5854 = vrot.lane.b32.xlu0 %v8569_v53, %s5953_s27  ;;  %v2593_v62 = vsel %vm95_vm8, %v11181_v39, %v5612_v13  ;;  %v2592_v31 = vsel %vm95_vm8, %v5612_v13, %v5606_v24  ;;  %v3518_v13 = vunpack.c.l.b16 %v8991_v1 }
 0x46e   :  { %11658 = vst [vmem:[#allocation51_spill] sm:$0xff] %v9018_v14  ;;  %3970 = vmatpush.bf16.msrb.mxu2 %v9015_v4  ;;  %3983 = vmatpush.bf16.msrb.mxu3 %v9018_v14  ;;  %v9032_v50 = vpop.permute.xlu1 %5654  ;;  %v9034_v35 = vpop.permute.xlu2 %5619  ;;  %v3540_v63 = vpack.c.b16 %v3520_v23, %v3520_v23  ;;  %v3541_v30 = vpack.c.b16 %v3521_v17, %v3521_v17  ;;  %v3116_v14 = vunpack.c.l.b16 %v2595_v56  ;;  %v3117_v4 = vunpack.c.h.b16 %v2595_v56 }
 0x46f   :  { %11656 = vst [vmem:[#allocation48_spill] sm:$0xff] %v9011_v25  ;;  %v5656_v18 = vunpack.i.l.bf16 %v9032_v50  ;;  %v9037_v27 = vpop.permute.xlu0 %5644  ;;  %v11189_v58 = vunpack.i.l.bf16 %v9034_v35  ;;  %v2661_v24 = vsel %vm166_vm7, %v5616_v36, %v5617_v61  ;;  %v2594_v0 = vpack.c.bf16 %v2592_v31, %v2593_v62 }
 0x470   :  { %v5646_v43 = vunpack.i.l.bf16 %v9037_v27  ;;  %v11659_v17 = vunpack.i.l.bf16 %v8696_v7  ;;  %v5622_v62 = vunpack.i.h.bf16 %v9034_v35  ;;  %v9058_v31 = vsel %vm1083_vm3, %v3540_v63, 0 }
 0x471   :  { %v2660_v60 = vsel %vm166_vm7, %v5617_v61, %v11189_v58  ;;  %v2947_v23 = vsel %vm460_vm2, %v5656_v18, %v5552_v41  ;;  %11660 = vst [vmem:[#allocation54_spill] sm:$0xff] %v9058_v31  ;;  %v9061_v61 = vsel %vm1083_vm3, %v3541_v30, 0  ;;  %v3519_v56 = vunpack.c.h.b16 %v8991_v1 }
 0x472   :  { %v2948_v39 = vsel %vm460_vm2, %v11659_v17, %v5656_v18  ;;  %v2665_v20 = vpack.c.bf16 %v2660_v60, %v2661_v24  ;;  %11661 = vst [vmem:[#allocation55_spill] sm:$0xff] %v9061_v61  ;;  %v11662_v58 = vunpack.i.h.bf16 %v9037_v27  ;;  %v2946_v60 = vsel %vm460_vm2, %v5552_v41, %v5646_v43 }
 0x473   :  { %v9074_v30 = vpack.c.bf16 %v2947_v23, %v2948_v39  ;;  %v3136_v1 = vpack.c.b16 %v3116_v14, %v3116_v14  ;;  %v3114_v24 = vunpack.c.l.b16 %v2594_v0  ;;  %v3115_v17 = vunpack.c.h.b16 %v2594_v0 }
 0x474   :  { %v2945_v3 = vsel %vm460_vm2, %v5646_v43, %v11662_v58  ;;  %5874 = vrot.lane.b32.xlu1 %v8577_v21, %s5948_s18  ;;  %5799 = vrot.lane.b32.xlu2 %v8573_v16, %s5947_s17  ;;  %v3166_v18 = vunpack.c.l.b16 %v2665_v20  ;;  %v3167_v63 = vunpack.c.h.b16 %v2665_v20  ;;  %v3137_v41 = vpack.c.b16 %v3117_v4, %v3117_v4 }
 0x475   :  { %5869 = vrot.lane.b32.xlu0 %v8800_v32, %s5953_s27  ;;  %v3538_v38 = vpack.c.b16 %v3518_v13, %v3518_v13  ;;  %v2957_v22 = vpack.c.bf16 %v2945_v3, %v2946_v60  ;;  %v2662_v20 = vsel %vm166_vm7, %v5622_v62, %v5616_v36  ;;  %v3539_v4 = vpack.c.b16 %v3519_v56, %v3519_v56 }
 0x476   :  { %v9078_v58 = vpop.permute.xlu1 %5669  ;;  %v9080_v25 = vpop.permute.xlu2 %5634  ;;  %v3186_v43 = vpack.c.b16 %v3166_v18, %v3166_v18  ;;  %v3187_v29 = vpack.c.b16 %v3167_v63, %v3167_v63  ;;  %v11665_v3 = vunpack.i.h.bf16 %v8765_v51  ;;  %v11666_v13 = vunpack.i.l.bf16 %v8722_v6  ;;  %v11824_v28 = vld [vmem:[#allocation48_spill] sm:$0xff] }
 0x477   :  { %v5671_v39 = vunpack.i.l.bf16 %v9078_v58  ;;  %v9085_v23 = vpop.permute.xlu0 %5659  ;;  %v11193_v14 = vunpack.i.l.bf16 %v9080_v25 }
 0x478   :  { %v5661_v0 = vunpack.i.l.bf16 %v9085_v23  ;;  %v9090_v7 = vsel %vm1083_vm3, %v3136_v1, %v3186_v43  ;;  %v9093_v18 = vsel %vm1083_vm3, %v3137_v41, %v3187_v29  ;;  %v3418_v29 = vunpack.c.l.b16 %v9074_v30 }
 0x479   :  { %11663 = vst [vmem:[#allocation60_spill] sm:$0xff] %v9090_v7  ;;  %v2877_v36 = vsel %vm389_vm4, %v5671_v39, %v11665_v3  ;;  %v2878_v60 = vsel %vm389_vm4, %v11666_v13, %v5671_v39  ;;  %v2663_v63 = vsel %vm166_vm7, %v11193_v14, %v5622_v62  ;;  %3971 = vmatpush.bf16.msrb.mxu2 %v9090_v7  ;;  %v11667_v1 = vunpack.i.h.bf16 %v8726_v46 }
 0x47a   :  { %11664 = vst [vmem:[#allocation61_spill] sm:$0xff] %v9093_v18  ;;  %3984 = vmatpush.bf16.msrb.mxu3 %v9093_v18  ;;  %v2886_v56 = vpack.c.bf16 %v2877_v36, %v2878_v60  ;;  %v11668_v41 = vunpack.i.l.bf16 %v8724_v47  ;;  %v2664_v3 = vpack.c.bf16 %v2662_v20, %v2663_v63  ;;  %v3134_v13 = vpack.c.b16 %v3114_v24, %v3114_v24 }
 0x47b   :  { %v3017_v43 = vsel %vm531_vm0, %v5661_v0, %v11667_v1  ;;  %v3135_v14 = vpack.c.b16 %v3115_v17, %v3115_v17  ;;  %v9121_v36 = vsel %vm1083_vm3, %v3538_v38, 0  ;;  %v9128_v20 = vsel %vm1083_vm3, %v3539_v4, 0 }
 0x47c   :  { %v3018_v39 = vsel %vm531_vm0, %v11668_v41, %v5661_v0  ;;  %11669 = vst [vmem:[#allocation58_spill] sm:$0xff] %v9121_v36  ;;  %5889 = vrot.lane.b32.xlu1 %v8792_v11, %s5951_s21  ;;  %5814 = vrot.lane.b32.xlu2 %v8573_v16, %s5948_s18  ;;  %v3164_v60 = vunpack.c.l.b16 %v2664_v3  ;;  %v3165_v1 = vunpack.c.h.b16 %v2664_v3  ;;  %v3419_v0 = vunpack.c.h.b16 %v9074_v30 }
 0x47d   :  { %4019 = vmatpush.bf16.msra.mxu2 %v9058_v31  ;;  %v3026_v62 = vpack.c.bf16 %v3017_v43, %v3018_v39  ;;  %11670 = vst [vmem:[#allocation59_spill] sm:$0xff] %v9128_v20  ;;  %5879 = vrot.lane.b32.xlu0 %v8577_v21, %s5949_s19  ;;  %v3438_v24 = vpack.c.b16 %v3418_v29, %v3418_v29  ;;  %v3420_v17 = vunpack.c.l.b16 %v2957_v22  ;;  %v3421_v38 = vunpack.c.h.b16 %v2957_v22 }
 0x47e   :  { %4032 = vmatpush.bf16.msra.mxu3 %v9061_v61  ;;  %v3368_v63 = vunpack.c.l.b16 %v2886_v56  ;;  %v9133_v43 = vpop.permute.xlu1 %5684  ;;  %v9135_v41 = vpop.permute.xlu2 %5649  ;;  %v3184_v39 = vpack.c.b16 %v3164_v60, %v3164_v60  ;;  %v3185_v61 = vpack.c.b16 %v3165_v1, %v3165_v1  ;;  %v3369_v3 = vunpack.c.h.b16 %v2886_v56 }
 0x47f   :  { %v3468_v31 = vunpack.c.l.b16 %v3026_v62  ;;  %v5686_v4 = vunpack.i.l.bf16 %v9133_v43  ;;  %v9138_v18 = vpop.permute.xlu0 %5674  ;;  %v5651_v7 = vunpack.i.l.bf16 %v9135_v41  ;;  %v3469_v29 = vunpack.c.h.b16 %v3026_v62 }
 0x480   :  { %v5676_v6 = vunpack.i.l.bf16 %v9138_v18  ;;  %v9145_v47 = vsel %vm1083_vm3, %v3134_v13, %v3184_v39  ;;  %v9148_v60 = vsel %vm1083_vm3, %v3135_v14, %v3185_v61  ;;  %v11672_v56 = vunpack.i.h.bf16 %v8808_v55 }
 0x481   :  { %11671 = vst [vmem:[#allocation4_spill] sm:$0xff] %v9148_v60  ;;  %v11673_v30 = vunpack.i.l.bf16 %v8760_v57  ;;  %v11674_v22 = vunpack.i.h.bf16 %v9135_v41  ;;  %v11675_v13 = vunpack.i.h.bf16 %v8726_v46  ;;  %3945 = vmatpush.bf16.msrb.mxu0 %v9145_v47  ;;  %3958 = vmatpush.bf16.msrb.mxu1 %v9148_v60  ;;  %v3439_v39 = vpack.c.b16 %v3419_v0, %v3419_v0  ;;  %v9173_v46 = vld [vmem:[%s10965_s3] sm:$0xf] }
 0x482   :  { %v2728_v1 = vsel %vm237_vm6, %v5686_v4, %v11672_v56  ;;  %v3440_v57 = vpack.c.b16 %v3420_v17, %v3420_v17  ;;  %v3441_v56 = vpack.c.b16 %v3421_v38, %v3421_v38  ;;  %v11207_v38 = vunpack.i.h.bf16 %v8855_v2  ;;  %5048 = vmatmul.msk.bf16.vlgmr.msrb.gmra.mxu2 %vm1405_vm9, %v9173_v46  ;;  %5049 = vmatmul.msk.bf16.vlgmr.msrb.gmra.mxu3 %vm1405_vm9, %v9173_v46 }
 0x483   :  { %v2729_v62 = vsel %vm237_vm6, %v11673_v30, %v5686_v4  ;;  %v3015_v40 = vsel %vm531_vm0, %v5651_v7, %v11674_v22  ;;  %v3016_v61 = vsel %vm531_vm0, %v11675_v13, %v5651_v7  ;;  %v3488_v4 = vpack.c.b16 %v3468_v31, %v3468_v31 }
 0x484   :  { %v3027_v14 = vpack.c.bf16 %v3015_v40, %v3016_v61  ;;  %v3489_v30 = vpack.c.b16 %v3469_v29, %v3469_v29  ;;  %v3388_v22 = vpack.c.b16 %v3368_v63, %v3368_v63  ;;  %v9175_v7 = vpack.c.bf16 %v2728_v1, %v2729_v62  ;;  %5829 = vrot.lane.b32.xlu2 %v8573_v16, %s5950_s20 }
 0x485   :  { %3993 = vmatpush.bf16.msra.mxu0 %v9121_v36  ;;  %4006 = vmatpush.bf16.msra.mxu1 %v9128_v20  ;;  %v11676_v40 = vpack.i.bf16 %v8557_v10, %v8566_v9  ;;  %v3389_v31 = vpack.c.b16 %v3369_v3, %v3369_v3  ;;  %v11677_v63 = vunpack.i.h.bf16 %v9138_v18  ;;  %v11678_v1 = vunpack.i.h.bf16 %v8808_v55 }
 0x486   :  { %v3470_v0 = vunpack.c.l.b16 %v3027_v14  ;;  %v3471_v17 = vunpack.c.h.b16 %v3027_v14  ;;  %5894 = vrot.lane.b32.xlu0 %v8792_v11, %s5952_s22  ;;  %v9195_v10 = vsel %vm1083_vm3, %v3438_v24, %v3488_v4  ;;  %v9200_v16 = vpop.permute.xlu1 %5699  ;;  %v9202_v3 = vpop.permute.xlu2 %5664  ;;  %v9205_v13 = vsel %vm1083_vm3, %v3439_v39, %v3489_v30  ;;  %5046 = vmatmul.msk.bf16.vlgmr.msrb.gmra.mxu0 %vm1405_vm9, %v9173_v46 }
 0x487   :  { %5904 = vrot.lane.b32.xlu1 %v11676_v40, %s5954_s28  ;;  %v2726_v29 = vsel %vm237_vm6, %v5676_v6, %v11677_v63  ;;  %v2727_v62 = vsel %vm237_vm6, %v11678_v1, %v5676_v6  ;;  %11679 = vst [vmem:[#allocation3_spill] sm:$0xff] %v9205_v13  ;;  %v11205_v24 = vunpack.i.h.bf16 %v9200_v16  ;;  %v5701_v14 = vunpack.i.l.bf16 %v9200_v16  ;;  %v9213_v4 = vpop.permute.xlu0 %5689  ;;  %5047 = vmatmul.msk.bf16.vlgmr.msrb.gmra.mxu1 %vm1405_vm9, %v9173_v46 }
 0x488   :  { %v3490_v61 = vpack.c.b16 %v3470_v0, %v3470_v0  ;;  %v3491_v6 = vpack.c.b16 %v3471_v17, %v3471_v17  ;;  %v11206_v40 = vunpack.i.h.bf16 %v9202_v3  ;;  %v5666_v63 = vunpack.i.l.bf16 %v9202_v3 }
 0x489   :  { %3994 = vmatpush.bf16.msra.mxu0 %v9195_v10  ;;  %4007 = vmatpush.bf16.msra.mxu1 %v9205_v13  ;;  %v9219_v39 = vpack.c.bf16 %v2726_v29, %v2727_v62  ;;  %v5691_v30 = vunpack.i.l.bf16 %v9213_v4  ;;  %v11682_v9 = vunpack.i.h.bf16 %v8765_v51  ;;  %v11685_v51 = vunpack.i.l.bf16 %v8924_v44 }
 0x48a   :  { %v9223_v0 = vsel %vm1083_vm3, %v3440_v57, %v3490_v61  ;;  %v9226_v17 = vsel %vm1083_vm3, %v3441_v56, %v3491_v6  ;;  %v2875_v1 = vsel %vm389_vm4, %v5666_v63, %v11206_v40  ;;  %v9241_v57 = vsel %vm1083_vm3, %v8846_v15, %v3388_v22 }
 0x48b   :  { %11680 = vst [vmem:[#allocation5_spill] sm:$0xff] %v9223_v0  ;;  %v2876_v29 = vsel %vm389_vm4, %v11682_v9, %v5666_v63  ;;  %4020 = vmatpush.bf16.msra.mxu2 %v9223_v0  ;;  %v9245_v56 = vsel %vm1083_vm3, %v8848_v52, %v3389_v31  ;;  %v2798_v62 = vsel %vm308_vm5, %v5691_v30, %v11207_v38  ;;  %v3218_v15 = vunpack.c.l.b16 %v9175_v7 }
 0x48c   :  { %11681 = vst [vmem:[#allocation6_spill] sm:$0xff] %v9226_v17  ;;  %v2799_v9 = vsel %vm308_vm5, %v11685_v51, %v5691_v30  ;;  %v2887_v61 = vpack.c.bf16 %v2875_v1, %v2876_v29  ;;  %4033 = vmatpush.bf16.msra.mxu3 %v9226_v17  ;;  %v2656_v52 = vsel %vm166_vm7, %v5701_v14, %v11205_v24  ;;  %v11686_v22 = vunpack.i.h.bf16 %v9080_v25 }
 0x48d   :  { %11683 = vst [vmem:[#allocation8_spill] sm:$0xff] %v9241_v57  ;;  %v2806_v6 = vpack.c.bf16 %v2798_v62, %v2799_v9  ;;  %3995 = vmatpush.bf16.msra.mxu0 %v9241_v57  ;;  %4008 = vmatpush.bf16.msra.mxu1 %v9245_v56  ;;  %v3219_v62 = vunpack.c.h.b16 %v9175_v7  ;;  %v3238_v40 = vpack.c.b16 %v3218_v15, %v3218_v15 }
 0x48e   :  { %11684 = vst [vmem:[#allocation7_spill] sm:$0xff] %v9245_v56  ;;  %v2657_v31 = vsel %vm166_vm7, %v11686_v22, %v5701_v14  ;;  %5844 = vrot.lane.b32.xlu2 %v8800_v32, %s5951_s21  ;;  %v3370_v30 = vunpack.c.l.b16 %v2887_v61  ;;  %v3371_v1 = vunpack.c.h.b16 %v2887_v61  ;;  %2636 = vrot.lane.b32.xlu0 %v8738_v48, %s5954_s28  ;;  %v9277_v22 = vpop.permute.xlu1 %5714  ;;  %v9279_v24 = vpop.permute.xlu2 %5679  ;;  %v3220_v32 = vunpack.c.l.b16 %v9219_v39 }
 0x48f   :  { %v3268_v14 = vunpack.c.l.b16 %v2806_v6  ;;  %v3269_v51 = vunpack.c.h.b16 %v2806_v6  ;;  %v9275_v9 = vpack.c.bf16 %v2656_v52, %v2657_v31  ;;  %v3221_v61 = vunpack.c.h.b16 %v9219_v39  ;;  %v9283_v63 = vpop.permute.xlu0 %5704 }
 0x490   :  { %v11216_v29 = vunpack.i.h.bf16 %v9279_v24  ;;  %v5681_v48 = vunpack.i.l.bf16 %v9279_v24  ;;  %v3390_v44 = vpack.c.b16 %v3370_v30, %v3370_v30  ;;  %v3391_v7 = vpack.c.b16 %v3371_v1, %v3371_v1 }
 0x491   :  { %v11219_v52 = vunpack.i.h.bf16 %v9283_v63  ;;  %v5706_v31 = vunpack.i.l.bf16 %v9283_v63  ;;  %v3288_v6 = vpack.c.b16 %v3268_v14, %v3268_v14  ;;  %v3289_v38 = vpack.c.b16 %v3269_v51, %v3269_v51 }
 0x492   :  { %v5716_v15 = vunpack.i.l.bf16 %v9277_v22  ;;  %v2796_v39 = vsel %vm308_vm5, %v5681_v48, %v11216_v29  ;;  %v11687_v56 = vunpack.i.h.bf16 %v8855_v2  ;;  %v3239_v30 = vpack.c.b16 %v3219_v62, %v3219_v62 }
 0x493   :  { %v3081_v14 = vsel %vm602_vm1, %v5706_v31, %v11219_v52  ;;  %v11688_v51 = vunpack.i.h.bf16 %v8970_v45  ;;  %v9308_v13 = vsel %vm1083_vm3, %v3238_v40, %v3288_v6  ;;  %v9315_v62 = vsel %vm1083_vm3, %v8850_v12, %v3390_v44 }
 0x494   :  { %v2797_v57 = vsel %vm308_vm5, %v11687_v56, %v5681_v48  ;;  %11689 = vst [vmem:[#allocation9_spill] sm:$0xff] %v9308_v13  ;;  %v9311_v56 = vsel %vm1083_vm3, %v3239_v30, %v3289_v38  ;;  %3996 = vmatpush.bf16.msra.mxu0 %v9308_v13  ;;  %v9321_v48 = vsel %vm1083_vm3, %v8857_v5, %v3391_v7  ;;  %v11693_v40 = vunpack.i.h.bf16 %v9080_v25 }
 0x495   :  { %v3082_v17 = vsel %vm602_vm1, %v11688_v51, %v5706_v31  ;;  %v2807_v0 = vpack.c.bf16 %v2796_v39, %v2797_v57  ;;  %11690 = vst [vmem:[#allocation10_spill] sm:$0xff] %v9311_v56  ;;  %4009 = vmatpush.bf16.msra.mxu1 %v9311_v56  ;;  %v3240_v57 = vpack.c.b16 %v3220_v32, %v3220_v32  ;;  %v3170_v44 = vunpack.c.l.b16 %v9275_v9 }
 0x496   :  { %v3099_v29 = vpack.c.bf16 %v3081_v14, %v3082_v17  ;;  %11691 = vst [vmem:[#allocation12_spill] sm:$0xff] %v9315_v62  ;;  %v2658_v38 = vsel %vm166_vm7, %v5716_v15, %v11693_v40  ;;  %4021 = vmatpush.bf16.msra.mxu2 %v9315_v62  ;;  %4034 = vmatpush.bf16.msra.mxu3 %v9321_v48  ;;  %v3171_v6 = vunpack.c.h.b16 %v9275_v9  ;;  %v11694_v5 = vunpack.i.l.bf16 %v9034_v35  ;;  %v9339_v7 = vpop.permute.xlu2 %5694 }
 0x497   :  { %11692 = vst [vmem:[#allocation11_spill] sm:$0xff] %v9321_v48  ;;  %v3270_v17 = vunpack.c.l.b16 %v2807_v0  ;;  %v3271_v31 = vunpack.c.h.b16 %v2807_v0  ;;  %v3241_v12 = vpack.c.b16 %v3221_v61, %v3221_v61  ;;  %5859 = vrot.lane.b32.xlu2 %v8569_v53, %s5954_s28  ;;  %v9337_v0 = vpop.permute.xlu1 %5729  ;;  %v9343_v9 = vpop.permute.xlu0 %5719  ;;  %v11223_v35 = vunpack.i.h.bf16 %v9339_v7 }
 0x498   :  { %v2659_v32 = vsel %vm166_vm7, %v11694_v5, %v5716_v15  ;;  %v3524_v14 = vunpack.c.l.b16 %v3099_v29  ;;  %v11222_v61 = vunpack.i.h.bf16 %v9337_v0  ;;  %v5731_v51 = vunpack.i.l.bf16 %v9337_v0 }
 0x499   :  { %v3290_v39 = vpack.c.b16 %v3270_v17, %v3270_v17  ;;  %v3291_v30 = vpack.c.b16 %v3271_v31, %v3271_v31  ;;  %v5696_v15 = vunpack.i.l.bf16 %v9339_v7  ;;  %v5721_v40 = vunpack.i.l.bf16 %v9343_v9 }
 0x49a   :  { %v3525_v17 = vunpack.c.h.b16 %v3099_v29  ;;  %v2666_v31 = vpack.c.bf16 %v2658_v38, %v2659_v32  ;;  %v3011_v52 = vsel %vm531_vm0, %v5731_v51, %v11222_v61  ;;  %v11697_v56 = vunpack.i.h.bf16 %v8973_v42 }
 0x49b   :  { %v9349_v53 = vsel %vm1083_vm3, %v3240_v57, %v3290_v39  ;;  %v9352_v5 = vsel %vm1083_vm3, %v3241_v12, %v3291_v30  ;;  %v2586_v1 = vsel %vm95_vm8, %v5696_v15, %v11223_v35  ;;  %v11698_v29 = vunpack.i.h.bf16 %v9085_v23 }
 0x49c   :  { %11695 = vst [vmem:[#allocation13_spill] sm:$0xff] %v9349_v53  ;;  %v2587_v57 = vsel %vm95_vm8, %v11697_v56, %v5696_v15  ;;  %4022 = vmatpush.bf16.msra.mxu2 %v9349_v53  ;;  %v11699_v12 = vunpack.i.h.bf16 %v8970_v45  ;;  %v11700_v39 = vunpack.i.h.bf16 %v8922_v37  ;;  %4035 = vmatpush.bf16.msra.mxu3 %v9352_v5  ;;  %v11233_v56 = vunpack.i.h.bf16 %v9078_v58 }
 0x49d   :  { %11696 = vst [vmem:[#allocation14_spill] sm:$0xff] %v9352_v5  ;;  %v3012_v38 = vsel %vm531_vm0, %v11698_v29, %v5731_v51  ;;  %v2597_v61 = vpack.c.bf16 %v2586_v1, %v2587_v57  ;;  %v3544_v53 = vpack.c.b16 %v3524_v14, %v3524_v14  ;;  %v3190_v29 = vpack.c.b16 %v3170_v44, %v3170_v44 }
 0x49e   :  { %v3083_v32 = vsel %vm602_vm1, %v5721_v40, %v11699_v12  ;;  %v3084_v30 = vsel %vm602_vm1, %v11700_v39, %v5721_v40  ;;  %v3545_v13 = vpack.c.b16 %v3525_v17, %v3525_v17  ;;  %v9382_v48 = vpack.c.bf16 %v3011_v52, %v3012_v38  ;;  %v9388_v40 = vpop.permute.xlu2 %5709 }
 0x49f   :  { %v3098_v35 = vpack.c.bf16 %v3083_v32, %v3084_v30  ;;  %v3120_v51 = vunpack.c.l.b16 %v2597_v61  ;;  %v3121_v45 = vunpack.c.h.b16 %v2597_v61  ;;  %v3191_v12 = vpack.c.b16 %v3171_v6, %v3171_v6  ;;  %2628 = vrot.lane.b32.xlu2 %v8639_v34, %s5954_s28  ;;  %v9386_v1 = vpop.permute.xlu1 %5744  ;;  %v9395_v6 = vpop.permute.xlu0 %5734 }
 0x4a0   :  { %v3168_v37 = vunpack.c.l.b16 %v2666_v31  ;;  %v3169_v62 = vunpack.c.h.b16 %v2666_v31  ;;  %v9391_v14 = vsel %vm1083_vm3, %v3544_v53, 0  ;;  %v11232_v61 = vunpack.i.h.bf16 %v9386_v1 }
 0x4a1   :  { %v3140_v57 = vpack.c.b16 %v3120_v51, %v3120_v51  ;;  %v3141_v39 = vpack.c.b16 %v3121_v45, %v3121_v45  ;;  %11701 = vst [vmem:[#allocation2_spill] sm:$0xff] %v9391_v14  ;;  %v3522_v44 = vunpack.c.l.b16 %v3098_v35  ;;  %v5746_v52 = vunpack.i.l.bf16 %v9386_v1 }
 0x4a2   :  { %v5711_v17 = vunpack.i.l.bf16 %v9388_v40  ;;  %v3523_v31 = vunpack.c.h.b16 %v3098_v35  ;;  %v5736_v34 = vunpack.i.l.bf16 %v9395_v6  ;;  %v9406_v53 = vsel %vm1083_vm3, %v3545_v13, 0 }
 0x4a3   :  { %v9400_v38 = vsel %vm1083_vm3, %v3140_v57, %v3190_v29  ;;  %v9403_v32 = vsel %vm1083_vm3, %v3141_v39, %v3191_v12  ;;  %11704 = vst [vmem:[#allocation69_spill] sm:$0xff] %v9406_v53  ;;  %v2871_v30 = vsel %vm389_vm4, %v5746_v52, %v11232_v61  ;;  %v2872_v35 = vsel %vm389_vm4, %v11233_v56, %v5746_v52 }
 0x4a4   :  { %11702 = vst [vmem:[#allocation67_spill] sm:$0xff] %v9400_v38  ;;  %v11705_v51 = vunpack.i.h.bf16 %v8973_v42  ;;  %v11706_v45 = vunpack.i.l.bf16 %v8853_v19  ;;  %4023 = vmatpush.bf16.msra.mxu2 %v9400_v38  ;;  %v9425_v12 = vpack.c.bf16 %v2871_v30, %v2872_v35  ;;  %v11707_v57 = vunpack.i.h.bf16 %v9032_v50  ;;  %4036 = vmatpush.bf16.msra.mxu3 %v9403_v32 }
 0x4a5   :  { %11703 = vst [vmem:[#allocation68_spill] sm:$0xff] %v9403_v32  ;;  %v11708_v52 = vunpack.i.h.bf16 %v9037_v27  ;;  %v3542_v30 = vpack.c.b16 %v3522_v44, %v3522_v44  ;;  %v3543_v35 = vpack.c.b16 %v3523_v31, %v3523_v31  ;;  %v3189_v27 = vpack.c.b16 %v3169_v62, %v3169_v62 }
 0x4a6   :  { %v2588_v29 = vsel %vm95_vm8, %v5711_v17, %v11705_v51  ;;  %v2589_v13 = vsel %vm95_vm8, %v11706_v45, %v5711_v17  ;;  %v2943_v39 = vsel %vm460_vm2, %v5736_v34, %v11707_v57  ;;  %v3188_v57 = vpack.c.b16 %v3168_v37, %v3168_v37  ;;  %v9453_v62 = vpop.permute.xlu2 %5724 }
 0x4a7   :  { %v2944_v61 = vsel %vm460_vm2, %v11708_v52, %v5736_v34  ;;  %v2596_v51 = vpack.c.bf16 %v2588_v29, %v2589_v13  ;;  %5052 = vmatmul.msk.bf16.vlgmr.msra.gmra.mxu2 %vm1405_vm9, %v9173_v46  ;;  %v3474_v29 = vunpack.c.l.b16 %v9382_v48  ;;  %v3475_v13 = vunpack.c.h.b16 %v9382_v48  ;;  %5053 = vmatmul.msk.bf16.vlgmr.msra.gmra.mxu3 %vm1405_vm9, %v9173_v46  ;;  %v9451_v37 = vpop.permute.xlu1 %5759  ;;  %v9463_v17 = vpop.permute.xlu0 %5749 }
 0x4a8   :  { %4071 = vmatpush.bf16.msrb.mxu2 %v9391_v14  ;;  %4084 = vmatpush.bf16.msrb.mxu3 %v9406_v53  ;;  %v9442_v34 = vpack.c.bf16 %v2943_v39, %v2944_v61  ;;  %v3374_v52 = vunpack.c.l.b16 %v9425_v12  ;;  %v9456_v61 = vsel %vm1083_vm3, %v3542_v30, 0  ;;  %v9459_v39 = vsel %vm1083_vm3, %v3543_v35, 0 }
 0x4a9   :  { %v3118_v45 = vunpack.c.l.b16 %v2596_v51  ;;  %v3119_v15 = vunpack.c.h.b16 %v2596_v51  ;;  %5884 = vrot.lane.b32.xlu2 %v8577_v21, %s5950_s20  ;;  %11709 = vst [vmem:[#allocation70_spill] sm:$0xff] %v9456_v61  ;;  %v11238_v48 = vunpack.i.h.bf16 %v9451_v37  ;;  %v5761_v51 = vunpack.i.l.bf16 %v9451_v37 }
 0x4aa   :  { %11710 = vst [vmem:[#allocation71_spill] sm:$0xff] %v9459_v39  ;;  %v11239_v21 = vunpack.i.h.bf16 %v9453_v62  ;;  %v5726_v56 = vunpack.i.l.bf16 %v9453_v62  ;;  %v5751_v19 = vunpack.i.l.bf16 %v9463_v17  ;;  %v3375_v35 = vunpack.c.h.b16 %v9425_v12 }
 0x4ab   :  { %v3138_v44 = vpack.c.b16 %v3118_v45, %v3118_v45  ;;  %v3139_v31 = vpack.c.b16 %v3119_v15, %v3119_v15  ;;  %v2792_v45 = vsel %vm308_vm5, %v5761_v51, %v11238_v48  ;;  %v11713_v14 = vunpack.i.h.bf16 %v9032_v50 }
 0x4ac   :  { %v2941_v53 = vsel %vm460_vm2, %v5726_v56, %v11239_v21  ;;  %v11714_v12 = vunpack.i.h.bf16 %v9213_v4  ;;  %v11716_v21 = vunpack.i.h.bf16 %v9202_v3 }
 0x4ad   :  { %v9469_v15 = vsel %vm1083_vm3, %v3138_v44, %v3188_v57  ;;  %v9472_v30 = vsel %vm1083_vm3, %v3139_v31, %v3189_v27  ;;  %v2942_v57 = vsel %vm460_vm2, %v11713_v14, %v5726_v56  ;;  %v3394_v27 = vpack.c.b16 %v3374_v52, %v3374_v52 }
 0x4ae   :  { %11711 = vst [vmem:[#allocation72_spill] sm:$0xff] %v9469_v15  ;;  %3997 = vmatpush.bf16.msra.mxu0 %v9469_v15  ;;  %v2793_v44 = vsel %vm308_vm5, %v11714_v12, %v5761_v51  ;;  %v11715_v31 = vunpack.i.h.bf16 %v9078_v58  ;;  %v2874_v50 = vsel %vm389_vm4, %v11716_v21, %v5751_v19  ;;  %v2959_v32 = vpack.c.bf16 %v2941_v53, %v2942_v57 }
 0x4af   :  { %11712 = vst [vmem:[#allocation73_spill] sm:$0xff] %v9472_v30  ;;  %4010 = vmatpush.bf16.msra.mxu1 %v9472_v30  ;;  %v3494_v58 = vpack.c.b16 %v3474_v29, %v3474_v29  ;;  %v9508_v53 = vpack.c.bf16 %v2792_v45, %v2793_v44  ;;  %v3422_v21 = vunpack.c.l.b16 %v9442_v34  ;;  %v9517_v29 = vpop.permute.xlu1 %5774  ;;  %v9523_v45 = vsel %vm1083_vm3, %v8877_v49, %v3394_v27 }
 0x4b0   :  { %v2873_v48 = vsel %vm389_vm4, %v5751_v19, %v11715_v31  ;;  %v3424_v12 = vunpack.c.l.b16 %v2959_v32  ;;  %v3425_v3 = vunpack.c.h.b16 %v2959_v32  ;;  %v3495_v31 = vpack.c.b16 %v3475_v13, %v3475_v13  ;;  %v9519_v32 = vpop.permute.xlu2 %5739  ;;  %11717 = vst [vmem:[#allocation74_spill] sm:$0xff] %v9523_v45  ;;  %v9527_v19 = vpop.permute.xlu0 %5764 }
 0x4b1   :  { %v2888_v52 = vpack.c.bf16 %v2873_v48, %v2874_v50  ;;  %5050 = vmatmul.msk.bf16.vlgmr.msra.gmra.mxu0 %vm1405_vm9, %v9173_v46  ;;  %v3423_v48 = vunpack.c.h.b16 %v9442_v34  ;;  %5899 = vrot.lane.b32.xlu2 %v8792_v11, %s5953_s27  ;;  %v3395_v44 = vpack.c.b16 %v3375_v35, %v3375_v35  ;;  %v11244_v50 = vunpack.i.h.bf16 %v9517_v29 }
 0x4b2   :  { %4045 = vmatpush.bf16.msrb.mxu0 %v9456_v61  ;;  %5051 = vmatmul.msk.bf16.vlgmr.msra.gmra.mxu1 %vm1405_vm9, %v9173_v46  ;;  %v3444_v13 = vpack.c.b16 %v3424_v12, %v3424_v12  ;;  %v3445_v57 = vpack.c.b16 %v3425_v3, %v3425_v3  ;;  %v5776_v34 = vunpack.i.l.bf16 %v9517_v29  ;;  %v5741_v56 = vunpack.i.l.bf16 %v9519_v32 }
 0x4b3   :  { %4058 = vmatpush.bf16.msrb.mxu1 %v9459_v39  ;;  %v3372_v11 = vunpack.c.l.b16 %v2888_v52  ;;  %v5766_v51 = vunpack.i.l.bf16 %v9527_v19  ;;  %v3373_v49 = vunpack.c.h.b16 %v2888_v52  ;;  %v11720_v27 = vunpack.i.h.bf16 %v9388_v40 }
 0x4b4   :  { %v9532_v14 = vsel %vm1083_vm3, %v3444_v13, %v3494_v58  ;;  %v9535_v12 = vsel %vm1083_vm3, %v3445_v57, %v3495_v31  ;;  %v2582_v35 = vsel %vm95_vm8, %v5776_v34, %v11244_v50  ;;  %v11721_v39 = vunpack.i.h.bf16 %v9085_v23 }
 0x4b5   :  { %11718 = vst [vmem:[#allocation75_spill] sm:$0xff] %v9532_v14  ;;  %v2583_v3 = vsel %vm95_vm8, %v11720_v27, %v5776_v34  ;;  %v11722_v13 = vunpack.i.h.bf16 %v9135_v41  ;;  %4072 = vmatpush.bf16.msrb.mxu2 %v9532_v14  ;;  %v11723_v57 = vunpack.i.h.bf16 %v9133_v43  ;;  %v11724_v34 = vunpack.i.h.bf16 %v9138_v18  ;;  %4085 = vmatpush.bf16.msrb.mxu3 %v9535_v12 }
 0x4b6   :  { %11719 = vst [vmem:[#allocation76_spill] sm:$0xff] %v9535_v12  ;;  %v3013_v58 = vsel %vm531_vm0, %v5741_v56, %v11721_v39  ;;  %v2599_v31 = vpack.c.bf16 %v2582_v35, %v2583_v3  ;;  %v9567_v39 = vsel %vm1083_vm3, %v8879_v26, %v3395_v44  ;;  %v3443_v35 = vpack.c.b16 %v3423_v48, %v3423_v48 }
 0x4b7   :  { %v3014_v52 = vsel %vm531_vm0, %v11722_v13, %v5741_v56  ;;  %v2724_v50 = vsel %vm237_vm6, %v5766_v51, %v11723_v57  ;;  %v2725_v23 = vsel %vm237_vm6, %v11724_v34, %v5766_v51  ;;  %11725 = vst [vmem:[#allocation77_spill] sm:$0xff] %v9567_v39  ;;  %v3442_v56 = vpack.c.b16 %v3422_v21, %v3422_v21  ;;  %v9575_v26 = vpop.permute.xlu1 %5789 }
 0x4b8   :  { %v3028_v27 = vpack.c.bf16 %v3013_v58, %v3014_v52  ;;  %v9563_v41 = vpack.c.bf16 %v2724_v50, %v2725_v23  ;;  %v3274_v57 = vunpack.c.l.b16 %v9508_v53  ;;  %v3275_v18 = vunpack.c.h.b16 %v9508_v53  ;;  %v9577_v21 = vpop.permute.xlu2 %5754  ;;  %v9580_v23 = vpop.permute.xlu0 %5779 }
 0x4b9   :  { %4073 = vmatpush.bf16.msrb.mxu2 %v9523_v45  ;;  %v3392_v50 = vpack.c.b16 %v3372_v11, %v3372_v11  ;;  %v3393_v58 = vpack.c.b16 %v3373_v49, %v3373_v49  ;;  %4086 = vmatpush.bf16.msrb.mxu3 %v9567_v39  ;;  %v3124_v52 = vunpack.c.l.b16 %v2599_v31  ;;  %v3125_v34 = vunpack.c.h.b16 %v2599_v31 }
 0x4ba   :  { %v3472_v3 = vunpack.c.l.b16 %v3028_v27  ;;  %v3473_v13 = vunpack.c.h.b16 %v3028_v27  ;;  %v5791_v53 = vunpack.i.l.bf16 %v9575_v26  ;;  %v5756_v14 = vunpack.i.l.bf16 %v9577_v21 }
 0x4bb   :  { %v3222_v11 = vunpack.c.l.b16 %v9563_v41  ;;  %v5781_v51 = vunpack.i.l.bf16 %v9580_v23  ;;  %v11727_v31 = vunpack.i.h.bf16 %v9388_v40  ;;  %v11728_v27 = vunpack.i.h.bf16 %v9339_v7 }
 0x4bc   :  { %v3492_v48 = vpack.c.b16 %v3472_v3, %v3472_v3  ;;  %v3493_v44 = vpack.c.b16 %v3473_v13, %v3473_v13  ;;  %v11729_v49 = vunpack.i.h.bf16 %v9577_v21 }
 0x4bd   :  { %v2584_v13 = vsel %vm95_vm8, %v5791_v53, %v11727_v31  ;;  %v2585_v45 = vsel %vm95_vm8, %v11728_v27, %v5791_v53  ;;  %v9625_v31 = vsel %vm1083_vm3, %v8893_v54, %v3393_v58 }
 0x4be   :  { %v9588_v39 = vsel %vm1083_vm3, %v3442_v56, %v3492_v48  ;;  %v9591_v3 = vsel %vm1083_vm3, %v3443_v35, %v3493_v44  ;;  %v2722_v12 = vsel %vm237_vm6, %v5756_v14, %v11729_v49  ;;  %v11730_v56 = vunpack.i.h.bf16 %v9133_v43  ;;  %11734 = vst [vmem:[#allocation80_spill] sm:$0xff] %v9625_v31 }
 0x4bf   :  { %11726 = vst [vmem:[#allocation78_spill] sm:$0xff] %v9588_v39  ;;  %4046 = vmatpush.bf16.msrb.mxu0 %v9588_v39  ;;  %v2598_v40 = vpack.c.bf16 %v2584_v13, %v2585_v45  ;;  %v11731_v48 = vunpack.i.h.bf16 %v9580_v23  ;;  %v11732_v44 = vunpack.i.h.bf16 %v9277_v22  ;;  %4059 = vmatpush.bf16.msrb.mxu1 %v9591_v3  ;;  %v3294_v49 = vpack.c.b16 %v3274_v57, %v3274_v57 }
 0x4c0   :  { %v2723_v35 = vsel %vm237_vm6, %v11730_v56, %v5756_v14  ;;  %v9621_v14 = vsel %vm1083_vm3, %v8881_v33, %v3392_v50  ;;  %v3295_v45 = vpack.c.b16 %v3275_v18, %v3275_v18  ;;  %v9631_v33 = vpop.permute.xlu1 %5804  ;;  %v9633_v57 = vpop.permute.xlu2 %5769  ;;  %v11737_v39 = vunpack.i.h.bf16 %v9395_v6 }
 0x4c1   :  { %v2652_v7 = vsel %vm166_vm7, %v5781_v51, %v11731_v48  ;;  %v2653_v53 = vsel %vm166_vm7, %v11732_v44, %v5781_v51  ;;  %v2739_v27 = vpack.c.bf16 %v2722_v12, %v2723_v35  ;;  %11733 = vst [vmem:[#allocation79_spill] sm:$0xff] %v9621_v14  ;;  %v3144_v48 = vpack.c.b16 %v3124_v52, %v3124_v52  ;;  %v9637_v44 = vpop.permute.xlu0 %5794 }
 0x4c2   :  { %v2669_v43 = vpack.c.bf16 %v2652_v7, %v2653_v53  ;;  %v3145_v12 = vpack.c.b16 %v3125_v34, %v3125_v34  ;;  %v3242_v51 = vpack.c.b16 %v3222_v11, %v3222_v11  ;;  %v3223_v35 = vunpack.c.h.b16 %v9563_v41 }
 0x4c3   :  { %v3224_v13 = vunpack.c.l.b16 %v2739_v27  ;;  %v3225_v56 = vunpack.c.h.b16 %v2739_v27  ;;  %4047 = vmatpush.bf16.msrb.mxu0 %v9621_v14  ;;  %4060 = vmatpush.bf16.msrb.mxu1 %v9625_v31  ;;  %v3122_v58 = vunpack.c.l.b16 %v2598_v40  ;;  %v11257_v52 = vunpack.i.h.bf16 %v9631_v33 }
 0x4c4   :  { %v3174_v50 = vunpack.c.l.b16 %v2669_v43  ;;  %v5806_v7 = vunpack.i.l.bf16 %v9631_v33  ;;  %v5771_v34 = vunpack.i.l.bf16 %v9633_v57  ;;  %v3175_v11 = vunpack.c.h.b16 %v2669_v43 }
 0x4c5   :  { %v3244_v18 = vpack.c.b16 %v3224_v13, %v3224_v13  ;;  %v3245_v54 = vpack.c.b16 %v3225_v56, %v3225_v56  ;;  %v5796_v41 = vunpack.i.l.bf16 %v9637_v44  ;;  %v3123_v13 = vunpack.c.h.b16 %v2598_v40 }
 0x4c6   :  { %v2937_v56 = vsel %vm460_vm2, %v5806_v7, %v11257_v52  ;;  %v2938_v31 = vsel %vm460_vm2, %v11737_v39, %v5806_v7  ;;  %v11738_v43 = vunpack.i.h.bf16 %v9213_v4  ;;  %v11741_v39 = vunpack.i.h.bf16 %v9200_v16 }
 0x4c7   :  { %v9642_v53 = vsel %vm1083_vm3, %v3244_v18, %v3294_v49  ;;  %v9645_v27 = vsel %vm1083_vm3, %v3245_v54, %v3295_v45  ;;  %v11739_v18 = vunpack.i.h.bf16 %v9279_v24  ;;  %v2961_v45 = vpack.c.bf16 %v2937_v56, %v2938_v31 }
 0x4c8   :  { %11735 = vst [vmem:[#allocation81_spill] sm:$0xff] %v9642_v53  ;;  %v2794_v49 = vsel %vm308_vm5, %v5771_v34, %v11738_v43  ;;  %4074 = vmatpush.bf16.msrb.mxu2 %v9642_v53  ;;  %v11740_v54 = vunpack.i.h.bf16 %v9277_v22  ;;  %v2655_v4 = vsel %vm166_vm7, %v11741_v39, %v5796_v41  ;;  %4087 = vmatpush.bf16.msrb.mxu3 %v9645_v27 }
 0x4c9   :  { %11736 = vst [vmem:[#allocation82_spill] sm:$0xff] %v9645_v27  ;;  %v2795_v40 = vsel %vm308_vm5, %v11739_v18, %v5771_v34  ;;  %v3194_v43 = vpack.c.b16 %v3174_v50, %v3174_v50  ;;  %v3195_v14 = vpack.c.b16 %v3175_v11, %v3175_v11  ;;  %v3243_v34 = vpack.c.b16 %v3223_v35, %v3223_v35  ;;  %v9682_v50 = vpop.permute.xlu1 %5819  ;;  %v9684_v35 = vpop.permute.xlu2 %5784 }
 0x4ca   :  { %v2654_v52 = vsel %vm166_vm7, %v5796_v41, %v11740_v54  ;;  %v2808_v7 = vpack.c.bf16 %v2794_v49, %v2795_v40  ;;  %v3142_v31 = vpack.c.b16 %v3122_v58, %v3122_v58  ;;  %v3143_v56 = vpack.c.b16 %v3123_v13, %v3123_v13 }
 0x4cb   :  { %v2668_v24 = vpack.c.bf16 %v2654_v52, %v2655_v4  ;;  %v9675_v54 = vsel %vm1083_vm3, %v3144_v48, %v3194_v43  ;;  %v9678_v16 = vsel %vm1083_vm3, %v3145_v12, %v3195_v14  ;;  %v3428_v41 = vunpack.c.l.b16 %v2961_v45  ;;  %v9687_v48 = vpop.permute.xlu0 %5809 }
 0x4cc   :  { %v3272_v18 = vunpack.c.l.b16 %v2808_v7  ;;  %v3273_v53 = vunpack.c.h.b16 %v2808_v7  ;;  %11742 = vst [vmem:[#allocation83_spill] sm:$0xff] %v9675_v54  ;;  %4075 = vmatpush.bf16.msrb.mxu2 %v9675_v54  ;;  %4088 = vmatpush.bf16.msrb.mxu3 %v9678_v16  ;;  %v3429_v13 = vunpack.c.h.b16 %v2961_v45  ;;  %v5821_v49 = vunpack.i.l.bf16 %v9682_v50 }
 0x4cd   :  { %11743 = vst [vmem:[#allocation84_spill] sm:$0xff] %v9678_v16  ;;  %v3172_v11 = vunpack.c.l.b16 %v2668_v24  ;;  %v11262_v14 = vunpack.i.h.bf16 %v9684_v35  ;;  %v5786_v12 = vunpack.i.l.bf16 %v9684_v35  ;;  %v3173_v40 = vunpack.c.h.b16 %v2668_v24 }
 0x4ce   :  { %v3292_v52 = vpack.c.b16 %v3272_v18, %v3272_v18  ;;  %v3293_v58 = vpack.c.b16 %v3273_v53, %v3273_v53  ;;  %v11263_v39 = vunpack.i.h.bf16 %v9687_v48  ;;  %v5811_v4 = vunpack.i.l.bf16 %v9687_v48 }
 0x4cf   :  { %v11744_v45 = vunpack.i.h.bf16 %v9519_v32  ;;  %v11745_v18 = vunpack.i.h.bf16 %v9337_v0  ;;  %v3077_v22 = vsel %vm602_vm1, %v5786_v12, %v11262_v14  ;;  %5056 = vmatmul.msk.bf16.vlgmr.msrb.gmra.mxu2 %vm1405_vm9, %v9173_v46  ;;  %v3448_v16 = vpack.c.b16 %v3428_v41, %v3428_v41  ;;  %5057 = vmatmul.msk.bf16.vlgmr.msrb.gmra.mxu3 %vm1405_vm9, %v9173_v46 }
 0x4d0   :  { %v9694_v7 = vsel %vm1083_vm3, %v3242_v51, %v3292_v52  ;;  %v9697_v53 = vsel %vm1083_vm3, %v3243_v34, %v3293_v58  ;;  %v11746_v51 = vunpack.i.h.bf16 %v9343_v9  ;;  %v3007_v0 = vsel %vm531_vm0, %v5811_v4, %v11263_v39 }
 0x4d1   :  { %v3009_v43 = vsel %vm531_vm0, %v5821_v49, %v11744_v45  ;;  %v3010_v24 = vsel %vm531_vm0, %v11745_v18, %v5821_v49  ;;  %4048 = vmatpush.bf16.msrb.mxu0 %v9694_v7  ;;  %v11747_v58 = vmov %v11744_v45  ;;  %4061 = vmatpush.bf16.msrb.mxu1 %v9697_v53 }
 0x4d2   :  { %v3078_v34 = vsel %vm602_vm1, %v11746_v51, %v5786_v12  ;;  %v3030_v52 = vpack.c.bf16 %v3009_v43, %v3010_v24  ;;  %v3008_v49 = vsel %vm531_vm0, %v11747_v58, %v5811_v4  ;;  %v3192_v12 = vpack.c.b16 %v3172_v11, %v3172_v11 }
 0x4d3   :  { %v3101_v45 = vpack.c.bf16 %v3077_v22, %v3078_v34  ;;  %v3031_v14 = vpack.c.bf16 %v3007_v0, %v3008_v49  ;;  %v3193_v51 = vpack.c.b16 %v3173_v40, %v3173_v40  ;;  %v3449_v4 = vpack.c.b16 %v3429_v13, %v3429_v13  ;;  %v9739_v40 = vpop.permute.xlu1 %5834  ;;  %v9741_v34 = vpop.permute.xlu2 %5799 }
 0x4d4   :  { %v9732_v32 = vsel %vm1083_vm3, %v3142_v31, %v3192_v12  ;;  %v3476_v11 = vunpack.c.l.b16 %v3030_v52  ;;  %v3477_v49 = vunpack.c.h.b16 %v3030_v52  ;;  %v11270_v31 = vunpack.i.h.bf16 %v9739_v40 }
 0x4d5   :  { %v3528_v24 = vunpack.c.l.b16 %v3101_v45  ;;  %v3529_v39 = vunpack.c.h.b16 %v3101_v45  ;;  %11748 = vst [vmem:[#allocation85_spill] sm:$0xff] %v9732_v32  ;;  %v9735_v22 = vsel %vm1083_vm3, %v3143_v56, %v3193_v51  ;;  %4049 = vmatpush.bf16.msrb.mxu0 %v9732_v32  ;;  %v3478_v58 = vunpack.c.l.b16 %v3031_v14  ;;  %v9745_v56 = vpop.permute.xlu0 %5824 }
 0x4d6   :  { %11749 = vst [vmem:[#allocation86_spill] sm:$0xff] %v9735_v22  ;;  %4062 = vmatpush.bf16.msrb.mxu1 %v9735_v22  ;;  %v5836_v45 = vunpack.i.l.bf16 %v9739_v40  ;;  %v5801_v13 = vunpack.i.l.bf16 %v9741_v34  ;;  %v3479_v12 = vunpack.c.h.b16 %v3031_v14  ;;  %v5826_v18 = vunpack.i.l.bf16 %v9745_v56 }
 0x4d7   :  { %v3548_v41 = vpack.c.b16 %v3528_v24, %v3528_v24  ;;  %v3549_v0 = vpack.c.b16 %v3529_v39, %v3529_v39  ;;  %v11752_v24 = vunpack.i.h.bf16 %v9527_v19  ;;  %v11753_v51 = vunpack.i.h.bf16 %v9343_v9 }
 0x4d8   :  { %v2718_v52 = vsel %vm237_vm6, %v5836_v45, %v11270_v31  ;;  %v11755_v31 = vunpack.i.h.bf16 %v9745_v56  ;;  %v3499_v27 = vpack.c.b16 %v3479_v12, %v3479_v12  ;;  %5054 = vmatmul.msk.bf16.vlgmr.msrb.gmra.mxu0 %vm1405_vm9, %v9173_v46 }
 0x4d9   :  { %v9751_v43 = vsel %vm1083_vm3, %v3548_v41, 0  ;;  %v9754_v39 = vsel %vm1083_vm3, %v3549_v0, 0  ;;  %v2719_v14 = vsel %vm237_vm6, %v11752_v24, %v5836_v45  ;;  %v3079_v54 = vsel %vm602_vm1, %v5801_v13, %v11753_v51  ;;  %5055 = vmatmul.msk.bf16.vlgmr.msrb.gmra.mxu1 %vm1405_vm9, %v9173_v46 }
 0x4da   :  { %11750 = vst [vmem:[#allocation87_spill] sm:$0xff] %v9751_v43  ;;  %v11754_v41 = vunpack.i.h.bf16 %v9283_v63  ;;  %4123 = vmatpush.bf16.msra.mxu2 %v9751_v43  ;;  %v2741_v22 = vpack.c.bf16 %v2718_v52, %v2719_v14  ;;  %v2867_v32 = vsel %vm389_vm4, %v5826_v18, %v11755_v31  ;;  %v11756_v45 = vunpack.i.h.bf16 %v9463_v17  ;;  %4136 = vmatpush.bf16.msra.mxu3 %v9754_v39 }
 0x4db   :  { %11751 = vst [vmem:[#allocation88_spill] sm:$0xff] %v9754_v39  ;;  %v3498_v51 = vpack.c.b16 %v3478_v58, %v3478_v58  ;;  %v9797_v58 = vpop.permute.xlu1 %5849  ;;  %v9799_v12 = vpop.permute.xlu2 %5814 }
 0x4dc   :  { %v3080_v0 = vsel %vm602_vm1, %v11754_v41, %v5801_v13  ;;  %v2868_v9 = vsel %vm389_vm4, %v11756_v45, %v5826_v18  ;;  %v9782_v13 = vpack.c.b16 %v3476_v11, %v3476_v11  ;;  %v3228_v41 = vunpack.c.l.b16 %v2741_v22 }
 0x4dd   :  { %v3100_v24 = vpack.c.bf16 %v3079_v54, %v3080_v0  ;;  %v2891_v63 = vpack.c.bf16 %v2867_v32, %v2868_v9  ;;  %v9790_v54 = vsel %vm1083_vm3, %v3448_v16, %v3498_v51  ;;  %v9793_v18 = vsel %vm1083_vm3, %v3449_v4, %v3499_v27  ;;  %v9803_v27 = vpop.permute.xlu0 %5839 }
 0x4de   :  { %11757 = vst [vmem:[#allocation89_spill] sm:$0xff] %v9790_v54  ;;  %v3497_v32 = vpack.c.b16 %v3477_v49, %v3477_v49  ;;  %v3229_v11 = vunpack.c.h.b16 %v2741_v22  ;;  %4124 = vmatpush.bf16.msra.mxu2 %v9790_v54  ;;  %4137 = vmatpush.bf16.msra.mxu3 %v9793_v18  ;;  %v5816_v22 = vunpack.i.l.bf16 %v9799_v12  ;;  %v9806_v4 = vpack.c.b16 %v3228_v41, %v3228_v41 }
 0x4df   :  { %v3526_v14 = vunpack.c.l.b16 %v3100_v24  ;;  %v3527_v31 = vunpack.c.h.b16 %v3100_v24  ;;  %11758 = vst [vmem:[#allocation90_spill] sm:$0xff] %v9793_v18  ;;  %v3378_v9 = vunpack.c.l.b16 %v2891_v63  ;;  %v3379_v46 = vunpack.c.h.b16 %v2891_v63 }
 0x4e0   :  { %v5851_v24 = vunpack.i.l.bf16 %v9797_v58  ;;  %v5841_v51 = vunpack.i.l.bf16 %v9803_v27  ;;  %v11761_v63 = vunpack.i.h.bf16 %v9633_v57  ;;  %v11762_v16 = vunpack.i.h.bf16 %v9451_v37 }
 0x4e1   :  { %v3546_v0 = vpack.c.b16 %v3526_v14, %v3526_v14  ;;  %v3547_v45 = vpack.c.b16 %v3527_v31, %v3527_v31  ;;  %v11763_v49 = vunpack.i.h.bf16 %v9395_v6 }
 0x4e2   :  { %v2790_v31 = vsel %vm308_vm5, %v5851_v24, %v11761_v63  ;;  %v2791_v41 = vsel %vm308_vm5, %v11762_v16, %v5851_v24  ;;  %v11765_v63 = vunpack.i.h.bf16 %v9803_v27  ;;  %v11766_v16 = vunpack.i.h.bf16 %v9633_v57 }
 0x4e3   :  { %v9811_v52 = vsel %vm1083_vm3, %v3546_v0, 0  ;;  %v9814_v14 = vsel %vm1083_vm3, %v3547_v45, 0  ;;  %v2939_v18 = vsel %vm460_vm2, %v5816_v22, %v11763_v49  ;;  %v11764_v0 = vunpack.i.h.bf16 %v9453_v62 }
 0x4e4   :  { %11759 = vst [vmem:[#allocation91_spill] sm:$0xff] %v9811_v52  ;;  %4097 = vmatpush.bf16.msra.mxu0 %v9811_v52  ;;  %v2810_v54 = vpack.c.bf16 %v2790_v31, %v2791_v41  ;;  %v2788_v37 = vsel %vm308_vm5, %v5841_v51, %v11765_v63  ;;  %v2789_v6 = vsel %vm308_vm5, %v11766_v16, %v5841_v51 }
 0x4e5   :  { %11760 = vst [vmem:[#allocation92_spill] sm:$0xff] %v9814_v14  ;;  %v2940_v45 = vsel %vm460_vm2, %v11764_v0, %v5816_v22  ;;  %4110 = vmatpush.bf16.msra.mxu1 %v9814_v14  ;;  %v2811_v62 = vpack.c.bf16 %v2788_v37, %v2789_v6  ;;  %v3398_v22 = vpack.c.b16 %v3378_v9, %v3378_v9  ;;  %v5865_v9 = vpop.permute.xlu1 %5864 }
 0x4e6   :  { %v2960_v24 = vpack.c.bf16 %v2939_v18, %v2940_v45  ;;  %v3399_v0 = vpack.c.b16 %v3379_v46, %v3379_v46  ;;  %v3249_v41 = vpack.c.b16 %v3229_v11, %v3229_v11  ;;  %v3276_v43 = vunpack.c.l.b16 %v2810_v54  ;;  %v9853_v46 = vpop.permute.xlu2 %5829 }
 0x4e7   :  { %v9845_v63 = vsel %vm1083_vm3, %v8934_v59, %v3398_v22  ;;  %v3278_v18 = vunpack.c.l.b16 %v2811_v62  ;;  %v3277_v51 = vunpack.c.h.b16 %v2810_v54  ;;  %v3279_v37 = vunpack.c.h.b16 %v2811_v62 }
 0x4e8   :  { %v3426_v39 = vunpack.c.l.b16 %v2960_v24  ;;  %v3427_v31 = vunpack.c.h.b16 %v2960_v24  ;;  %11767 = vst [vmem:[#allocation93_spill] sm:$0xff] %v9845_v63  ;;  %v9849_v57 = vsel %vm1083_vm3, %v8936_v8, %v3399_v0  ;;  %4125 = vmatpush.bf16.msra.mxu2 %v9845_v63  ;;  %v9855_v16 = vpack.c.b16 %v3276_v43, %v3276_v43  ;;  %v9857_v24 = vpop.permute.xlu0 %5854 }
 0x4e9   :  { %11768 = vst [vmem:[#allocation94_spill] sm:$0xff] %v9849_v57  ;;  %4138 = vmatpush.bf16.msra.mxu3 %v9849_v57  ;;  %v5867_v59 = vunpack.i.h.bf16 %v5865_v9  ;;  %v5866_v6 = vunpack.i.l.bf16 %v5865_v9  ;;  %v5831_v54 = vunpack.i.l.bf16 %v9853_v46  ;;  %v5856_v0 = vunpack.i.l.bf16 %v9857_v24 }
 0x4ea   :  { %v3446_v45 = vpack.c.b16 %v3426_v39, %v3426_v39  ;;  %v3447_v11 = vpack.c.b16 %v3427_v31, %v3427_v31  ;;  %v11771_v43 = vunpack.i.h.bf16 %v9741_v34  ;;  %v11773_v8 = vunpack.i.h.bf16 %v9684_v35 }
 0x4eb   :  { %v11776_v34 = vunpack.i.h.bf16 %v9857_v24  ;;  %v11777_v35 = vunpack.i.h.bf16 %v9575_v26 }
 0x4ec   :  { %v9865_v49 = vsel %vm1083_vm3, %v3446_v45, %v9782_v13  ;;  %v9868_v39 = vsel %vm1083_vm3, %v3447_v11, %v3497_v32  ;;  %v3074_v62 = vsel %vm602_vm1, %v11771_v43, %v5866_v6  ;;  %v11772_v31 = vmov %v11771_v43  ;;  %v11774_v13 = vld [vmem:[#allocation27_spill] sm:$0xff] }
 0x4ed   :  { %11769 = vst [vmem:[#allocation95_spill] sm:$0xff] %v9865_v49  ;;  %v3075_v9 = vsel %vm602_vm1, %v5867_v59, %v11772_v31  ;;  %v3076_v22 = vsel %vm602_vm1, %v11773_v8, %v5867_v59  ;;  %v11775_v45 = vunpack.i.h.bf16 %v11774_v13  ;;  %4098 = vmatpush.bf16.msra.mxu0 %v9865_v49  ;;  %v2578_v31 = vsel %vm95_vm8, %v5856_v0, %v11776_v34 }
 0x4ee   :  { %11770 = vst [vmem:[#allocation96_spill] sm:$0xff] %v9868_v39  ;;  %v9887_v11 = vpack.c.bf16 %v3075_v9, %v3076_v22  ;;  %v2579_v59 = vsel %vm95_vm8, %v11777_v35, %v5856_v0  ;;  %4111 = vmatpush.bf16.msra.mxu1 %v9868_v39  ;;  %v3298_v13 = vpack.c.b16 %v3278_v18, %v3278_v18 }
 0x4ef   :  { %v3093_v32 = vsel %vm602_vm1, %v5866_v6, %v11775_v45  ;;  %v2601_v8 = vpack.c.bf16 %v2578_v31, %v2579_v59  ;;  %v11778_v6 = vunpack.i.h.bf16 %v9463_v17  ;;  %v9906_v34 = vpack.c.b16 %v3277_v51, %v3277_v51  ;;  %v5875_v59 = vpop.permute.xlu1 %5874 }
 0x4f0   :  { %v3103_v43 = vpack.c.bf16 %v3093_v32, %v3074_v62  ;;  %v11779_v62 = vunpack.i.h.bf16 %v9386_v1  ;;  %v3299_v32 = vpack.c.b16 %v3279_v37, %v3279_v37  ;;  %v9910_v0 = vsel %vm1083_vm3, %v9806_v4, %v3298_v13 }
 0x4f1   :  { %v2869_v22 = vsel %vm389_vm4, %v5831_v54, %v11778_v6  ;;  %11780 = vst [vmem:[#allocation27_spill] sm:$0xff] %v9910_v0  ;;  %v3128_v31 = vunpack.c.l.b16 %v2601_v8  ;;  %v3129_v17 = vunpack.c.h.b16 %v2601_v8  ;;  %4126 = vmatpush.bf16.msra.mxu2 %v9910_v0  ;;  %v5877_v51 = vunpack.i.h.bf16 %v5875_v59 }
 0x4f2   :  { %v2870_v9 = vsel %vm389_vm4, %v11779_v62, %v5831_v54  ;;  %v3532_v57 = vunpack.c.l.b16 %v3103_v43  ;;  %v3533_v35 = vunpack.c.h.b16 %v3103_v43  ;;  %v9914_v1 = vsel %vm1083_vm3, %v3249_v41, %v3299_v32  ;;  %v5845_v54 = vpop.permute.xlu2 %5844  ;;  %v9917_v62 = vpop.permute.xlu0 %5869  ;;  %v11785_v43 = vld [vmem:[#allocation30_spill] sm:$0xff] }
 0x4f3   :  { %v2890_v45 = vpack.c.bf16 %v2869_v22, %v2870_v9  ;;  %11781 = vst [vmem:[#allocation97_spill] sm:$0xff] %v9914_v1  ;;  %4139 = vmatpush.bf16.msra.mxu3 %v9914_v1  ;;  %v5876_v22 = vunpack.i.l.bf16 %v5875_v59  ;;  %v5847_v4 = vunpack.i.h.bf16 %v5845_v54  ;;  %v5846_v9 = vunpack.i.l.bf16 %v5845_v54 }
 0x4f4   :  { %v3552_v37 = vpack.c.b16 %v3532_v57, %v3532_v57  ;;  %v5871_v8 = vunpack.i.l.bf16 %v9917_v62  ;;  %v11782_v32 = vunpack.i.h.bf16 %v9799_v12  ;;  %v11784_v1 = vunpack.i.h.bf16 %v9631_v33 }
 0x4f5   :  { %v3376_v18 = vunpack.c.l.b16 %v2890_v45  ;;  %v3377_v6 = vunpack.c.h.b16 %v2890_v45  ;;  %v11786_v0 = vunpack.i.h.bf16 %v11785_v43 }
 0x4f6   :  { %v2934_v45 = vsel %vm460_vm2, %v11782_v32, %v5876_v22  ;;  %v11783_v57 = vmov %v11782_v32  ;;  %v2936_v54 = vsel %vm460_vm2, %v11784_v1, %v5877_v51  ;;  %v11787_v32 = vunpack.i.h.bf16 %v9575_v26  ;;  %v11791_v26 = vld [vmem:[#allocation38_spill] sm:$0xff] }
 0x4f7   :  { %v3396_v13 = vpack.c.b16 %v3376_v18, %v3376_v18  ;;  %v3397_v41 = vpack.c.b16 %v3377_v6, %v3377_v6  ;;  %v2935_v59 = vsel %vm460_vm2, %v5877_v51, %v11783_v57  ;;  %v2953_v18 = vsel %vm460_vm2, %v5876_v22, %v11786_v0 }
 0x4f8   :  { %v9937_v6 = vpack.c.bf16 %v2935_v59, %v2936_v54  ;;  %v2963_v63 = vpack.c.bf16 %v2953_v18, %v2934_v45  ;;  %v2580_v12 = vsel %vm95_vm8, %v5871_v8, %v11787_v32  ;;  %v11788_v57 = vunpack.i.h.bf16 %v9517_v29  ;;  %v11793_v29 = vld [vmem:[#allocation46_spill] sm:$0xff]  ;;  %v5890_v18 = vpop.permute.xlu1 %5889 }
 0x4f9   :  { %v11789_v1 = vunpack.i.h.bf16 %v9527_v19  ;;  %v11790_v0 = vunpack.i.h.bf16 %v9577_v21  ;;  %v9957_v43 = vsel %vm1083_vm3, %v11791_v26, %v3396_v13  ;;  %v9964_v19 = vpack.c.b16 %v3128_v31, %v3128_v31 }
 0x4fa   :  { %v2581_v33 = vsel %vm95_vm8, %v11788_v57, %v5871_v8  ;;  %11792 = vst [vmem:[#allocation30_spill] sm:$0xff] %v9957_v43  ;;  %4099 = vmatpush.bf16.msra.mxu0 %v9957_v43  ;;  %v9962_v8 = vsel %vm1083_vm3, %v11793_v29, %v3397_v41  ;;  %v9966_v59 = vpack.c.b16 %v3129_v17, %v3129_v17  ;;  %v9970_v21 = vsel %vm1083_vm3, %v3552_v37, 0  ;;  %v9977_v37 = vpop.permute.xlu2 %5859 }
 0x4fb   :  { %v2600_v39 = vpack.c.bf16 %v2580_v12, %v2581_v33  ;;  %v2720_v51 = vsel %vm237_vm6, %v5846_v9, %v11789_v1  ;;  %v2721_v22 = vsel %vm237_vm6, %v11790_v0, %v5846_v9  ;;  %11794 = vst [vmem:[#allocation38_spill] sm:$0xff] %v9962_v8  ;;  %4112 = vmatpush.bf16.msra.mxu1 %v9962_v8  ;;  %v3432_v54 = vunpack.c.l.b16 %v2963_v63 }
 0x4fc   :  { %v2740_v45 = vpack.c.bf16 %v2720_v51, %v2721_v22  ;;  %v3553_v9 = vpack.c.b16 %v3533_v35, %v3533_v35  ;;  %v3433_v13 = vunpack.c.h.b16 %v2963_v63  ;;  %v5892_v1 = vunpack.i.h.bf16 %v5890_v18  ;;  %v5880_v51 = vpop.permute.xlu0 %5879 }
 0x4fd   :  { %v3126_v57 = vunpack.c.l.b16 %v2600_v39  ;;  %v3127_v33 = vunpack.c.h.b16 %v2600_v39  ;;  %v5891_v41 = vunpack.i.l.bf16 %v5890_v18  ;;  %v9975_v17 = vpack.c.b16 %v3432_v54, %v3432_v54 }
 0x4fe   :  { %v3226_v32 = vunpack.c.l.b16 %v2740_v45  ;;  %v3227_v12 = vunpack.c.h.b16 %v2740_v45  ;;  %v9973_v31 = vsel %vm1083_vm3, %v3553_v9, 0  ;;  %v5882_v0 = vunpack.i.h.bf16 %v5880_v51 }
 0x4ff   :  { %v5881_v22 = vunpack.i.l.bf16 %v5880_v51  ;;  %v11795_v63 = vunpack.i.l.bf16 %v8808_v55  ;;  %v2715_v39 = vsel %vm237_vm6, %v5847_v4, %v5891_v41  ;;  %v2716_v29 = vsel %vm237_vm6, %v5892_v1, %v5847_v4 }
 0x500   :  { %v3246_v35 = vpack.c.b16 %v3226_v32, %v3226_v32  ;;  %v3247_v26 = vpack.c.b16 %v3227_v12, %v3227_v12  ;;  %v11796_v9 = vunpack.i.h.bf16 %v9739_v40  ;;  %v11797_v55 = vunpack.i.h.bf16 %v9682_v50 }
 0x501   :  { %v2714_v45 = vsel %vm237_vm6, %v5891_v41, %v11795_v63  ;;  %v11799_v4 = vunpack.i.h.bf16 %v9687_v48 }
 0x502   :  { %v2717_v54 = vsel %vm237_vm6, %v11796_v9, %v5892_v1  ;;  %v9993_v32 = vpack.c.bf16 %v2714_v45, %v2715_v39  ;;  %v3005_v12 = vsel %vm531_vm0, %v5882_v0, %v11797_v55  ;;  %v11798_v51 = vmov %v11797_v55  ;;  %v11800_v1 = vld [vmem:[#allocation34_spill] sm:$0xff] }
 0x503   :  { %v9991_v18 = vpack.c.bf16 %v2716_v29, %v2717_v54  ;;  %v3004_v41 = vsel %vm531_vm0, %v11798_v51, %v5881_v22  ;;  %v3006_v40 = vsel %vm531_vm0, %v11799_v4, %v5882_v0  ;;  %v11801_v63 = vunpack.i.h.bf16 %v11800_v1 }
 0x504   :  { %v5862_v39 = vunpack.i.h.bf16 %v9977_v37  ;;  %v5861_v29 = vunpack.i.l.bf16 %v9977_v37  ;;  %v10013_v9 = vpack.c.bf16 %v3005_v12, %v3006_v40  ;;  %v10017_v54 = vsel %vm1083_vm3, %v3246_v35, %v9855_v16  ;;  %v5905_v12 = vpop.permute.xlu1 %5904  ;;  %v5895_v40 = vpop.permute.xlu0 %5894 }
 0x505   :  { %v3023_v45 = vsel %vm531_vm0, %v5881_v22, %v11801_v63  ;;  %11802 = vst [vmem:[#allocation46_spill] sm:$0xff] %v10017_v54  ;;  %v10021_v48 = vsel %vm1083_vm3, %v3247_v26, %v9906_v34  ;;  %v11804_v22 = vunpack.i.h.bf16 %v9637_v44  ;;  %4100 = vmatpush.bf16.msra.mxu0 %v10017_v54  ;;  %v3453_v37 = vpack.c.b16 %v3433_v13, %v3433_v13 }
 0x506   :  { %v3033_v50 = vpack.c.bf16 %v3023_v45, %v3004_v41  ;;  %11803 = vst [vmem:[#allocation34_spill] sm:$0xff] %v10021_v48  ;;  %v2648_v0 = vsel %vm166_vm7, %v5861_v29, %v5862_v39  ;;  %4113 = vmatpush.bf16.msra.mxu1 %v10021_v48  ;;  %v3530_v16 = vunpack.c.l.b16 %v9887_v11  ;;  %v3146_v26 = vpack.c.b16 %v3126_v57, %v3126_v57 }
 0x507   :  { %v2649_v55 = vsel %vm166_vm7, %v11804_v22, %v5861_v29  ;;  %v5907_v41 = vunpack.i.h.bf16 %v5905_v12  ;;  %v5906_v4 = vunpack.i.l.bf16 %v5905_v12  ;;  %v3147_v1 = vpack.c.b16 %v3127_v33, %v3127_v33  ;;  %v2629_v29 = vpop.permute.xlu2 %2628 }
 0x508   :  { %v2671_v35 = vpack.c.bf16 %v2648_v0, %v2649_v55  ;;  %v3482_v51 = vunpack.c.l.b16 %v3033_v50  ;;  %v3483_v34 = vunpack.c.h.b16 %v3033_v50  ;;  %v3550_v63 = vpack.c.b16 %v3530_v16, %v3530_v16 }
 0x509   :  { %v5897_v45 = vunpack.i.h.bf16 %v5895_v40  ;;  %v5896_v8 = vunpack.i.l.bf16 %v5895_v40  ;;  %v11805_v48 = vunpack.i.l.bf16 %v9080_v25  ;;  %v2645_v0 = vsel %vm166_vm7, %v5906_v4, %v5907_v41 }
 0x50a   :  { %v3178_v22 = vunpack.c.l.b16 %v2671_v35  ;;  %v3179_v54 = vunpack.c.h.b16 %v2671_v35  ;;  %v11806_v57 = vunpack.i.h.bf16 %v9637_v44  ;;  %v11807_v33 = vunpack.i.h.bf16 %v9580_v23 }
 0x50b   :  { %v2644_v13 = vsel %vm166_vm7, %v5907_v41, %v11805_v48  ;;  %v11808_v25 = vunpack.i.h.bf16 %v9797_v58  ;;  %v11809_v35 = vunpack.i.l.bf16 %v8855_v2  ;;  %v11811_v41 = vunpack.i.h.bf16 %v9803_v27 }
 0x50c   :  { %v2650_v50 = vsel %vm166_vm7, %v2629_v29, %v11806_v57  ;;  %v2651_v55 = vsel %vm166_vm7, %v11807_v33, %v2629_v29  ;;  %v10046_v16 = vpack.c.bf16 %v2644_v13, %v2645_v0  ;;  %v3198_v0 = vpack.c.b16 %v3178_v22, %v3178_v22 }
 0x50d   :  { %v2786_v48 = vsel %vm308_vm5, %v5897_v45, %v11808_v25  ;;  %v2784_v44 = vsel %vm308_vm5, %v5896_v8, %v11809_v35  ;;  %v11810_v12 = vmov %v11808_v25  ;;  %v2787_v40 = vsel %vm308_vm5, %v11811_v41, %v5897_v45 }
 0x50e   :  { %v2785_v23 = vsel %vm308_vm5, %v11810_v12, %v5896_v8  ;;  %v2670_v13 = vpack.c.bf16 %v2650_v50, %v2651_v55  ;;  %v10066_v57 = vpack.c.bf16 %v2786_v48, %v2787_v40  ;;  %v3199_v2 = vpack.c.b16 %v3179_v54, %v3179_v54 }
 0x50f   :  { %v10064_v29 = vpack.c.bf16 %v2784_v44, %v2785_v23  ;;  %v3502_v33 = vpack.c.b16 %v3482_v51, %v3482_v51  ;;  %v3503_v25 = vpack.c.b16 %v3483_v34, %v3483_v34  ;;  %v10070_v58 = vsel %vm1083_vm3, %v9964_v19, %v3198_v0  ;;  %v10104_v23 = vld [vmem:[%s10965_s3] sm:$0xf] }
 0x510   :  { %v3176_v35 = vunpack.c.l.b16 %v2670_v13  ;;  %v3177_v43 = vunpack.c.h.b16 %v2670_v13  ;;  %v10073_v27 = vsel %vm1083_vm3, %v3550_v63, 0  ;;  %4127 = vmatpush.bf16.msra.mxu2 %v10070_v58  ;;  %v10078_v8 = vsel %vm1083_vm3, %v9966_v59, %v3199_v2  ;;  %v2637_v63 = vpop.permute.xlu0 %2636 }
 0x511   :  { %v10082_v54 = vsel %vm1083_vm3, %v9975_v17, %v3502_v33  ;;  %v10085_v51 = vsel %vm1083_vm3, %v3453_v37, %v3503_v25  ;;  %v3531_v34 = vunpack.c.h.b16 %v9887_v11  ;;  %4140 = vmatpush.bf16.msra.mxu3 %v10078_v8  ;;  %v3430_v22 = vunpack.c.l.b16 %v9937_v6  ;;  %v5885_v11 = vpop.permute.xlu2 %5884 }
 0x512   :  { %v3196_v19 = vpack.c.b16 %v3176_v35, %v3176_v35  ;;  %v3197_v45 = vpack.c.b16 %v3177_v43, %v3177_v43  ;;  %v3480_v59 = vunpack.c.l.b16 %v10013_v9  ;;  %v2646_v17 = vsel %vm166_vm7, %v2637_v63, %v5906_v4  ;;  %v11815_v35 = vld [vmem:[#allocation33_spill] sm:$0xff] }
 0x513   :  { %v2647_v37 = vsel %vm166_vm7, %v5862_v39, %v2637_v63  ;;  %v3551_v50 = vpack.c.b16 %v3531_v34, %v3531_v34  ;;  %v3431_v43 = vunpack.c.h.b16 %v9937_v6  ;;  %v5887_v48 = vunpack.i.h.bf16 %v5885_v11  ;;  %5060 = vmatmul.msk.bf16.vlgmr.msra.gmra.mxu2 %vm1405_vm9, %v10104_v23 }
 0x514   :  { %4175 = vmatpush.bf16.msrb.mxu2 %v9970_v21  ;;  %v2672_v55 = vpack.c.bf16 %v2646_v17, %v2647_v37  ;;  %v5886_v44 = vunpack.i.l.bf16 %v5885_v11  ;;  %v10099_v12 = vsel %vm1083_vm3, %v3146_v26, %v3196_v19  ;;  %v10110_v39 = vsel %vm1083_vm3, %v3147_v1, %v3197_v45  ;;  %5061 = vmatmul.msk.bf16.vlgmr.msra.gmra.mxu3 %vm1405_vm9, %v10104_v23 }
 0x515   :  { %4188 = vmatpush.bf16.msrb.mxu3 %v9973_v31  ;;  %4101 = vmatpush.bf16.msra.mxu0 %v10099_v12  ;;  %v10113_v6 = vsel %vm1083_vm3, %v3551_v50, 0  ;;  %v3450_v4 = vpack.c.b16 %v3430_v22, %v3430_v22  ;;  %v3500_v41 = vpack.c.b16 %v3480_v59, %v3480_v59  ;;  %v11812_v13 = vunpack.i.h.bf16 %v9745_v56 }
 0x516   :  { %v3180_v26 = vunpack.c.l.b16 %v2672_v55  ;;  %v3181_v40 = vunpack.c.h.b16 %v2672_v55  ;;  %v11813_v2 = vunpack.i.h.bf16 %v9853_v46  ;;  %4114 = vmatpush.bf16.msra.mxu1 %v10110_v39  ;;  %v11816_v34 = vunpack.i.h.bf16 %v11815_v35 }
 0x517   :  { %v2866_v0 = vsel %vm389_vm4, %v11812_v13, %v5887_v48  ;;  %v10138_v19 = vsel %vm1083_vm3, %v3450_v4, %v3500_v41  ;;  %v3481_v45 = vunpack.c.h.b16 %v10013_v9  ;;  %v3451_v17 = vpack.c.b16 %v3431_v43, %v3431_v43 }
 0x518   :  { %v2864_v1 = vsel %vm389_vm4, %v11813_v2, %v5886_v44  ;;  %4176 = vmatpush.bf16.msrb.mxu2 %v10082_v54  ;;  %v11814_v33 = vmov %v11813_v2  ;;  %v2883_v56 = vsel %vm389_vm4, %v5886_v44, %v11816_v34  ;;  %v10141_v63 = vpack.c.b16 %v3180_v26, %v3180_v26  ;;  %5058 = vmatmul.msk.bf16.vlgmr.msra.gmra.mxu0 %vm1405_vm9, %v10104_v23 }
 0x519   :  { %v2865_v25 = vsel %vm389_vm4, %v5887_v48, %v11814_v33  ;;  %4189 = vmatpush.bf16.msrb.mxu3 %v10085_v51  ;;  %4149 = vmatpush.bf16.msrb.mxu0 %v10073_v27  ;;  %v10143_v46 = vpack.c.b16 %v3181_v40, %v3181_v40  ;;  %v2893_v59 = vpack.c.bf16 %v2883_v56, %v2864_v1  ;;  %v3230_v11 = vunpack.c.l.b16 %v9991_v18  ;;  %v5900_v43 = vpop.permute.xlu2 %5899 }
 0x51a   :  { %v2892_v22 = vpack.c.bf16 %v2865_v25, %v2866_v0  ;;  %4162 = vmatpush.bf16.msrb.mxu1 %v10113_v6  ;;  %v3501_v37 = vpack.c.b16 %v3481_v45, %v3481_v45  ;;  %v3280_v9 = vunpack.c.l.b16 %v10066_v57  ;;  %v3231_v40 = vunpack.c.h.b16 %v9991_v18 }
 0x51b   :  { %5059 = vmatmul.msk.bf16.vlgmr.msra.gmra.mxu1 %vm1405_vm9, %v10104_v23  ;;  %v3382_v48 = vunpack.c.l.b16 %v2893_v59  ;;  %v3383_v44 = vunpack.c.h.b16 %v2893_v59  ;;  %v3250_v41 = vpack.c.b16 %v3230_v11, %v3230_v11  ;;  %v5902_v13 = vunpack.i.h.bf16 %v5900_v43 }
 0x51c   :  { %v3380_v50 = vunpack.c.l.b16 %v2892_v22  ;;  %v3381_v55 = vunpack.c.h.b16 %v2892_v22  ;;  %v10154_v4 = vsel %vm1083_vm3, %v3451_v17, %v3501_v37  ;;  %v3300_v26 = vpack.c.b16 %v3280_v9, %v3280_v9 }
 0x51d   :  { %4150 = vmatpush.bf16.msrb.mxu0 %v10138_v19  ;;  %v5901_v0 = vunpack.i.l.bf16 %v5900_v43  ;;  %v3402_v33 = vpack.c.b16 %v3382_v48, %v3382_v48  ;;  %v3403_v25 = vpack.c.b16 %v3383_v44, %v3383_v44  ;;  %v3251_v34 = vpack.c.b16 %v3231_v40, %v3231_v40 }
 0x51e   :  { %4163 = vmatpush.bf16.msrb.mxu1 %v10154_v4  ;;  %v3400_v2 = vpack.c.b16 %v3380_v50, %v3380_v50  ;;  %v3401_v1 = vpack.c.b16 %v3381_v55, %v3381_v55  ;;  %v10159_v35 = vsel %vm1083_vm3, %v3250_v41, %v3300_v26  ;;  %v11817_v56 = vunpack.i.h.bf16 %v9917_v62  ;;  %v11821_v55 = vld [vmem:[#allocation44_spill] sm:$0xff] }
 0x51f   :  { %v11818_v22 = vunpack.i.h.bf16 %v9857_v24  ;;  %v11819_v59 = vunpack.i.l.bf16 %v8973_v42  ;;  %v11822_v24 = vld [vmem:[#allocation45_spill] sm:$0xff]  ;;  %v11823_v42 = vld [vmem:[#allocation47_spill] sm:$0xff]  ;;  %v10193_v43 = vsel %vm1083_vm3, %v11824_v28, %v3403_v25  ;;  %v3281_v41 = vunpack.c.h.b16 %v10066_v57 }
 0x520   :  { %v2576_v45 = vsel %vm95_vm8, %v5902_v13, %v11817_v56  ;;  %v11820_v37 = vmov %v11817_v56  ;;  %v10179_v48 = vsel %vm1083_vm3, %v11821_v55, %v3400_v2  ;;  %v10183_v44 = vsel %vm1083_vm3, %v11822_v24, %v3401_v1  ;;  %4190 = vmatpush.bf16.msrb.mxu3 %v10193_v43 }
 0x521   :  { %v2577_v18 = vsel %vm95_vm8, %v11818_v22, %v5902_v13  ;;  %v2574_v17 = vsel %vm95_vm8, %v5901_v0, %v11819_v59  ;;  %v2575_v11 = vsel %vm95_vm8, %v11820_v37, %v5901_v0  ;;  %4151 = vmatpush.bf16.msrb.mxu0 %v10179_v48  ;;  %v10189_v62 = vsel %vm1083_vm3, %v11823_v42, %v3402_v33 }
 0x522   :  { %v2602_v9 = vpack.c.bf16 %v2576_v45, %v2577_v18  ;;  %v2603_v50 = vpack.c.bf16 %v2574_v17, %v2575_v11  ;;  %4164 = vmatpush.bf16.msrb.mxu1 %v10183_v44  ;;  %v3232_v26 = vunpack.c.l.b16 %v9993_v32  ;;  %4177 = vmatpush.bf16.msrb.mxu2 %v10189_v62  ;;  %v3282_v40 = vunpack.c.l.b16 %v10064_v29 }
 0x523   :  { %v3233_v13 = vunpack.c.h.b16 %v9993_v32  ;;  %v3283_v0 = vunpack.c.h.b16 %v10064_v29  ;;  %v3301_v1 = vpack.c.b16 %v3281_v41, %v3281_v41  ;;  %v3182_v32 = vunpack.c.l.b16 %v10046_v16 }
 0x524   :  { %v3130_v2 = vunpack.c.l.b16 %v2602_v9  ;;  %v3252_v33 = vpack.c.b16 %v3232_v26, %v3232_v26  ;;  %v3131_v56 = vunpack.c.h.b16 %v2602_v9  ;;  %v3132_v25 = vunpack.c.l.b16 %v2603_v50 }
 0x525   :  { %v3302_v45 = vpack.c.b16 %v3282_v40, %v3282_v40  ;;  %v3253_v22 = vpack.c.b16 %v3233_v13, %v3233_v13  ;;  %v3303_v57 = vpack.c.b16 %v3283_v0, %v3283_v0  ;;  %4152 = vmatpush.bf16.msrb.mxu0 %v10159_v35  ;;  %v10204_v59 = vsel %vm1083_vm3, %v3251_v34, %v3301_v1  ;;  %v11828_v40 = vld [vmem:[#allocation29_spill] sm:$0xff]  ;;  %v11829_v13 = vld [vmem:[#allocation43_spill] sm:$0xff] }
 0x526   :  { %v3150_v18 = vpack.c.b16 %v3130_v2, %v3130_v2  ;;  %v3151_v17 = vpack.c.b16 %v3131_v56, %v3131_v56  ;;  %v3152_v37 = vpack.c.b16 %v3132_v25, %v3132_v25  ;;  %4165 = vmatpush.bf16.msrb.mxu1 %v10204_v59  ;;  %v3133_v55 = vunpack.c.h.b16 %v2603_v50  ;;  %v11825_v50 = vld [vmem:[#allocation31_spill] sm:$0xff]  ;;  %v11830_v0 = vld [vmem:[#allocation37_spill] sm:$0xff]  ;;  %v11834_v56 = vld [vmem:[#allocation40_spill] sm:$0xff] }
 0x527   :  { %v10209_v29 = vsel %vm1083_vm3, %v3252_v33, %v3302_v45  ;;  %v10212_v11 = vsel %vm1083_vm3, %v3253_v22, %v3303_v57  ;;  %v3202_v24 = vpack.c.b16 %v3182_v32, %v3182_v32  ;;  %v3183_v42 = vunpack.c.h.b16 %v10046_v16  ;;  %v11827_v16 = vld [vmem:[#allocation28_spill] sm:$0xff]  ;;  %v11831_v2 = vld [vmem:[#allocation35_spill] sm:$0xff]  ;;  %v11832_v1 = vld [vmem:[#allocation41_spill] sm:$0xff] }
 0x528   :  { %v10216_v9 = vsel %vm1083_vm3, %v3150_v18, %v10141_v63  ;;  %4178 = vmatpush.bf16.msrb.mxu2 %v10209_v29  ;;  %4191 = vmatpush.bf16.msrb.mxu3 %v10212_v11  ;;  %v10222_v34 = vsel %vm1083_vm3, %v3151_v17, %v10143_v46  ;;  %v3153_v28 = vpack.c.b16 %v3133_v55, %v3133_v55  ;;  %v11826_v46 = vld [vmem:[#allocation32_spill] sm:$0xff]  ;;  %v11833_v33 = vld [vmem:[#allocation39_spill] sm:$0xff]  ;;  %v11835_v25 = vld [vmem:[#allocation42_spill] sm:$0xff] }
 0x529   :  { %4153 = vmatpush.bf16.msrb.mxu0 %v10216_v9  ;;  %v10227_v41 = vsel %vm1083_vm3, %v3152_v37, %v3202_v24  ;;  %v3203_v63 = vpack.c.b16 %v3183_v42, %v3183_v42  ;;  %v11836_v45 = vld [vmem:[#allocation36_spill] sm:$0xff]  ;;  %v11837_v22 = vld [vmem:[#allocation49_spill] sm:$0xff]  ;;  %v11838_v57 = vld [vmem:[#allocation50_spill] sm:$0xff] }
 0x52a   :  { %4166 = vmatpush.bf16.msrb.mxu1 %v10222_v34  ;;  %v11840_v18 = vld [vmem:[#allocation51_spill] sm:$0xff]  ;;  %v11841_v17 = vld [vmem:[#allocation60_spill] sm:$0xff]  ;;  %v10265_v37 = vld [vmem:[%s10965_s3 + $0x4] sm:$0xf] }
 0x52b   :  { %v10233_v26 = vsel %vm1083_vm3, %v3153_v28, %v3203_v63  ;;  %v11842_v32 = vld [vmem:[#allocation61_spill] sm:$0xff]  ;;  %v11843_v55 = vld [vmem:[#allocation54_spill] sm:$0xff]  ;;  %v11844_v24 = vld [vmem:[#allocation55_spill] sm:$0xff] }
 0x52c   :  { %4179 = vmatpush.bf16.msrb.mxu2 %v10227_v41  ;;  %4192 = vmatpush.bf16.msrb.mxu3 %v10233_v26  ;;  %v11845_v42 = vld [vmem:[#allocation3_spill] sm:$0xff]  ;;  %v11846_v28 = vld [vmem:[#allocation5_spill] sm:$0xff]  ;;  %v11847_v63 = vld [vmem:[#allocation6_spill] sm:$0xff] }
 0x52d   :  { %4206 = vmatpush.bf16.msra.mxu0 %v11825_v50  ;;  %5063 = vmatmul.msk.bf16.vlgmr.msrb.gmra.mxu1 %vm1405_vm9, %v10104_v23 }
 0x52e   :  { %4219 = vmatpush.bf16.msra.mxu1 %v11826_v46  ;;  %5062 = vmatmul.msk.bf16.vlgmr.msrb.gmra.mxu0 %vm1405_vm9, %v10104_v23 }
 0x52f   :  { %5064 = vmatmul.msk.bf16.vlgmr.msrb.gmra.mxu2 %vm1405_vm9, %v10104_v23  ;;  %5065 = vmatmul.msk.bf16.vlgmr.msrb.gmra.mxu3 %vm1405_vm9, %v10104_v23  ;;  %v11839_v23 = vld [vmem:[#allocation53_spill] sm:$0xff] }
 0x530   :  { %4232 = vmatpush.bf16.msra.mxu2 %v11827_v16  ;;  %4245 = vmatpush.bf16.msra.mxu3 %v11828_v40 }
 0x531   :  { %4207 = vmatpush.bf16.msra.mxu0 %v11829_v13 }
 0x532   :  { %4220 = vmatpush.bf16.msra.mxu1 %v11830_v0 }
 0x534   :  { %4233 = vmatpush.bf16.msra.mxu2 %v11831_v2  ;;  %4246 = vmatpush.bf16.msra.mxu3 %v11832_v1 }
 0x535   :  { %4208 = vmatpush.bf16.msra.mxu0 %v11833_v33 }
 0x536   :  { %4221 = vmatpush.bf16.msra.mxu1 %v11834_v56 }
 0x538   :  { %4234 = vmatpush.bf16.msra.mxu2 %v11835_v25  ;;  %4247 = vmatpush.bf16.msra.mxu3 %v11836_v45 }
 0x539   :  { %4209 = vmatpush.bf16.msra.mxu0 %v11837_v22 }
 0x53a   :  { %4222 = vmatpush.bf16.msra.mxu1 %v11838_v57 }
 0x53c   :  { %4235 = vmatpush.bf16.msra.mxu2 %v11839_v23  ;;  %4248 = vmatpush.bf16.msra.mxu3 %v11840_v18 }
 0x53d   :  { %4210 = vmatpush.bf16.msra.mxu0 %v9145_v47 }
 0x53e   :  { %4223 = vmatpush.bf16.msra.mxu1 %v9148_v60  ;;  %v11854_v60 = vld [vmem:[#allocation13_spill] sm:$0xff] }
 0x540   :  { %4236 = vmatpush.bf16.msra.mxu2 %v11841_v17  ;;  %4249 = vmatpush.bf16.msra.mxu3 %v11842_v32  ;;  %v11852_v32 = vld [vmem:[#allocation9_spill] sm:$0xff]  ;;  %v11853_v17 = vld [vmem:[#allocation10_spill] sm:$0xff] }
 0x541   :  { %4258 = vmatpush.bf16.msrb.mxu0 %v9121_v36  ;;  %5068 = vmatmul.msk.bf16.vlgmr.msra.gmra.mxu1 %vm1405_vm9, %v10265_v37  ;;  %v11851_v36 = vld [vmem:[#allocation11_spill] sm:$0xff] }
 0x542   :  { %4271 = vmatpush.bf16.msrb.mxu1 %v9128_v20  ;;  %5067 = vmatmul.msk.bf16.vlgmr.msra.gmra.mxu0 %vm1405_vm9, %v10265_v37  ;;  %v11850_v20 = vld [vmem:[#allocation12_spill] sm:$0xff] }
 0x543   :  { %5069 = vmatmul.msk.bf16.vlgmr.msra.gmra.mxu2 %vm1405_vm9, %v10265_v37  ;;  %5070 = vmatmul.msk.bf16.vlgmr.msra.gmra.mxu3 %vm1405_vm9, %v10265_v37 }
 0x544   :  { %4284 = vmatpush.bf16.msrb.mxu2 %v11843_v55  ;;  %4297 = vmatpush.bf16.msrb.mxu3 %v11844_v24  ;;  %v11848_v24 = vld [vmem:[#allocation8_spill] sm:$0xff]  ;;  %v11849_v55 = vld [vmem:[#allocation7_spill] sm:$0xff] }
 0x545   :  { %4259 = vmatpush.bf16.msrb.mxu0 %v9195_v10 }
 0x546   :  { %4272 = vmatpush.bf16.msrb.mxu1 %v11845_v42 }
 0x548   :  { %4285 = vmatpush.bf16.msrb.mxu2 %v11846_v28  ;;  %4298 = vmatpush.bf16.msrb.mxu3 %v11847_v63 }
 0x549   :  { %4260 = vmatpush.bf16.msrb.mxu0 %v11848_v24  ;;  %v11855_v24 = vld [vmem:[#allocation68_spill] sm:$0xff] }
 0x54a   :  { %4273 = vmatpush.bf16.msrb.mxu1 %v11849_v55  ;;  %v10296_v55 = vpop.f32.mrf.mxu1 }
 0x54b   :  { %11856 = vst [vmem:[#allocation33_spill] sm:$0xff] %v10296_v55  ;;  %v11861_v55 = vld [vmem:[#allocation78_spill] sm:$0xff] }
 0x54c   :  { %4286 = vmatpush.bf16.msrb.mxu2 %v11850_v20  ;;  %4299 = vmatpush.bf16.msrb.mxu3 %v11851_v36  ;;  %v10298_v20 = vpop.f32.mrf.mxu0 }
 0x54d   :  { %4261 = vmatpush.bf16.msrb.mxu0 %v11852_v32  ;;  %11857 = vst [vmem:[#allocation44_spill] sm:$0xff] %v10298_v20  ;;  %v11858_v32 = vld [vmem:[#allocation71_spill] sm:$0xff] }
 0x54e   :  { %4274 = vmatpush.bf16.msrb.mxu1 %v11853_v17  ;;  %v11859_v17 = vld [vmem:[#allocation2_spill] sm:$0xff]  ;;  %v11862_v20 = vld [vmem:[#allocation75_spill] sm:$0xff] }
 0x550   :  { %4287 = vmatpush.bf16.msrb.mxu2 %v11854_v60  ;;  %4300 = vmatpush.bf16.msrb.mxu3 %v9352_v5  ;;  %v11860_v60 = vld [vmem:[#allocation69_spill] sm:$0xff] }
 0x551   :  { %4262 = vmatpush.bf16.msrb.mxu0 %v9469_v15  ;;  %v11868_v15 = vld [vmem:[#allocation74_spill] sm:$0xff]  ;;  %v11869_v5 = vld [vmem:[#allocation77_spill] sm:$0xff] }
 0x552   :  { %4275 = vmatpush.bf16.msrb.mxu1 %v9472_v30  ;;  %v11867_v30 = vld [vmem:[#allocation80_spill] sm:$0xff] }
 0x554   :  { %4288 = vmatpush.bf16.msrb.mxu2 %v9400_v38  ;;  %4301 = vmatpush.bf16.msrb.mxu3 %v11855_v24  ;;  %v3949_v24 = vpop.f32.mrf.mxu0  ;;  %v11866_v38 = vld [vmem:[#allocation79_spill] sm:$0xff] }
 0x555   :  { %4310 = vmatpush.bf16.msra.mxu0 %v9456_v61  ;;  %5072 = vmatmul.msk.bf16.vlgmr.msrb.gmra.mxu1 %vm1405_vm9, %v10265_v37  ;;  %v3962_v61 = vpop.f32.mrf.mxu1  ;;  %v11873_v24 = vld [vmem:[#allocation85_spill] sm:$0xff] }
 0x556   :  { %4323 = vmatpush.bf16.msra.mxu1 %v11858_v32  ;;  %5071 = vmatmul.msk.bf16.vlgmr.msrb.gmra.mxu0 %vm1405_vm9, %v10265_v37  ;;  %v10318_v32 = vpop.f32.mrf.mxu3 }
 0x557   :  { %5073 = vmatmul.msk.bf16.vlgmr.msrb.gmra.mxu2 %vm1405_vm9, %v10265_v37  ;;  %5074 = vmatmul.msk.bf16.vlgmr.msrb.gmra.mxu3 %vm1405_vm9, %v10265_v37  ;;  %11865 = vst [vmem:[#allocation47_spill] sm:$0xff] %v10318_v32 }
 0x558   :  { %4336 = vmatpush.bf16.msra.mxu2 %v11859_v17  ;;  %4349 = vmatpush.bf16.msra.mxu3 %v11860_v60  ;;  %v11863_v17 = vld [vmem:[#allocation76_spill] sm:$0xff]  ;;  %v10316_v60 = vpop.f32.mrf.mxu2 }
 0x559   :  { %4311 = vmatpush.bf16.msra.mxu0 %v11861_v55  ;;  %11864 = vst [vmem:[#allocation45_spill] sm:$0xff] %v10316_v60 }
 0x55a   :  { %4324 = vmatpush.bf16.msra.mxu1 %v9591_v3 }
 0x55c   :  { %4337 = vmatpush.bf16.msra.mxu2 %v11862_v20  ;;  %4350 = vmatpush.bf16.msra.mxu3 %v11863_v17  ;;  %v11870_v20 = vld [vmem:[#allocation81_spill] sm:$0xff]  ;;  %v11871_v17 = vld [vmem:[#allocation82_spill] sm:$0xff] }
 0x55d   :  { %4312 = vmatpush.bf16.msra.mxu0 %v11866_v38  ;;  %v10328_v61 = vpop.f32.mrf.mxu1  ;;  %v11874_v38 = vld [vmem:[#allocation86_spill] sm:$0xff] }
 0x55e   :  { %4325 = vmatpush.bf16.msra.mxu1 %v11867_v30  ;;  %v3988_v32 = vpop.f32.mrf.mxu3  ;;  %11872 = vst [vmem:[#allocation48_spill] sm:$0xff] %v10328_v61  ;;  %v11875_v30 = vld [vmem:[#allocation83_spill] sm:$0xff]  ;;  %v11881_v61 = vld [vmem:[#allocation89_spill] sm:$0xff] }
 0x55f   :  { %v11880_v32 = vld [vmem:[#allocation96_spill] sm:$0xff] }
 0x560   :  { %4338 = vmatpush.bf16.msra.mxu2 %v11868_v15  ;;  %4351 = vmatpush.bf16.msra.mxu3 %v11869_v5  ;;  %v3975_v60 = vpop.f32.mrf.mxu2  ;;  %v11876_v15 = vld [vmem:[#allocation84_spill] sm:$0xff]  ;;  %v10334_v5 = vpop.f32.mrf.mxu0 }
 0x561   :  { %4313 = vmatpush.bf16.msra.mxu0 %v9694_v7  ;;  %11877 = vst [vmem:[#allocation31_spill] sm:$0xff] %v10334_v5  ;;  %v11879_v60 = vld [vmem:[#allocation88_spill] sm:$0xff]  ;;  %v11882_v5 = vld [vmem:[#allocation90_spill] sm:$0xff] }
 0x562   :  { %4326 = vmatpush.bf16.msra.mxu1 %v9697_v53 }
 0x564   :  { %4339 = vmatpush.bf16.msra.mxu2 %v11870_v20  ;;  %4352 = vmatpush.bf16.msra.mxu3 %v11871_v17  ;;  %v11878_v20 = vld [vmem:[#allocation87_spill] sm:$0xff] }
 0x565   :  { %4314 = vmatpush.bf16.msra.mxu0 %v11873_v24  ;;  %v11888_v24 = vld [vmem:[#allocation94_spill] sm:$0xff] }
 0x566   :  { %4327 = vmatpush.bf16.msra.mxu1 %v11874_v38  ;;  %v11887_v38 = vld [vmem:[#allocation93_spill] sm:$0xff] }
 0x568   :  { %4340 = vmatpush.bf16.msra.mxu2 %v11875_v30  ;;  %4353 = vmatpush.bf16.msra.mxu3 %v11876_v15  ;;  %v11885_v15 = vld [vmem:[#allocation30_spill] sm:$0xff] }
 0x569   :  { %4362 = vmatpush.bf16.msrb.mxu0 %v9811_v52  ;;  %5076 = vmatmul.msk.bf16.vlgmr.msra.gmra.mxu1 %vm1405_vm9, %v10265_v37  ;;  %v4001_v52 = vpop.f32.mrf.mxu0  ;;  %v11886_v30 = vld [vmem:[#allocation38_spill] sm:$0xff] }
 0x56a   :  { %4375 = vmatpush.bf16.msrb.mxu1 %v9814_v14  ;;  %5075 = vmatmul.msk.bf16.vlgmr.msra.gmra.mxu0 %vm1405_vm9, %v10265_v37  ;;  %v4014_v14 = vpop.f32.mrf.mxu1 }
 0x56b   :  { %5077 = vmatmul.msk.bf16.vlgmr.msra.gmra.mxu2 %vm1405_vm9, %v10265_v37  ;;  %5078 = vmatmul.msk.bf16.vlgmr.msra.gmra.mxu3 %vm1405_vm9, %v10265_v37 }
 0x56c   :  { %4388 = vmatpush.bf16.msrb.mxu2 %v11878_v20  ;;  %4401 = vmatpush.bf16.msrb.mxu3 %v11879_v60  ;;  %v10352_v60 = vpop.f32.mrf.mxu2  ;;  %v10354_v20 = vpop.f32.mrf.mxu3 }
 0x56d   :  { %4363 = vmatpush.bf16.msrb.mxu0 %v9865_v49  ;;  %11883 = vst [vmem:[#allocation32_spill] sm:$0xff] %v10352_v60  ;;  %v11889_v49 = vld [vmem:[#allocation46_spill] sm:$0xff] }
 0x56e   :  { %4376 = vmatpush.bf16.msrb.mxu1 %v11880_v32  ;;  %11884 = vst [vmem:[#allocation28_spill] sm:$0xff] %v10354_v20  ;;  %v11890_v32 = vld [vmem:[#allocation34_spill] sm:$0xff] }
 0x570   :  { %4389 = vmatpush.bf16.msrb.mxu2 %v11881_v61  ;;  %4402 = vmatpush.bf16.msrb.mxu3 %v11882_v5  ;;  %v11891_v61 = vld [vmem:[#allocation27_spill] sm:$0xff]  ;;  %v11892_v5 = vld [vmem:[#allocation97_spill] sm:$0xff] }
 0x571   :  { %4364 = vmatpush.bf16.msrb.mxu0 %v11885_v15  ;;  %v10366_v52 = vpop.f32.mrf.mxu0 }
 0x572   :  { %4377 = vmatpush.bf16.msrb.mxu1 %v11886_v30  ;;  %v10364_v14 = vpop.f32.mrf.mxu1  ;;  %11894 = vst [vmem:[#allocation43_spill] sm:$0xff] %v10366_v52 }
 0x573   :  { %11893 = vst [vmem:[#allocation29_spill] sm:$0xff] %v10364_v14 }
 0x574   :  { %4390 = vmatpush.bf16.msrb.mxu2 %v11887_v38  ;;  %4403 = vmatpush.bf16.msrb.mxu3 %v11888_v24  ;;  %v4027_v60 = vpop.f32.mrf.mxu2  ;;  %v4040_v20 = vpop.f32.mrf.mxu3 }
 0x575   :  { %4365 = vmatpush.bf16.msrb.mxu0 %v11889_v49 }
 0x576   :  { %4378 = vmatpush.bf16.msrb.mxu1 %v11890_v32 }
 0x578   :  { %4391 = vmatpush.bf16.msrb.mxu2 %v11891_v61  ;;  %4404 = vmatpush.bf16.msrb.mxu3 %v11892_v5 }
 0x579   :  { %4366 = vmatpush.bf16.msrb.mxu0 %v10099_v12  ;;  %v4053_v52 = vpop.f32.mrf.mxu0 }
 0x57a   :  { %4379 = vmatpush.bf16.msrb.mxu1 %v10110_v39  ;;  %v4066_v14 = vpop.f32.mrf.mxu1  ;;  %v11907_v52 = vld [vmem:[#allocation9_spill] sm:$0xff] }
 0x57c   :  { %4392 = vmatpush.bf16.msrb.mxu2 %v10070_v58  ;;  %4405 = vmatpush.bf16.msrb.mxu3 %v10078_v8  ;;  %v10384_v20 = vpop.f32.mrf.mxu2  ;;  %v10386_v60 = vpop.f32.mrf.mxu3 }
 0x57d   :  { %4414 = vmatpush.bf16.msra.mxu0 %v10073_v27  ;;  %5080 = vmatmul.msk.bf16.vlgmr.msrb.gmra.mxu1 %vm1405_vm9, %v10265_v37  ;;  %11895 = vst [vmem:[#allocation37_spill] sm:$0xff] %v10384_v20 }
 0x57e   :  { %4427 = vmatpush.bf16.msra.mxu1 %v10113_v6  ;;  %5079 = vmatmul.msk.bf16.vlgmr.msrb.gmra.mxu0 %vm1405_vm9, %v10265_v37  ;;  %11896 = vst [vmem:[#allocation35_spill] sm:$0xff] %v10386_v60 }
 0x57f   :  { %5081 = vmatmul.msk.bf16.vlgmr.msrb.gmra.mxu2 %vm1405_vm9, %v10265_v37  ;;  %5082 = vmatmul.msk.bf16.vlgmr.msrb.gmra.mxu3 %vm1405_vm9, %v10265_v37 }
 0x580   :  { %4440 = vmatpush.bf16.msra.mxu2 %v9970_v21  ;;  %4453 = vmatpush.bf16.msra.mxu3 %v9973_v31 }
 0x581   :  { %4415 = vmatpush.bf16.msra.mxu0 %v10138_v19 }
 0x582   :  { %4428 = vmatpush.bf16.msra.mxu1 %v10154_v4 }
 0x584   :  { %4441 = vmatpush.bf16.msra.mxu2 %v10082_v54  ;;  %4454 = vmatpush.bf16.msra.mxu3 %v10085_v51  ;;  %v4079_v20 = vpop.f32.mrf.mxu2  ;;  %v4092_v60 = vpop.f32.mrf.mxu3 }
 0x585   :  { %4416 = vmatpush.bf16.msra.mxu0 %v10179_v48  ;;  %v11912_v20 = vld [vmem:[#allocation73_spill] sm:$0xff]  ;;  %v11913_v60 = vld [vmem:[#allocation67_spill] sm:$0xff] }
 0x586   :  { %4429 = vmatpush.bf16.msra.mxu1 %v10183_v44 }
 0x588   :  { %4442 = vmatpush.bf16.msra.mxu2 %v10189_v62  ;;  %4455 = vmatpush.bf16.msra.mxu3 %v10193_v43 }
 0x589   :  { %4417 = vmatpush.bf16.msra.mxu0 %v10159_v35 }
 0x58a   :  { %4430 = vmatpush.bf16.msra.mxu1 %v10204_v59 }
 0x58c   :  { %4443 = vmatpush.bf16.msra.mxu2 %v10209_v29  ;;  %4456 = vmatpush.bf16.msra.mxu3 %v10212_v11 }
 0x58d   :  { %4418 = vmatpush.bf16.msra.mxu0 %v10216_v9 }
 0x58e   :  { %4431 = vmatpush.bf16.msra.mxu1 %v10222_v34 }
 0x590   :  { %4444 = vmatpush.bf16.msra.mxu2 %v10227_v41  ;;  %4457 = vmatpush.bf16.msra.mxu3 %v10233_v26 }
 0x591   :  { %4491 = vmatpush.bf16.msrb.mxu0 %v11825_v50  ;;  %5084 = vmatmul.msk.bf16.vlgmr.msra.gmra.mxu1 %vm1405_vm9, %v10265_v37  ;;  %v11897_v50 = vld [vmem:[#allocation4_spill] sm:$0xff] }
 0x592   :  { %4504 = vmatpush.bf16.msrb.mxu1 %v11826_v46  ;;  %5083 = vmatmul.msk.bf16.vlgmr.msra.gmra.mxu0 %vm1405_vm9, %v10265_v37  ;;  %v11898_v46 = vld [vmem:[#allocation60_spill] sm:$0xff] }
 0x593   :  { %5085 = vmatmul.msk.bf16.vlgmr.msra.gmra.mxu2 %vm1405_vm9, %v10265_v37  ;;  %5086 = vmatmul.msk.bf16.vlgmr.msra.gmra.mxu3 %vm1405_vm9, %v10265_v37  ;;  %v11906_v37 = vld [vmem:[#allocation12_spill] sm:$0xff] }
 0x594   :  { %4517 = vmatpush.bf16.msrb.mxu2 %v11827_v16  ;;  %4530 = vmatpush.bf16.msrb.mxu3 %v11828_v40  ;;  %v11899_v16 = vld [vmem:[#allocation61_spill] sm:$0xff]  ;;  %v10435_v40 = vld [vmem:[%s10965_s3 + $0x8] sm:$0xf] }
 0x595   :  { %4492 = vmatpush.bf16.msrb.mxu0 %v11829_v13 }
 0x596   :  { %4505 = vmatpush.bf16.msrb.mxu1 %v11830_v0  ;;  %v10439_v0 = vpop.f32.mrf.mxu0 }
 0x598   :  { %4518 = vmatpush.bf16.msrb.mxu2 %v11831_v2  ;;  %4531 = vmatpush.bf16.msrb.mxu3 %v11832_v1  ;;  %v10437_v13 = vpop.f32.mrf.mxu1  ;;  %v11900_v2 = vld [vmem:[#allocation58_spill] sm:$0xff]  ;;  %v11901_v1 = vld [vmem:[#allocation59_spill] sm:$0xff] }
 0x599   :  { %4493 = vmatpush.bf16.msrb.mxu0 %v11833_v33  ;;  %v11902_v33 = vld [vmem:[#allocation54_spill] sm:$0xff] }
 0x59a   :  { %4506 = vmatpush.bf16.msrb.mxu1 %v11834_v56  ;;  %v11903_v56 = vld [vmem:[#allocation55_spill] sm:$0xff] }
 0x59c   :  { %4519 = vmatpush.bf16.msrb.mxu2 %v11835_v25  ;;  %4532 = vmatpush.bf16.msrb.mxu3 %v11836_v45  ;;  %v10447_v25 = vpop.f32.mrf.mxu3 }
 0x59d   :  { %4494 = vmatpush.bf16.msrb.mxu0 %v11837_v22 }
 0x59e   :  { %4507 = vmatpush.bf16.msrb.mxu1 %v11838_v57  ;;  %v4105_v22 = vpop.f32.mrf.mxu0  ;;  %v11904_v57 = vld [vmem:[#allocation8_spill] sm:$0xff] }
 0x5a0   :  { %4520 = vmatpush.bf16.msrb.mxu2 %v11839_v23  ;;  %4533 = vmatpush.bf16.msrb.mxu3 %v11840_v18  ;;  %v4118_v45 = vpop.f32.mrf.mxu1  ;;  %v11905_v23 = vld [vmem:[#allocation7_spill] sm:$0xff] }
 0x5a1   :  { %4495 = vmatpush.bf16.msrb.mxu0 %v9145_v47  ;;  %v10443_v47 = vpop.f32.mrf.mxu2  ;;  %v11920_v45 = vld [vmem:[#allocation76_spill] sm:$0xff] }
 0x5a2   :  { %4508 = vmatpush.bf16.msrb.mxu1 %v11897_v50  ;;  %v11914_v50 = vld [vmem:[#allocation68_spill] sm:$0xff] }
 0x5a4   :  { %4521 = vmatpush.bf16.msrb.mxu2 %v11898_v46  ;;  %4534 = vmatpush.bf16.msrb.mxu3 %v11899_v16  ;;  %v4144_v14 = vpop.f32.mrf.mxu3  ;;  %v11915_v46 = vld [vmem:[#allocation70_spill] sm:$0xff] }
 0x5a5   :  { %4543 = vmatpush.bf16.msra.mxu0 %v11900_v2  ;;  %5089 = vmatmul.msk.bf16.vlgmr.msrb.gmra.mxu1 %vm1405_vm9, %v10435_v40  ;;  %v11917_v2 = vld [vmem:[#allocation2_spill] sm:$0xff] }
 0x5a6   :  { %4556 = vmatpush.bf16.msra.mxu1 %v11901_v1  ;;  %5088 = vmatmul.msk.bf16.vlgmr.msrb.gmra.mxu0 %vm1405_vm9, %v10435_v40  ;;  %v11918_v1 = vld [vmem:[#allocation69_spill] sm:$0xff]  ;;  %v11923_v14 = vld [vmem:[#allocation74_spill] sm:$0xff] }
 0x5a7   :  { %5090 = vmatmul.msk.bf16.vlgmr.msrb.gmra.mxu2 %vm1405_vm9, %v10435_v40  ;;  %5091 = vmatmul.msk.bf16.vlgmr.msrb.gmra.mxu3 %vm1405_vm9, %v10435_v40 }
 0x5a8   :  { %4569 = vmatpush.bf16.msra.mxu2 %v11902_v33  ;;  %4582 = vmatpush.bf16.msra.mxu3 %v11903_v56  ;;  %v11919_v56 = vld [vmem:[#allocation75_spill] sm:$0xff] }
 0x5a9   :  { %4544 = vmatpush.bf16.msra.mxu0 %v9195_v10  ;;  %v4131_v18 = vpop.f32.mrf.mxu2  ;;  %v11908_v10 = vld [vmem:[#allocation10_spill] sm:$0xff] }
 0x5aa   :  { %4557 = vmatpush.bf16.msra.mxu1 %v11845_v42  ;;  %v11909_v42 = vld [vmem:[#allocation13_spill] sm:$0xff]  ;;  %v10475_v16 = vpop.f32.mrf.mxu1 }
 0x5ab   :  { %v10479_v33 = vpop.f32.mrf.mxu0 }
 0x5ac   :  { %4570 = vmatpush.bf16.msra.mxu2 %v11846_v28  ;;  %4583 = vmatpush.bf16.msra.mxu3 %v11847_v63  ;;  %v11910_v28 = vld [vmem:[#allocation14_spill] sm:$0xff]  ;;  %v11911_v63 = vld [vmem:[#allocation72_spill] sm:$0xff] }
 0x5ad   :  { %4545 = vmatpush.bf16.msra.mxu0 %v11904_v57  ;;  %v11921_v57 = vld [vmem:[#allocation79_spill] sm:$0xff] }
 0x5ae   :  { %4558 = vmatpush.bf16.msra.mxu1 %v11905_v23  ;;  %v11922_v23 = vld [vmem:[#allocation80_spill] sm:$0xff] }
 0x5b0   :  { %4571 = vmatpush.bf16.msra.mxu2 %v11906_v37  ;;  %4584 = vmatpush.bf16.msra.mxu3 %v11851_v36  ;;  %v11916_v36 = vld [vmem:[#allocation71_spill] sm:$0xff] }
 0x5b1   :  { %4546 = vmatpush.bf16.msra.mxu0 %v11907_v52  ;;  %v11924_v52 = vld [vmem:[#allocation77_spill] sm:$0xff] }
 0x5b2   :  { %4559 = vmatpush.bf16.msra.mxu1 %v11908_v10  ;;  %v10493_v22 = vpop.f32.mrf.mxu2  ;;  %v4194_v18 = vpop.f32.mrf.mxu3 }
 0x5b3   :  { %v4170_v37 = vpop.f32.mrf.mxu1  ;;  %v4157_v10 = vpop.f32.mrf.mxu0 }
 0x5b4   :  { %4572 = vmatpush.bf16.msra.mxu2 %v11909_v42  ;;  %4585 = vmatpush.bf16.msra.mxu3 %v11910_v28  ;;  %v11926_v42 = vld [vmem:[#allocation85_spill] sm:$0xff]  ;;  %v11927_v28 = vld [vmem:[#allocation86_spill] sm:$0xff] }
 0x5b5   :  { %4547 = vmatpush.bf16.msra.mxu0 %v11911_v63 }
 0x5b6   :  { %4560 = vmatpush.bf16.msra.mxu1 %v11912_v20  ;;  %v11928_v20 = vld [vmem:[#allocation83_spill] sm:$0xff] }
 0x5b8   :  { %4573 = vmatpush.bf16.msra.mxu2 %v11913_v60  ;;  %4586 = vmatpush.bf16.msra.mxu3 %v11914_v50  ;;  %v11929_v60 = vld [vmem:[#allocation84_spill] sm:$0xff]  ;;  %v11930_v50 = vld [vmem:[#allocation91_spill] sm:$0xff] }
 0x5b9   :  { %4595 = vmatpush.bf16.msrb.mxu0 %v11915_v46  ;;  %5093 = vmatmul.msk.bf16.vlgmr.msra.gmra.mxu1 %vm1405_vm9, %v10435_v40  ;;  %v11931_v46 = vld [vmem:[#allocation92_spill] sm:$0xff] }
 0x5ba   :  { %4608 = vmatpush.bf16.msrb.mxu1 %v11916_v36  ;;  %5092 = vmatmul.msk.bf16.vlgmr.msra.gmra.mxu0 %vm1405_vm9, %v10435_v40  ;;  %v4196_v63 = vpop.f32.mrf.mxu3  ;;  %v11933_v36 = vld [vmem:[#allocation88_spill] sm:$0xff] }
 0x5bb   :  { %5094 = vmatmul.msk.bf16.vlgmr.msra.gmra.mxu2 %vm1405_vm9, %v10435_v40  ;;  %5095 = vmatmul.msk.bf16.vlgmr.msra.gmra.mxu3 %vm1405_vm9, %v10435_v40 }
 0x5bc   :  { %4621 = vmatpush.bf16.msrb.mxu2 %v11917_v2  ;;  %4634 = vmatpush.bf16.msrb.mxu3 %v11918_v1  ;;  %v11934_v1 = vld [vmem:[#allocation95_spill] sm:$0xff] }
 0x5bd   :  { %4596 = vmatpush.bf16.msrb.mxu0 %v11861_v55  ;;  %v4183_v55 = vpop.f32.mrf.mxu2 }
 0x5be   :  { %4609 = vmatpush.bf16.msrb.mxu1 %v9591_v3  ;;  %v11925_v3 = vld [vmem:[#allocation81_spill] sm:$0xff] }
 0x5c0   :  { %4622 = vmatpush.bf16.msrb.mxu2 %v11919_v56  ;;  %4635 = vmatpush.bf16.msrb.mxu3 %v11920_v45  ;;  %v11935_v56 = vld [vmem:[#allocation96_spill] sm:$0xff]  ;;  %v11936_v45 = vld [vmem:[#allocation89_spill] sm:$0xff] }
 0x5c1   :  { %4597 = vmatpush.bf16.msrb.mxu0 %v11921_v57  ;;  %v11937_v57 = vld [vmem:[#allocation90_spill] sm:$0xff] }
 0x5c2   :  { %4610 = vmatpush.bf16.msrb.mxu1 %v11922_v23 }
 0x5c4   :  { %4623 = vmatpush.bf16.msrb.mxu2 %v11923_v14  ;;  %4636 = vmatpush.bf16.msrb.mxu3 %v11924_v52 }
 0x5c5   :  { %4598 = vmatpush.bf16.msrb.mxu0 %v9694_v7  ;;  %v10509_v7 = vpop.f32.mrf.mxu1 }
 0x5c6   :  { %4611 = vmatpush.bf16.msrb.mxu1 %v9697_v53  ;;  %v11932_v53 = vld [vmem:[#allocation87_spill] sm:$0xff]  ;;  %v10527_v23 = vpop.f32.mrf.mxu2  ;;  %v10529_v37 = vpop.f32.mrf.mxu3 }
 0x5c8   :  { %4624 = vmatpush.bf16.msrb.mxu2 %v11925_v3  ;;  %4637 = vmatpush.bf16.msrb.mxu3 %v11871_v17  ;;  %v4212_v17 = vpop.f32.mrf.mxu0 }
 0x5c9   :  { %4599 = vmatpush.bf16.msrb.mxu0 %v11926_v42  ;;  %v10521_v2 = vadd.f32 %v4212_v17, %v4194_v18  ;;  %v11938_v17 = vld [vmem:[#allocation44_spill] sm:$0xff] }
 0x5ca   :  { %4612 = vmatpush.bf16.msrb.mxu1 %v11927_v28 }
 0x5cc   :  { %4625 = vmatpush.bf16.msrb.mxu2 %v11928_v20  ;;  %4638 = vmatpush.bf16.msrb.mxu3 %v11929_v60 }
 0x5cd   :  { %4647 = vmatpush.bf16.msra.mxu0 %v11930_v50  ;;  %5097 = vmatmul.msk.bf16.vlgmr.msrb.gmra.mxu1 %vm1405_vm9, %v10435_v40  ;;  %v4227_v14 = vpop.f32.mrf.mxu1 }
 0x5ce   :  { %4660 = vmatpush.bf16.msra.mxu1 %v11931_v46  ;;  %5096 = vmatmul.msk.bf16.vlgmr.msrb.gmra.mxu0 %vm1405_vm9, %v10435_v40  ;;  %v4240_v52 = vpop.f32.mrf.mxu2  ;;  %v4253_v10 = vpop.f32.mrf.mxu3 }
 0x5cf   :  { %5098 = vmatmul.msk.bf16.vlgmr.msrb.gmra.mxu2 %vm1405_vm9, %v10435_v40  ;;  %5099 = vmatmul.msk.bf16.vlgmr.msrb.gmra.mxu3 %vm1405_vm9, %v10435_v40  ;;  %v11939_v52 = vld [vmem:[#allocation33_spill] sm:$0xff] }
 0x5d0   :  { %4673 = vmatpush.bf16.msra.mxu2 %v11932_v53  ;;  %4686 = vmatpush.bf16.msra.mxu3 %v11933_v36  ;;  %v4214_v18 = vpop.f32.mrf.mxu0  ;;  %v4465_v10 = vadd.f32 %v10527_v23, %v11939_v52  ;;  %v11944_v23 = vld [vmem:[#allocation31_spill] sm:$0xff] }
 0x5d1   :  { %4648 = vmatpush.bf16.msra.mxu0 %v11934_v1  ;;  %v4464_v1 = vadd.f32 %v10509_v7, %v11938_v17 }
 0x5d2   :  { %4661 = vmatpush.bf16.msra.mxu1 %v11935_v56 }
 0x5d4   :  { %4674 = vmatpush.bf16.msra.mxu2 %v11936_v45  ;;  %4687 = vmatpush.bf16.msra.mxu3 %v11937_v57 }
 0x5d5   :  { %4649 = vmatpush.bf16.msra.mxu0 %v11885_v15 }
 0x5d6   :  { %4662 = vmatpush.bf16.msra.mxu1 %v11886_v30 }
 0x5d8   :  { %4675 = vmatpush.bf16.msra.mxu2 %v11887_v38  ;;  %4688 = vmatpush.bf16.msra.mxu3 %v11888_v24  ;;  %v10547_v38 = vpop.f32.mrf.mxu0 }
 0x5d9   :  { %4650 = vmatpush.bf16.msra.mxu0 %v11889_v49 }
 0x5da   :  { %4663 = vmatpush.bf16.msra.mxu1 %v11890_v32  ;;  %v10565_v15 = vpop.f32.mrf.mxu2  ;;  %v10567_v30 = vpop.f32.mrf.mxu3 }
 0x5dc   :  { %4676 = vmatpush.bf16.msra.mxu2 %v11891_v61  ;;  %4689 = vmatpush.bf16.msra.mxu3 %v11892_v5  ;;  %v10549_v5 = vpop.f32.mrf.mxu1 }
 0x5dd   :  { %4651 = vmatpush.bf16.msra.mxu0 %v10099_v12 }
 0x5de   :  { %4664 = vmatpush.bf16.msra.mxu1 %v10110_v39 }
 0x5e0   :  { %4677 = vmatpush.bf16.msra.mxu2 %v10070_v58  ;;  %4690 = vmatpush.bf16.msra.mxu3 %v10078_v8  ;;  %v4266_v49 = vpop.f32.mrf.mxu0 }
 0x5e1   :  { %4699 = vmatpush.bf16.msrb.mxu0 %v10073_v27  ;;  %5101 = vmatmul.msk.bf16.vlgmr.msra.gmra.mxu1 %vm1405_vm9, %v10435_v40  ;;  %v11940_v49 = vld [vmem:[#allocation45_spill] sm:$0xff] }
 0x5e2   :  { %4712 = vmatpush.bf16.msrb.mxu1 %v10113_v6  ;;  %5100 = vmatmul.msk.bf16.vlgmr.msra.gmra.mxu0 %vm1405_vm9, %v10435_v40  ;;  %v4305_v58 = vpop.f32.mrf.mxu3 }
 0x5e3   :  { %5102 = vmatmul.msk.bf16.vlgmr.msra.gmra.mxu2 %vm1405_vm9, %v10435_v40  ;;  %5103 = vmatmul.msk.bf16.vlgmr.msra.gmra.mxu3 %vm1405_vm9, %v10435_v40 }
 0x5e4   :  { %4725 = vmatpush.bf16.msrb.mxu2 %v9970_v21  ;;  %4738 = vmatpush.bf16.msrb.mxu3 %v9973_v31  ;;  %v4279_v21 = vpop.f32.mrf.mxu1  ;;  %v4292_v31 = vpop.f32.mrf.mxu2 }
 0x5e5   :  { %4700 = vmatpush.bf16.msrb.mxu0 %v10138_v19  ;;  %v4466_v21 = vadd.f32 %v10529_v37, %v11940_v49  ;;  %v11941_v31 = vld [vmem:[#allocation15_spill] sm:$0xff] }
 0x5e6   :  { %4713 = vmatpush.bf16.msrb.mxu1 %v10154_v4 }
 0x5e8   :  { %4726 = vmatpush.bf16.msrb.mxu2 %v10082_v54  ;;  %4739 = vmatpush.bf16.msrb.mxu3 %v10085_v51  ;;  %v10583_v27 = vpop.f32.mrf.mxu0 }
 0x5e9   :  { %4701 = vmatpush.bf16.msrb.mxu0 %v10179_v48 }
 0x5ea   :  { %4714 = vmatpush.bf16.msrb.mxu1 %v10183_v44 }
 0x5ec   :  { %4727 = vmatpush.bf16.msrb.mxu2 %v10189_v62  ;;  %4740 = vmatpush.bf16.msrb.mxu3 %v10193_v43  ;;  %v10585_v8 = vpop.f32.mrf.mxu1 }
 0x5ed   :  { %4702 = vmatpush.bf16.msrb.mxu0 %v10159_v35 }
 0x5ee   :  { %4715 = vmatpush.bf16.msrb.mxu1 %v10204_v59  ;;  %v10591_v54 = vpop.f32.mrf.mxu2  ;;  %v10593_v51 = vpop.f32.mrf.mxu3 }
 0x5f0   :  { %4728 = vmatpush.bf16.msrb.mxu2 %v10209_v29  ;;  %4741 = vmatpush.bf16.msrb.mxu3 %v10212_v11  ;;  %v4318_v12 = vpop.f32.mrf.mxu0 }
 0x5f1   :  { %4703 = vmatpush.bf16.msrb.mxu0 %v10216_v9  ;;  %v11942_v12 = vld [vmem:[#allocation16_spill] sm:$0xff] }
 0x5f2   :  { %4716 = vmatpush.bf16.msrb.mxu1 %v10222_v34 }
 0x5f4   :  { %4729 = vmatpush.bf16.msrb.mxu2 %v10227_v41  ;;  %4742 = vmatpush.bf16.msrb.mxu3 %v10233_v26  ;;  %v4331_v39 = vpop.f32.mrf.mxu1 }
 0x5f5   :  { %5104 = vmatmul.msk.bf16.vlgmr.msrb.gmra.mxu0 %vm1405_vm9, %v10435_v40  ;;  %5105 = vmatmul.msk.bf16.vlgmr.msrb.gmra.mxu1 %vm1405_vm9, %v10435_v40 }
 0x5f6   :  { %v4344_v6 = vpop.f32.mrf.mxu2  ;;  %v4357_v19 = vpop.f32.mrf.mxu3 }
 0x5f7   :  { %5106 = vmatmul.msk.bf16.vlgmr.msrb.gmra.mxu2 %vm1405_vm9, %v10435_v40  ;;  %5107 = vmatmul.msk.bf16.vlgmr.msrb.gmra.mxu3 %vm1405_vm9, %v10435_v40 }
 0x5fb   :  { %v10595_v4 = vpop.f32.mrf.mxu0 }
 0x5fc   :  { %v10597_v35 = vpop.f32.mrf.mxu1 }
 0x602   :  { %v10599_v48 = vpop.f32.mrf.mxu2  ;;  %v10601_v44 = vpop.f32.mrf.mxu3 }
 0x603   :  { %v4370_v62 = vpop.f32.mrf.mxu0 }
 0x604   :  { %v4383_v43 = vpop.f32.mrf.mxu1 }
 0x60a   :  { %v4396_v59 = vpop.f32.mrf.mxu2  ;;  %v4409_v29 = vpop.f32.mrf.mxu3 }
 0x60b   :  { %v4468_v29 = vadd.f32 %v10549_v5, %v11944_v23  ;;  %v11954_v23 = vld [vmem:[#allocation62_spill] sm:$0xff] }
 0x60e   :  { %v10605_v9 = vpop.f32.mrf.mxu1 }
 0x60f   :  { %v10603_v11 = vpop.f32.mrf.mxu0 }
 0x616   :  { %v10607_v34 = vpop.f32.mrf.mxu2  ;;  %v4459_v41 = vpop.f32.mrf.mxu3 }
 0x617   :  { %v4422_v26 = vpop.f32.mrf.mxu0  ;;  %v4435_v61 = vpop.f32.mrf.mxu1  ;;  %v4482_v40 = vadd.f32 %v4459_v41, %v10493_v22 }
 0x618   :  { %v11945_v26 = vld [vmem:[#allocation17_spill] sm:$0xff] }
 0x61e   :  { %v4448_v24 = vpop.f32.mrf.mxu2  ;;  %v4461_v32 = vpop.f32.mrf.mxu3 }
 0x61f   :  { %v11946_v24 = vld [vmem:[#allocation52_spill] sm:$0xff] }
 0x622   :  { %v4510_v55 = vpop.f32.mrf.mxu1 }
 0x623   :  { %v4497_v3 = vpop.f32.mrf.mxu0  ;;  %v4748_v18 = vadd.f32 %v4510_v55, %v10521_v2  ;;  %v11943_v2 = vld [vmem:[#allocation47_spill] sm:$0xff] }
 0x624   :  { %v10610_v42 = vadd.f32 %v4497_v3, %v4482_v40  ;;  %v4467_v59 = vadd.f32 %v10547_v38, %v11943_v2  ;;  %v11953_v2 = vld [vmem:[#allocation66_spill] sm:$0xff] }
 0x625   :  { %v10623_v39 = vmul.f32 %v4748_v18, %v11942_v12 }
 0x627   :  { %v4811_v37 = vmul.f32 %v10623_v39, %v10623_v39 }
 0x62a   :  { %v4523_v28 = vpop.f32.mrf.mxu2  ;;  %v4536_v63 = vpop.f32.mrf.mxu3 }
 0x62b   :  { %v4499_v20 = vpop.f32.mrf.mxu0  ;;  %v4512_v60 = vpop.f32.mrf.mxu1  ;;  %v4749_v56 = vadd.f32 %v4523_v28, %v4464_v1  ;;  %v4750_v7 = vadd.f32 %v4536_v63, %v4465_v10 }
 0x62c   :  { %v11947_v60 = vld [vmem:[#allocation48_spill] sm:$0xff] }
 0x62d   :  { %v10620_v58 = vmul.f32 %v4749_v56, %v11941_v31  ;;  %v10636_v61 = vmul.f32 %v4750_v7, %v11945_v26  ;;  %v11949_v56 = vld [vmem:[#allocation56_spill] sm:$0xff] }
 0x62e   :  { %v11951_v7 = vld [vmem:[#allocation28_spill] sm:$0xff] }
 0x62f   :  { %v4812_v19 = vmul.f32 %v10620_v58, %v10620_v58  ;;  %v4790_v41 = vadd.f32 %v10620_v58, %v10623_v39  ;;  %v4813_v5 = vmul.f32 %v10636_v61, %v10636_v61 }
 0x631   :  { %v4831_v55 = vadd.f32 %v4812_v19, %v4811_v37  ;;  %v4791_v63 = vadd.f32 %v4790_v41, %v10636_v61  ;;  %v11952_v19 = vld [vmem:[#allocation43_spill] sm:$0xff] }
 0x632   :  { %v4525_v50 = vpop.f32.mrf.mxu2  ;;  %v4538_v46 = vpop.f32.mrf.mxu3 }
 0x633   :  { %v4469_v50 = vadd.f32 %v10565_v15, %v11947_v60  ;;  %v11948_v46 = vld [vmem:[#allocation32_spill] sm:$0xff]  ;;  %v4832_v17 = vadd.f32 %v4831_v55, %v4813_v5  ;;  %v11957_v60 = vld [vmem:[#allocation63_spill] sm:$0xff] }
 0x636   :  { %v4562_v36 = vpop.f32.mrf.mxu1 }
 0x637   :  { %v4549_v53 = vpop.f32.mrf.mxu0  ;;  %v4752_v28 = vadd.f32 %v4562_v36, %v4467_v59 }
 0x638   :  { %v4751_v6 = vadd.f32 %v4549_v53, %v4466_v21  ;;  %v4470_v53 = vadd.f32 %v10567_v30, %v11948_v46  ;;  %v11958_v46 = vld [vmem:[#allocation64_spill] sm:$0xff] }
 0x639   :  { %v10652_v36 = vmul.f32 %v4752_v28, %v11949_v56  ;;  %v11955_v28 = vld [vmem:[#allocation29_spill] sm:$0xff] }
 0x63a   :  { %v10639_v32 = vmul.f32 %v4751_v6, %v11946_v24  ;;  %v4471_v6 = vadd.f32 %v10583_v27, %v11951_v7  ;;  %v4476_v7 = vadd.f32 %v10597_v35, %v10439_v0  ;;  %v11962_v35 = vld [vmem:[#allocation19_spill] sm:$0xff] }
 0x63b   :  { %v4815_v30 = vmul.f32 %v10652_v36, %v10652_v36 }
 0x63c   :  { %v4814_v20 = vmul.f32 %v10639_v32, %v10639_v32  ;;  %v4792_v1 = vadd.f32 %v4791_v63, %v10639_v32  ;;  %v11956_v63 = vld [vmem:[#allocation37_spill] sm:$0xff] }
 0x63d   :  { %v4474_v5 = vadd.f32 %v10593_v51, %v11956_v63 }
 0x63e   :  { %v4575_v45 = vpop.f32.mrf.mxu2  ;;  %v4588_v57 = vpop.f32.mrf.mxu3  ;;  %v4793_v15 = vadd.f32 %v4792_v1, %v10652_v36 }
 0x63f   :  { %v4551_v14 = vpop.f32.mrf.mxu0  ;;  %v4564_v22 = vpop.f32.mrf.mxu1  ;;  %v4753_v38 = vadd.f32 %v4575_v45, %v4468_v29  ;;  %v11950_v45 = vld [vmem:[#allocation57_spill] sm:$0xff]  ;;  %v4754_v18 = vadd.f32 %v4588_v57, %v4469_v50 }
 0x640   :  { %v4833_v22 = vadd.f32 %v4832_v17, %v4814_v20 }
 0x641   :  { %v10655_v14 = vmul.f32 %v4753_v38, %v11950_v45  ;;  %v10668_v59 = vmul.f32 %v4754_v18, %v11953_v2  ;;  %v4473_v38 = vadd.f32 %v10591_v54, %v11955_v28 }
 0x642   :  { %v4834_v57 = vadd.f32 %v4833_v22, %v4815_v30 }
 0x643   :  { %v4816_v12 = vmul.f32 %v10655_v14, %v10655_v14  ;;  %v4817_v27 = vmul.f32 %v10668_v59, %v10668_v59 }
 0x645   :  { %v4835_v37 = vadd.f32 %v4834_v57, %v4816_v12  ;;  %v11961_v12 = vld [vmem:[#allocation18_spill] sm:$0xff] }
 0x646   :  { %v4577_v62 = vpop.f32.mrf.mxu2  ;;  %v4590_v43 = vpop.f32.mrf.mxu3 }
 0x647   :  { %v4472_v62 = vadd.f32 %v10585_v8, %v11952_v19  ;;  %v4794_v43 = vadd.f32 %v4793_v15, %v10655_v14  ;;  %v4836_v20 = vadd.f32 %v4835_v37, %v4817_v27  ;;  %v11960_v15 = vld [vmem:[#allocation65_spill] sm:$0xff] }
 0x649   :  { %v4795_v24 = vadd.f32 %v4794_v43, %v10668_v59 }
 0x64a   :  { %v4614_v3 = vpop.f32.mrf.mxu1 }
 0x64b   :  { %v4601_v40 = vpop.f32.mrf.mxu0  ;;  %v4756_v41 = vadd.f32 %v4614_v3, %v4471_v6 }
 0x64c   :  { %v4755_v52 = vadd.f32 %v4601_v40, %v4470_v53 }
 0x64d   :  { %v10684_v50 = vmul.f32 %v4756_v41, %v11957_v60 }
 0x64e   :  { %v10671_v29 = vmul.f32 %v4755_v52, %v11954_v23  ;;  %v11959_v52 = vld [vmem:[#allocation35_spill] sm:$0xff] }
 0x64f   :  { %v4819_v54 = vmul.f32 %v10684_v50, %v10684_v50 }
 0x650   :  { %v4818_v8 = vmul.f32 %v10671_v29, %v10671_v29  ;;  %v4796_v3 = vadd.f32 %v4795_v24, %v10671_v29 }
 0x652   :  { %v4627_v10 = vpop.f32.mrf.mxu2  ;;  %v4640_v49 = vpop.f32.mrf.mxu3  ;;  %v4837_v56 = vadd.f32 %v4836_v20, %v4818_v8  ;;  %v4797_v18 = vadd.f32 %v4796_v3, %v10684_v50  ;;  %v11963_v8 = vld [vmem:[#allocation22_spill] sm:$0xff]  ;;  %v4478_v20 = vadd.f32 %v10601_v44, %v10443_v47  ;;  %v4479_v3 = vadd.f32 %v10603_v11, %v10447_v25 }
 0x653   :  { %v4603_v21 = vpop.f32.mrf.mxu0  ;;  %v4616_v31 = vpop.f32.mrf.mxu1  ;;  %v4757_v26 = vadd.f32 %v4627_v10, %v4472_v62  ;;  %v4758_v45 = vadd.f32 %v4640_v49, %v4473_v38  ;;  %v4475_v10 = vadd.f32 %v10595_v4, %v11959_v52  ;;  %v4480_v25 = vadd.f32 %v10605_v9, %v10479_v33 }
 0x654   :  { %v4838_v21 = vadd.f32 %v4837_v56, %v4819_v54  ;;  %v4481_v11 = vadd.f32 %v10607_v34, %v10475_v16  ;;  %v11968_v34 = vld [vmem:[#allocation25_spill] sm:$0xff] }
 0x655   :  { %v10687_v53 = vmul.f32 %v4757_v26, %v11958_v46  ;;  %v10698_v30 = vmul.f32 %v4758_v45, %v11960_v15  ;;  %v4477_v26 = vadd.f32 %v10599_v48, %v10437_v13  ;;  %v11966_v15 = vld [vmem:[#allocation21_spill] sm:$0xff] }
 0x657   :  { %v4820_v51 = vmul.f32 %v10687_v53, %v10687_v53  ;;  %v4798_v31 = vadd.f32 %v4797_v18, %v10687_v53  ;;  %v4821_v37 = vmul.f32 %v10698_v30, %v10698_v30 }
 0x659   :  { %v4839_v6 = vadd.f32 %v4838_v21, %v4820_v51  ;;  %v4799_v4 = vadd.f32 %v4798_v31, %v10698_v30  ;;  %v11965_v51 = vld [vmem:[#allocation20_spill] sm:$0xff] }
 0x65a   :  { %v4629_v40 = vpop.f32.mrf.mxu2  ;;  %v4642_v55 = vpop.f32.mrf.mxu3 }
 0x65b   :  { %v4840_v24 = vadd.f32 %v4839_v6, %v4821_v37  ;;  %v11969_v37 = vld [vmem:[#allocation26_spill] sm:$0xff] }
 0x65e   :  { %v4666_v1 = vpop.f32.mrf.mxu1 }
 0x65f   :  { %v4653_v17 = vpop.f32.mrf.mxu0  ;;  %v4760_v19 = vadd.f32 %v4666_v1, %v4475_v10 }
 0x660   :  { %v4759_v22 = vadd.f32 %v4653_v17, %v4474_v5  ;;  %v11964_v17 = vld [vmem:[#allocation23_spill] sm:$0xff] }
 0x661   :  { %v10714_v27 = vmul.f32 %v4760_v19, %v11962_v35 }
 0x662   :  { %v10701_v49 = vmul.f32 %v4759_v22, %v11961_v12 }
 0x663   :  { %v4823_v63 = vmul.f32 %v10714_v27, %v10714_v27 }
 0x664   :  { %v4822_v41 = vmul.f32 %v10701_v49, %v10701_v49  ;;  %v4800_v0 = vadd.f32 %v4799_v4, %v10701_v49 }
 0x666   :  { %v4679_v62 = vpop.f32.mrf.mxu2  ;;  %v4692_v57 = vpop.f32.mrf.mxu3  ;;  %v4841_v55 = vadd.f32 %v4840_v24, %v4822_v41  ;;  %v4801_v38 = vadd.f32 %v4800_v0, %v10714_v27  ;;  %v10759_v41 = vmul.f32 %v10610_v42, %v11969_v37 }
 0x667   :  { %v4761_v43 = vadd.f32 %v4679_v62, %v4476_v7  ;;  %v4655_v2 = vpop.f32.mrf.mxu0  ;;  %v4668_v23 = vpop.f32.mrf.mxu1  ;;  %v4762_v28 = vadd.f32 %v4692_v57, %v4477_v26 }
 0x668   :  { %v4842_v60 = vadd.f32 %v4841_v55, %v4823_v63  ;;  %v11967_v23 = vld [vmem:[#allocation24_spill] sm:$0xff]  ;;  %v4830_v42 = vmul.f32 %v10759_v41, %v10759_v41 }
 0x669   :  { %v10717_v40 = vmul.f32 %v4761_v43, %v11963_v8  ;;  %v10730_v1 = vmul.f32 %v4762_v28, %v11964_v17 }
 0x66b   :  { %v4824_v5 = vmul.f32 %v10717_v40, %v10717_v40  ;;  %v4802_v46 = vadd.f32 %v4801_v38, %v10717_v40  ;;  %v4825_v47 = vmul.f32 %v10730_v1, %v10730_v1 }
 0x66d   :  { %v4843_v18 = vadd.f32 %v4842_v60, %v4824_v5  ;;  %v4803_v10 = vadd.f32 %v4802_v46, %v10730_v1 }
 0x66e   :  { %v4681_v13 = vpop.f32.mrf.mxu2  ;;  %v4694_v48 = vpop.f32.mrf.mxu3 }
 0x66f   :  { %v4844_v21 = vadd.f32 %v4843_v18, %v4825_v47  ;;  %v4768_v47 = vld [vmem:[%s10966_s6] sm:$0xff] }
 0x672   :  { %v4705_v56 = vpop.f32.mrf.mxu0  ;;  %v4718_v45 = vpop.f32.mrf.mxu1 }
 0x673   :  { %v4763_v22 = vadd.f32 %v4705_v56, %v4478_v20  ;;  %v4764_v54 = vadd.f32 %v4718_v45, %v4479_v3 }
 0x675   :  { %v10733_v52 = vmul.f32 %v4763_v22, %v11965_v51  ;;  %v10746_v12 = vmul.f32 %v4764_v54, %v11966_v15 }
 0x677   :  { %v4826_v44 = vmul.f32 %v10733_v52, %v10733_v52  ;;  %v4804_v31 = vadd.f32 %v4803_v10, %v10733_v52  ;;  %v4827_v9 = vmul.f32 %v10746_v12, %v10746_v12 }
 0x679   :  { %v4845_v19 = vadd.f32 %v4844_v21, %v4826_v44  ;;  %v4805_v33 = vadd.f32 %v4804_v31, %v10746_v12  ;;  %v4769_v21 = vld [vmem:[%s10967_s7] sm:$0xff] }
 0x67a   :  { %v4731_v7 = vpop.f32.mrf.mxu2  ;;  %v4744_v6 = vpop.f32.mrf.mxu3 }
 0x67b   :  { %v4765_v62 = vadd.f32 %v4731_v7, %v4480_v25  ;;  %v4766_v57 = vadd.f32 %v4744_v6, %v4481_v11  ;;  %v4707_v43 = vpop.f32.mrf.mxu0  ;;  %v4720_v2 = vpop.f32.mrf.mxu1  ;;  %v4846_v26 = vadd.f32 %v4845_v19, %v4827_v9 }
 0x67d   :  { %v10752_v16 = vmul.f32 %v4765_v62, %v11967_v23  ;;  %v10755_v4 = vmul.f32 %v4766_v57, %v11968_v34 }
 0x67f   :  { %v4806_v24 = vadd.f32 %v4805_v33, %v10752_v16  ;;  %v4828_v0 = vmul.f32 %v10752_v16, %v10752_v16  ;;  %v4829_v35 = vmul.f32 %v10755_v4, %v10755_v4 }
 0x681   :  { %v4807_v8 = vadd.f32 %v4806_v24, %v10755_v4  ;;  %v4847_v55 = vadd.f32 %v4846_v26, %v4828_v0 }
 0x682   :  { %v4733_v28 = vpop.f32.mrf.mxu2  ;;  %v4746_v38 = vpop.f32.mrf.mxu3 }
 0x683   :  { %v4808_v63 = vadd.f32 %v4807_v8, %v10759_v41  ;;  %v4848_v5 = vadd.f32 %v4847_v55, %v4829_v35 }
 0x685   :  { %4809 = vadd.xlane.f32.xlu2 %v4808_v63  ;;  %v4849_v13 = vadd.f32 %v4848_v5, %v4830_v42 }
 0x687   :  { %4850 = vadd.xlane.f32.xlu1 %v4849_v13 }
 0x6f8   :  { %v4810_v48 = vpop.xlane.xlu2 %4809 }
 0x6f9   :  { %v4852_v20 = vmul.f32 0.0009765625, %v4810_v48 }
 0x6fa   :  { %v4851_v3 = vpop.xlane.xlu1 %4850 }
 0x6fb   :  { %v4854_v60 = vmul.f32 %v4852_v20, %v4852_v20  ;;  %v4853_v46 = vmul.f32 0.0009765625, %v4851_v3 }
 0x6fd   :  { %v4855_v17 = vsub.f32 %v4853_v46, %v4854_v60  ;;  %v5930_v46 = vld [vmem:[%s10960_s0 + $0x18] sm:$0xff] }
 0x6ff   :  { %v4856_v56 = vadd.f32 1e-05, %v4855_v17 }
 0x701   :  { %5911 = vrsqrt.f32 %v4856_v56  ;;  %vm4863_vm14 = vweird.f32 %v4856_v56 }
 0x707   :  { %v5912_v45 = vpop.eup %5911 }
 0x708   :  { %v4858_v22 = vmul.f32 %v5912_v45, %v4856_v56  ;;  %vm4864_vm13 = vweird.f32 %v5912_v45 }
 0x709   :  { %vm4865_vm15 = vmor %vm4863_vm14, %vm4864_vm13 }
 0x70a   :  { %v4859_v18 = vmul.f32 %v5912_v45, %v4858_v22 }
 0x70c   :  { %v4860_v54 = vmul.f32 0.5, %v4859_v18  ;;  %v5931_v18 = vld [vmem:[%s10960_s0 + $0x20] sm:$0xff] }
 0x70e   :  { %v4861_v51 = vsub.f32 1.5, %v4860_v54 }
 0x710   :  { %v4862_v10 = vmul.f32 %v5912_v45, %v4861_v51 }
 0x712   :  { %v4866_v25 = vsel %vm4865_vm15, %v5912_v45, %v4862_v10 }
 0x713   :  { %v4867_v44 = vmul.f32 %v4866_v25, %v4768_v47 }
 0x715   :  { %4872 = vperm.xlu0 %5908, %v4867_v44   ;;  %v4868_v11 = vmul.f32 %v4867_v44, %v4852_v20 }
 0x717   :  { %v4869_v31 = vsub.f32 %v4769_v21, %v4868_v11 }
 0x71d   :  { %4897 = vperm.xlu0 %5908, %v4869_v31  }
 0x787   :  { %v10776_v15 = vpop.permute.xlu0 %4872 }
 0x788   :  { %v4875_v6 = vmul.f32 %v10776_v15, %v10623_v39  ;;  %v4876_v19 = vmul.f32 %v10776_v15, %v10620_v58  ;;  %v4877_v62 = vmul.f32 %v10776_v15, %v10636_v61  ;;  %v4878_v57 = vmul.f32 %v10776_v15, %v10639_v32 }
 0x789   :  { %v4879_v43 = vmul.f32 %v10776_v15, %v10652_v36  ;;  %v4880_v39 = vmul.f32 %v10776_v15, %v10655_v14  ;;  %v4881_v61 = vmul.f32 %v10776_v15, %v10668_v59  ;;  %v4882_v32 = vmul.f32 %v10776_v15, %v10671_v29 }
 0x78a   :  { %v4883_v36 = vmul.f32 %v10776_v15, %v10684_v50  ;;  %v4884_v0 = vmul.f32 %v10776_v15, %v10687_v53  ;;  %v4885_v59 = vmul.f32 %v10776_v15, %v10698_v30  ;;  %v4886_v29 = vmul.f32 %v10776_v15, %v10701_v49  ;;  %v5927_v30 = vld [vmem:[%s10960_s0] sm:$0xff]  ;;  %v5928_v49 = vld [vmem:[%s10960_s0 + $0x8] sm:$0xff] }
 0x78b   :  { %v4887_v28 = vmul.f32 %v10776_v15, %v10714_v27  ;;  %v5929_v27 = vld [vmem:[%s10960_s0 + $0x10] sm:$0xff]  ;;  %v4888_v20 = vmul.f32 %v10776_v15, %v10717_v40  ;;  %v4889_v56 = vmul.f32 %v10776_v15, %v10730_v1  ;;  %v4890_v40 = vmul.f32 %v10776_v15, %v10733_v52  ;;  %v5932_v1 = vld [vmem:[%s10960_s0 + $0x28] sm:$0xff] }
 0x78c   :  { %v4891_v25 = vmul.f32 %v10776_v15, %v10746_v12  ;;  %v5933_v52 = vld [vmem:[%s10960_s0 + $0x30] sm:$0xff]  ;;  %v4892_v31 = vmul.f32 %v10776_v15, %v10752_v16  ;;  %v5934_v12 = vld [vmem:[%s10960_s0 + $0x38] sm:$0xff]  ;;  %v5935_v16 = vld [vmem:[%s10960_s0 + $0x40] sm:$0xff] }
 0x78f   :  { %v10778_v7 = vpop.permute.xlu0 %4897 }
 0x790   :  { %v4900_v2 = vadd.f32 %v10778_v7, %v4875_v6  ;;  %v4901_v33 = vadd.f32 %v10778_v7, %v4876_v19  ;;  %v4902_v9 = vadd.f32 %v10778_v7, %v4877_v62  ;;  %v4903_v58 = vadd.f32 %v10778_v7, %v4878_v57 }
 0x791   :  { %v4904_v23 = vadd.f32 %v10778_v7, %v4879_v43  ;;  %v4905_v34 = vadd.f32 %v10778_v7, %v4880_v39  ;;  %v4906_v37 = vadd.f32 %v10778_v7, %v4881_v61  ;;  %v4907_v35 = vadd.f32 %v10778_v7, %v4882_v32 }
 0x792   :  { %v4920_v26 = vmax.f32 %v4900_v2, 0.0  ;;  %v4921_v24 = vmax.f32 %v4901_v33, 0.0  ;;  %v4922_v14 = vmax.f32 %v4902_v9, 0.0  ;;  %v4923_v8 = vmax.f32 %v4903_v58, 0.0 }
 0x793   :  { %v4908_v50 = vadd.f32 %v10778_v7, %v4883_v36  ;;  %v4924_v55 = vmax.f32 %v4904_v23, 0.0  ;;  %v4909_v38 = vadd.f32 %v10778_v7, %v4884_v0  ;;  %v4910_v63 = vadd.f32 %v10778_v7, %v4885_v59  ;;  %v5937_v36 = vld [vmem:[%s10960_s0 + $0x50] sm:$0xff]  ;;  %v5940_v59 = vld [vmem:[%s10960_s0 + $0x68] sm:$0xff] }
 0x794   :  { %v4925_v53 = vmax.f32 %v4905_v34, 0.0  ;;  %v4926_v42 = vmax.f32 %v4906_v37, 0.0  ;;  %v4940_v5 = vadd.f32 %v5927_v30, %v4920_v26  ;;  %v4941_v13 = vadd.f32 %v5928_v49, %v4921_v24  ;;  %v5938_v37 = vld [vmem:[%s10960_s0 + $0x58] sm:$0xff] }
 0x795   :  { %v4942_v48 = vadd.f32 %v5929_v27, %v4922_v14  ;;  %v4911_v3 = vadd.f32 %v10778_v7, %v4886_v29  ;;  %v4927_v60 = vmax.f32 %v4907_v35, 0.0  ;;  %v4943_v17 = vadd.f32 %v5930_v46, %v4923_v8  ;;  %v5939_v14 = vld [vmem:[%s10960_s0 + $0x60] sm:$0xff]  ;;  %v5941_v29 = vld [vmem:[%s10960_s0 + $0x70] sm:$0xff] }
 0x796   :  { %v4912_v45 = vadd.f32 %v10778_v7, %v4887_v28  ;;  %v4928_v22 = vmax.f32 %v4908_v50, 0.0  ;;  %v4944_v54 = vadd.f32 %v5931_v18, %v4924_v55  ;;  %4960 = vst [vmem:[%s10968_s8] sm:$0xff] %v4940_v5  ;;  %v4913_v51 = vadd.f32 %v10778_v7, %v4888_v20  ;;  %v5942_v28 = vld [vmem:[%s10960_s0 + $0x78] sm:$0xff]  ;;  %v5945_v5 = vld [vmem:[%s10960_s0 + $0x90] sm:$0xff] }
 0x797   :  { %v4929_v10 = vmax.f32 %v4909_v38, 0.0  ;;  %v4945_v47 = vadd.f32 %v5932_v1, %v4925_v53  ;;  %4961 = vst [vmem:[%s10968_s8 + $0x8] sm:$0xff] %v4941_v13  ;;  %v4914_v44 = vadd.f32 %v10778_v7, %v4889_v56  ;;  %v4930_v11 = vmax.f32 %v4910_v63, 0.0  ;;  %v5943_v63 = vld [vmem:[%s10960_s0 + $0x80] sm:$0xff]  ;;  %v5946_v13 = vld [vmem:[%s10960_s0 + $0x98] sm:$0xff] }
 0x798   :  { %v4946_v21 = vadd.f32 %v5933_v52, %v4926_v42  ;;  %4962 = vst [vmem:[%s10968_s8 + $0x10] sm:$0xff] %v4942_v48  ;;  %v4915_v6 = vadd.f32 %v10778_v7, %v4890_v40  ;;  %v4931_v19 = vmax.f32 %v4911_v3, 0.0  ;;  %v4947_v62 = vadd.f32 %v5934_v12, %v4927_v60  ;;  %v5944_v42 = vld [vmem:[%s10960_s0 + $0x88] sm:$0xff] }
 0x799   :  { %4963 = vst [vmem:[%s10968_s8 + $0x18] sm:$0xff] %v4943_v17  ;;  %v4893_v57 = vmul.f32 %v10776_v15, %v10755_v4  ;;  %v4916_v43 = vadd.f32 %v10778_v7, %v4891_v25  ;;  %v4932_v2 = vmax.f32 %v4912_v45, 0.0  ;;  %v4948_v33 = vadd.f32 %v5935_v16, %v4928_v22  ;;  %v5936_v4 = vld [vmem:[%s10960_s0 + $0x48] sm:$0xff] }
 0x79a   :  { %4964 = vst [vmem:[%s10968_s8 + $0x20] sm:$0xff] %v4944_v54  ;;  %v4894_v9 = vmul.f32 %v10776_v15, %v10759_v41  ;;  %v4917_v39 = vadd.f32 %v10778_v7, %v4892_v31  ;;  %v4933_v58 = vmax.f32 %v4913_v51, 0.0  ;;  %v4949_v61 = vadd.f32 %v5936_v4, %v4929_v10 }
 0x79b   :  { %4965 = vst [vmem:[%s10968_s8 + $0x28] sm:$0xff] %v4945_v47  ;;  %v4918_v23 = vadd.f32 %v10778_v7, %v4893_v57  ;;  %v4934_v32 = vmax.f32 %v4914_v44, 0.0  ;;  %v4950_v41 = vadd.f32 %v5937_v36, %v4930_v11  ;;  %v4935_v34 = vmax.f32 %v4915_v6, 0.0 }
 0x79c   :  { %4966 = vst [vmem:[%s10968_s8 + $0x30] sm:$0xff] %v4946_v21  ;;  %v4919_v15 = vadd.f32 %v10778_v7, %v4894_v9  ;;  %v4951_v26 = vadd.f32 %v5938_v37, %v4931_v19  ;;  %v4936_v24 = vmax.f32 %v4916_v43, 0.0  ;;  %v4952_v0 = vadd.f32 %v5939_v14, %v4932_v2 }
 0x79d   :  { %4967 = vst [vmem:[%s10968_s8 + $0x38] sm:$0xff] %v4947_v62  ;;  %v4937_v7 = vmax.f32 %v4917_v39, 0.0  ;;  %v4953_v35 = vadd.f32 %v5940_v59, %v4933_v58  ;;  %v4938_v8 = vmax.f32 %v4918_v23, 0.0  ;;  %v4954_v50 = vadd.f32 %v5941_v29, %v4934_v32 }
 0x79e   :  { %4968 = vst [vmem:[%s10968_s8 + $0x40] sm:$0xff] %v4948_v33  ;;  %v4939_v55 = vmax.f32 %v4919_v15, 0.0  ;;  %v4955_v38 = vadd.f32 %v5942_v28, %v4935_v34  ;;  %v4956_v53 = vadd.f32 %v5943_v63, %v4936_v24 }
 0x79f   :  { %4969 = vst [vmem:[%s10968_s8 + $0x48] sm:$0xff] %v4949_v61  ;;  %v4957_v30 = vadd.f32 %v5944_v42, %v4937_v7  ;;  %v4958_v49 = vadd.f32 %v5945_v5, %v4938_v8 }
 0x7a0   :  { %4970 = vst [vmem:[%s10968_s8 + $0x50] sm:$0xff] %v4950_v41  ;;  %v4959_v27 = vadd.f32 %v5946_v13, %v4939_v55 }
 0x7a1   :  { %4971 = vst [vmem:[%s10968_s8 + $0x58] sm:$0xff] %v4951_v26 }
 0x7a2   :  { %4972 = vst [vmem:[%s10968_s8 + $0x60] sm:$0xff] %v4952_v0 }
 0x7a3   :  { %4973 = vst [vmem:[%s10968_s8 + $0x68] sm:$0xff] %v4953_v35 }
 0x7a4   :  { %4974 = vst [vmem:[%s10968_s8 + $0x70] sm:$0xff] %v4954_v50 }
 0x7a5   :  { %4975 = vst [vmem:[%s10968_s8 + $0x78] sm:$0xff] %v4955_v38 }
 0x7a6   :  { %4976 = vst [vmem:[%s10968_s8 + $0x80] sm:$0xff] %v4956_v53 }
 0x7a7   :  { %4977 = vst [vmem:[%s10968_s8 + $0x88] sm:$0xff] %v4957_v30 }
 0x7a8   :  { %4978 = vst [vmem:[%s10968_s8 + $0x90] sm:$0xff] %v4958_v49 }
 0x7a9   :  { %4979 = vst [vmem:[%s10968_s8 + $0x98] sm:$0xff] %v4959_v27 }

</bundles_post_ra>
